<compile_context>
chip_gen: v6e
topology: v6e:2x2x1
jax: 0.10.0
libtpu: 0.0.40
codegen_flags: <defaults>
</compile_context>

<pallas_src>
import functools

import jax
import jax.numpy as jnp
from jax.experimental import pallas as pl
from jax.experimental.pallas import tpu as pltpu

NEG_SLOPE = 0.1


def _round_up(x, m):
    return ((x + m - 1) // m) * m


# ----------------------------------------------------------------------------
# Kernel 1: fused 3x3 conv (+ folded eval-mode BN + LeakyReLU), no im2col
# ----------------------------------------------------------------------------
def _conv3x3_kernel(x_ref, w_ref, scale_ref, bias_ref, o_ref, *, stride, wpp, m_rows):
    """One batch element, one output-channel tile.

    x_ref:     (1, s*s, L, Cin)  bf16  padded, phase-decomposed, row-flattened input
    w_ref:     (9, Cin, TN)      bf16  tap-major weights
    scale_ref: (1, TN)           f32   folded BN scale
    bias_ref:  (1, TN)           f32   folded BN shift
    o_ref:     (1, m_rows, TN)   bf16  flattened (Ho * Wpp, sublane-padded) output rows
    """
    s = stride
    acc = None
    for t in range(9):                               # static unroll -> 9 MXU matmuls
        kh, kw = t // 3, t % 3
        plane = (kh % s) * s + (kw % s)              # phase plane (stride-2 space-to-depth)
        off = (kh // s) * wpp + (kw // s)            # static row-window offset
        xt = x_ref[0, plane, pl.ds(off, m_rows), :]  # (m_rows, Cin) bf16
        d = jnp.dot(xt, w_ref[t], preferred_element_type=jnp.float32)
        acc = d if acc is None else acc + d
    y = acc * scale_ref[...] + bias_ref[...]
    y = jnp.where(y >= 0, y, NEG_SLOPE * y)
    o_ref[0] = y.astype(o_ref.dtype)


def _phase_flatten(x_nhwc, stride):
    """Pad (+1 ring), phase-decompose (stride 2) and row-flatten the activation.

    Returns planes (N, s*s, L, C) bf16 such that a 3x3/stride-s conv is 9 matmuls over
    contiguous row-windows of `planes` -- one cheap rearrangement instead of a 9x im2col copy.
    """
    n, h, w, c = x_nhwc.shape
    s = stride
    xp = jnp.pad(x_nhwc, ((0, 0), (1, 1), (1, 1), (0, 0)))
    hp, wp = h + 2, w + 2
    ho = (hp - 3) // s + 1
    wo = (wp - 3) // s + 1
    if s == 1:
        planes = xp.reshape(n, 1, hp * wp, c)
        wpp = wp
    else:
        assert hp % s == 0 and wp % s == 0
        hq, wq = hp // s, wp // s
        planes = xp.reshape(n, hq, s, wq, s, c).transpose(0, 2, 4, 1, 3, 5)
        planes = planes.reshape(n, s * s, hq * wq, c)
        wpp = wq
    m_rows = ho * wpp                                 # includes junk columns wo..wpp
    m_rows_pad = _round_up(m_rows, 8)                 # sublane-aligned output rows
    max_off = (2 // s) * wpp + (2 // s)
    l_pad = _round_up(m_rows_pad + max_off, 8)        # keeps every pl.ds window in-bounds
    planes = jnp.pad(planes, ((0, 0), (0, 0), (0, l_pad - planes.shape[2]), (0, 0)))
    return planes.astype(jnp.bfloat16), (ho, wo, wpp, m_rows, m_rows_pad)


def conv3x3_bn_lrelu(x_nhwc, conv_p, stride):
    """x_nhwc (N, H, W, Cin) bf16 -> (N, Ho, Wo, O) bf16."""
    n, _, _, c_in = x_nhwc.shape
    planes, (ho, wo, wpp, m_rows, m_rows_pad) = _phase_flatten(x_nhwc, stride)
    l_pad = planes.shape[2]
    w, scale, bias = conv_p["w"], conv_p["scale"], conv_p["bias"]
    o_pad = w.shape[2]
    tn = conv_p["tn"]
    s = stride

    kernel = functools.partial(_conv3x3_kernel, stride=s, wpp=wpp, m_rows=m_rows_pad)
    out = pl.pallas_call(
        kernel,
        out_shape=jax.ShapeDtypeStruct((n, m_rows_pad, o_pad), jnp.bfloat16),
        grid_spec=pltpu.PrefetchScalarGridSpec(
            num_scalar_prefetch=0,
            grid=(n, o_pad // tn),                     # batch x out-channel tiles, both parallel
            in_specs=[
                pl.BlockSpec((1, s * s, l_pad, c_in), lambda b, j: (b, 0, 0, 0)),
                pl.BlockSpec((9, c_in, tn), lambda b, j: (0, 0, j)),
                pl.BlockSpec((1, tn), lambda b, j: (0, j)),
                pl.BlockSpec((1, tn), lambda b, j: (0, j)),
            ],
            out_specs=pl.BlockSpec((1, m_rows_pad, tn), lambda b, j: (b, 0, j)),
        ),
        compiler_params=pltpu.CompilerParams(
            dimension_semantics=("parallel", "parallel")),
    )(planes, w, scale, bias)

    out = out[:, :m_rows, :].reshape(n, ho, wpp, o_pad)[:, :, :wo, :conv_p["o"]]
    return out


# ----------------------------------------------------------------------------
# Kernel 2: weight-streaming fused linear (full-K block, epilogue bias + LeakyReLU)
# ----------------------------------------------------------------------------
def _linear_kernel(x_ref, w_ref, bias_ref, o_ref, *, apply_leaky):
    y = jnp.dot(x_ref[...], w_ref[...], preferred_element_type=jnp.float32)
    y = y + bias_ref[...]
    if apply_leaky:
        y = jnp.where(y >= 0, y, NEG_SLOPE * y)
    o_ref[...] = y.astype(o_ref.dtype)


def fused_linear(x, lin_p, *, apply_leaky):
    """x (M, K) -> (M, N) f32.  Weight is pre-transposed/padded/bf16: (Kp, Np)."""
    m, k = x.shape
    w, bias = lin_p["w"], lin_p["bias"]
    kp, np_ = w.shape
    tn = lin_p["tn"]
    mp = _round_up(m, 16)                              # bf16 sublane packing
    xp = jnp.zeros((mp, kp), jnp.bfloat16).at[:m, :k].set(x.astype(jnp.bfloat16))

    kernel = functools.partial(_linear_kernel, apply_leaky=apply_leaky)
    out = pl.pallas_call(
        kernel,
        out_shape=jax.ShapeDtypeStruct((mp, np_), jnp.float32),
        grid_spec=pltpu.PrefetchScalarGridSpec(
            num_scalar_prefetch=0,
            grid=(np_ // tn,),
            in_specs=[
                pl.BlockSpec((mp, kp), lambda j: (0, 0)),   # X resident across N tiles
                pl.BlockSpec((kp, tn), lambda j: (0, j)),   # weight streamed, full K per step
                pl.BlockSpec((1, tn), lambda j: (0, j)),
            ],
            out_specs=pl.BlockSpec((mp, tn), lambda j: (0, j)),
        ),
        compiler_params=pltpu.CompilerParams(
            dimension_semantics=("parallel",)),
    )(xp, w, bias)
    return out[:m, :lin_p["n"]]


# ----------------------------------------------------------------------------
# One-time parameter prep (transpose / pad / BN-fold / bf16 cast)
# ----------------------------------------------------------------------------
def prepare_conv(w_oihw, gamma, beta, mean, var, eps=1e-5):
    o, cin, kh, kw = w_oihw.shape
    assert (kh, kw) == (3, 3)
    tn = 128 if o <= 128 else 256
    o_pad = _round_up(o, tn)
    wm = jnp.transpose(w_oihw, (2, 3, 1, 0)).reshape(9, cin, o)      # tap-major (9, Cin, O)
    wm = jnp.pad(wm, ((0, 0), (0, 0), (0, o_pad - o))).astype(jnp.bfloat16)
    scale = gamma / jnp.sqrt(var + eps)
    shift = beta - mean * scale
    scale = jnp.pad(scale, (0, o_pad - o)).reshape(1, o_pad).astype(jnp.float32)
    shift = jnp.pad(shift, (0, o_pad - o)).reshape(1, o_pad).astype(jnp.float32)
    return dict(w=wm, scale=scale, bias=shift, o=o, tn=tn)


def prepare_linear(w_torch, b, tn=256):
    n, k = w_torch.shape                                             # torch Linear: (out, in)
    kp = _round_up(k, 128)
    np_ = _round_up(n, tn)
    w = jnp.zeros((kp, np_), jnp.bfloat16).at[:k, :n].set(w_torch.T.astype(jnp.bfloat16))
    bias = jnp.zeros((1, np_), jnp.float32).at[0, :n].set(b)
    return dict(w=w, bias=bias, n=n, tn=tn)


def prepare_params(params):
    prepped = {}
    for i in range(4):
        p = params[f"conv{i}"]
        prepped[f"conv{i}"] = prepare_conv(p["w"], p["gamma"], p["beta"], p["mean"], p["var"])
    prepped["fc1"] = prepare_linear(params["fc1"]["w"], params["fc1"]["b"])
    prepped["fc2"] = prepare_linear(params["fc2"]["w"], params["fc2"]["b"])
    return prepped


# ----------------------------------------------------------------------------
# Model: raw params + forward
# ----------------------------------------------------------------------------
def init_params(key, ch, split_size, num_boxes, num_classes, hidden=496):
    out_dim = split_size * split_size * (num_classes + num_boxes * 5)
    fc1_in = ch * split_size * split_size
    keys = iter(jax.random.split(key, 40))
    params = {}
    for i in range(4):
        fan_in = ch * 9
        params[f"conv{i}"] = dict(
            w=jax.random.normal(next(keys), (ch, ch, 3, 3), jnp.float32) / jnp.sqrt(fan_in),
            gamma=1.0 + 0.1 * jax.random.normal(next(keys), (ch,), jnp.float32),
            beta=0.1 * jax.random.normal(next(keys), (ch,), jnp.float32),
            mean=0.1 * jax.random.normal(next(keys), (ch,), jnp.float32),
            var=jnp.abs(1.0 + 0.1 * jax.random.normal(next(keys), (ch,), jnp.float32)),
        )
    params["fc1"] = dict(
        w=jax.random.normal(next(keys), (hidden, fc1_in), jnp.float32) / jnp.sqrt(fc1_in),
        b=0.01 * jax.random.normal(next(keys), (hidden,), jnp.float32),
    )
    params["fc2"] = dict(
        w=jax.random.normal(next(keys), (out_dim, hidden), jnp.float32) / jnp.sqrt(hidden),
        b=0.01 * jax.random.normal(next(keys), (out_dim,), jnp.float32),
    )
    return params


def yolo_v1_forward(x_nchw, prepped):
    # TODO(synk): darknet_layers backbone is treated as identity (not part of this head).
    x = jnp.transpose(x_nchw, (0, 2, 3, 1)).astype(jnp.bfloat16)     # NCHW -> NHWC, bf16
    for i, s in enumerate((1, 2, 1, 1)):
        x = conv3x3_bn_lrelu(x, prepped[f"conv{i}"], stride=s)
    n = x.shape[0]
    x = jnp.transpose(x, (0, 3, 1, 2)).reshape(n, -1)                # flatten in (C, H, W) order
    x = fused_linear(x, prepped["fc1"], apply_leaky=True)
    x = fused_linear(x.astype(jnp.bfloat16), prepped["fc2"], apply_leaky=False)
    return x


# ----------------------------------------------------------------------------
# Pure-XLA f32 reference (for a loose numerical check)
# ----------------------------------------------------------------------------
def reference_forward(x_nchw, params, eps=1e-5):
    hi = jax.lax.Precision.HIGHEST
    x = x_nchw
    for i, s in enumerate((1, 2, 1, 1)):
        p = params[f"conv{i}"]
        x = jax.lax.conv_general_dilated(
            x, p["w"], window_strides=(s, s), padding=((1, 1), (1, 1)),
            dimension_numbers=("NCHW", "OIHW", "NCHW"), precision=hi)
        scale = p["gamma"] / jnp.sqrt(p["var"] + eps)
        shift = p["beta"] - p["mean"] * scale
        x = x * scale[None, :, None, None] + shift[None, :, None, None]
        x = jnp.where(x >= 0, x, NEG_SLOPE * x)
    x = x.reshape(x.shape[0], -1)
    x = jnp.dot(x, params["fc1"]["w"].T, precision=hi) + params["fc1"]["b"]
    x = jnp.where(x >= 0, x, NEG_SLOPE * x)
    x = jnp.dot(x, params["fc2"]["w"].T, precision=hi) + params["fc2"]["b"]
    return x


if __name__ == "__main__":
    CH = 128             # reduced from 1024 for the small demo
    SPLIT = 7
    NUM_BOXES = 2
    NUM_CLASSES = 20
    BATCH = 2
    SPATIAL = 2 * SPLIT  # 14 -> stride-2 conv -> 7

    key = jax.random.PRNGKey(0)
    k_param, k_x = jax.random.split(key)
    params = init_params(k_param, CH, SPLIT, NUM_BOXES, NUM_CLASSES)
    prepped = prepare_params(params)                 # one-time weight prep (bf16/pad/BN-fold)
    x = jax.random.normal(k_x, (BATCH, CH, SPATIAL, SPATIAL), jnp.float32)

    fwd = jax.jit(lambda inp: yolo_v1_forward(inp, prepped))
    out = jax.block_until_ready(fwd(x))

    expected = (BATCH, SPLIT * SPLIT * (NUM_CLASSES + NUM_BOXES * 5))
    assert out.shape == expected, (out.shape, expected)
    assert bool(jnp.all(jnp.isfinite(out)))

    ref = reference_forward(x, params)
    rel_err = float(jnp.max(jnp.abs(out - ref)) / (jnp.max(jnp.abs(ref)) + 1e-6))
    assert rel_err < 0.1, f"relative error too large vs f32 reference: {rel_err}"

    print("KERNEL_OK")
</pallas_src>

<mosaic_0001>
module attributes {stable_mosaic.version = 11 : i64} {
  func.func @_conv3x3_kernel(%arg0: i32, %arg1: i32, %arg2: memref<1x1x264x128xbf16, #tpu.memory_space<vmem>>, %arg3: memref<9x128x128xbf16, #tpu.memory_space<vmem>>, %arg4: memref<1x128xf32, #tpu.memory_space<vmem>>, %arg5: memref<1x128xf32, #tpu.memory_space<vmem>>, %arg6: memref<1x224x128xbf16, #tpu.memory_space<vmem>>) attributes {dimension_semantics = [#tpu.dimension_semantics<parallel>, #tpu.dimension_semantics<parallel>], iteration_bounds = array<i64: 2, 1>, scalar_prefetch = 0 : i64, scratch_operands = 0 : i64, tpu.core_type = #tpu.core_type<tc>, window_params = [{transform_indices = @transform_0, window_bounds = array<i64: 1, 1, 264, 128>}, {transform_indices = @transform_1, window_bounds = array<i64: 9, 128, 128>}, {transform_indices = @transform_2, window_bounds = array<i64: 1, 128>}, {transform_indices = @transform_3, window_bounds = array<i64: 1, 128>}, {transform_indices = @transform_4, window_bounds = array<i64: 1, 224, 128>}]} {
    %c0 = arith.constant 0 : index
    %c0_0 = arith.constant 0 : index
    %c0_1 = arith.constant 0 : index
    %c0_2 = arith.constant 0 : index
    %0 = vector.load %arg2[%c0, %c0_0, %c0_1, %c0_2] : memref<1x1x264x128xbf16, #tpu.memory_space<vmem>>, vector<1x1x224x128xbf16>
    %1 = vector.shape_cast %0 : vector<1x1x224x128xbf16> to vector<224x128xbf16>
    %c0_3 = arith.constant 0 : index
    %c0_4 = arith.constant 0 : index
    %c0_5 = arith.constant 0 : index
    %2 = vector.load %arg3[%c0_3, %c0_4, %c0_5] : memref<9x128x128xbf16, #tpu.memory_space<vmem>>, vector<1x128x128xbf16>
    %3 = vector.shape_cast %2 : vector<1x128x128xbf16> to vector<128x128xbf16>
    %cst = arith.constant dense<0.000000e+00> : vector<224x128xf32>
    %4 = tpu.matmul %1, %3, %cst {dimension_numbers = #tpu.dot_dimension_numbers<[1], [0], [0], [1], [0, 0, 1, 1], [], []>} : vector<224x128xbf16>, vector<128x128xbf16>, vector<224x128xf32> -> vector<224x128xf32>
    %c0_6 = arith.constant 0 : index
    %c0_7 = arith.constant 0 : index
    %c1 = arith.constant 1 : index
    %c0_8 = arith.constant 0 : index
    %5 = vector.load %arg2[%c0_6, %c0_7, %c1, %c0_8] : memref<1x1x264x128xbf16, #tpu.memory_space<vmem>>, vector<1x1x224x128xbf16>
    %6 = vector.shape_cast %5 : vector<1x1x224x128xbf16> to vector<224x128xbf16>
    %c1_9 = arith.constant 1 : index
    %c0_10 = arith.constant 0 : index
    %c0_11 = arith.constant 0 : index
    %7 = vector.load %arg3[%c1_9, %c0_10, %c0_11] : memref<9x128x128xbf16, #tpu.memory_space<vmem>>, vector<1x128x128xbf16>
    %8 = vector.shape_cast %7 : vector<1x128x128xbf16> to vector<128x128xbf16>
    %cst_12 = arith.constant dense<0.000000e+00> : vector<224x128xf32>
    %9 = tpu.matmul %6, %8, %cst_12 {dimension_numbers = #tpu.dot_dimension_numbers<[1], [0], [0], [1], [0, 0, 1, 1], [], []>} : vector<224x128xbf16>, vector<128x128xbf16>, vector<224x128xf32> -> vector<224x128xf32>
    %10 = arith.addf %4, %9 : vector<224x128xf32>
    %c0_13 = arith.constant 0 : index
    %c0_14 = arith.constant 0 : index
    %c2 = arith.constant 2 : index
    %c0_15 = arith.constant 0 : index
    %11 = vector.load %arg2[%c0_13, %c0_14, %c2, %c0_15] : memref<1x1x264x128xbf16, #tpu.memory_space<vmem>>, vector<1x1x224x128xbf16>
    %12 = vector.shape_cast %11 : vector<1x1x224x128xbf16> to vector<224x128xbf16>
    %c2_16 = arith.constant 2 : index
    %c0_17 = arith.constant 0 : index
    %c0_18 = arith.constant 0 : index
    %13 = vector.load %arg3[%c2_16, %c0_17, %c0_18] : memref<9x128x128xbf16, #tpu.memory_space<vmem>>, vector<1x128x128xbf16>
    %14 = vector.shape_cast %13 : vector<1x128x128xbf16> to vector<128x128xbf16>
    %cst_19 = arith.constant dense<0.000000e+00> : vector<224x128xf32>
    %15 = tpu.matmul %12, %14, %cst_19 {dimension_numbers = #tpu.dot_dimension_numbers<[1], [0], [0], [1], [0, 0, 1, 1], [], []>} : vector<224x128xbf16>, vector<128x128xbf16>, vector<224x128xf32> -> vector<224x128xf32>
    %16 = arith.addf %10, %15 : vector<224x128xf32>
    %c0_20 = arith.constant 0 : index
    %c0_21 = arith.constant 0 : index
    %c16 = arith.constant 16 : index
    %c0_22 = arith.constant 0 : index
    %17 = vector.load %arg2[%c0_20, %c0_21, %c16, %c0_22] : memref<1x1x264x128xbf16, #tpu.memory_space<vmem>>, vector<1x1x224x128xbf16>
    %18 = vector.shape_cast %17 : vector<1x1x224x128xbf16> to vector<224x128xbf16>
    %c3 = arith.constant 3 : index
    %c0_23 = arith.constant 0 : index
    %c0_24 = arith.constant 0 : index
    %19 = vector.load %arg3[%c3, %c0_23, %c0_24] : memref<9x128x128xbf16, #tpu.memory_space<vmem>>, vector<1x128x128xbf16>
    %20 = vector.shape_cast %19 : vector<1x128x128xbf16> to vector<128x128xbf16>
    %cst_25 = arith.constant dense<0.000000e+00> : vector<224x128xf32>
    %21 = tpu.matmul %18, %20, %cst_25 {dimension_numbers = #tpu.dot_dimension_numbers<[1], [0], [0], [1], [0, 0, 1, 1], [], []>} : vector<224x128xbf16>, vector<128x128xbf16>, vector<224x128xf32> -> vector<224x128xf32>
    %22 = arith.addf %16, %21 : vector<224x128xf32>
    %c0_26 = arith.constant 0 : index
    %c0_27 = arith.constant 0 : index
    %c17 = arith.constant 17 : index
    %c0_28 = arith.constant 0 : index
    %23 = vector.load %arg2[%c0_26, %c0_27, %c17, %c0_28] : memref<1x1x264x128xbf16, #tpu.memory_space<vmem>>, vector<1x1x224x128xbf16>
    %24 = vector.shape_cast %23 : vector<1x1x224x128xbf16> to vector<224x128xbf16>
    %c4 = arith.constant 4 : index
    %c0_29 = arith.constant 0 : index
    %c0_30 = arith.constant 0 : index
    %25 = vector.load %arg3[%c4, %c0_29, %c0_30] : memref<9x128x128xbf16, #tpu.memory_space<vmem>>, vector<1x128x128xbf16>
    %26 = vector.shape_cast %25 : vector<1x128x128xbf16> to vector<128x128xbf16>
    %cst_31 = arith.constant dense<0.000000e+00> : vector<224x128xf32>
    %27 = tpu.matmul %24, %26, %cst_31 {dimension_numbers = #tpu.dot_dimension_numbers<[1], [0], [0], [1], [0, 0, 1, 1], [], []>} : vector<224x128xbf16>, vector<128x128xbf16>, vector<224x128xf32> -> vector<224x128xf32>
    %28 = arith.addf %22, %27 : vector<224x128xf32>
    %c0_32 = arith.constant 0 : index
    %c0_33 = arith.constant 0 : index
    %c18 = arith.constant 18 : index
    %c0_34 = arith.constant 0 : index
    %29 = vector.load %arg2[%c0_32, %c0_33, %c18, %c0_34] : memref<1x1x264x128xbf16, #tpu.memory_space<vmem>>, vector<1x1x224x128xbf16>
    %30 = vector.shape_cast %29 : vector<1x1x224x128xbf16> to vector<224x128xbf16>
    %c5 = arith.constant 5 : index
    %c0_35 = arith.constant 0 : index
    %c0_36 = arith.constant 0 : index
    %31 = vector.load %arg3[%c5, %c0_35, %c0_36] : memref<9x128x128xbf16, #tpu.memory_space<vmem>>, vector<1x128x128xbf16>
    %32 = vector.shape_cast %31 : vector<1x128x128xbf16> to vector<128x128xbf16>
    %cst_37 = arith.constant dense<0.000000e+00> : vector<224x128xf32>
    %33 = tpu.matmul %30, %32, %cst_37 {dimension_numbers = #tpu.dot_dimension_numbers<[1], [0], [0], [1], [0, 0, 1, 1], [], []>} : vector<224x128xbf16>, vector<128x128xbf16>, vector<224x128xf32> -> vector<224x128xf32>
    %34 = arith.addf %28, %33 : vector<224x128xf32>
    %c0_38 = arith.constant 0 : index
    %c0_39 = arith.constant 0 : index
    %c32 = arith.constant 32 : index
    %c0_40 = arith.constant 0 : index
    %35 = vector.load %arg2[%c0_38, %c0_39, %c32, %c0_40] : memref<1x1x264x128xbf16, #tpu.memory_space<vmem>>, vector<1x1x224x128xbf16>
    %36 = vector.shape_cast %35 : vector<1x1x224x128xbf16> to vector<224x128xbf16>
    %c6 = arith.constant 6 : index
    %c0_41 = arith.constant 0 : index
    %c0_42 = arith.constant 0 : index
    %37 = vector.load %arg3[%c6, %c0_41, %c0_42] : memref<9x128x128xbf16, #tpu.memory_space<vmem>>, vector<1x128x128xbf16>
    %38 = vector.shape_cast %37 : vector<1x128x128xbf16> to vector<128x128xbf16>
    %cst_43 = arith.constant dense<0.000000e+00> : vector<224x128xf32>
    %39 = tpu.matmul %36, %38, %cst_43 {dimension_numbers = #tpu.dot_dimension_numbers<[1], [0], [0], [1], [0, 0, 1, 1], [], []>} : vector<224x128xbf16>, vector<128x128xbf16>, vector<224x128xf32> -> vector<224x128xf32>
    %40 = arith.addf %34, %39 : vector<224x128xf32>
    %c0_44 = arith.constant 0 : index
    %c0_45 = arith.constant 0 : index
    %c33 = arith.constant 33 : index
    %c0_46 = arith.constant 0 : index
    %41 = vector.load %arg2[%c0_44, %c0_45, %c33, %c0_46] : memref<1x1x264x128xbf16, #tpu.memory_space<vmem>>, vector<1x1x224x128xbf16>
    %42 = vector.shape_cast %41 : vector<1x1x224x128xbf16> to vector<224x128xbf16>
    %c7 = arith.constant 7 : index
    %c0_47 = arith.constant 0 : index
    %c0_48 = arith.constant 0 : index
    %43 = vector.load %arg3[%c7, %c0_47, %c0_48] : memref<9x128x128xbf16, #tpu.memory_space<vmem>>, vector<1x128x128xbf16>
    %44 = vector.shape_cast %43 : vector<1x128x128xbf16> to vector<128x128xbf16>
    %cst_49 = arith.constant dense<0.000000e+00> : vector<224x128xf32>
    %45 = tpu.matmul %42, %44, %cst_49 {dimension_numbers = #tpu.dot_dimension_numbers<[1], [0], [0], [1], [0, 0, 1, 1], [], []>} : vector<224x128xbf16>, vector<128x128xbf16>, vector<224x128xf32> -> vector<224x128xf32>
    %46 = arith.addf %40, %45 : vector<224x128xf32>
    %c0_50 = arith.constant 0 : index
    %c0_51 = arith.constant 0 : index
    %c34 = arith.constant 34 : index
    %c0_52 = arith.constant 0 : index
    %47 = vector.load %arg2[%c0_50, %c0_51, %c34, %c0_52] : memref<1x1x264x128xbf16, #tpu.memory_space<vmem>>, vector<1x1x224x128xbf16>
    %48 = vector.shape_cast %47 : vector<1x1x224x128xbf16> to vector<224x128xbf16>
    %c8 = arith.constant 8 : index
    %c0_53 = arith.constant 0 : index
    %c0_54 = arith.constant 0 : index
    %49 = vector.load %arg3[%c8, %c0_53, %c0_54] : memref<9x128x128xbf16, #tpu.memory_space<vmem>>, vector<1x128x128xbf16>
    %50 = vector.shape_cast %49 : vector<1x128x128xbf16> to vector<128x128xbf16>
    %cst_55 = arith.constant dense<0.000000e+00> : vector<224x128xf32>
    %51 = tpu.matmul %48, %50, %cst_55 {dimension_numbers = #tpu.dot_dimension_numbers<[1], [0], [0], [1], [0, 0, 1, 1], [], []>} : vector<224x128xbf16>, vector<128x128xbf16>, vector<224x128xf32> -> vector<224x128xf32>
    %52 = arith.addf %46, %51 : vector<224x128xf32>
    %c0_56 = arith.constant 0 : index
    %c0_57 = arith.constant 0 : index
    %53 = vector.load %arg4[%c0_56, %c0_57] : memref<1x128xf32, #tpu.memory_space<vmem>>, vector<1x128xf32>
    %54 = vector.broadcast %53 : vector<1x128xf32> to vector<224x128xf32>
    %55 = arith.mulf %52, %54 : vector<224x128xf32>
    %c0_58 = arith.constant 0 : index
    %c0_59 = arith.constant 0 : index
    %56 = vector.load %arg5[%c0_58, %c0_59] : memref<1x128xf32, #tpu.memory_space<vmem>>, vector<1x128xf32>
    %57 = vector.broadcast %56 : vector<1x128xf32> to vector<224x128xf32>
    %58 = arith.addf %55, %57 : vector<224x128xf32>
    %cst_60 = arith.constant 0.000000e+00 : f32
    %59 = vector.broadcast %cst_60 : f32 to vector<224x128xf32>
    %60 = arith.cmpf oge, %58, %59 : vector<224x128xf32>
    %cst_61 = arith.constant 1.000000e-01 : f32
    %61 = vector.broadcast %cst_61 : f32 to vector<224x128xf32>
    %62 = arith.mulf %61, %58 : vector<224x128xf32>
    %63 = arith.select %60, %58, %62 : vector<224x128xi1>, vector<224x128xf32>
    %64 = arith.truncf %63 : vector<224x128xf32> to vector<224x128xbf16>
    %c0_62 = arith.constant 0 : index
    %c0_63 = arith.constant 0 : index
    %c0_64 = arith.constant 0 : index
    %65 = vector.load %arg6[%c0_62, %c0_63, %c0_64] : memref<1x224x128xbf16, #tpu.memory_space<vmem>>, vector<1x224x128xbf16>
    %66 = vector.shape_cast %65 : vector<1x224x128xbf16> to vector<224x128xbf16>
    %67 = vector.shape_cast %64 : vector<224x128xbf16> to vector<1x224x128xbf16>
    tpu.vector_store %arg6[%c0_62, %c0_63, %c0_64], %67 {strides = array<i32>} : memref<1x224x128xbf16, #tpu.memory_space<vmem>>, vector<1x224x128xbf16>,
    return
  }
  func.func @transform_0(%arg0: i32, %arg1: i32) -> (i32, i32, i32, i32) {
    %c0_i32 = arith.constant 0 : i32
    %c0_i32_0 = arith.constant 0 : i32
    %c0_i32_1 = arith.constant 0 : i32
    %c0_i32_2 = arith.constant 0 : i32
    return %arg0, %c0_i32, %c0_i32_0, %c0_i32_1 : i32, i32, i32, i32
  }
  func.func @transform_1(%arg0: i32, %arg1: i32) -> (i32, i32, i32) {
    %c0_i32 = arith.constant 0 : i32
    %c0_i32_0 = arith.constant 0 : i32
    %c0_i32_1 = arith.constant 0 : i32
    return %c0_i32, %c0_i32_0, %arg1 : i32, i32, i32
  }
  func.func @transform_2(%arg0: i32, %arg1: i32) -> (i32, i32) {
    %c0_i32 = arith.constant 0 : i32
    %c0_i32_0 = arith.constant 0 : i32
    return %c0_i32, %arg1 : i32, i32
  }
  func.func @transform_3(%arg0: i32, %arg1: i32) -> (i32, i32) {
    %c0_i32 = arith.constant 0 : i32
    %c0_i32_0 = arith.constant 0 : i32
    return %c0_i32, %arg1 : i32, i32
  }
  func.func @transform_4(%arg0: i32, %arg1: i32) -> (i32, i32, i32) {
    %c0_i32 = arith.constant 0 : i32
    %c0_i32_0 = arith.constant 0 : i32
    return %arg0, %c0_i32, %arg1 : i32, i32, i32
  }
}

module attributes {stable_mosaic.version = 11 : i64} {
  func.func @_conv3x3_kernel(%arg0: i32, %arg1: i32, %arg2: memref<1x4x72x128xbf16, #tpu.memory_space<vmem>>, %arg3: memref<9x128x128xbf16, #tpu.memory_space<vmem>>, %arg4: memref<1x128xf32, #tpu.memory_space<vmem>>, %arg5: memref<1x128xf32, #tpu.memory_space<vmem>>, %arg6: memref<1x56x128xbf16, #tpu.memory_space<vmem>>) attributes {dimension_semantics = [#tpu.dimension_semantics<parallel>, #tpu.dimension_semantics<parallel>], iteration_bounds = array<i64: 2, 1>, scalar_prefetch = 0 : i64, scratch_operands = 0 : i64, tpu.core_type = #tpu.core_type<tc>, window_params = [{transform_indices = @transform_0, window_bounds = array<i64: 1, 4, 72, 128>}, {transform_indices = @transform_1, window_bounds = array<i64: 9, 128, 128>}, {transform_indices = @transform_2, window_bounds = array<i64: 1, 128>}, {transform_indices = @transform_3, window_bounds = array<i64: 1, 128>}, {transform_indices = @transform_4, window_bounds = array<i64: 1, 56, 128>}]} {
    %c0 = arith.constant 0 : index
    %c0_0 = arith.constant 0 : index
    %c0_1 = arith.constant 0 : index
    %c0_2 = arith.constant 0 : index
    %0 = vector.load %arg2[%c0, %c0_0, %c0_1, %c0_2] : memref<1x4x72x128xbf16, #tpu.memory_space<vmem>>, vector<1x1x56x128xbf16>
    %1 = vector.shape_cast %0 : vector<1x1x56x128xbf16> to vector<56x128xbf16>
    %c0_3 = arith.constant 0 : index
    %c0_4 = arith.constant 0 : index
    %c0_5 = arith.constant 0 : index
    %2 = vector.load %arg3[%c0_3, %c0_4, %c0_5] : memref<9x128x128xbf16, #tpu.memory_space<vmem>>, vector<1x128x128xbf16>
    %3 = vector.shape_cast %2 : vector<1x128x128xbf16> to vector<128x128xbf16>
    %cst = arith.constant dense<0.000000e+00> : vector<56x128xf32>
    %4 = tpu.matmul %1, %3, %cst {dimension_numbers = #tpu.dot_dimension_numbers<[1], [0], [0], [1], [0, 0, 1, 1], [], []>} : vector<56x128xbf16>, vector<128x128xbf16>, vector<56x128xf32> -> vector<56x128xf32>
    %c0_6 = arith.constant 0 : index
    %c1 = arith.constant 1 : index
    %c0_7 = arith.constant 0 : index
    %c0_8 = arith.constant 0 : index
    %5 = vector.load %arg2[%c0_6, %c1, %c0_7, %c0_8] : memref<1x4x72x128xbf16, #tpu.memory_space<vmem>>, vector<1x1x56x128xbf16>
    %6 = vector.shape_cast %5 : vector<1x1x56x128xbf16> to vector<56x128xbf16>
    %c1_9 = arith.constant 1 : index
    %c0_10 = arith.constant 0 : index
    %c0_11 = arith.constant 0 : index
    %7 = vector.load %arg3[%c1_9, %c0_10, %c0_11] : memref<9x128x128xbf16, #tpu.memory_space<vmem>>, vector<1x128x128xbf16>
    %8 = vector.shape_cast %7 : vector<1x128x128xbf16> to vector<128x128xbf16>
    %cst_12 = arith.constant dense<0.000000e+00> : vector<56x128xf32>
    %9 = tpu.matmul %6, %8, %cst_12 {dimension_numbers = #tpu.dot_dimension_numbers<[1], [0], [0], [1], [0, 0, 1, 1], [], []>} : vector<56x128xbf16>, vector<128x128xbf16>, vector<56x128xf32> -> vector<56x128xf32>
    %10 = arith.addf %4, %9 : vector<56x128xf32>
    %c0_13 = arith.constant 0 : index
    %c0_14 = arith.constant 0 : index
    %c1_15 = arith.constant 1 : index
    %c0_16 = arith.constant 0 : index
    %11 = vector.load %arg2[%c0_13, %c0_14, %c1_15, %c0_16] : memref<1x4x72x128xbf16, #tpu.memory_space<vmem>>, vector<1x1x56x128xbf16>
    %12 = vector.shape_cast %11 : vector<1x1x56x128xbf16> to vector<56x128xbf16>
    %c2 = arith.constant 2 : index
    %c0_17 = arith.constant 0 : index
    %c0_18 = arith.constant 0 : index
    %13 = vector.load %arg3[%c2, %c0_17, %c0_18] : memref<9x128x128xbf16, #tpu.memory_space<vmem>>, vector<1x128x128xbf16>
    %14 = vector.shape_cast %13 : vector<1x128x128xbf16> to vector<128x128xbf16>
    %cst_19 = arith.constant dense<0.000000e+00> : vector<56x128xf32>
    %15 = tpu.matmul %12, %14, %cst_19 {dimension_numbers = #tpu.dot_dimension_numbers<[1], [0], [0], [1], [0, 0, 1, 1], [], []>} : vector<56x128xbf16>, vector<128x128xbf16>, vector<56x128xf32> -> vector<56x128xf32>
    %16 = arith.addf %10, %15 : vector<56x128xf32>
    %c0_20 = arith.constant 0 : index
    %c2_21 = arith.constant 2 : index
    %c0_22 = arith.constant 0 : index
    %c0_23 = arith.constant 0 : index
    %17 = vector.load %arg2[%c0_20, %c2_21, %c0_22, %c0_23] : memref<1x4x72x128xbf16, #tpu.memory_space<vmem>>, vector<1x1x56x128xbf16>
    %18 = vector.shape_cast %17 : vector<1x1x56x128xbf16> to vector<56x128xbf16>
    %c3 = arith.constant 3 : index
    %c0_24 = arith.constant 0 : index
    %c0_25 = arith.constant 0 : index
    %19 = vector.load %arg3[%c3, %c0_24, %c0_25] : memref<9x128x128xbf16, #tpu.memory_space<vmem>>, vector<1x128x128xbf16>
    %20 = vector.shape_cast %19 : vector<1x128x128xbf16> to vector<128x128xbf16>
    %cst_26 = arith.constant dense<0.000000e+00> : vector<56x128xf32>
    %21 = tpu.matmul %18, %20, %cst_26 {dimension_numbers = #tpu.dot_dimension_numbers<[1], [0], [0], [1], [0, 0, 1, 1], [], []>} : vector<56x128xbf16>, vector<128x128xbf16>, vector<56x128xf32> -> vector<56x128xf32>
    %22 = arith.addf %16, %21 : vector<56x128xf32>
    %c0_27 = arith.constant 0 : index
    %c3_28 = arith.constant 3 : index
    %c0_29 = arith.constant 0 : index
    %c0_30 = arith.constant 0 : index
    %23 = vector.load %arg2[%c0_27, %c3_28, %c0_29, %c0_30] : memref<1x4x72x128xbf16, #tpu.memory_space<vmem>>, vector<1x1x56x128xbf16>
    %24 = vector.shape_cast %23 : vector<1x1x56x128xbf16> to vector<56x128xbf16>
    %c4 = arith.constant 4 : index
    %c0_31 = arith.constant 0 : index
    %c0_32 = arith.constant 0 : index
    %25 = vector.load %arg3[%c4, %c0_31, %c0_32] : memref<9x128x128xbf16, #tpu.memory_space<vmem>>, vector<1x128x128xbf16>
    %26 = vector.shape_cast %25 : vector<1x128x128xbf16> to vector<128x128xbf16>
    %cst_33 = arith.constant dense<0.000000e+00> : vector<56x128xf32>
    %27 = tpu.matmul %24, %26, %cst_33 {dimension_numbers = #tpu.dot_dimension_numbers<[1], [0], [0], [1], [0, 0, 1, 1], [], []>} : vector<56x128xbf16>, vector<128x128xbf16>, vector<56x128xf32> -> vector<56x128xf32>
    %28 = arith.addf %22, %27 : vector<56x128xf32>
    %c0_34 = arith.constant 0 : index
    %c2_35 = arith.constant 2 : index
    %c1_36 = arith.constant 1 : index
    %c0_37 = arith.constant 0 : index
    %29 = vector.load %arg2[%c0_34, %c2_35, %c1_36, %c0_37] : memref<1x4x72x128xbf16, #tpu.memory_space<vmem>>, vector<1x1x56x128xbf16>
    %30 = vector.shape_cast %29 : vector<1x1x56x128xbf16> to vector<56x128xbf16>
    %c5 = arith.constant 5 : index
    %c0_38 = arith.constant 0 : index
    %c0_39 = arith.constant 0 : index
    %31 = vector.load %arg3[%c5, %c0_38, %c0_39] : memref<9x128x128xbf16, #tpu.memory_space<vmem>>, vector<1x128x128xbf16>
    %32 = vector.shape_cast %31 : vector<1x128x128xbf16> to vector<128x128xbf16>
    %cst_40 = arith.constant dense<0.000000e+00> : vector<56x128xf32>
    %33 = tpu.matmul %30, %32, %cst_40 {dimension_numbers = #tpu.dot_dimension_numbers<[1], [0], [0], [1], [0, 0, 1, 1], [], []>} : vector<56x128xbf16>, vector<128x128xbf16>, vector<56x128xf32> -> vector<56x128xf32>
    %34 = arith.addf %28, %33 : vector<56x128xf32>
    %c0_41 = arith.constant 0 : index
    %c0_42 = arith.constant 0 : index
    %c8 = arith.constant 8 : index
    %c0_43 = arith.constant 0 : index
    %35 = vector.load %arg2[%c0_41, %c0_42, %c8, %c0_43] : memref<1x4x72x128xbf16, #tpu.memory_space<vmem>>, vector<1x1x56x128xbf16>
    %36 = vector.shape_cast %35 : vector<1x1x56x128xbf16> to vector<56x128xbf16>
    %c6 = arith.constant 6 : index
    %c0_44 = arith.constant 0 : index
    %c0_45 = arith.constant 0 : index
    %37 = vector.load %arg3[%c6, %c0_44, %c0_45] : memref<9x128x128xbf16, #tpu.memory_space<vmem>>, vector<1x128x128xbf16>
    %38 = vector.shape_cast %37 : vector<1x128x128xbf16> to vector<128x128xbf16>
    %cst_46 = arith.constant dense<0.000000e+00> : vector<56x128xf32>
    %39 = tpu.matmul %36, %38, %cst_46 {dimension_numbers = #tpu.dot_dimension_numbers<[1], [0], [0], [1], [0, 0, 1, 1], [], []>} : vector<56x128xbf16>, vector<128x128xbf16>, vector<56x128xf32> -> vector<56x128xf32>
    %40 = arith.addf %34, %39 : vector<56x128xf32>
    %c0_47 = arith.constant 0 : index
    %c1_48 = arith.constant 1 : index
    %c8_49 = arith.constant 8 : index
    %c0_50 = arith.constant 0 : index
    %41 = vector.load %arg2[%c0_47, %c1_48, %c8_49, %c0_50] : memref<1x4x72x128xbf16, #tpu.memory_space<vmem>>, vector<1x1x56x128xbf16>
    %42 = vector.shape_cast %41 : vector<1x1x56x128xbf16> to vector<56x128xbf16>
    %c7 = arith.constant 7 : index
    %c0_51 = arith.constant 0 : index
    %c0_52 = arith.constant 0 : index
    %43 = vector.load %arg3[%c7, %c0_51, %c0_52] : memref<9x128x128xbf16, #tpu.memory_space<vmem>>, vector<1x128x128xbf16>
    %44 = vector.shape_cast %43 : vector<1x128x128xbf16> to vector<128x128xbf16>
    %cst_53 = arith.constant dense<0.000000e+00> : vector<56x128xf32>
    %45 = tpu.matmul %42, %44, %cst_53 {dimension_numbers = #tpu.dot_dimension_numbers<[1], [0], [0], [1], [0, 0, 1, 1], [], []>} : vector<56x128xbf16>, vector<128x128xbf16>, vector<56x128xf32> -> vector<56x128xf32>
    %46 = arith.addf %40, %45 : vector<56x128xf32>
    %c0_54 = arith.constant 0 : index
    %c0_55 = arith.constant 0 : index
    %c9 = arith.constant 9 : index
    %c0_56 = arith.constant 0 : index
    %47 = vector.load %arg2[%c0_54, %c0_55, %c9, %c0_56] : memref<1x4x72x128xbf16, #tpu.memory_space<vmem>>, vector<1x1x56x128xbf16>
    %48 = vector.shape_cast %47 : vector<1x1x56x128xbf16> to vector<56x128xbf16>
    %c8_57 = arith.constant 8 : index
    %c0_58 = arith.constant 0 : index
    %c0_59 = arith.constant 0 : index
    %49 = vector.load %arg3[%c8_57, %c0_58, %c0_59] : memref<9x128x128xbf16, #tpu.memory_space<vmem>>, vector<1x128x128xbf16>
    %50 = vector.shape_cast %49 : vector<1x128x128xbf16> to vector<128x128xbf16>
    %cst_60 = arith.constant dense<0.000000e+00> : vector<56x128xf32>
    %51 = tpu.matmul %48, %50, %cst_60 {dimension_numbers = #tpu.dot_dimension_numbers<[1], [0], [0], [1], [0, 0, 1, 1], [], []>} : vector<56x128xbf16>, vector<128x128xbf16>, vector<56x128xf32> -> vector<56x128xf32>
    %52 = arith.addf %46, %51 : vector<56x128xf32>
    %c0_61 = arith.constant 0 : index
    %c0_62 = arith.constant 0 : index
    %53 = vector.load %arg4[%c0_61, %c0_62] : memref<1x128xf32, #tpu.memory_space<vmem>>, vector<1x128xf32>
    %54 = vector.broadcast %53 : vector<1x128xf32> to vector<56x128xf32>
    %55 = arith.mulf %52, %54 : vector<56x128xf32>
    %c0_63 = arith.constant 0 : index
    %c0_64 = arith.constant 0 : index
    %56 = vector.load %arg5[%c0_63, %c0_64] : memref<1x128xf32, #tpu.memory_space<vmem>>, vector<1x128xf32>
    %57 = vector.broadcast %56 : vector<1x128xf32> to vector<56x128xf32>
    %58 = arith.addf %55, %57 : vector<56x128xf32>
    %cst_65 = arith.constant 0.000000e+00 : f32
    %59 = vector.broadcast %cst_65 : f32 to vector<56x128xf32>
    %60 = arith.cmpf oge, %58, %59 : vector<56x128xf32>
    %cst_66 = arith.constant 1.000000e-01 : f32
    %61 = vector.broadcast %cst_66 : f32 to vector<56x128xf32>
    %62 = arith.mulf %61, %58 : vector<56x128xf32>
    %63 = arith.select %60, %58, %62 : vector<56x128xi1>, vector<56x128xf32>
    %64 = arith.truncf %63 : vector<56x128xf32> to vector<56x128xbf16>
    %c0_67 = arith.constant 0 : index
    %c0_68 = arith.constant 0 : index
    %c0_69 = arith.constant 0 : index
    %65 = vector.load %arg6[%c0_67, %c0_68, %c0_69] : memref<1x56x128xbf16, #tpu.memory_space<vmem>>, vector<1x56x128xbf16>
    %66 = vector.shape_cast %65 : vector<1x56x128xbf16> to vector<56x128xbf16>
    %67 = vector.shape_cast %64 : vector<56x128xbf16> to vector<1x56x128xbf16>
    tpu.vector_store %arg6[%c0_67, %c0_68, %c0_69], %67 {strides = array<i32>} : memref<1x56x128xbf16, #tpu.memory_space<vmem>>, vector<1x56x128xbf16>,
    return
  }
  func.func @transform_0(%arg0: i32, %arg1: i32) -> (i32, i32, i32, i32) {
    %c0_i32 = arith.constant 0 : i32
    %c0_i32_0 = arith.constant 0 : i32
    %c0_i32_1 = arith.constant 0 : i32
    %c0_i32_2 = arith.constant 0 : i32
    return %arg0, %c0_i32, %c0_i32_0, %c0_i32_1 : i32, i32, i32, i32
  }
  func.func @transform_1(%arg0: i32, %arg1: i32) -> (i32, i32, i32) {
    %c0_i32 = arith.constant 0 : i32
    %c0_i32_0 = arith.constant 0 : i32
    %c0_i32_1 = arith.constant 0 : i32
    return %c0_i32, %c0_i32_0, %arg1 : i32, i32, i32
  }
  func.func @transform_2(%arg0: i32, %arg1: i32) -> (i32, i32) {
    %c0_i32 = arith.constant 0 : i32
    %c0_i32_0 = arith.constant 0 : i32
    return %c0_i32, %arg1 : i32, i32
  }
  func.func @transform_3(%arg0: i32, %arg1: i32) -> (i32, i32) {
    %c0_i32 = arith.constant 0 : i32
    %c0_i32_0 = arith.constant 0 : i32
    return %c0_i32, %arg1 : i32, i32
  }
  func.func @transform_4(%arg0: i32, %arg1: i32) -> (i32, i32, i32) {
    %c0_i32 = arith.constant 0 : i32
    %c0_i32_0 = arith.constant 0 : i32
    return %arg0, %c0_i32, %arg1 : i32, i32, i32
  }
}

module attributes {stable_mosaic.version = 11 : i64} {
  func.func @_conv3x3_kernel(%arg0: i32, %arg1: i32, %arg2: memref<1x1x88x128xbf16, #tpu.memory_space<vmem>>, %arg3: memref<9x128x128xbf16, #tpu.memory_space<vmem>>, %arg4: memref<1x128xf32, #tpu.memory_space<vmem>>, %arg5: memref<1x128xf32, #tpu.memory_space<vmem>>, %arg6: memref<1x64x128xbf16, #tpu.memory_space<vmem>>) attributes {dimension_semantics = [#tpu.dimension_semantics<parallel>, #tpu.dimension_semantics<parallel>], iteration_bounds = array<i64: 2, 1>, scalar_prefetch = 0 : i64, scratch_operands = 0 : i64, tpu.core_type = #tpu.core_type<tc>, window_params = [{transform_indices = @transform_0, window_bounds = array<i64: 1, 1, 88, 128>}, {transform_indices = @transform_1, window_bounds = array<i64: 9, 128, 128>}, {transform_indices = @transform_2, window_bounds = array<i64: 1, 128>}, {transform_indices = @transform_3, window_bounds = array<i64: 1, 128>}, {transform_indices = @transform_4, window_bounds = array<i64: 1, 64, 128>}]} {
    %c0 = arith.constant 0 : index
    %c0_0 = arith.constant 0 : index
    %c0_1 = arith.constant 0 : index
    %c0_2 = arith.constant 0 : index
    %0 = vector.load %arg2[%c0, %c0_0, %c0_1, %c0_2] : memref<1x1x88x128xbf16, #tpu.memory_space<vmem>>, vector<1x1x64x128xbf16>
    %1 = vector.shape_cast %0 : vector<1x1x64x128xbf16> to vector<64x128xbf16>
    %c0_3 = arith.constant 0 : index
    %c0_4 = arith.constant 0 : index
    %c0_5 = arith.constant 0 : index
    %2 = vector.load %arg3[%c0_3, %c0_4, %c0_5] : memref<9x128x128xbf16, #tpu.memory_space<vmem>>, vector<1x128x128xbf16>
    %3 = vector.shape_cast %2 : vector<1x128x128xbf16> to vector<128x128xbf16>
    %cst = arith.constant dense<0.000000e+00> : vector<64x128xf32>
    %4 = tpu.matmul %1, %3, %cst {dimension_numbers = #tpu.dot_dimension_numbers<[1], [0], [0], [1], [0, 0, 1, 1], [], []>} : vector<64x128xbf16>, vector<128x128xbf16>, vector<64x128xf32> -> vector<64x128xf32>
    %c0_6 = arith.constant 0 : index
    %c0_7 = arith.constant 0 : index
    %c1 = arith.constant 1 : index
    %c0_8 = arith.constant 0 : index
    %5 = vector.load %arg2[%c0_6, %c0_7, %c1, %c0_8] : memref<1x1x88x128xbf16, #tpu.memory_space<vmem>>, vector<1x1x64x128xbf16>
    %6 = vector.shape_cast %5 : vector<1x1x64x128xbf16> to vector<64x128xbf16>
    %c1_9 = arith.constant 1 : index
    %c0_10 = arith.constant 0 : index
    %c0_11 = arith.constant 0 : index
    %7 = vector.load %arg3[%c1_9, %c0_10, %c0_11] : memref<9x128x128xbf16, #tpu.memory_space<vmem>>, vector<1x128x128xbf16>
    %8 = vector.shape_cast %7 : vector<1x128x128xbf16> to vector<128x128xbf16>
    %cst_12 = arith.constant dense<0.000000e+00> : vector<64x128xf32>
    %9 = tpu.matmul %6, %8, %cst_12 {dimension_numbers = #tpu.dot_dimension_numbers<[1], [0], [0], [1], [0, 0, 1, 1], [], []>} : vector<64x128xbf16>, vector<128x128xbf16>, vector<64x128xf32> -> vector<64x128xf32>
    %10 = arith.addf %4, %9 : vector<64x128xf32>
    %c0_13 = arith.constant 0 : index
    %c0_14 = arith.constant 0 : index
    %c2 = arith.constant 2 : index
    %c0_15 = arith.constant 0 : index
    %11 = vector.load %arg2[%c0_13, %c0_14, %c2, %c0_15] : memref<1x1x88x128xbf16, #tpu.memory_space<vmem>>, vector<1x1x64x128xbf16>
    %12 = vector.shape_cast %11 : vector<1x1x64x128xbf16> to vector<64x128xbf16>
    %c2_16 = arith.constant 2 : index
    %c0_17 = arith.constant 0 : index
    %c0_18 = arith.constant 0 : index
    %13 = vector.load %arg3[%c2_16, %c0_17, %c0_18] : memref<9x128x128xbf16, #tpu.memory_space<vmem>>, vector<1x128x128xbf16>
    %14 = vector.shape_cast %13 : vector<1x128x128xbf16> to vector<128x128xbf16>
    %cst_19 = arith.constant dense<0.000000e+00> : vector<64x128xf32>
    %15 = tpu.matmul %12, %14, %cst_19 {dimension_numbers = #tpu.dot_dimension_numbers<[1], [0], [0], [1], [0, 0, 1, 1], [], []>} : vector<64x128xbf16>, vector<128x128xbf16>, vector<64x128xf32> -> vector<64x128xf32>
    %16 = arith.addf %10, %15 : vector<64x128xf32>
    %c0_20 = arith.constant 0 : index
    %c0_21 = arith.constant 0 : index
    %c9 = arith.constant 9 : index
    %c0_22 = arith.constant 0 : index
    %17 = vector.load %arg2[%c0_20, %c0_21, %c9, %c0_22] : memref<1x1x88x128xbf16, #tpu.memory_space<vmem>>, vector<1x1x64x128xbf16>
    %18 = vector.shape_cast %17 : vector<1x1x64x128xbf16> to vector<64x128xbf16>
    %c3 = arith.constant 3 : index
    %c0_23 = arith.constant 0 : index
    %c0_24 = arith.constant 0 : index
    %19 = vector.load %arg3[%c3, %c0_23, %c0_24] : memref<9x128x128xbf16, #tpu.memory_space<vmem>>, vector<1x128x128xbf16>
    %20 = vector.shape_cast %19 : vector<1x128x128xbf16> to vector<128x128xbf16>
    %cst_25 = arith.constant dense<0.000000e+00> : vector<64x128xf32>
    %21 = tpu.matmul %18, %20, %cst_25 {dimension_numbers = #tpu.dot_dimension_numbers<[1], [0], [0], [1], [0, 0, 1, 1], [], []>} : vector<64x128xbf16>, vector<128x128xbf16>, vector<64x128xf32> -> vector<64x128xf32>
    %22 = arith.addf %16, %21 : vector<64x128xf32>
    %c0_26 = arith.constant 0 : index
    %c0_27 = arith.constant 0 : index
    %c10 = arith.constant 10 : index
    %c0_28 = arith.constant 0 : index
    %23 = vector.load %arg2[%c0_26, %c0_27, %c10, %c0_28] : memref<1x1x88x128xbf16, #tpu.memory_space<vmem>>, vector<1x1x64x128xbf16>
    %24 = vector.shape_cast %23 : vector<1x1x64x128xbf16> to vector<64x128xbf16>
    %c4 = arith.constant 4 : index
    %c0_29 = arith.constant 0 : index
    %c0_30 = arith.constant 0 : index
    %25 = vector.load %arg3[%c4, %c0_29, %c0_30] : memref<9x128x128xbf16, #tpu.memory_space<vmem>>, vector<1x128x128xbf16>
    %26 = vector.shape_cast %25 : vector<1x128x128xbf16> to vector<128x128xbf16>
    %cst_31 = arith.constant dense<0.000000e+00> : vector<64x128xf32>
    %27 = tpu.matmul %24, %26, %cst_31 {dimension_numbers = #tpu.dot_dimension_numbers<[1], [0], [0], [1], [0, 0, 1, 1], [], []>} : vector<64x128xbf16>, vector<128x128xbf16>, vector<64x128xf32> -> vector<64x128xf32>
    %28 = arith.addf %22, %27 : vector<64x128xf32>
    %c0_32 = arith.constant 0 : index
    %c0_33 = arith.constant 0 : index
    %c11 = arith.constant 11 : index
    %c0_34 = arith.constant 0 : index
    %29 = vector.load %arg2[%c0_32, %c0_33, %c11, %c0_34] : memref<1x1x88x128xbf16, #tpu.memory_space<vmem>>, vector<1x1x64x128xbf16>
    %30 = vector.shape_cast %29 : vector<1x1x64x128xbf16> to vector<64x128xbf16>
    %c5 = arith.constant 5 : index
    %c0_35 = arith.constant 0 : index
    %c0_36 = arith.constant 0 : index
    %31 = vector.load %arg3[%c5, %c0_35, %c0_36] : memref<9x128x128xbf16, #tpu.memory_space<vmem>>, vector<1x128x128xbf16>
    %32 = vector.shape_cast %31 : vector<1x128x128xbf16> to vector<128x128xbf16>
    %cst_37 = arith.constant dense<0.000000e+00> : vector<64x128xf32>
    %33 = tpu.matmul %30, %32, %cst_37 {dimension_numbers = #tpu.dot_dimension_numbers<[1], [0], [0], [1], [0, 0, 1, 1], [], []>} : vector<64x128xbf16>, vector<128x128xbf16>, vector<64x128xf32> -> vector<64x128xf32>
    %34 = arith.addf %28, %33 : vector<64x128xf32>
    %c0_38 = arith.constant 0 : index
    %c0_39 = arith.constant 0 : index
    %c18 = arith.constant 18 : index
    %c0_40 = arith.constant 0 : index
    %35 = vector.load %arg2[%c0_38, %c0_39, %c18, %c0_40] : memref<1x1x88x128xbf16, #tpu.memory_space<vmem>>, vector<1x1x64x128xbf16>
    %36 = vector.shape_cast %35 : vector<1x1x64x128xbf16> to vector<64x128xbf16>
    %c6 = arith.constant 6 : index
    %c0_41 = arith.constant 0 : index
    %c0_42 = arith.constant 0 : index
    %37 = vector.load %arg3[%c6, %c0_41, %c0_42] : memref<9x128x128xbf16, #tpu.memory_space<vmem>>, vector<1x128x128xbf16>
    %38 = vector.shape_cast %37 : vector<1x128x128xbf16> to vector<128x128xbf16>
    %cst_43 = arith.constant dense<0.000000e+00> : vector<64x128xf32>
    %39 = tpu.matmul %36, %38, %cst_43 {dimension_numbers = #tpu.dot_dimension_numbers<[1], [0], [0], [1], [0, 0, 1, 1], [], []>} : vector<64x128xbf16>, vector<128x128xbf16>, vector<64x128xf32> -> vector<64x128xf32>
    %40 = arith.addf %34, %39 : vector<64x128xf32>
    %c0_44 = arith.constant 0 : index
    %c0_45 = arith.constant 0 : index
    %c19 = arith.constant 19 : index
    %c0_46 = arith.constant 0 : index
    %41 = vector.load %arg2[%c0_44, %c0_45, %c19, %c0_46] : memref<1x1x88x128xbf16, #tpu.memory_space<vmem>>, vector<1x1x64x128xbf16>
    %42 = vector.shape_cast %41 : vector<1x1x64x128xbf16> to vector<64x128xbf16>
    %c7 = arith.constant 7 : index
    %c0_47 = arith.constant 0 : index
    %c0_48 = arith.constant 0 : index
    %43 = vector.load %arg3[%c7, %c0_47, %c0_48] : memref<9x128x128xbf16, #tpu.memory_space<vmem>>, vector<1x128x128xbf16>
    %44 = vector.shape_cast %43 : vector<1x128x128xbf16> to vector<128x128xbf16>
    %cst_49 = arith.constant dense<0.000000e+00> : vector<64x128xf32>
    %45 = tpu.matmul %42, %44, %cst_49 {dimension_numbers = #tpu.dot_dimension_numbers<[1], [0], [0], [1], [0, 0, 1, 1], [], []>} : vector<64x128xbf16>, vector<128x128xbf16>, vector<64x128xf32> -> vector<64x128xf32>
    %46 = arith.addf %40, %45 : vector<64x128xf32>
    %c0_50 = arith.constant 0 : index
    %c0_51 = arith.constant 0 : index
    %c20 = arith.constant 20 : index
    %c0_52 = arith.constant 0 : index
    %47 = vector.load %arg2[%c0_50, %c0_51, %c20, %c0_52] : memref<1x1x88x128xbf16, #tpu.memory_space<vmem>>, vector<1x1x64x128xbf16>
    %48 = vector.shape_cast %47 : vector<1x1x64x128xbf16> to vector<64x128xbf16>
    %c8 = arith.constant 8 : index
    %c0_53 = arith.constant 0 : index
    %c0_54 = arith.constant 0 : index
    %49 = vector.load %arg3[%c8, %c0_53, %c0_54] : memref<9x128x128xbf16, #tpu.memory_space<vmem>>, vector<1x128x128xbf16>
    %50 = vector.shape_cast %49 : vector<1x128x128xbf16> to vector<128x128xbf16>
    %cst_55 = arith.constant dense<0.000000e+00> : vector<64x128xf32>
    %51 = tpu.matmul %48, %50, %cst_55 {dimension_numbers = #tpu.dot_dimension_numbers<[1], [0], [0], [1], [0, 0, 1, 1], [], []>} : vector<64x128xbf16>, vector<128x128xbf16>, vector<64x128xf32> -> vector<64x128xf32>
    %52 = arith.addf %46, %51 : vector<64x128xf32>
    %c0_56 = arith.constant 0 : index
    %c0_57 = arith.constant 0 : index
    %53 = vector.load %arg4[%c0_56, %c0_57] : memref<1x128xf32, #tpu.memory_space<vmem>>, vector<1x128xf32>
    %54 = vector.broadcast %53 : vector<1x128xf32> to vector<64x128xf32>
    %55 = arith.mulf %52, %54 : vector<64x128xf32>
    %c0_58 = arith.constant 0 : index
    %c0_59 = arith.constant 0 : index
    %56 = vector.load %arg5[%c0_58, %c0_59] : memref<1x128xf32, #tpu.memory_space<vmem>>, vector<1x128xf32>
    %57 = vector.broadcast %56 : vector<1x128xf32> to vector<64x128xf32>
    %58 = arith.addf %55, %57 : vector<64x128xf32>
    %cst_60 = arith.constant 0.000000e+00 : f32
    %59 = vector.broadcast %cst_60 : f32 to vector<64x128xf32>
    %60 = arith.cmpf oge, %58, %59 : vector<64x128xf32>
    %cst_61 = arith.constant 1.000000e-01 : f32
    %61 = vector.broadcast %cst_61 : f32 to vector<64x128xf32>
    %62 = arith.mulf %61, %58 : vector<64x128xf32>
    %63 = arith.select %60, %58, %62 : vector<64x128xi1>, vector<64x128xf32>
    %64 = arith.truncf %63 : vector<64x128xf32> to vector<64x128xbf16>
    %c0_62 = arith.constant 0 : index
    %c0_63 = arith.constant 0 : index
    %c0_64 = arith.constant 0 : index
    %65 = vector.load %arg6[%c0_62, %c0_63, %c0_64] : memref<1x64x128xbf16, #tpu.memory_space<vmem>>, vector<1x64x128xbf16>
    %66 = vector.shape_cast %65 : vector<1x64x128xbf16> to vector<64x128xbf16>
    %67 = vector.shape_cast %64 : vector<64x128xbf16> to vector<1x64x128xbf16>
    tpu.vector_store %arg6[%c0_62, %c0_63, %c0_64], %67 {strides = array<i32>} : memref<1x64x128xbf16, #tpu.memory_space<vmem>>, vector<1x64x128xbf16>,
    return
  }
  func.func @transform_0(%arg0: i32, %arg1: i32) -> (i32, i32, i32, i32) {
    %c0_i32 = arith.constant 0 : i32
    %c0_i32_0 = arith.constant 0 : i32
    %c0_i32_1 = arith.constant 0 : i32
    %c0_i32_2 = arith.constant 0 : i32
    return %arg0, %c0_i32, %c0_i32_0, %c0_i32_1 : i32, i32, i32, i32
  }
  func.func @transform_1(%arg0: i32, %arg1: i32) -> (i32, i32, i32) {
    %c0_i32 = arith.constant 0 : i32
    %c0_i32_0 = arith.constant 0 : i32
    %c0_i32_1 = arith.constant 0 : i32
    return %c0_i32, %c0_i32_0, %arg1 : i32, i32, i32
  }
  func.func @transform_2(%arg0: i32, %arg1: i32) -> (i32, i32) {
    %c0_i32 = arith.constant 0 : i32
    %c0_i32_0 = arith.constant 0 : i32
    return %c0_i32, %arg1 : i32, i32
  }
  func.func @transform_3(%arg0: i32, %arg1: i32) -> (i32, i32) {
    %c0_i32 = arith.constant 0 : i32
    %c0_i32_0 = arith.constant 0 : i32
    return %c0_i32, %arg1 : i32, i32
  }
  func.func @transform_4(%arg0: i32, %arg1: i32) -> (i32, i32, i32) {
    %c0_i32 = arith.constant 0 : i32
    %c0_i32_0 = arith.constant 0 : i32
    return %arg0, %c0_i32, %arg1 : i32, i32, i32
  }
}

module attributes {stable_mosaic.version = 11 : i64} {
  func.func @_linear_kernel(%arg0: i32, %arg1: memref<16x6272xbf16, #tpu.memory_space<vmem>>, %arg2: memref<6272x256xbf16, #tpu.memory_space<vmem>>, %arg3: memref<1x256xf32, #tpu.memory_space<vmem>>, %arg4: memref<16x256xf32, #tpu.memory_space<vmem>>) attributes {dimension_semantics = [#tpu.dimension_semantics<parallel>], iteration_bounds = array<i64: 2>, scalar_prefetch = 0 : i64, scratch_operands = 0 : i64, tpu.core_type = #tpu.core_type<tc>, window_params = [{pipeline_mode = #tpu.pipeline_mode<synchronous>, transform_indices = @transform_0, window_bounds = array<i64: 16, 6272>}, {transform_indices = @transform_1, window_bounds = array<i64: 6272, 256>}, {transform_indices = @transform_2, window_bounds = array<i64: 1, 256>}, {transform_indices = @transform_3, window_bounds = array<i64: 16, 256>}]} {
    %c0 = arith.constant 0 : index
    %c0_0 = arith.constant 0 : index
    %0 = vector.load %arg1[%c0, %c0_0] : memref<16x6272xbf16, #tpu.memory_space<vmem>>, vector<16x6272xbf16>
    %c0_1 = arith.constant 0 : index
    %c0_2 = arith.constant 0 : index
    %1 = vector.load %arg2[%c0_1, %c0_2] : memref<6272x256xbf16, #tpu.memory_space<vmem>>, vector<6272x256xbf16>
    %cst = arith.constant dense<0.000000e+00> : vector<16x256xf32>
    %2 = tpu.matmul %0, %1, %cst {dimension_numbers = #tpu.dot_dimension_numbers<[1], [0], [0], [1], [0, 0, 1, 1], [], []>} : vector<16x6272xbf16>, vector<6272x256xbf16>, vector<16x256xf32> -> vector<16x256xf32>
    %c0_3 = arith.constant 0 : index
    %c0_4 = arith.constant 0 : index
    %3 = vector.load %arg3[%c0_3, %c0_4] : memref<1x256xf32, #tpu.memory_space<vmem>>, vector<1x256xf32>
    %4 = vector.broadcast %3 : vector<1x256xf32> to vector<16x256xf32>
    %5 = arith.addf %2, %4 : vector<16x256xf32>
    %cst_5 = arith.constant 0.000000e+00 : f32
    %6 = vector.broadcast %cst_5 : f32 to vector<16x256xf32>
    %7 = arith.cmpf oge, %5, %6 : vector<16x256xf32>
    %cst_6 = arith.constant 1.000000e-01 : f32
    %8 = vector.broadcast %cst_6 : f32 to vector<16x256xf32>
    %9 = arith.mulf %8, %5 : vector<16x256xf32>
    %10 = arith.select %7, %5, %9 : vector<16x256xi1>, vector<16x256xf32>
    %c0_7 = arith.constant 0 : index
    %c0_8 = arith.constant 0 : index
    %11 = vector.load %arg4[%c0_7, %c0_8] : memref<16x256xf32, #tpu.memory_space<vmem>>, vector<16x256xf32>
    tpu.vector_store %arg4[%c0_7, %c0_8], %10 {strides = array<i32>} : memref<16x256xf32, #tpu.memory_space<vmem>>, vector<16x256xf32>,
    return
  }
  func.func @transform_0(%arg0: i32) -> (i32, i32) {
    %c0_i32 = arith.constant 0 : i32
    %c0_i32_0 = arith.constant 0 : i32
    %c0_i32_1 = arith.constant 0 : i32
    return %c0_i32, %c0_i32_0 : i32, i32
  }
  func.func @transform_1(%arg0: i32) -> (i32, i32) {
    %c0_i32 = arith.constant 0 : i32
    %c0_i32_0 = arith.constant 0 : i32
    return %c0_i32, %arg0 : i32, i32
  }
  func.func @transform_2(%arg0: i32) -> (i32, i32) {
    %c0_i32 = arith.constant 0 : i32
    %c0_i32_0 = arith.constant 0 : i32
    return %c0_i32, %arg0 : i32, i32
  }
  func.func @transform_3(%arg0: i32) -> (i32, i32) {
    %c0_i32 = arith.constant 0 : i32
    %c0_i32_0 = arith.constant 0 : i32
    return %c0_i32, %arg0 : i32, i32
  }
}

module attributes {stable_mosaic.version = 11 : i64} {
  func.func @_linear_kernel(%arg0: i32, %arg1: memref<16x512xbf16, #tpu.memory_space<vmem>>, %arg2: memref<512x256xbf16, #tpu.memory_space<vmem>>, %arg3: memref<1x256xf32, #tpu.memory_space<vmem>>, %arg4: memref<16x256xf32, #tpu.memory_space<vmem>>) attributes {dimension_semantics = [#tpu.dimension_semantics<parallel>], iteration_bounds = array<i64: 6>, scalar_prefetch = 0 : i64, scratch_operands = 0 : i64, tpu.core_type = #tpu.core_type<tc>, window_params = [{pipeline_mode = #tpu.pipeline_mode<synchronous>, transform_indices = @transform_0, window_bounds = array<i64: 16, 512>}, {transform_indices = @transform_1, window_bounds = array<i64: 512, 256>}, {transform_indices = @transform_2, window_bounds = array<i64: 1, 256>}, {transform_indices = @transform_3, window_bounds = array<i64: 16, 256>}]} {
    %c0 = arith.constant 0 : index
    %c0_0 = arith.constant 0 : index
    %0 = vector.load %arg1[%c0, %c0_0] : memref<16x512xbf16, #tpu.memory_space<vmem>>, vector<16x512xbf16>
    %c0_1 = arith.constant 0 : index
    %c0_2 = arith.constant 0 : index
    %1 = vector.load %arg2[%c0_1, %c0_2] : memref<512x256xbf16, #tpu.memory_space<vmem>>, vector<512x256xbf16>
    %cst = arith.constant dense<0.000000e+00> : vector<16x256xf32>
    %2 = tpu.matmul %0, %1, %cst {dimension_numbers = #tpu.dot_dimension_numbers<[1], [0], [0], [1], [0, 0, 1, 1], [], []>} : vector<16x512xbf16>, vector<512x256xbf16>, vector<16x256xf32> -> vector<16x256xf32>
    %c0_3 = arith.constant 0 : index
    %c0_4 = arith.constant 0 : index
    %3 = vector.load %arg3[%c0_3, %c0_4] : memref<1x256xf32, #tpu.memory_space<vmem>>, vector<1x256xf32>
    %4 = vector.broadcast %3 : vector<1x256xf32> to vector<16x256xf32>
    %5 = arith.addf %2, %4 : vector<16x256xf32>
    %c0_5 = arith.constant 0 : index
    %c0_6 = arith.constant 0 : index
    %6 = vector.load %arg4[%c0_5, %c0_6] : memref<16x256xf32, #tpu.memory_space<vmem>>, vector<16x256xf32>
    tpu.vector_store %arg4[%c0_5, %c0_6], %5 {strides = array<i32>} : memref<16x256xf32, #tpu.memory_space<vmem>>, vector<16x256xf32>,
    return
  }
  func.func @transform_0(%arg0: i32) -> (i32, i32) {
    %c0_i32 = arith.constant 0 : i32
    %c0_i32_0 = arith.constant 0 : i32
    %c0_i32_1 = arith.constant 0 : i32
    return %c0_i32, %c0_i32_0 : i32, i32
  }
  func.func @transform_1(%arg0: i32) -> (i32, i32) {
    %c0_i32 = arith.constant 0 : i32
    %c0_i32_0 = arith.constant 0 : i32
    return %c0_i32, %arg0 : i32, i32
  }
  func.func @transform_2(%arg0: i32) -> (i32, i32) {
    %c0_i32 = arith.constant 0 : i32
    %c0_i32_0 = arith.constant 0 : i32
    return %c0_i32, %arg0 : i32, i32
  }
  func.func @transform_3(%arg0: i32) -> (i32, i32) {
    %c0_i32 = arith.constant 0 : i32
    %c0_i32_0 = arith.constant 0 : i32
    return %c0_i32, %arg0 : i32, i32
  }
}

</mosaic_0001>

<bundles_post_ra>
// kernel: _lambda_.8
= control target key start
LH: loop header
LB: loop body
LE: loop exit
PB: predicated region body
PF: predicated region fallthrough
CT: control target
= control target key end

     0   :  { %9 = vsyncpa [#allocation3], 0  ;;  %s3133_s0 = inlined_call_operand.vmem [shape: bf16[2,1,88,128], index: 0, kind: input, shape index: {}]   ;;  %s3134_s1 = inlined_call_operand.hbm [shape: bf16[9,128,128], index: 1, kind: input, shape index: {}]   ;;  %s3135_s2 = inlined_call_operand.hbm [shape: f32[1,128], index: 2, kind: input, shape index: {}]   ;;  %s3136_s3 = inlined_call_operand.hbm [shape: f32[1,128], index: 3, kind: input, shape index: {}]   ;;  %s3137_s4 = inlined_call_operand.vmem [shape: bf16[2,64,128], index: 4, kind: output, shape index: {}]  }
   0x1   :  { %10 = vsyncpa [#allocation5], 0  ;;  %s2831_s15 = smov 0   ;;  %s2833_s16 = smov 0  }
   0x2   :  { %s2835_s17 = smov 0  }
   0x3 LB: > { %s2801_s18 = smov [#allocation4]   ;;  %s2051_s20 = sadd.s32 4294967295, %s2799_s17   ;;  %s2799_s17 = sphi %s2835_s17, %s16_s17   ;;  %s2795_s16 = sphi %s2833_s16, %s3157_s16   ;;  %s2791_s15 = sphi %s2831_s15, %s3156_s15  }
   0x4   : > { %s195_s19 = sshll.u32 %s2801_s18, 4  ;;  %p2053_p0 = scmp.ge.s32.totalorder %s2799_s17, 1  ;;  %s196_s19 = int_to_ptr.vmem [resolvable:$true] %s195_s19 }
   0x5   : > { %p165_p1 = scmp.lt.s32.totalorder %s2799_s17, 3  ;;  %p2849_p2 = scmp.eq.s32.totalorder %s2051_s20, 0 }
   0x6   : > { %s28_s23 = sadd.s32 1, %s2795_s16  ;;  %s2802_s26 = smov [#allocation2]  }
   0x7   : > { %p2853_p3 = pnand %p2053_p0, %p165_p1  ;;  %p2866_p6 = scmp.ge.s32.totalorder %s28_s23, 2 }
   0x8   : > { %s179_s27 = sshll.u32 %s2802_s26, 4  ;;  %s2702_s28 = scalar_lea.vmem %s196_s19, 16  ;;  %s180_s27 = int_to_ptr.vmem [resolvable:$true] %s179_s27 }
   0x9   : > { %p2554_p4 = pneg %p2853_p3  ;;  %p2703_p8 = scmp.ne.s32.totalorder %s196_s19, %s2702_s28 }
   0xa   : > { %s2709_s29 = scalar_lea.vmem %s196_s19, 32  ;;  %p2710_p11 = scmp.lt.s32.totalorder %s196_s19, %s196_s19 }
   0xb   : > { %p2862_p5 = pnand %p2849_p2, %p2554_p4  ;;  %p2711_p12 = scmp.lt.s32.totalorder %s2709_s29, %s2702_s28 }
   0xd   : > { %p2693_p7 = pneg %p2862_p5  ;;  %p2712_p13 = por %p2711_p12, %p2710_p11 }
   0xf   : > { %p2705_p9 = pnand %p2703_p8, %p2693_p7 }
  0x11   : > { %p2706_p10 = pneg %p2705_p9 }
  0x13   : > { %p2713_p0 = pnand %p2712_p13, %p2706_p10 }
  0x15   : > { %2716 = shalt.err (!%p2713_p0)
}
  0x16   : > { %2560 = dma.hbm_to_vmem [thread:$0]  (!%p2862_p5), %s3135_s2, 16, %s196_s19, [#allocation5]  }
  0x17   : > { %s3159_s23 = smov (%p2866_p6, %s28_s23), 0  ;;  %s2728_s6 = scalar_lea.vmem %s180_s27, 9216 }
  0x18   : > { %p2729_p1 = scmp.ne.s32.totalorder %s180_s27, %s2728_s6  ;;  %p2736_p9 = scmp.lt.s32.totalorder %s180_s27, %s180_s27 }
  0x19   : > { %p2737_p10 = scmp.lt.s32.totalorder %s2728_s6, %s2728_s6 }
  0x1a   : > { %p2731_p4 = pnand %p2729_p1, %p2693_p7 }
  0x1b   : > { %p2738_p11 = por %p2737_p10, %p2736_p9 }
  0x1c   : > { %p2732_p8 = pneg %p2731_p4 }
  0x1e   : > { %p2739_p12 = pnand %p2738_p11, %p2732_p8 }
  0x20   : > { %2742 = shalt.err (!%p2739_p12)
}
  0x21   : > { %s2803_s7 = smov 64   ;;  %s2804_s8 = smov 4  }
  0x22   : > { %2557 = dma.hbm_to_vmem [thread:$0]  (!%p2862_p5), %s3134_s1, 9216, %s180_s27, [#allocation3], %s2803_s7, %s2803_s7, %s2804_s8  }
  0x23   : > { %s2805_s11 = smov [#allocation6]  }
  0x24   : > { %s208_s12 = sshll.u32 %s2805_s11, 4  ;;  %s209_s12 = int_to_ptr.vmem [resolvable:$true] %s208_s12 }
  0x25   : > { %s2754_s13 = scalar_lea.vmem %s209_s12, 16  ;;  %s2761_s14 = scalar_lea.vmem %s209_s12, 32 }
  0x26   : > { %p2755_p6 = scmp.ne.s32.totalorder %s209_s12, %s2754_s13  ;;  %p2762_p1 = scmp.lt.s32.totalorder %s209_s12, %s209_s12 }
  0x27   : > { %p2763_p4 = scmp.lt.s32.totalorder %s2761_s14, %s2754_s13 }
  0x28   : > { %p2757_p13 = pnand %p2755_p6, %p2693_p7 }
  0x29   : > { %p2764_p8 = por %p2763_p4, %p2762_p1 }
  0x2a   : > { %p2758_p0 = pneg %p2757_p13 }
  0x2c   : > { %p2765_p9 = pnand %p2764_p8, %p2758_p0 }
  0x2e   : > { %2768 = shalt.err (!%p2765_p9)
}
  0x2f   : > { %2563 = dma.hbm_to_vmem [thread:$0]  (!%p2862_p5), %s3136_s3, 16, %s209_s12, [#allocation5]  }
  0x30   : > { %229 = sbr.rel (%p2853_p3) target bundleno = 430 (0x1ae), region = 36 }
  0x35   : > { %2782 = dma.done.wait (%p2849_p2), [#allocation3], 9216  }
  0x36   : > { %2784 = vsyncadd (%p2849_p2), [#allocation3], 4294958080 }
  0x37   : > { %2786 = dma.done.wait (%p2849_p2), [#allocation5], 32  }
  0x38   : > { %2788 = vsyncadd (%p2849_p2), [#allocation5], 4294967264  ;;  %v2599_v0 = vld [vmem:[#allocation2 + $0x78] sm:$0xff]   ;;  %p266_p5 = scmp.lt.s32.totalorder %s2791_s15, 1  ;;  %v2601_v2 = vld [vmem:[#allocation2 + $0x70] sm:$0xff]   ;;  %vm637_vm1 = vcmask 1046528  }
  0x39   : > { %v2600_v1 = vld [vmem:[#allocation2 + $0x38] sm:$0xff]   ;;  %2309 = vmatprep.subr.bf16.mxu0 %v2599_v0  ;;  %v2602_v3 = vld [vmem:[#allocation2 + $0x30] sm:$0xff]   ;;  %v2603_v4 = vld [vmem:[#allocation2 + $0x68] sm:$0xff]   ;;  %vm345_vm0 = vsmask.f32 7424  ;;  %vm1707_vm3 = vcmask 1045504  }
  0x3a   : > { %2333 = vmatprep.subr.bf16.mxu1 %v2600_v1  ;;  %2310 = vmatpush3.bf16.msra.mxu0 %v2599_v0  ;;  %v2604_v5 = vld [vmem:[#allocation2 + $0x28] sm:$0xff]   ;;  %s3161_s15 = smov (!%p266_p5, %s2791_s15), 1  ;;  %v2605_v6 = vld [vmem:[#allocation2 + $0x60] sm:$0xff]   ;;  %v2607_v8 = vld [vmem:[#allocation2 + $0x58] sm:$0xff]   ;;  %vm1158_vm2 = vsmask.f32 6400 }
  0x3b   : > { %2334 = vmatpush3.bf16.msra.mxu1 %v2600_v1  ;;  %2311 = vmatprep.subr.bf16.mxu0 %v2601_v2  ;;  %v2606_v7 = vld [vmem:[#allocation2 + $0x20] sm:$0xff]   ;;  %s2541_s20 = smul.u32 44, %s3161_s15  ;;  %v2608_v9 = vld [vmem:[#allocation2 + $0x18] sm:$0xff]   ;;  %v2609_v10 = vld [vmem:[#allocation2 + $0x50] sm:$0xff]   ;;  %s2169_s25 = sshll.u32 %s3161_s15, 5 }
  0x3c   : > { %2335 = vmatprep.subr.bf16.mxu1 %v2602_v3  ;;  %v2610_v11 = vld [vmem:[#allocation2 + $0x10] sm:$0xff]   ;;  %v2611_v20 = vld [vmem:[#allocation2 + $0x48] sm:$0xff]   ;;  %v2613_v27 = vld [vmem:[#allocation2 + $0x40] sm:$0xff]   ;;  %s278_s28 = scalar_lea.vmem %s3137_s4, %s2169_s25 }
  0x3d   : > { %s2918_s24 = scalar_lea.vmem %s3133_s0, %s2541_s20  ;;  %v2612_v21 = vld [vmem:[#allocation2 + $0x8] sm:$0xff]   ;;  %v2614_v28 = vld [vmem:[#allocation2] sm:$0xff]   ;;  %v2618_v32 = vld [vmem:[#allocation2 + $0xb8] sm:$0xff]  }
  0x3e   : > { %2312 = vmatpush3.bf16.msra.mxu0 %v2601_v2  ;;  %v280_v12 = vld [vmem:[%s2918_s24] sm:$0xf]  ;;  %v2922_v13 = vld [vmem:[%s2918_s24 + $0x4] sm:$0xf]  ;;  %v2926_v15 = vld [vmem:[%s2918_s24 + $0x8] sm:$0xff]  }
  0x3f   : > { %2336 = vmatpush3.bf16.msra.mxu1 %v2602_v3  ;;  %2313 = vmatprep.subr.bf16.mxu0 %v2603_v4  ;;  %v2065_v14 = vcombine.low %v280_v12, %v2922_v13  ;;  %v2929_v16 = vld [vmem:[%s2918_s24 + $0x10] sm:$0xff]   ;;  %v354_v19 = vshll.u32 %v2926_v15, 16  ;;  %v358_v24 = vshrl.u32 %v2926_v15, 16  ;;  %v2619_v34 = vld [vmem:[#allocation2 + $0xf8] sm:$0xff]   ;;  %v2622_v46 = vld [vmem:[#allocation2 + $0xa8] sm:$0xff]   ;;  %v639_v51 = vrot.slane %v2926_v15, 1 }
  0x40   : > { %2337 = vmatprep.subr.bf16.mxu1 %v2604_v5  ;;  %v362_v25 = vshll.u32 %v2929_v16, 16  ;;  %v366_v33 = vshrl.u32 %v2929_v16, 16  ;;  %v2937_v35 = vld [vmem:[%s2918_s24 + $0x18] sm:$0xff]   ;;  %v2940_v36 = vld [vmem:[%s2918_s24 + $0x20] ss:$0 sps:$4 sm:$0x11]  }
  0x41   : > { %v347_v17 = vshrl.u32 %v2065_v14, 16  ;;  %v349_v18 = vshll.u32 %v2065_v14, 16  ;;  %2349 = vmatprep.mubr.bf16.mxu1 %v2065_v14  ;;  %v356_v23 = vrot.slane %v354_v19, 1  ;;  %v2620_v38 = vld [vmem:[#allocation2 + $0xb0] sm:$0xff]   ;;  %v370_v41 = vshll.u32 %v2937_v35, 16  ;;  %v2623_v49 = vld [vmem:[#allocation2 + $0xe8] sm:$0xff]  }
  0x42   : > { %2314 = vmatpush3.bf16.msra.mxu0 %v2603_v4  ;;  %v364_v31 = vrot.slane %v362_v25, 1  ;;  %v2621_v39 = vld [vmem:[#allocation2 + $0xf0] sm:$0xff]   ;;  %v374_v42 = vshrl.u32 %v2937_v35, 16  ;;  %v378_v43 = vshll.u32 %v2940_v36, 16  ;;  %v616_v50 = vld [vmem:[%s2918_s24] sm:$0xe] }
  0x43   : > { %2338 = vmatpush3.bf16.msra.mxu1 %v2604_v5  ;;  %2315 = vmatprep.subr.bf16.mxu0 %v2605_v6  ;;  %v351_v22 = vrot.slane %v349_v18, 1  ;;  %v360_v30 = vor.u32 %v358_v24, %v356_v23  ;;  %v372_v44 = vrot.slane %v370_v41, 1  ;;  %v772_v52 = vld [vmem:[%s2918_s24 + $0x4] sm:$0xf]  ;;  %v2086_v53 = vcombine.low %v616_v50, %v2922_v13  ;;  %v2954_v54 = vld [vmem:[%s2918_s24 + $0x8] sm:$0xf] }
  0x44   : > { %2339 = vmatprep.subr.bf16.mxu1 %v2606_v7  ;;  %v368_v40 = vor.u32 %v366_v33, %v364_v31  ;;  %v380_v45 = vrot.slane %v378_v43, 1  ;;  %v2095_v56 = vcombine.low %v772_v52, %v2954_v54  ;;  %v2959_v57 = vld [vmem:[%s2918_s24 + $0xc] sm:$0xff]   ;;  %v2624_v58 = vld [vmem:[#allocation2 + $0xa0] sm:$0xff]   ;;  %v2626_v3 = vld [vmem:[#allocation2 + $0x98] sm:$0xff]   ;;  %v641_v19 = vrot.slane %v2929_v16, 1 }
  0x45   : > { %v352_v26 = vor.u32 %v351_v22, %v347_v17  ;;  %v365_v37 = vsel %vm345_vm0, %v360_v30, %v364_v31  ;;  %v376_v48 = vor.u32 %v374_v42, %v372_v44  ;;  %v638_v59 = vrot.slane %v2086_v53, 1  ;;  %v2625_v60 = vld [vmem:[#allocation2 + $0xe0] sm:$0xff]   ;;  %v2627_v4 = vld [vmem:[#allocation2 + $0xd8] sm:$0xff]  }
  0x46   : > { %2316 = vmatpush3.bf16.msra.mxu0 %v2605_v6  ;;  %v373_v47 = vsel %vm345_vm0, %v368_v40, %v372_v44  ;;  %v822_v61 = vshrl.u32 %v2095_v56, 16  ;;  %v824_v62 = vshll.u32 %v2095_v56, 16  ;;  %v829_v63 = vshll.u32 %v2959_v57, 16  ;;  %v2973_v12 = vld [vmem:[%s2918_s24 + $0x1c] sm:$0xff]  }
  0x47   : > { %2340 = vmatpush3.bf16.msra.mxu1 %v2606_v7  ;;  %2317 = vmatprep.subr.bf16.mxu0 %v2607_v8  ;;  %v357_v29 = vsel %vm345_vm0, %v352_v26, %v356_v23  ;;  %v381_v55 = vsel %vm345_vm0, %v376_v48, %v380_v45  ;;  %v640_v0 = vsel %vm637_vm1, %v638_v59, %v639_v51  ;;  %v2630_v7 = vld [vmem:[#allocation2 + $0x90] sm:$0xff]   ;;  %v2634_v13 = vld [vmem:[#allocation2 + $0x80] sm:$0xff]   ;;  %v833_v14 = vshrl.u32 %v2959_v57, 16  ;;  %v2640_v26 = vld [vmem:[#allocation2 + $0x138] sm:$0xff]  }
  0x48   : > { %2341 = vmatprep.subr.bf16.mxu1 %v2608_v9  ;;  %2325 = vmatprep.mubr.bf16.mxu0 %v357_v29  ;;  %v826_v1 = vrot.slane %v824_v62, 1  ;;  %v831_v2 = vrot.slane %v829_v63, 1  ;;  %v2635_v18 = vld [vmem:[#allocation2 + $0xc0] sm:$0xff]   ;;  %v642_v31 = vsel %vm637_vm1, %v639_v51, %v641_v19  ;;  %v1168_v43 = vrot.slane %v829_v63, 2  ;;  %v2644_v45 = vld [vmem:[#allocation2 + $0x128] sm:$0xff]   ;;  %v2650_v59 = vld [vmem:[#allocation2 + $0x118] sm:$0xff]  }
  0x49   : > { %v2981_v22 = vld [vmem:[%s2918_s24 + $0x24] ss:$0 sps:$4 sm:$0x11]   ;;  %v982_v23 = vld [vmem:[%s2918_s24 + $0x4] sm:$0xe]  ;;  %v1167_v42 = vrot.slane %v833_v14, 1 }
  0x4a   : > { %2318 = vmatpush3.bf16.msra.mxu0 %v2607_v8  ;;  %v827_v5 = vor.u32 %v826_v1, %v822_v61  ;;  %v2631_v8 = vld [vmem:[#allocation2 + $0xd0] sm:$0xff]   ;;  %v835_v24 = vor.u32 %v833_v14, %v831_v2  ;;  %v1004_v50 = vrot.slane %v2959_v57, 1  ;;  %v2649_v56 = vld [vmem:[#allocation2 + $0x160] sm:$0xff]   ;;  %v2654_v63 = vld [vmem:[#allocation2 + $0x108] sm:$0xff]  }
  0x4b   : > { %2342 = vmatpush3.bf16.msra.mxu1 %v2608_v9  ;;  %2319 = vmatprep.subr.bf16.mxu0 %v2609_v10  ;;  %v2632_v9 = vld [vmem:[#allocation2 + $0x88] sm:$0xff]   ;;  %v3007_v53 = vor.u32 %v1168_v43, %v1167_v42  ;;  %v2652_v61 = vld [vmem:[#allocation2 + $0x110] sm:$0xff]  }
  0x4c   : > { %2343 = vmatprep.subr.bf16.mxu1 %v2610_v11  ;;  %v832_v6 = vsel %vm345_vm0, %v827_v5, %v831_v2  ;;  %v2653_v62 = vld [vmem:[#allocation2 + $0x150] sm:$0xff]   ;;  %v2665_v2 = vld [vmem:[%s2918_s24 + $0x24] ss:$0 sps:$4 sm:$0x33]   ;;  %v1313_v5 = vld [vmem:[%s2918_s24 + $0x8] sm:$0xe] }
  0x4d   : > { %v3029_v14 = vld [vmem:[%s2918_s24 + $0x10] sm:$0xff]  }
  0x4e   : > { %2320 = vmatpush3.bf16.msra.mxu0 %v2609_v10  ;;  %v2970_v10 = vld [vmem:[%s2918_s24 + $0x14] sm:$0xff]   ;;  %v1363_v42 = vrot.slane %v3029_v14, 1 }
  0x4f   : > { %2344 = vmatpush3.bf16.msra.mxu1 %v2610_v11  ;;  %2321 = vmatprep.subr.bf16.mxu0 %v2611_v20  ;;  %v2633_v11 = vld [vmem:[#allocation2 + $0xc8] sm:$0xff]   ;;  %v837_v17 = vshll.u32 %v2970_v10, 16 }
  0x50   : > { %2345 = vmatprep.subr.bf16.mxu1 %v2612_v21 }
  0x51   : > { %v839_v25 = vrot.slane %v837_v17, 1 }
  0x52   : > { %2322 = vmatpush3.bf16.msra.mxu0 %v2611_v20  ;;  %v841_v20 = vshrl.u32 %v2970_v10, 16 }
  0x53   : > { %2346 = vmatpush3.bf16.msra.mxu1 %v2612_v21  ;;  %2323 = vmatprep.subr.bf16.mxu0 %v2613_v27  ;;  %v845_v21 = vshll.u32 %v2973_v12, 16 }
  0x54   : > { %2347 = vmatprep.subr.bf16.mxu1 %v2614_v28  ;;  %v843_v33 = vor.u32 %v841_v20, %v839_v25  ;;  %v1171_v1 = vrot.slane %v841_v20, 1  ;;  %v1183_v20 = vshll.u32 %v2665_v2, 16 }
  0x56   : > { %2324 = vmatpush3.bf16.msra.mxu0 %v2613_v27  ;;  %v2108_v27 = vcombine.low %v982_v23, %v2954_v54  ;;  %v2660_v23 = vld [vmem:[#allocation2 + $0x1f8] sm:$0xff]  }
  0x57   : > { %2348 = vmatpush3.bf16.msra.mxu1 %v2614_v28  ;;  %2357 = vmatprep.subr.bf16.mxu0 %v2618_v32  ;;  %v2641_v28 = vld [vmem:[#allocation2 + $0x178] sm:$0xff]  }
  0x58   : > { %2381 = vmatprep.subr.bf16.mxu1 %v2619_v34  ;;  %v1160_v29 = vshrl.u32 %v2108_v27, 16  ;;  %v1163_v30 = vshll.u32 %v2108_v27, 16 }
  0x59   : > { %2326 = vmatmul.mubr.bf16.vlgmr.msra.gmra.mxu0 %v365_v37  ;;  %v840_v37 = vsel %vm345_vm0, %v835_v24, %v839_v25  ;;  %v1008_v24 = vrot.slane %v2973_v12, 1 }
  0x5a   : > { %2350 = vmatmul.mubr.bf16.vlgmr.msra.gmra.mxu1 %v2926_v15  ;;  %2358 = vmatpush3.bf16.msra.mxu0 %v2618_v32  ;;  %v645_v32 = vrot.slane %v2940_v36, 1  ;;  %v853_v15 = vshll.u32 %v2981_v22, 16  ;;  %v1162_v36 = vrot.slane %v1160_v29, 1  ;;  %v1165_v41 = vrot.slane %v1163_v30, 2  ;;  %v2661_v29 = vld [vmem:[#allocation2 + $0x1b0] sm:$0xff]  }
  0x5b   : > { %2382 = vmatpush3.bf16.msra.mxu1 %v2619_v34  ;;  %2359 = vmatprep.subr.bf16.mxu0 %v2620_v38  ;;  %v847_v34 = vrot.slane %v845_v21, 1 }
  0x5c   : > { %2383 = vmatprep.subr.bf16.mxu1 %v2621_v39  ;;  %2329 = vmatprep.mubr.bf16.mxu0 %v373_v47  ;;  %v855_v48 = vrot.slane %v853_v15, 1  ;;  %v1166_v52 = vor.u32 %v1165_v41, %v1162_v36  ;;  %v2663_v15 = vld [vmem:[#allocation2 + $0x1a8] sm:$0xff]  }
  0x5d   : > { %2353 = vmatprep.mubr.bf16.mxu1 %v2929_v16  ;;  %v643_v16 = vrot.slane %v2937_v35, 1  ;;  %v848_v44 = vsel %vm345_vm0, %v843_v33, %v847_v34  ;;  %v1010_v33 = vrot.slane %v2981_v22, 1  ;;  %v2664_v36 = vld [vmem:[#allocation2 + $0x1e8] sm:$0xff]  }
  0x5e   : > { %2360 = vmatpush3.bf16.msra.mxu0 %v2620_v38  ;;  %v2643_v38 = vld [vmem:[#allocation2 + $0x170] sm:$0xff]   ;;  %v1170_v57 = vsel %vm1158_vm2, %v1166_v52, %v3007_v53 }
  0x5f   : > { %2384 = vmatpush3.bf16.msra.mxu1 %v2621_v39  ;;  %2361 = vmatprep.subr.bf16.mxu0 %v2622_v46  ;;  %v849_v39 = vshrl.u32 %v2973_v12, 16  ;;  %v644_v40 = vsel %vm637_vm1, %v641_v19, %v643_v16  ;;  %v646_v51 = vsel %vm637_vm1, %v643_v16, %v645_v32  ;;  %v1180_v19 = vshrl.u32 %v2665_v2, 16  ;;  %v2662_v32 = vld [vmem:[#allocation2 + $0x1f0] sm:$0xff]   ;;  %v2675_v2 = vld [vmem:[#allocation2 + $0x1c0] sm:$0xff]  }
  0x60   : > { %2385 = vmatprep.subr.bf16.mxu1 %v2623_v49  ;;  %v1011_v22 = vsel %vm637_vm1, %v1008_v24, %v1010_v33  ;;  %v2670_v52 = vld [vmem:[#allocation2 + $0x190] sm:$0xff]  }
  0x61   : > { %2330 = vmatmul.mubr.bf16.gmra.mxu0 %v381_v55  ;;  %v851_v47 = vor.u32 %v849_v39, %v847_v34  ;;  %v2648_v55 = vld [vmem:[#allocation2 + $0x120] sm:$0xff]   ;;  %v1182_v30 = vrot.slane %v1180_v19, 1 }
  0x62   : > { %2362 = vmatpush3.bf16.msra.mxu0 %v2622_v46  ;;  %2354 = vmatmul.mubr.bf16.gmra.mxu1 %v2937_v35  ;;  %v2642_v35 = vld [vmem:[#allocation2 + $0x130] sm:$0xff]   ;;  %v2645_v46 = vld [vmem:[#allocation2 + $0x168] sm:$0xff]  }
  0x63   : > { %2386 = vmatpush3.bf16.msra.mxu1 %v2623_v49  ;;  %2363 = vmatprep.subr.bf16.mxu0 %v2624_v58  ;;  %v1003_v49 = vrot.slane %v2108_v27, 1  ;;  %v856_v54 = vsel %vm345_vm0, %v851_v47, %v855_v48  ;;  %v1526_v27 = vshrl.u32 %v3029_v14, 16  ;;  %v2667_v47 = vld [vmem:[#allocation2 + $0x1e0] sm:$0xff]  }
  0x64   : > { %2387 = vmatprep.subr.bf16.mxu1 %v2625_v60  ;;  %2373 = vmatprep.mubr.bf16.mxu0 %v640_v0  ;;  %v2655_v0 = vld [vmem:[#allocation2 + $0x148] sm:$0xff]  }
  0x65   : > { %2397 = vmatprep.mubr.bf16.mxu1 %v832_v6  ;;  %v3020_v6 = vld [vmem:[%s2918_s24 + $0xc] sm:$0xf] }
  0x66   : > { %2364 = vmatpush3.bf16.msra.mxu0 %v2624_v58  ;;  %v1005_v58 = vsel %vm637_vm1, %v1003_v49, %v1004_v50 }
  0x67   : > { %2388 = vmatpush3.bf16.msra.mxu1 %v2625_v60  ;;  %2365 = vmatprep.subr.bf16.mxu0 %v2626_v3  ;;  %v2651_v60 = vld [vmem:[#allocation2 + $0x158] sm:$0xff]  }
  0x68   : > { %2389 = vmatprep.subr.bf16.mxu1 %v2627_v4 }
  0x6a   : > { %2366 = vmatpush3.bf16.msra.mxu0 %v2626_v3  ;;  %v2656_v3 = vld [vmem:[#allocation2 + $0x100] sm:$0xff]  }
  0x6b   : > { %2390 = vmatpush3.bf16.msra.mxu1 %v2627_v4  ;;  %2367 = vmatprep.subr.bf16.mxu0 %v2630_v7  ;;  %v1172_v4 = vrot.slane %v837_v17, 2 }
  0x6c   : > { %2391 = vmatprep.subr.bf16.mxu1 %v2631_v8 }
  0x6d   : > { %v1173_v17 = vor.u32 %v1172_v4, %v1171_v1  ;;  %v3061_v1 = vld [vmem:[%s2918_s24 + $0x28] ss:$0 sps:$4 sm:$0x33]  }
  0x6e   : > { %2368 = vmatpush3.bf16.msra.mxu0 %v2630_v7  ;;  %v2657_v7 = vld [vmem:[#allocation2 + $0x140] sm:$0xff]  }
  0x6f   : > { %2392 = vmatpush3.bf16.msra.mxu1 %v2631_v8  ;;  %2369 = vmatprep.subr.bf16.mxu0 %v2632_v9  ;;  %v1006_v8 = vrot.slane %v2970_v10, 1  ;;  %v1174_v16 = vsel %vm1158_vm2, %v3007_v53, %v1173_v17  ;;  %v3051_v53 = vld [vmem:[%s2918_s24 + $0x18] sm:$0xff]  }
  0x70   : > { %2393 = vmatprep.subr.bf16.mxu1 %v2633_v11 }
  0x71   : > { %v1007_v10 = vsel %vm637_vm1, %v1004_v50, %v1006_v8  ;;  %v1009_v12 = vsel %vm637_vm1, %v1006_v8, %v1008_v24  ;;  %v2668_v50 = vld [vmem:[#allocation2 + $0x198] sm:$0xff]  }
  0x72   : > { %2370 = vmatpush3.bf16.msra.mxu0 %v2632_v9  ;;  %v1175_v9 = vrot.slane %v849_v39, 1  ;;  %v2679_v8 = vld [vmem:[#allocation2 + $0x238] sm:$0xff]  }
  0x73   : > { %2394 = vmatpush3.bf16.msra.mxu1 %v2633_v11  ;;  %2371 = vmatprep.subr.bf16.mxu0 %v2634_v13  ;;  %v1176_v11 = vrot.slane %v845_v21, 2 }
  0x74   : > { %2395 = vmatprep.subr.bf16.mxu1 %v2635_v18 }
  0x75   : > { %v1177_v25 = vor.u32 %v1176_v11, %v1175_v9  ;;  %v1553_v9 = vshrl.u32 %v3061_v1, 16  ;;  %v1556_v11 = vshll.u32 %v3061_v1, 16 }
  0x76   : > { %2372 = vmatpush3.bf16.msra.mxu0 %v2634_v13  ;;  %v2126_v13 = vcombine.low %v1313_v5, %v3020_v6 }
  0x77   : > { %2396 = vmatpush3.bf16.msra.mxu1 %v2635_v18  ;;  %2405 = vmatprep.subr.bf16.mxu0 %v2640_v26  ;;  %v2659_v18 = vld [vmem:[#allocation2 + $0x1b8] sm:$0xff]   ;;  %v1178_v34 = vsel %vm1158_vm2, %v1173_v17, %v1177_v25  ;;  %v1555_v24 = vrot.slane %v1553_v9, 1 }
  0x78   : > { %2429 = vmatprep.subr.bf16.mxu1 %v2641_v28  ;;  %v1518_v21 = vshrl.u32 %v2126_v13, 16  ;;  %v1362_v41 = vrot.slane %v2126_v13, 1 }
  0x79   : > { %2374 = vmatmul.mubr.bf16.vlgmr.msra.gmra.mxu0 %v642_v31  ;;  %v1185_v31 = vrot.slane %v1183_v20, 2  ;;  %v1686_v20 = vld [vmem:[%s2918_s24 + $0x8] sm:$0xc] }
  0x7a   : > { %2398 = vmatmul.mubr.bf16.vlgmr.msra.gmra.mxu1 %v840_v37  ;;  %2406 = vmatpush3.bf16.msra.mxu0 %v2640_v26  ;;  %v1521_v26 = vshll.u32 %v2126_v13, 16  ;;  %v1520_v37 = vrot.slane %v1518_v21, 1  ;;  %v1364_v48 = vsel %vm637_vm1, %v1362_v41, %v1363_v42 }
  0x7b   : > { %2430 = vmatpush3.bf16.msra.mxu1 %v2641_v28  ;;  %2407 = vmatprep.subr.bf16.mxu0 %v2642_v35  ;;  %v1529_v28 = vshll.u32 %v3029_v14, 16 }
  0x7c   : > { %2431 = vmatprep.subr.bf16.mxu1 %v2643_v38  ;;  %2377 = vmatprep.mubr.bf16.mxu0 %v644_v40  ;;  %v1186_v40 = vor.u32 %v1185_v31, %v1182_v30  ;;  %v1709_v31 = vrot.slane %v3029_v14, 2 }
  0x7d   : > { %2401 = vmatprep.mubr.bf16.mxu1 %v848_v44  ;;  %v1531_v39 = vrot.slane %v1529_v28, 2 }
  0x7e   : > { %2408 = vmatpush3.bf16.msra.mxu0 %v2642_v35  ;;  %v1523_v35 = vrot.slane %v1521_v26, 2  ;;  %v2148_v26 = vcombine.low %v1686_v20, %v3020_v6  ;;  %v1711_v6 = vrot.slane %v3051_v53, 2 }
  0x7f   : > { %2432 = vmatpush3.bf16.msra.mxu1 %v2643_v38  ;;  %2409 = vmatprep.subr.bf16.mxu0 %v2644_v45  ;;  %v1528_v38 = vrot.slane %v1526_v27, 1 }
  0x80   : > { %2433 = vmatprep.subr.bf16.mxu1 %v2645_v46  ;;  %v1524_v43 = vor.u32 %v1523_v35, %v1520_v37  ;;  %v1708_v30 = vrot.slane %v2148_v26, 2  ;;  %v2686_v35 = vld [vmem:[#allocation2 + $0x218] sm:$0xff]  }
  0x81   : > { %2378 = vmatmul.mubr.bf16.gmra.mxu0 %v646_v51  ;;  %v3042_v44 = vor.u32 %v1531_v39, %v1528_v38  ;;  %v2669_v51 = vld [vmem:[#allocation2 + $0x1d8] sm:$0xff]   ;;  %v2687_v38 = vld [vmem:[#allocation2 + $0x210] sm:$0xff]   ;;  %v2688_v39 = vld [vmem:[#allocation2 + $0x208] sm:$0xff]  }
  0x82   : > { %2410 = vmatpush3.bf16.msra.mxu0 %v2644_v45  ;;  %2402 = vmatmul.mubr.bf16.gmra.mxu1 %v856_v54  ;;  %v1187_v45 = vsel %vm1158_vm2, %v1177_v25, %v1186_v40  ;;  %v2671_v54 = vld [vmem:[#allocation2 + $0x1d0] sm:$0xff]   ;;  %v1558_v25 = vrot.slane %v1556_v11, 2  ;;  %v1710_v37 = vsel %vm1707_vm3, %v1708_v30, %v1709_v31  ;;  %v1715_v40 = vrot.slane %v3061_v1, 2 }
  0x83   : > { %2434 = vmatpush3.bf16.msra.mxu1 %v2645_v46  ;;  %2411 = vmatprep.subr.bf16.mxu0 %v2648_v55  ;;  %v2666_v46 = vld [vmem:[#allocation2 + $0x1a0] sm:$0xff]   ;;  %v1533_v49 = vsel %vm1158_vm2, %v1524_v43, %v3042_v44 }
  0x84   : > { %2435 = vmatprep.subr.bf16.mxu1 %v2649_v56  ;;  %2421 = vmatprep.mubr.bf16.mxu0 %v1005_v58  ;;  %v1535_v58 = vshrl.u32 %v3051_v53, 16 }
  0x85   : > { %2445 = vmatprep.mubr.bf16.mxu1 %v1170_v57  ;;  %v1538_v57 = vshll.u32 %v3051_v53, 16 }
  0x86   : > { %2412 = vmatpush3.bf16.msra.mxu0 %v2648_v55  ;;  %v3054_v55 = vld [vmem:[%s2918_s24 + $0x20] sm:$0xff]  }
  0x87   : > { %2436 = vmatpush3.bf16.msra.mxu1 %v2649_v56  ;;  %2413 = vmatprep.subr.bf16.mxu0 %v2650_v59  ;;  %v2672_v56 = vld [vmem:[#allocation2 + $0x188] sm:$0xff]   ;;  %v1367_v13 = vrot.slane %v3054_v55, 1 }
  0x88   : > { %2437 = vmatprep.subr.bf16.mxu1 %v2651_v60 }
  0x8a   : > { %2414 = vmatpush3.bf16.msra.mxu0 %v2650_v59  ;;  %v2673_v59 = vld [vmem:[#allocation2 + $0x1c8] sm:$0xff]  }
  0x8b   : > { %2438 = vmatpush3.bf16.msra.mxu1 %v2651_v60  ;;  %2415 = vmatprep.subr.bf16.mxu0 %v2652_v61  ;;  %v1544_v60 = vshrl.u32 %v3054_v55, 16 }
  0x8c   : > { %2439 = vmatprep.subr.bf16.mxu1 %v2653_v62 }
  0x8d   : > { %v1546_v4 = vrot.slane %v1544_v60, 1 }
  0x8e   : > { %2416 = vmatpush3.bf16.msra.mxu0 %v2652_v61  ;;  %v1547_v61 = vshll.u32 %v3054_v55, 16 }
  0x8f   : > { %2440 = vmatpush3.bf16.msra.mxu1 %v2653_v62  ;;  %2417 = vmatprep.subr.bf16.mxu0 %v2654_v63  ;;  %v2674_v62 = vld [vmem:[#allocation2 + $0x180] sm:$0xff]  }
  0x90   : > { %2441 = vmatprep.subr.bf16.mxu1 %v2655_v0  ;;  %v1549_v5 = vrot.slane %v1547_v61, 2 }
  0x92   : > { %2418 = vmatpush3.bf16.msra.mxu0 %v2654_v63  ;;  %v1537_v63 = vrot.slane %v1535_v58, 1  ;;  %v1550_v19 = vor.u32 %v1549_v5, %v1546_v4 }
  0x93   : > { %2442 = vmatpush3.bf16.msra.mxu1 %v2655_v0  ;;  %2419 = vmatprep.subr.bf16.mxu0 %v2656_v3  ;;  %v1540_v0 = vrot.slane %v1538_v57, 2 }
  0x94   : > { %2443 = vmatprep.subr.bf16.mxu1 %v2657_v7 }
  0x96   : > { %2420 = vmatpush3.bf16.msra.mxu0 %v2656_v3  ;;  %v1365_v3 = vrot.slane %v3051_v53, 1 }
  0x97   : > { %2444 = vmatpush3.bf16.msra.mxu1 %v2657_v7  ;;  %2453 = vmatprep.subr.bf16.mxu0 %v2659_v18  ;;  %v1541_v7 = vor.u32 %v1540_v0, %v1537_v63 }
  0x98   : > { %2477 = vmatprep.subr.bf16.mxu1 %v2660_v23  ;;  %v1366_v17 = vsel %vm637_vm1, %v1363_v42, %v1365_v3  ;;  %v1368_v21 = vsel %vm637_vm1, %v1365_v3, %v1367_v13 }
  0x99   : > { %2422 = vmatmul.mubr.bf16.vlgmr.msra.gmra.mxu0 %v1007_v10  ;;  %v2680_v10 = vld [vmem:[#allocation2 + $0x230] sm:$0xff]   ;;  %v1551_v28 = vsel %vm1158_vm2, %v1541_v7, %v1550_v19 }
  0x9a   : > { %2446 = vmatmul.mubr.bf16.vlgmr.msra.gmra.mxu1 %v1174_v16  ;;  %2454 = vmatpush3.bf16.msra.mxu0 %v2659_v18  ;;  %v2682_v18 = vld [vmem:[%s2918_s24 + $0x28] ss:$0 sps:$4 sm:$0x11]  }
  0x9b   : > { %2478 = vmatpush3.bf16.msra.mxu1 %v2660_v23  ;;  %2455 = vmatprep.subr.bf16.mxu0 %v2661_v29  ;;  %v1542_v23 = vsel %vm1158_vm2, %v3042_v44, %v1541_v7  ;;  %v1369_v27 = vrot.slane %v2682_v18, 1  ;;  %v2683_v16 = vld [vmem:[#allocation2 + $0x228] sm:$0xff]  }
  0x9c   : > { %2479 = vmatprep.subr.bf16.mxu1 %v2662_v32  ;;  %2425 = vmatprep.mubr.bf16.mxu0 %v1009_v12  ;;  %v1713_v12 = vrot.slane %v3054_v55, 2 }
  0x9d   : > { %2449 = vmatprep.mubr.bf16.mxu1 %v1178_v34  ;;  %v2685_v34 = vld [vmem:[#allocation2 + $0x220] sm:$0xff]  }
  0x9e   : > { %2456 = vmatpush3.bf16.msra.mxu0 %v2661_v29  ;;  %v1559_v29 = vor.u32 %v1558_v25, %v1555_v24  ;;  %v1714_v14 = vsel %vm1707_vm3, %v1711_v6, %v1713_v12  ;;  %v1716_v41 = vsel %vm1707_vm3, %v1713_v12, %v1715_v40 }
  0x9f   : > { %2480 = vmatpush3.bf16.msra.mxu1 %v2662_v32  ;;  %2457 = vmatprep.subr.bf16.mxu0 %v2663_v15  ;;  %v1370_v32 = vsel %vm637_vm1, %v1367_v13, %v1369_v27 }
  0xa0   : > { %2481 = vmatprep.subr.bf16.mxu1 %v2664_v36  ;;  %v1560_v33 = vsel %vm1158_vm2, %v1550_v19, %v1559_v29 }
  0xa1   : > { %2426 = vmatmul.mubr.bf16.gmra.mxu0 %v1011_v22 }
  0xa2   : > { %2458 = vmatpush3.bf16.msra.mxu0 %v2663_v15  ;;  %2450 = vmatmul.mubr.bf16.gmra.mxu1 %v1187_v45  ;;  %v2689_v15 = vld [vmem:[#allocation2 + $0x200] sm:$0xff]  }
  0xa3   : > { %2482 = vmatpush3.bf16.msra.mxu1 %v2664_v36  ;;  %2459 = vmatprep.subr.bf16.mxu0 %v2666_v46  ;;  %v1712_v36 = vsel %vm1707_vm3, %v1709_v31, %v1711_v6 }
  0xa4   : > { %2483 = vmatprep.subr.bf16.mxu1 %v2667_v47  ;;  %2469 = vmatprep.mubr.bf16.mxu0 %v1364_v48 }
  0xa5   : > { %2493 = vmatprep.mubr.bf16.mxu1 %v1533_v49 }
  0xa6   : > { %2460 = vmatpush3.bf16.msra.mxu0 %v2666_v46 }
  0xa7   : > { %2484 = vmatpush3.bf16.msra.mxu1 %v2667_v47  ;;  %2461 = vmatprep.subr.bf16.mxu0 %v2668_v50 }
  0xa8   : > { %2485 = vmatprep.subr.bf16.mxu1 %v2669_v51 }
  0xaa   : > { %2462 = vmatpush3.bf16.msra.mxu0 %v2668_v50 }
  0xab   : > { %2486 = vmatpush3.bf16.msra.mxu1 %v2669_v51  ;;  %2463 = vmatprep.subr.bf16.mxu0 %v2670_v52 }
  0xac   : > { %2487 = vmatprep.subr.bf16.mxu1 %v2671_v54 }
  0xae   : > { %2464 = vmatpush3.bf16.msra.mxu0 %v2670_v52 }
  0xaf   : > { %2488 = vmatpush3.bf16.msra.mxu1 %v2671_v54  ;;  %2465 = vmatprep.subr.bf16.mxu0 %v2672_v56 }
  0xb0   : > { %2489 = vmatprep.subr.bf16.mxu1 %v2673_v59 }
  0xb2   : > { %2466 = vmatpush3.bf16.msra.mxu0 %v2672_v56 }
  0xb3   : > { %2490 = vmatpush3.bf16.msra.mxu1 %v2673_v59  ;;  %2467 = vmatprep.subr.bf16.mxu0 %v2674_v62 }
  0xb4   : > { %2491 = vmatprep.subr.bf16.mxu1 %v2675_v2 }
  0xb6   : > { %2468 = vmatpush3.bf16.msra.mxu0 %v2674_v62 }
  0xb7   : > { %2492 = vmatpush3.bf16.msra.mxu1 %v2675_v2  ;;  %2501 = vmatprep.subr.bf16.mxu0 %v2679_v8 }
  0xb8   : > { %2525 = vmatprep.subr.bf16.mxu1 %v2679_v8 }
  0xb9   : > { %2470 = vmatmul.mubr.bf16.vlgmr.msra.gmra.mxu0 %v1366_v17 }
  0xba   : > { %2494 = vmatmul.mubr.bf16.vlgmr.msra.gmra.mxu1 %v1542_v23  ;;  %2502 = vmatpush3.bf16.msra.mxu0 %v2679_v8 }
  0xbb   : > { %2533 = vmatpush3.bf16.msra.mxu1 %v2679_v8  ;;  %2503 = vmatprep.subr.bf16.mxu0 %v2680_v10 }
  0xbc   : > { %2526 = vmatprep.subr.bf16.mxu1 %v2680_v10  ;;  %2473 = vmatprep.mubr.bf16.mxu0 %v1368_v21 }
  0xbd   : > { %2497 = vmatprep.mubr.bf16.mxu1 %v1551_v28 }
  0xbe   : > { %2504 = vmatpush3.bf16.msra.mxu0 %v2680_v10 }
  0xbf   : > { %2534 = vmatpush3.bf16.msra.mxu1 %v2680_v10  ;;  %2505 = vmatprep.subr.bf16.mxu0 %v2683_v16 }
  0xc0   : > { %2527 = vmatprep.subr.bf16.mxu1 %v2683_v16 }
  0xc1   : > { %2474 = vmatmul.mubr.bf16.gmra.mxu0 %v1370_v32 }
  0xc2   : > { %2506 = vmatpush3.bf16.msra.mxu0 %v2683_v16  ;;  %2498 = vmatmul.mubr.bf16.gmra.mxu1 %v1560_v33 }
  0xc3   : > { %2535 = vmatpush3.bf16.msra.mxu1 %v2683_v16  ;;  %2507 = vmatprep.subr.bf16.mxu0 %v2685_v34 }
  0xc4   : > { %2528 = vmatprep.subr.bf16.mxu1 %v2685_v34  ;;  %2517 = vmatprep.mubr.bf16.mxu0 %v1710_v37 }
  0xc5   : > { %2521 = vmatprep.mubr.bf16.mxu1 %v1714_v14 }
  0xc6   : > { %2508 = vmatpush3.bf16.msra.mxu0 %v2685_v34 }
  0xc7   : > { %2536 = vmatpush3.bf16.msra.mxu1 %v2685_v34  ;;  %2509 = vmatprep.subr.bf16.mxu0 %v2686_v35 }
  0xc8   : > { %2529 = vmatprep.subr.bf16.mxu1 %v2686_v35 }
  0xca   : > { %2510 = vmatpush3.bf16.msra.mxu0 %v2686_v35 }
  0xcb   : > { %2537 = vmatpush3.bf16.msra.mxu1 %v2686_v35  ;;  %2511 = vmatprep.subr.bf16.mxu0 %v2687_v38 }
  0xcc   : > { %2530 = vmatprep.subr.bf16.mxu1 %v2687_v38 }
  0xce   : > { %2512 = vmatpush3.bf16.msra.mxu0 %v2687_v38 }
  0xcf   : > { %2538 = vmatpush3.bf16.msra.mxu1 %v2687_v38  ;;  %2513 = vmatprep.subr.bf16.mxu0 %v2688_v39 }
  0xd0   : > { %2531 = vmatprep.subr.bf16.mxu1 %v2688_v39 }
  0xd2   : > { %2514 = vmatpush3.bf16.msra.mxu0 %v2688_v39 }
  0xd3   : > { %2539 = vmatpush3.bf16.msra.mxu1 %v2688_v39  ;;  %2515 = vmatprep.subr.bf16.mxu0 %v2689_v15 }
  0xd4   : > { %2532 = vmatprep.subr.bf16.mxu1 %v2689_v15 }
  0xd6   : > { %2516 = vmatpush3.bf16.msra.mxu0 %v2689_v15 }
  0xd7   : > { %2540 = vmatpush3.bf16.msra.mxu1 %v2689_v15 }
  0xd9   : > { %2518 = vmatmul.mubr.bf16.vlgmr.msra.gmra.mxu0 %v1712_v36 }
  0xda   : > { %2522 = vmatmul.mubr.bf16.vlgmr.msra.gmra.mxu1 %v1716_v41 }
 0x119   : > { %v2327_v42 = vpop.f32.mrf.mxu0 }
 0x11a   : > { %v2351_v43 = vpop.f32.mrf.mxu1 }
 0x11b   : > { %v468_v22 = vpop.f32.mrf.mxu0  ;;  %v594_v33 = vadd.f32 %v2351_v43, %v2327_v42 }
 0x11c   : > { %v585_v45 = vpop.f32.mrf.mxu1 }
 0x11d   : > { %v2328_v44 = vpop.f32.mrf.mxu0  ;;  %v586_v35 = vadd.f32 %v585_v45, %v468_v22 }
 0x11e   : > { %v2352_v48 = vpop.f32.mrf.mxu1 }
 0x11f   : > { %v3087_v46 = vpop.f32.mrf.mxu0  ;;  %v597_v40 = vadd.f32 %v2352_v48, %v2328_v44 }
 0x120   : > { %v3089_v50 = vpop.f32.mrf.mxu1 }
 0x121   : > { %v2331_v47 = vpop.f32.mrf.mxu0  ;;  %v589_v22 = vadd.f32 %v3089_v50, %v3087_v46 }
 0x122   : > { %v2355_v51 = vpop.f32.mrf.mxu1 }
 0x123   : > { %v484_v49 = vpop.f32.mrf.mxu0  ;;  %v610_v37 = vadd.f32 %v2355_v51, %v2331_v47 }
 0x124   : > { %v601_v53 = vpop.f32.mrf.mxu1 }
 0x125   : > { %v2332_v52 = vpop.f32.mrf.mxu0  ;;  %v602_v39 = vadd.f32 %v601_v53, %v484_v49 }
 0x126   : > { %v2356_v56 = vpop.f32.mrf.mxu1 }
 0x127   : > { %v3091_v54 = vpop.f32.mrf.mxu0 }
 0x128   : > { %3142 = vst [vmem:[#allocation9_spill] sm:$0xff] %v3091_v54  ;;  %v604_v57 = vpop.f32.mrf.mxu1 }
 0x12f   : > { %v3149_v44 = vld [vmem:[#allocation9_spill] sm:$0xff] }
 0x130   : > { %v605_v48 = vadd.f32 %v604_v57, %v3149_v44 }
 0x139   : > { %v2375_v55 = vpop.f32.mrf.mxu0 }
 0x13a   : > { %v2399_v59 = vpop.f32.mrf.mxu1  ;;  %v766_v38 = vadd.f32 %v2375_v55, %v594_v33 }
 0x13b   : > { %v733_v58 = vpop.f32.mrf.mxu0 }
 0x13c   : > { %v943_v61 = vpop.f32.mrf.mxu1  ;;  %v764_v36 = vadd.f32 %v733_v58, %v586_v35 }
 0x13d   : > { %v2376_v60 = vpop.f32.mrf.mxu0 }
 0x13e   : > { %v2400_v63 = vpop.f32.mrf.mxu1 }
 0x13f   : > { %v736_v62 = vpop.f32.mrf.mxu0 }
 0x140   : > { %v3093_v1 = vpop.f32.mrf.mxu1 }
 0x141   : > { %v2379_v0 = vpop.f32.mrf.mxu0  ;;  %3143 = vst [vmem:[#allocation10_spill] sm:$0xff] %v3093_v1  ;;  %v767_v1 = vadd.f32 %v2376_v60, %v597_v40 }
 0x142   : > { %v2403_v3 = vpop.f32.mrf.mxu1  ;;  %v770_v15 = vadd.f32 %v2379_v0, %v610_v37 }
 0x143   : > { %v749_v2 = vpop.f32.mrf.mxu0  ;;  %v977_v53 = vadd.f32 %v2400_v63, %v767_v1 }
 0x144   : > { %v959_v5 = vpop.f32.mrf.mxu1  ;;  %v980_v42 = vadd.f32 %v2403_v3, %v770_v15 }
 0x145   : > { %v2380_v4 = vpop.f32.mrf.mxu0 }
 0x146   : > { %v2404_v8 = vpop.f32.mrf.mxu1 }
 0x147   : > { %v752_v7 = vpop.f32.mrf.mxu0 }
 0x148   : > { %v3095_v11 = vpop.f32.mrf.mxu1  ;;  %v769_v60 = vadd.f32 %v752_v7, %v605_v48  ;;  %v3150_v50 = vld [vmem:[#allocation10_spill] sm:$0xff] }
 0x149   : > { %3144 = vst [vmem:[#allocation11_spill] sm:$0xff] %v3095_v11  ;;  %v976_v11 = vadd.f32 %v2399_v59, %v766_v38 }
 0x150   : > { %v3151_v57 = vld [vmem:[#allocation11_spill] sm:$0xff] }
 0x151   : > { %v979_v63 = vadd.f32 %v3151_v57, %v769_v60 }
 0x159   : > { %v2423_v9 = vpop.f32.mrf.mxu0 }
 0x15a   : > { %v2447_v17 = vpop.f32.mrf.mxu1  ;;  %v1131_v47 = vadd.f32 %v2423_v9, %v976_v11 }
 0x15b   : > { %v1098_v13 = vpop.f32.mrf.mxu0 }
 0x15c   : > { %v1274_v19 = vpop.f32.mrf.mxu1  ;;  %v1307_v0 = vadd.f32 %v2447_v17, %v1131_v47 }
 0x15d   : > { %v2424_v18 = vpop.f32.mrf.mxu0 }
 0x15e   : > { %v2448_v23 = vpop.f32.mrf.mxu1 }
 0x15f   : > { %v3097_v20 = vpop.f32.mrf.mxu0 }
 0x160   : > { %3145 = vst [vmem:[#allocation12_spill] sm:$0xff] %v3097_v20  ;;  %v3099_v24 = vpop.f32.mrf.mxu1 }
 0x161   : > { %v2427_v10 = vpop.f32.mrf.mxu0  ;;  %3146 = vst [vmem:[#allocation13_spill] sm:$0xff] %v3099_v24  ;;  %v613_v24 = vadd.f32 %v2356_v56, %v2332_v52  ;;  %v765_v56 = vadd.f32 %v736_v62, %v589_v22 }
 0x162   : > { %v2451_v25 = vpop.f32.mrf.mxu1  ;;  %v1135_v49 = vadd.f32 %v2427_v10, %v980_v42 }
 0x163   : > { %v1114_v21 = vpop.f32.mrf.mxu0  ;;  %v771_v43 = vadd.f32 %v2380_v4, %v613_v24 }
 0x164   : > { %v1290_v26 = vpop.f32.mrf.mxu1  ;;  %v1311_v3 = vadd.f32 %v2451_v25, %v1135_v49 }
 0x165   : > { %v2428_v27 = vpop.f32.mrf.mxu0  ;;  %v981_v58 = vadd.f32 %v2404_v8, %v771_v43 }
 0x166   : > { %v2452_v28 = vpop.f32.mrf.mxu1 }
 0x167   : > { %v1117_v16 = vpop.f32.mrf.mxu0  ;;  %v3152_v62 = vld [vmem:[#allocation12_spill] sm:$0xff] }
 0x168   : > { %v3101_v30 = vpop.f32.mrf.mxu1  ;;  %v3153_v35 = vld [vmem:[#allocation13_spill] sm:$0xff] }
 0x169   : > { %3147 = vst [vmem:[#allocation14_spill] sm:$0xff] %v3101_v30  ;;  %v768_v30 = vadd.f32 %v749_v2, %v602_v39  ;;  %v1132_v2 = vadd.f32 %v2424_v18, %v977_v53  ;;  %v1134_v18 = vadd.f32 %v1117_v16, %v979_v63 }
 0x16b   : > { %v978_v45 = vadd.f32 %v959_v5, %v768_v30  ;;  %v975_v5 = vadd.f32 %v3150_v50, %v765_v56  ;;  %v1308_v1 = vadd.f32 %v2448_v23, %v1132_v2 }
 0x16d   : > { %v1133_v59 = vadd.f32 %v1114_v21, %v978_v45  ;;  %v1130_v8 = vadd.f32 %v3152_v62, %v975_v5 }
 0x16f   : > { %v1309_v10 = vadd.f32 %v1290_v26, %v1133_v59  ;;  %v1306_v38 = vadd.f32 %v3153_v35, %v1130_v8 }
 0x179   : > { %v2471_v29 = vpop.f32.mrf.mxu0 }
 0x17a   : > { %v2495_v31 = vpop.f32.mrf.mxu1  ;;  %v1490_v11 = vadd.f32 %v2471_v29, %v1307_v0 }
 0x17b   : > { %v1457_v32 = vpop.f32.mrf.mxu0 }
 0x17c   : > { %v1647_v6 = vpop.f32.mrf.mxu1  ;;  %v1680_v25 = vadd.f32 %v2495_v31, %v1490_v11 }
 0x17d   : > { %v2472_v12 = vpop.f32.mrf.mxu0 }
 0x17e   : > { %v3103_v34 = vpop.f32.mrf.mxu1 }
 0x17f   : > { %3148 = vst [vmem:[#allocation15_spill] sm:$0xff] %v3103_v34  ;;  %v3105_v14 = vpop.f32.mrf.mxu0  ;;  %v974_v34 = vadd.f32 %v943_v61, %v764_v36  ;;  %v1136_v61 = vadd.f32 %v2428_v27, %v981_v58  ;;  %v1491_v27 = vadd.f32 %v2472_v12, %v1308_v1 }
 0x180   : > { %v3107_v41 = vpop.f32.mrf.mxu1 }
 0x181   : > { %v2475_v20 = vpop.f32.mrf.mxu0  ;;  %v1129_v55 = vadd.f32 %v1098_v13, %v974_v34  ;;  %v1312_v21 = vadd.f32 %v2452_v28, %v1136_v61  ;;  %v2157_v34 = vld [vmem:[#allocation4] ss:$0 sm:$0xff]  ;;  %v3154_v28 = vld [vmem:[#allocation14_spill] sm:$0xff] }
 0x182   : > { %v2499_v54 = vpop.f32.mrf.mxu1  ;;  %v1494_v24 = vadd.f32 %v2475_v20, %v1311_v3  ;;  %v1310_v40 = vadd.f32 %v3154_v28, %v1134_v18 }
 0x183   : > { %v1473_v51 = vpop.f32.mrf.mxu0  ;;  %v1305_v9 = vadd.f32 %v1274_v19, %v1129_v55 }
 0x184   : > { %v1663_v52 = vpop.f32.mrf.mxu1  ;;  %v1492_v7 = vadd.f32 %v1473_v51, %v1309_v10  ;;  %v1684_v19 = vadd.f32 %v2499_v54, %v1494_v24 }
 0x185   : > { %v2476_v4 = vpop.f32.mrf.mxu0  ;;  %v1488_v13 = vadd.f32 %v1457_v32, %v1305_v9  ;;  %v2158_v32 = vld [vmem:[#allocation6] ss:$0 sm:$0xff] }
 0x186   : > { %v2500_v46 = vpop.f32.mrf.mxu1  ;;  %v1495_v29 = vadd.f32 %v2476_v4, %v1312_v21  ;;  %v1682_v23 = vadd.f32 %v1663_v52, %v1492_v7  ;;  %v3155_v36 = vld [vmem:[#allocation15_spill] sm:$0xff] }
 0x187   : > { %v1476_v17 = vpop.f32.mrf.mxu0  ;;  %v1678_v37 = vadd.f32 %v1647_v6, %v1488_v13  ;;  %v1681_v16 = vadd.f32 %v3155_v36, %v1491_v27  ;;  %v1489_v6 = vadd.f32 %v3105_v14, %v1306_v38 }
 0x188   : > { %v1666_v30 = vpop.f32.mrf.mxu1  ;;  %v1685_v54 = vadd.f32 %v2500_v46, %v1495_v29  ;;  %v1493_v45 = vadd.f32 %v1476_v17, %v1310_v40 }
 0x189   : > { %v1679_v60 = vadd.f32 %v3107_v41, %v1489_v6 }
 0x18a   : > { %v1683_v0 = vadd.f32 %v1666_v30, %v1493_v45 }
 0x199   : > { %v2519_v33 = vpop.f32.mrf.mxu0 }
 0x19a   : > { %v1836_v26 = vadd.f32 %v2519_v33, %v1680_v25  ;;  %v2523_v20 = vpop.f32.mrf.mxu1 }
 0x19b   : > { %v1840_v39 = vadd.f32 %v2523_v20, %v1684_v19  ;;  %v1803_v15 = vpop.f32.mrf.mxu0 }
 0x19c   : > { %v1851_v31 = vmul.f32 %v2157_v34, %v1836_v26  ;;  %v1834_v12 = vadd.f32 %v1803_v15, %v1678_v37  ;;  %v1819_v42 = vpop.f32.mrf.mxu1 }
 0x19d   : > { %v1855_v43 = vmul.f32 %v2157_v34, %v1840_v39  ;;  %v1838_v47 = vadd.f32 %v1819_v42, %v1682_v23  ;;  %v2520_v22 = vpop.f32.mrf.mxu0 }
 0x19e   : > { %v1866_v49 = vadd.f32 %v2158_v32, %v1851_v31  ;;  %v1837_v51 = vadd.f32 %v2520_v22, %v1681_v16  ;;  %v2524_v44 = vpop.f32.mrf.mxu1  ;;  %v1849_v53 = vmul.f32 %v2157_v34, %v1834_v12 }
 0x19f   : > { %v1870_v48 = vadd.f32 %v2158_v32, %v1855_v43  ;;  %v1841_v55 = vadd.f32 %v2524_v44, %v1685_v54  ;;  %v1853_v56 = vmul.f32 %v2157_v34, %v1838_v47  ;;  %v1806_v59 = vpop.f32.mrf.mxu0 }
 0x1a0   : > { %v1852_v52 = vmul.f32 %v2157_v34, %v1837_v51  ;;  %v1882_v2 = vmul.f32 0.1, %v1866_v49  ;;  %v1822_v61 = vpop.f32.mrf.mxu1  ;;  %vm1874_vm4 = vcmp.ge.f32.partialorder %v1866_v49, 0.0  ;;  %v1864_v4 = vadd.f32 %v2158_v32, %v1849_v53 }
 0x1a1   : > { %v1856_v58 = vmul.f32 %v2157_v34, %v1841_v55  ;;  %v1886_v14 = vmul.f32 0.1, %v1870_v48  ;;  %vm1878_vm5 = vcmp.ge.f32.partialorder %v1870_v48, 0.0  ;;  %v1835_v46 = vadd.f32 %v1806_v59, %v1679_v60 }
 0x1a2   : > { %v1867_v3 = vadd.f32 %v2158_v32, %v1852_v52  ;;  %v1868_v50 = vadd.f32 %v2158_v32, %v1853_v56  ;;  %v1839_v10 = vadd.f32 %v1822_v61, %v1683_v0  ;;  %v1890_v24 = vsel %vm1874_vm4, %v1866_v49, %v1882_v2 }
 0x1a3   : > { %v1871_v9 = vadd.f32 %v2158_v32, %v1856_v58  ;;  %v1850_v57 = vmul.f32 %v2157_v34, %v1835_v46  ;;  %v1894_v63 = vsel %vm1878_vm5, %v1870_v48, %v1886_v14  ;;  %v1880_v8 = vmul.f32 0.1, %v1864_v4 }
 0x1a4   : > { %vm1875_vm6 = vcmp.ge.f32.partialorder %v1867_v3, 0.0  ;;  %v1883_v11 = vmul.f32 0.1, %v1867_v3  ;;  %v1854_v62 = vmul.f32 %v2157_v34, %v1839_v10  ;;  %vm1872_vm8 = vcmp.ge.f32.partialorder %v1864_v4, 0.0 }
 0x1a5   : > { %vm1879_vm7 = vcmp.ge.f32.partialorder %v1871_v9, 0.0  ;;  %v1887_v5 = vmul.f32 0.1, %v1871_v9  ;;  %v1865_v7 = vadd.f32 %v2158_v32, %v1850_v57  ;;  %v1884_v17 = vmul.f32 0.1, %v1868_v50 }
 0x1a6   : > { %v1891_v41 = vsel %vm1875_vm6, %v1867_v3, %v1883_v11  ;;  %v1869_v18 = vadd.f32 %v2158_v32, %v1854_v62  ;;  %vm1876_vm9 = vcmp.ge.f32.partialorder %v1868_v50, 0.0  ;;  %v1888_v30 = vsel %vm1872_vm8, %v1864_v4, %v1880_v8 }
 0x1a7   : > { %v2186_v1 = vpack.c.bf16 %v1891_v41, %v1890_v24  ;;  %v1895_v13 = vsel %vm1879_vm7, %v1871_v9, %v1887_v5  ;;  %vm1873_vm10 = vcmp.ge.f32.partialorder %v1865_v7, 0.0  ;;  %v1881_v25 = vmul.f32 0.1, %v1865_v7 }
 0x1a8   : > { %v2196_v21 = vpack.c.bf16 %v1895_v13, %v1894_v63  ;;  %vm1877_vm11 = vcmp.ge.f32.partialorder %v1869_v18, 0.0  ;;  %v1885_v27 = vmul.f32 0.1, %v1869_v18  ;;  %v1892_v29 = vsel %vm1876_vm9, %v1868_v50, %v1884_v17 }
 0x1a9   : > { %2198 = vst [vmem:[%s278_s28 + $0x8] sm:$0xff] %v2186_v1   ;;  %v1889_v19 = vsel %vm1873_vm10, %v1865_v7, %v1881_v25 }
 0x1aa   : > { %2200 = vst [vmem:[%s278_s28 + $0x18] sm:$0xff] %v2196_v21   ;;  %v2181_v33 = vpack.c.bf16 %v1889_v19, %v1888_v30  ;;  %v1893_v37 = vsel %vm1877_vm11, %v1869_v18, %v1885_v27 }
 0x1ab   : > { %v2191_v26 = vpack.c.bf16 %v1893_v37, %v1892_v29 }
 0x1ac   : > { %2182 = vst [vmem:[%s278_s28] sm:$0xff] %v2181_v33  }
 0x1ad   : > { %2199 = vst [vmem:[%s278_s28 + $0x10] sm:$0xff] %v2191_v26  }
 0x1ae PF: > { %s16_s17 = sadd.s32 1, %s2799_s17   ;;  %s3156_s15 = smov %s2795_s16 }
 0x1af   : > { %p13_p2 = scmp.ge.s32.totalorder %s16_s17, 4   ;;  %s3157_s16 = smov %s3159_s23 }
 0x1b1   :  { %15 = sbr.rel (!%p13_p2) target bundleno = 3 (0x3), region = 90 }
 0x1b6   :  { %1963 = vsyncpa [#allocation3], 1 }
 0x1b7   :  { %1965 = vsyncpa [#allocation3 + $0x1], 1 }
 0x1b8   :  { %1966 = vsyncpa [#allocation5], 1 }

// kernel: _lambda_.7
= control target key start
LH: loop header
LB: loop body
LE: loop exit
PB: predicated region body
PF: predicated region fallthrough
CT: control target
= control target key end

     0   :  { %9 = vsyncpa [#allocation3], 0  ;;  %s3076_s0 = inlined_call_operand.vmem [shape: bf16[2,4,72,128], index: 0, kind: input, shape index: {}]   ;;  %s3077_s1 = inlined_call_operand.hbm [shape: bf16[9,128,128], index: 1, kind: input, shape index: {}]   ;;  %s3078_s2 = inlined_call_operand.hbm [shape: f32[1,128], index: 2, kind: input, shape index: {}]   ;;  %s3079_s3 = inlined_call_operand.hbm [shape: f32[1,128], index: 3, kind: input, shape index: {}]   ;;  %s3080_s4 = inlined_call_operand.vmem [shape: bf16[2,56,128], index: 4, kind: output, shape index: {}]  }
   0x1   :  { %10 = vsyncpa [#allocation5], 0  ;;  %s2877_s15 = smov 0   ;;  %s2879_s16 = smov 0  }
   0x2   :  { %s2881_s17 = smov 0  }
   0x3 LB: > { %s2847_s18 = smov [#allocation4]   ;;  %s2038_s20 = sadd.s32 4294967295, %s2845_s17   ;;  %s2845_s17 = sphi %s2881_s17, %s16_s17   ;;  %s2841_s16 = sphi %s2879_s16, %s3086_s16   ;;  %s2837_s15 = sphi %s2877_s15, %s3085_s15  }
   0x4   : > { %s195_s19 = sshll.u32 %s2847_s18, 4  ;;  %p2040_p0 = scmp.ge.s32.totalorder %s2845_s17, 1  ;;  %s196_s19 = int_to_ptr.vmem [resolvable:$true] %s195_s19 }
   0x5   : > { %p165_p1 = scmp.lt.s32.totalorder %s2845_s17, 3  ;;  %p2895_p2 = scmp.eq.s32.totalorder %s2038_s20, 0 }
   0x6   : > { %s28_s23 = sadd.s32 1, %s2841_s16  ;;  %s2848_s26 = smov [#allocation2]  }
   0x7   : > { %p2899_p3 = pnand %p2040_p0, %p165_p1  ;;  %p2912_p6 = scmp.ge.s32.totalorder %s28_s23, 2 }
   0x8   : > { %s179_s27 = sshll.u32 %s2848_s26, 4  ;;  %s2748_s28 = scalar_lea.vmem %s196_s19, 16  ;;  %s180_s27 = int_to_ptr.vmem [resolvable:$true] %s179_s27 }
   0x9   : > { %p2584_p4 = pneg %p2899_p3  ;;  %p2749_p8 = scmp.ne.s32.totalorder %s196_s19, %s2748_s28 }
   0xa   : > { %s2755_s29 = scalar_lea.vmem %s196_s19, 32  ;;  %p2756_p11 = scmp.lt.s32.totalorder %s196_s19, %s196_s19 }
   0xb   : > { %p2908_p5 = pnand %p2895_p2, %p2584_p4  ;;  %p2757_p12 = scmp.lt.s32.totalorder %s2755_s29, %s2748_s28 }
   0xd   : > { %p2739_p7 = pneg %p2908_p5  ;;  %p2758_p13 = por %p2757_p12, %p2756_p11 }
   0xf   : > { %p2751_p9 = pnand %p2749_p8, %p2739_p7 }
  0x11   : > { %p2752_p10 = pneg %p2751_p9 }
  0x13   : > { %p2759_p0 = pnand %p2758_p13, %p2752_p10 }
  0x15   : > { %2762 = shalt.err (!%p2759_p0)
}
  0x16   : > { %2590 = dma.hbm_to_vmem [thread:$0]  (!%p2908_p5), %s3078_s2, 16, %s196_s19, [#allocation5]  }
  0x17   : > { %s3088_s23 = smov (%p2912_p6, %s28_s23), 0  ;;  %s2774_s6 = scalar_lea.vmem %s180_s27, 9216 }
  0x18   : > { %p2775_p1 = scmp.ne.s32.totalorder %s180_s27, %s2774_s6  ;;  %p2782_p9 = scmp.lt.s32.totalorder %s180_s27, %s180_s27 }
  0x19   : > { %p2783_p10 = scmp.lt.s32.totalorder %s2774_s6, %s2774_s6 }
  0x1a   : > { %p2777_p4 = pnand %p2775_p1, %p2739_p7 }
  0x1b   : > { %p2784_p11 = por %p2783_p10, %p2782_p9 }
  0x1c   : > { %p2778_p8 = pneg %p2777_p4 }
  0x1e   : > { %p2785_p12 = pnand %p2784_p11, %p2778_p8 }
  0x20   : > { %2788 = shalt.err (!%p2785_p12)
}
  0x21   : > { %s2849_s7 = smov 64   ;;  %s2850_s8 = smov 4  }
  0x22   : > { %2587 = dma.hbm_to_vmem [thread:$0]  (!%p2908_p5), %s3077_s1, 9216, %s180_s27, [#allocation3], %s2849_s7, %s2849_s7, %s2850_s8  }
  0x23   : > { %s2851_s11 = smov [#allocation6]  }
  0x24   : > { %s208_s12 = sshll.u32 %s2851_s11, 4  ;;  %s209_s12 = int_to_ptr.vmem [resolvable:$true] %s208_s12 }
  0x25   : > { %s2800_s13 = scalar_lea.vmem %s209_s12, 16  ;;  %s2807_s14 = scalar_lea.vmem %s209_s12, 32 }
  0x26   : > { %p2801_p6 = scmp.ne.s32.totalorder %s209_s12, %s2800_s13  ;;  %p2808_p1 = scmp.lt.s32.totalorder %s209_s12, %s209_s12 }
  0x27   : > { %p2809_p4 = scmp.lt.s32.totalorder %s2807_s14, %s2800_s13 }
  0x28   : > { %p2803_p13 = pnand %p2801_p6, %p2739_p7 }
  0x29   : > { %p2810_p8 = por %p2809_p4, %p2808_p1 }
  0x2a   : > { %p2804_p0 = pneg %p2803_p13 }
  0x2c   : > { %p2811_p9 = pnand %p2810_p8, %p2804_p0 }
  0x2e   : > { %2814 = shalt.err (!%p2811_p9)
}
  0x2f   : > { %2593 = dma.hbm_to_vmem [thread:$0]  (!%p2908_p5), %s3079_s3, 16, %s209_s12, [#allocation5]  }
  0x30   : > { %229 = sbr.rel (%p2899_p3) target bundleno = 431 (0x1af), region = 36 }
  0x35   : > { %2828 = dma.done.wait (%p2895_p2), [#allocation3], 9216  }
  0x36   : > { %2830 = vsyncadd (%p2895_p2), [#allocation3], 4294958080 }
  0x37   : > { %2832 = dma.done.wait (%p2895_p2), [#allocation5], 32  }
  0x38   : > { %2834 = vsyncadd (%p2895_p2), [#allocation5], 4294967264  ;;  %v2629_v0 = vld [vmem:[#allocation2 + $0x78] sm:$0xff]   ;;  %p266_p5 = scmp.lt.s32.totalorder %s2837_s15, 1  ;;  %v2631_v2 = vld [vmem:[#allocation2 + $0x70] sm:$0xff]  }
  0x39   : > { %v2630_v1 = vld [vmem:[#allocation2 + $0x38] sm:$0xff]   ;;  %2338 = vmatprep.subr.bf16.mxu0 %v2629_v0  ;;  %v2632_v3 = vld [vmem:[#allocation2 + $0x30] sm:$0xff]   ;;  %v2633_v4 = vld [vmem:[#allocation2 + $0x68] sm:$0xff]   ;;  %vm641_vm0 = vsmask.f32 7424 }
  0x3a   : > { %2362 = vmatprep.subr.bf16.mxu1 %v2630_v1  ;;  %2339 = vmatpush3.bf16.msra.mxu0 %v2629_v0  ;;  %v2634_v5 = vld [vmem:[#allocation2 + $0x28] sm:$0xff]   ;;  %s3090_s15 = smov (!%p266_p5, %s2837_s15), 1  ;;  %v2635_v6 = vld [vmem:[#allocation2 + $0x60] sm:$0xff]   ;;  %v2637_v8 = vld [vmem:[#allocation2 + $0x58] sm:$0xff]  }
  0x3b   : > { %2363 = vmatpush3.bf16.msra.mxu1 %v2630_v1  ;;  %2340 = vmatprep.subr.bf16.mxu0 %v2631_v2  ;;  %v2636_v7 = vld [vmem:[#allocation2 + $0x20] sm:$0xff]   ;;  %s2570_s20 = smul.u32 144, %s3090_s15  ;;  %v2638_v9 = vld [vmem:[#allocation2 + $0x18] sm:$0xff]   ;;  %v2639_v10 = vld [vmem:[#allocation2 + $0x50] sm:$0xff]  }
  0x3c   : > { %2364 = vmatprep.subr.bf16.mxu1 %v2632_v3  ;;  %v2640_v11 = vld [vmem:[#allocation2 + $0x10] sm:$0xff]   ;;  %v2641_v14 = vld [vmem:[#allocation2 + $0x48] sm:$0xff]   ;;  %v2643_v16 = vld [vmem:[#allocation2 + $0x40] sm:$0xff]   ;;  %s2571_s25 = smul.u32 28, %s3090_s15 }
  0x3d   : > { %s2964_s24 = scalar_lea.vmem %s3076_s0, %s2570_s20  ;;  %v2642_v15 = vld [vmem:[#allocation2 + $0x8] sm:$0xff]   ;;  %v2644_v17 = vld [vmem:[#allocation2] sm:$0xff]   ;;  %v2649_v19 = vld [vmem:[#allocation2 + $0xb8] sm:$0xff]  }
  0x3e   : > { %2341 = vmatpush3.bf16.msra.mxu0 %v2631_v2  ;;  %v2645_v12 = vld [vmem:[%s2964_s24 + $0x24] sm:$0xff]   ;;  %v2647_v18 = vld [vmem:[%s2964_s24 + $0x2c] sm:$0xff]   ;;  %v2650_v20 = vld [vmem:[#allocation2 + $0xf8] sm:$0xff]   ;;  %s3061_s28 = scalar_lea.vmem %s3080_s4, %s2571_s25 }
  0x3f   : > { %2365 = vmatpush3.bf16.msra.mxu1 %v2632_v3  ;;  %2342 = vmatprep.subr.bf16.mxu0 %v2633_v4  ;;  %v2646_v13 = vld [vmem:[%s2964_s24] sm:$0xff]   ;;  %v2648_v21 = vld [vmem:[%s2964_s24 + $0x8] sm:$0xff]   ;;  %v2651_v22 = vld [vmem:[#allocation2 + $0xb0] sm:$0xff]  }
  0x40   : > { %2366 = vmatprep.subr.bf16.mxu1 %v2634_v5  ;;  %2354 = vmatprep.mubr.bf16.mxu0 %v2645_v12  ;;  %v2652_v23 = vld [vmem:[#allocation2 + $0xf0] sm:$0xff]   ;;  %v2653_v26 = vld [vmem:[#allocation2 + $0xa8] sm:$0xff]   ;;  %v2655_v28 = vld [vmem:[#allocation2 + $0xa0] sm:$0xff]  }
  0x41   : > { %2378 = vmatprep.mubr.bf16.mxu1 %v2646_v13  ;;  %v2659_v24 = vld [vmem:[%s2964_s24 + $0x34] sm:$0xff]   ;;  %v2654_v27 = vld [vmem:[#allocation2 + $0xe8] sm:$0xff]   ;;  %v2661_v29 = vld [vmem:[%s2964_s24 + $0x3c] ss:$0 sps:$4 sm:$0xff]  }
  0x42   : > { %2343 = vmatpush3.bf16.msra.mxu0 %v2633_v4  ;;  %v2660_v25 = vld [vmem:[%s2964_s24 + $0x10] sm:$0xff]   ;;  %v2656_v30 = vld [vmem:[#allocation2 + $0xe0] sm:$0xff]   ;;  %v2662_v31 = vld [vmem:[%s2964_s24 + $0x18] ss:$0 sps:$4 sm:$0xff]  }
  0x43   : > { %2367 = vmatpush3.bf16.msra.mxu1 %v2634_v5  ;;  %2344 = vmatprep.subr.bf16.mxu0 %v2635_v6  ;;  %v596_v32 = vld [vmem:[%s2964_s24] sm:$0xf]  ;;  %v2976_v33 = vld [vmem:[%s2964_s24 + $0x4] sm:$0xf]  ;;  %v2979_v34 = vld [vmem:[%s2964_s24 + $0x8] sm:$0xf] }
  0x44   : > { %2368 = vmatprep.subr.bf16.mxu1 %v2636_v7  ;;  %v2982_v35 = vld [vmem:[%s2964_s24 + $0xc] sm:$0xf]  ;;  %v2985_v36 = vld [vmem:[%s2964_s24 + $0x10] sm:$0xf]  ;;  %v2082_v37 = vcombine.low %v596_v32, %v2976_v33  ;;  %v2152_v41 = vcombine.low %v2976_v33, %v2979_v34  ;;  %v2657_v45 = vld [vmem:[#allocation2 + $0x98] sm:$0xff]  }
  0x45   : > { %v2083_v38 = vcombine.low %v2979_v34, %v2982_v35  ;;  %v2153_v39 = vcombine.low %v2982_v35, %v2985_v36  ;;  %v2672_v40 = vld [vmem:[%s2964_s24 + $0x48] sm:$0xff]   ;;  %v2658_v47 = vld [vmem:[#allocation2 + $0xd8] sm:$0xff]   ;;  %v2663_v50 = vld [vmem:[#allocation2 + $0x90] sm:$0xff]  }
  0x46   : > { %2345 = vmatpush3.bf16.msra.mxu0 %v2635_v6  ;;  %v643_v42 = vshrl.u32 %v2082_v37, 16  ;;  %v645_v43 = vshll.u32 %v2082_v37, 16  ;;  %v2664_v51 = vld [vmem:[#allocation2 + $0xd0] sm:$0xff]   ;;  %v3000_v54 = vld [vmem:[%s2964_s24 + $0x18] sm:$0xf]  ;;  %v2665_v58 = vld [vmem:[#allocation2 + $0x88] sm:$0xff]  }
  0x47   : > { %2369 = vmatpush3.bf16.msra.mxu1 %v2636_v7  ;;  %2346 = vmatprep.subr.bf16.mxu0 %v2637_v8  ;;  %v650_v44 = vshll.u32 %v2083_v38, 16  ;;  %v2997_v53 = vld [vmem:[%s2964_s24 + $0x14] sm:$0xf]  ;;  %v603_v57 = vld [vmem:[%s2964_s24 + $0x1c] sm:$0x1]  ;;  %v2666_v59 = vld [vmem:[#allocation2 + $0xc8] sm:$0xff]  }
  0x48   : > { %2370 = vmatprep.subr.bf16.mxu1 %v2638_v9  ;;  %v647_v46 = vrot.slane %v645_v43, 1  ;;  %v2154_v55 = vcombine.low %v2997_v53, %v3000_v54  ;;  %v2084_v56 = vcombine.low %v2985_v36, %v2997_v53  ;;  %v2085_v60 = vcombine.low %v3000_v54, %v603_v57  ;;  %v2667_v63 = vld [vmem:[#allocation2 + $0x80] sm:$0xff]   ;;  %v2675_v5 = vld [vmem:[#allocation2 + $0x138] sm:$0xff]   ;;  %v2674_v6 = vld [vmem:[%s2964_s24 + $0x50] sm:$0xff]  }
  0x49   : > { %v652_v48 = vrot.slane %v650_v44, 1  ;;  %v654_v61 = vshrl.u32 %v2083_v38, 16  ;;  %v2668_v0 = vld [vmem:[#allocation2 + $0xc0] sm:$0xff]   ;;  %v2676_v7 = vld [vmem:[#allocation2 + $0x178] sm:$0xff]   ;;  %v2678_v12 = vld [vmem:[#allocation2 + $0x170] sm:$0xff]  }
  0x4a   : > { %2347 = vmatpush3.bf16.msra.mxu0 %v2637_v8  ;;  %v648_v49 = vor.u32 %v647_v46, %v643_v42  ;;  %v658_v62 = vshll.u32 %v2084_v56, 16  ;;  %v662_v1 = vshrl.u32 %v2084_v56, 16  ;;  %v666_v2 = vshll.u32 %v2085_v60, 16  ;;  %v2677_v8 = vld [vmem:[#allocation2 + $0x130] sm:$0xff]   ;;  %v2695_v13 = vld [vmem:[%s2964_s24 + $0x48] sm:$0xff]   ;;  %v2686_v32 = vld [vmem:[#allocation2 + $0x118] sm:$0xff]  }
  0x4b   : > { %2371 = vmatpush3.bf16.msra.mxu1 %v2638_v9  ;;  %2348 = vmatprep.subr.bf16.mxu0 %v2639_v10  ;;  %v656_v3 = vor.u32 %v654_v61, %v652_v48  ;;  %v2687_v37 = vld [vmem:[#allocation2 + $0x158] sm:$0xff]   ;;  %v2688_v38 = vld [vmem:[#allocation2 + $0x110] sm:$0xff]   ;;  %v2690_v42 = vld [vmem:[#allocation2 + $0x108] sm:$0xff]  }
  0x4c   : > { %2372 = vmatprep.subr.bf16.mxu1 %v2640_v11  ;;  %v653_v52 = vsel %vm641_vm0, %v648_v49, %v652_v48  ;;  %v660_v4 = vrot.slane %v658_v62, 1  ;;  %v2698_v43 = vld [vmem:[%s2964_s24 + $0x58] sm:$0xff]   ;;  %v2691_v44 = vld [vmem:[#allocation2 + $0x148] sm:$0xff]   ;;  %v2707_v46 = vld [vmem:[%s2964_s24 + $0x60] sm:$0x1f]  }
  0x4d   : > { %v1189_v48 = vshll.u32 %v2698_v43, 16  ;;  %v2693_v49 = vld [vmem:[#allocation2 + $0x140] sm:$0xff]   ;;  %v2699_v57 = vld [vmem:[#allocation2 + $0x1b8] sm:$0xff]  }
  0x4e   : > { %2349 = vmatpush3.bf16.msra.mxu0 %v2639_v10  ;;  %v664_v9 = vor.u32 %v662_v1, %v660_v4  ;;  %v668_v10 = vrot.slane %v666_v2, 1  ;;  %v2703_v1 = vld [vmem:[%s2964_s24 + $0x7c] sm:$0xff]   ;;  %v1201_v2 = vshrl.u32 %v2707_v46, 16 }
  0x4f   : > { %2373 = vmatpush3.bf16.msra.mxu1 %v2640_v11  ;;  %2350 = vmatprep.subr.bf16.mxu0 %v2641_v14  ;;  %v661_v11 = vsel %vm641_vm0, %v656_v3, %v660_v4  ;;  %v1191_v56 = vrot.slane %v1189_v48, 1  ;;  %v2705_v4 = vld [vmem:[#allocation2 + $0x1a8] sm:$0xff]   ;;  %v2716_v33 = vld [vmem:[#allocation2 + $0x180] sm:$0xff]   ;;  %v2724_v35 = vld [vmem:[%s2964_s24 + $0x1c] ss:$0 sps:$4 sm:$0xff]  }
  0x50   : > { %2374 = vmatprep.subr.bf16.mxu1 %v2642_v15  ;;  %v2717_v34 = vld [vmem:[#allocation2 + $0x1c0] sm:$0xff]   ;;  %v2729_v54 = vld [vmem:[#allocation2 + $0x218] sm:$0xff]  }
  0x52   : > { %2351 = vmatpush3.bf16.msra.mxu0 %v2641_v14  ;;  %v3012_v14 = vld [vmem:[%s2964_s24 + $0x50] sm:$0xff]  }
  0x53   : > { %2375 = vmatpush3.bf16.msra.mxu1 %v2642_v15  ;;  %2352 = vmatprep.subr.bf16.mxu0 %v2643_v16  ;;  %v669_v15 = vsel %vm641_vm0, %v664_v9, %v668_v10  ;;  %v2709_v9 = vld [vmem:[#allocation2 + $0x1e0] sm:$0xff]  }
  0x54   : > { %2376 = vmatprep.subr.bf16.mxu1 %v2644_v17 }
  0x56   : > { %2353 = vmatpush3.bf16.msra.mxu0 %v2643_v16  ;;  %v670_v16 = vshrl.u32 %v2085_v60, 16  ;;  %v2701_v60 = vld [vmem:[#allocation2 + $0x1b0] sm:$0xff]  }
  0x57   : > { %2377 = vmatpush3.bf16.msra.mxu1 %v2644_v17  ;;  %2386 = vmatprep.subr.bf16.mxu0 %v2649_v19  ;;  %v2682_v17 = vld [vmem:[%s2964_s24 + $0x58] sm:$0xff]  }
  0x58   : > { %2410 = vmatprep.subr.bf16.mxu1 %v2650_v20 }
  0x59   : > { %2355 = vmatmul.mubr.bf16.vlgmr.msra.gmra.mxu0 %v2647_v18  ;;  %v1176_v18 = vshll.u32 %v2695_v13, 16 }
  0x5a   : > { %2379 = vmatmul.mubr.bf16.vlgmr.msra.gmra.mxu1 %v2648_v21  ;;  %2387 = vmatpush3.bf16.msra.mxu0 %v2649_v19  ;;  %v1174_v19 = vshrl.u32 %v2695_v13, 16  ;;  %v2680_v21 = vld [vmem:[#allocation2 + $0x128] sm:$0xff]   ;;  %v2712_v13 = vld [vmem:[#allocation2 + $0x190] sm:$0xff]  }
  0x5b   : > { %2411 = vmatpush3.bf16.msra.mxu1 %v2650_v20  ;;  %2388 = vmatprep.subr.bf16.mxu0 %v2651_v22  ;;  %v1181_v20 = vshll.u32 %v3012_v14, 16 }
  0x5c   : > { %2412 = vmatprep.subr.bf16.mxu1 %v2652_v23  ;;  %2358 = vmatprep.mubr.bf16.mxu0 %v2659_v24  ;;  %v2683_v24 = vld [vmem:[%s2964_s24 + $0x60] ss:$0 sps:$4 sm:$0xff]  }
  0x5d   : > { %2382 = vmatprep.mubr.bf16.mxu1 %v2660_v25  ;;  %v672_v25 = vor.u32 %v670_v16, %v668_v10  ;;  %v2719_v10 = vld [vmem:[%s2964_s24 + $0x28] sm:$0xff]  }
  0x5e   : > { %2389 = vmatpush3.bf16.msra.mxu0 %v2651_v22  ;;  %v2681_v22 = vld [vmem:[#allocation2 + $0x168] sm:$0xff]  }
  0x5f   : > { %2413 = vmatpush3.bf16.msra.mxu1 %v2652_v23  ;;  %2390 = vmatprep.subr.bf16.mxu0 %v2653_v26  ;;  %v1178_v23 = vrot.slane %v1176_v18, 1  ;;  %v2715_v16 = vld [vmem:[#allocation2 + $0x1c8] sm:$0xff]   ;;  %v2721_v18 = vld [vmem:[#allocation2 + $0x238] sm:$0xff]  }
  0x60   : > { %2414 = vmatprep.subr.bf16.mxu1 %v2654_v27 }
  0x61   : > { %2359 = vmatmul.mubr.bf16.gmra.mxu0 %v2661_v29  ;;  %v2685_v29 = vld [vmem:[#allocation2 + $0x160] sm:$0xff]  }
  0x62   : > { %2391 = vmatpush3.bf16.msra.mxu0 %v2653_v26  ;;  %2383 = vmatmul.mubr.bf16.gmra.mxu1 %v2662_v31  ;;  %v2684_v26 = vld [vmem:[#allocation2 + $0x120] sm:$0xff]  }
  0x63   : > { %2415 = vmatpush3.bf16.msra.mxu1 %v2654_v27  ;;  %2392 = vmatprep.subr.bf16.mxu0 %v2655_v28  ;;  %v1183_v27 = vrot.slane %v1181_v20, 1 }
  0x64   : > { %2416 = vmatprep.subr.bf16.mxu1 %v2656_v30  ;;  %2426 = vmatprep.mubr.bf16.mxu1 %v2672_v40  ;;  %v2689_v40 = vld [vmem:[#allocation2 + $0x150] sm:$0xff]  }
  0x65   : > { %2402 = vmatprep.mubr.bf16.mxu0 %v653_v52 }
  0x66   : > { %2393 = vmatpush3.bf16.msra.mxu0 %v2655_v28  ;;  %v1179_v28 = vor.u32 %v1178_v23, %v1174_v19  ;;  %v3035_v19 = vld [vmem:[%s2964_s24 + $0xc] sm:$0xff]  }
  0x67   : > { %2417 = vmatpush3.bf16.msra.mxu1 %v2656_v30  ;;  %2394 = vmatprep.subr.bf16.mxu0 %v2657_v45  ;;  %v2694_v30 = vld [vmem:[%s2964_s24 + $0x6c] sm:$0xff]  }
  0x68   : > { %2418 = vmatprep.subr.bf16.mxu1 %v2658_v47  ;;  %v1184_v31 = vsel %vm641_vm0, %v1179_v28, %v1183_v27  ;;  %v1692_v28 = vshll.u32 %v3035_v19, 16 }
  0x6a   : > { %2395 = vmatpush3.bf16.msra.mxu0 %v2657_v45  ;;  %v2692_v45 = vld [vmem:[#allocation2 + $0x100] sm:$0xff]  }
  0x6b   : > { %2419 = vmatpush3.bf16.msra.mxu1 %v2658_v47  ;;  %2396 = vmatprep.subr.bf16.mxu0 %v2663_v50  ;;  %v1185_v47 = vshrl.u32 %v3012_v14, 16  ;;  %v2713_v14 = vld [vmem:[#allocation2 + $0x1d0] sm:$0xff]  }
  0x6c   : > { %2420 = vmatprep.subr.bf16.mxu1 %v2664_v51 }
  0x6d   : > { %v1187_v52 = vor.u32 %v1185_v47, %v1183_v27 }
  0x6e   : > { %2397 = vmatpush3.bf16.msra.mxu0 %v2663_v50  ;;  %v1193_v50 = vshrl.u32 %v2698_v43, 16 }
  0x6f   : > { %2421 = vmatpush3.bf16.msra.mxu1 %v2664_v51  ;;  %2398 = vmatprep.subr.bf16.mxu0 %v2665_v58  ;;  %v1197_v51 = vshll.u32 %v2707_v46, 16  ;;  %v2732_v46 = vld [vmem:[#allocation2 + $0x200] sm:$0xff]  }
  0x70   : > { %2422 = vmatprep.subr.bf16.mxu1 %v2666_v59  ;;  %v1195_v61 = vor.u32 %v1193_v50, %v1191_v56 }
  0x71   : > { %v1199_v62 = vrot.slane %v1197_v51, 1 }
  0x72   : > { %2399 = vmatpush3.bf16.msra.mxu0 %v2665_v58  ;;  %v2700_v58 = vld [vmem:[#allocation2 + $0x1f8] sm:$0xff]  }
  0x73   : > { %2423 = vmatpush3.bf16.msra.mxu1 %v2666_v59  ;;  %2400 = vmatprep.subr.bf16.mxu0 %v2667_v63  ;;  %v2697_v59 = vld [vmem:[%s2964_s24 + $0x74] sm:$0xff]   ;;  %v1200_v3 = vsel %vm641_vm0, %v1195_v61, %v1199_v62 }
  0x74   : > { %2424 = vmatprep.subr.bf16.mxu1 %v2668_v0 }
  0x76   : > { %2401 = vmatpush3.bf16.msra.mxu0 %v2667_v63  ;;  %v1192_v63 = vsel %vm641_vm0, %v1187_v52, %v1191_v56 }
  0x77   : > { %2425 = vmatpush3.bf16.msra.mxu1 %v2668_v0  ;;  %2434 = vmatprep.subr.bf16.mxu0 %v2675_v5  ;;  %v2702_v0 = vld [vmem:[#allocation2 + $0x1f0] sm:$0xff]  }
  0x78   : > { %2458 = vmatprep.subr.bf16.mxu1 %v2676_v7 }
  0x79   : > { %2403 = vmatmul.mubr.bf16.vlgmr.msra.gmra.mxu0 %v661_v11  ;;  %v2710_v11 = vld [vmem:[#allocation2 + $0x198] sm:$0xff]  }
  0x7a   : > { %2427 = vmatmul.mubr.bf16.vlgmr.msra.gmra.mxu1 %v2674_v6  ;;  %2435 = vmatpush3.bf16.msra.mxu0 %v2675_v5  ;;  %v2706_v5 = vld [vmem:[#allocation2 + $0x1e8] sm:$0xff]   ;;  %v2704_v6 = vld [vmem:[%s2964_s24 + $0x84] ss:$0 sps:$4 sm:$0xff]  }
  0x7b   : > { %2459 = vmatpush3.bf16.msra.mxu1 %v2676_v7  ;;  %2436 = vmatprep.subr.bf16.mxu0 %v2677_v8  ;;  %v1203_v7 = vor.u32 %v1201_v2, %v1199_v62 }
  0x7c   : > { %2460 = vmatprep.subr.bf16.mxu1 %v2678_v12  ;;  %2406 = vmatprep.mubr.bf16.mxu0 %v669_v15  ;;  %v2714_v15 = vld [vmem:[#allocation2 + $0x188] sm:$0xff]  }
  0x7d   : > { %2430 = vmatprep.mubr.bf16.mxu1 %v2682_v17  ;;  %v2735_v17 = vld [vmem:[%s2964_s24 + $0x14] sm:$0xff]  }
  0x7e   : > { %2437 = vmatpush3.bf16.msra.mxu0 %v2677_v8  ;;  %v2708_v8 = vld [vmem:[#allocation2 + $0x1a0] sm:$0xff]   ;;  %v1700_v23 = vshll.u32 %v2735_v17, 16 }
  0x7f   : > { %2461 = vmatpush3.bf16.msra.mxu1 %v2678_v12  ;;  %2438 = vmatprep.subr.bf16.mxu0 %v2680_v21  ;;  %v2711_v12 = vld [vmem:[#allocation2 + $0x1d8] sm:$0xff]  }
  0x80   : > { %2462 = vmatprep.subr.bf16.mxu1 %v2681_v22 }
  0x81   : > { %2407 = vmatmul.mubr.bf16.gmra.mxu0 %v672_v25  ;;  %v2726_v25 = vld [vmem:[%s2964_s24 + $0x38] sm:$0xff]  }
  0x82   : > { %2439 = vmatpush3.bf16.msra.mxu0 %v2680_v21  ;;  %2431 = vmatmul.mubr.bf16.gmra.mxu1 %v2683_v24  ;;  %v2720_v21 = vld [vmem:[%s2964_s24 + $0x30] sm:$0xff]  }
  0x83   : > { %2463 = vmatpush3.bf16.msra.mxu1 %v2681_v22  ;;  %2440 = vmatprep.subr.bf16.mxu0 %v2684_v26  ;;  %v3039_v22 = vld [vmem:[%s2964_s24 + $0x1c] sm:$0x1f]   ;;  %v2722_v24 = vld [vmem:[#allocation2 + $0x230] sm:$0xff]  }
  0x84   : > { %2464 = vmatprep.subr.bf16.mxu1 %v2685_v29  ;;  %2450 = vmatprep.mubr.bf16.mxu0 %v2694_v30  ;;  %v1704_v30 = vshrl.u32 %v2735_v17, 16  ;;  %v1712_v48 = vshrl.u32 %v3039_v22, 16 }
  0x85   : > { %2474 = vmatprep.mubr.bf16.mxu1 %v1184_v31  ;;  %v1708_v31 = vshll.u32 %v3039_v22, 16 }
  0x86   : > { %2441 = vmatpush3.bf16.msra.mxu0 %v2684_v26 }
  0x87   : > { %2465 = vmatpush3.bf16.msra.mxu1 %v2685_v29  ;;  %2442 = vmatprep.subr.bf16.mxu0 %v2686_v32  ;;  %v1702_v29 = vrot.slane %v1700_v23, 1 }
  0x88   : > { %2466 = vmatprep.subr.bf16.mxu1 %v2687_v37 }
  0x8a   : > { %2443 = vmatpush3.bf16.msra.mxu0 %v2686_v32  ;;  %v2725_v32 = vld [vmem:[#allocation2 + $0x228] sm:$0xff]  }
  0x8b   : > { %2467 = vmatpush3.bf16.msra.mxu1 %v2687_v37  ;;  %2444 = vmatprep.subr.bf16.mxu0 %v2688_v38  ;;  %v2727_v37 = vld [vmem:[%s2964_s24 + $0x40] ss:$0 sps:$4 sm:$0xff]  }
  0x8c   : > { %2468 = vmatprep.subr.bf16.mxu1 %v2689_v40 }
  0x8e   : > { %2445 = vmatpush3.bf16.msra.mxu0 %v2688_v38  ;;  %v1706_v38 = vor.u32 %v1704_v30, %v1702_v29 }
  0x8f   : > { %2469 = vmatpush3.bf16.msra.mxu1 %v2689_v40  ;;  %2446 = vmatprep.subr.bf16.mxu0 %v2690_v42  ;;  %v1710_v40 = vrot.slane %v1708_v31, 1 }
  0x90   : > { %2470 = vmatprep.subr.bf16.mxu1 %v2691_v44 }
  0x91   : > { %v1711_v53 = vsel %vm641_vm0, %v1706_v38, %v1710_v40 }
  0x92   : > { %2447 = vmatpush3.bf16.msra.mxu0 %v2690_v42  ;;  %v2728_v42 = vld [vmem:[#allocation2 + $0x220] sm:$0xff]  }
  0x93   : > { %2471 = vmatpush3.bf16.msra.mxu1 %v2691_v44  ;;  %2448 = vmatprep.subr.bf16.mxu0 %v2692_v45  ;;  %v2731_v44 = vld [vmem:[#allocation2 + $0x208] sm:$0xff]  }
  0x94   : > { %2472 = vmatprep.subr.bf16.mxu1 %v2693_v49 }
  0x96   : > { %2449 = vmatpush3.bf16.msra.mxu0 %v2692_v45  ;;  %v1696_v45 = vshrl.u32 %v3035_v19, 16 }
  0x97   : > { %2473 = vmatpush3.bf16.msra.mxu1 %v2693_v49  ;;  %2482 = vmatprep.subr.bf16.mxu0 %v2699_v57  ;;  %v1714_v49 = vor.u32 %v1712_v48, %v1710_v40 }
  0x98   : > { %2506 = vmatprep.subr.bf16.mxu1 %v2700_v58 }
  0x99   : > { %2451 = vmatmul.mubr.bf16.vlgmr.msra.gmra.mxu0 %v2697_v59 }
  0x9a   : > { %2475 = vmatmul.mubr.bf16.vlgmr.msra.gmra.mxu1 %v1192_v63  ;;  %2483 = vmatpush3.bf16.msra.mxu0 %v2699_v57 }
  0x9b   : > { %2507 = vmatpush3.bf16.msra.mxu1 %v2700_v58  ;;  %2484 = vmatprep.subr.bf16.mxu0 %v2701_v60 }
  0x9c   : > { %2508 = vmatprep.subr.bf16.mxu1 %v2702_v0  ;;  %2454 = vmatprep.mubr.bf16.mxu0 %v2703_v1 }
  0x9d   : > { %2478 = vmatprep.mubr.bf16.mxu1 %v1200_v3 }
  0x9e   : > { %2485 = vmatpush3.bf16.msra.mxu0 %v2701_v60 }
  0x9f   : > { %2509 = vmatpush3.bf16.msra.mxu1 %v2702_v0  ;;  %2486 = vmatprep.subr.bf16.mxu0 %v2705_v4 }
  0xa0   : > { %2510 = vmatprep.subr.bf16.mxu1 %v2706_v5 }
  0xa1   : > { %2455 = vmatmul.mubr.bf16.gmra.mxu0 %v2704_v6 }
  0xa2   : > { %2487 = vmatpush3.bf16.msra.mxu0 %v2705_v4  ;;  %2479 = vmatmul.mubr.bf16.gmra.mxu1 %v1203_v7 }
  0xa3   : > { %2511 = vmatpush3.bf16.msra.mxu1 %v2706_v5  ;;  %2488 = vmatprep.subr.bf16.mxu0 %v2708_v8 }
  0xa4   : > { %2512 = vmatprep.subr.bf16.mxu1 %v2709_v9  ;;  %2498 = vmatprep.mubr.bf16.mxu0 %v2152_v41  ;;  %v2733_v41 = vld [vmem:[%s2964_s24 + $0x4] sm:$0xff]  }
  0xa5   : > { %2522 = vmatprep.mubr.bf16.mxu1 %v2719_v10  ;;  %v1687_v20 = vshll.u32 %v2733_v41, 16  ;;  %v1685_v26 = vshrl.u32 %v2733_v41, 16 }
  0xa6   : > { %2489 = vmatpush3.bf16.msra.mxu0 %v2708_v8 }
  0xa7   : > { %2513 = vmatpush3.bf16.msra.mxu1 %v2709_v9  ;;  %2490 = vmatprep.subr.bf16.mxu0 %v2710_v11  ;;  %v1689_v27 = vrot.slane %v1687_v20, 1 }
  0xa8   : > { %2514 = vmatprep.subr.bf16.mxu1 %v2711_v12 }
  0xa9   : > { %v1690_v36 = vor.u32 %v1689_v27, %v1685_v26 }
  0xaa   : > { %2491 = vmatpush3.bf16.msra.mxu0 %v2710_v11 }
  0xab   : > { %2515 = vmatpush3.bf16.msra.mxu1 %v2711_v12  ;;  %2492 = vmatprep.subr.bf16.mxu0 %v2712_v13 }
  0xac   : > { %2516 = vmatprep.subr.bf16.mxu1 %v2713_v14 }
  0xae   : > { %2493 = vmatpush3.bf16.msra.mxu0 %v2712_v13 }
  0xaf   : > { %2517 = vmatpush3.bf16.msra.mxu1 %v2713_v14  ;;  %2494 = vmatprep.subr.bf16.mxu0 %v2714_v15 }
  0xb0   : > { %2518 = vmatprep.subr.bf16.mxu1 %v2715_v16 }
  0xb2   : > { %2495 = vmatpush3.bf16.msra.mxu0 %v2714_v15 }
  0xb3   : > { %2519 = vmatpush3.bf16.msra.mxu1 %v2715_v16  ;;  %2496 = vmatprep.subr.bf16.mxu0 %v2716_v33 }
  0xb4   : > { %2520 = vmatprep.subr.bf16.mxu1 %v2717_v34 }
  0xb6   : > { %2497 = vmatpush3.bf16.msra.mxu0 %v2716_v33 }
  0xb7   : > { %2521 = vmatpush3.bf16.msra.mxu1 %v2717_v34  ;;  %2530 = vmatprep.subr.bf16.mxu0 %v2721_v18 }
  0xb8   : > { %2554 = vmatprep.subr.bf16.mxu1 %v2721_v18 }
  0xb9   : > { %2499 = vmatmul.mubr.bf16.vlgmr.msra.gmra.mxu0 %v2153_v39  ;;  %v1694_v39 = vrot.slane %v1692_v28, 1 }
  0xba   : > { %2523 = vmatmul.mubr.bf16.vlgmr.msra.gmra.mxu1 %v2720_v21  ;;  %2531 = vmatpush3.bf16.msra.mxu0 %v2721_v18 }
  0xbb   : > { %2562 = vmatpush3.bf16.msra.mxu1 %v2721_v18  ;;  %2532 = vmatprep.subr.bf16.mxu0 %v2722_v24  ;;  %v1695_v43 = vsel %vm641_vm0, %v1690_v36, %v1694_v39  ;;  %v1698_v47 = vor.u32 %v1696_v45, %v1694_v39 }
  0xbc   : > { %2555 = vmatprep.subr.bf16.mxu1 %v2722_v24  ;;  %2502 = vmatprep.mubr.bf16.mxu0 %v2154_v55  ;;  %v2730_v55 = vld [vmem:[#allocation2 + $0x210] sm:$0xff]  }
  0xbd   : > { %2526 = vmatprep.mubr.bf16.mxu1 %v2726_v25  ;;  %v1703_v50 = vsel %vm641_vm0, %v1698_v47, %v1702_v29 }
  0xbe   : > { %2533 = vmatpush3.bf16.msra.mxu0 %v2722_v24 }
  0xbf   : > { %2563 = vmatpush3.bf16.msra.mxu1 %v2722_v24  ;;  %2534 = vmatprep.subr.bf16.mxu0 %v2725_v32 }
  0xc0   : > { %2556 = vmatprep.subr.bf16.mxu1 %v2725_v32 }
  0xc1   : > { %2503 = vmatmul.mubr.bf16.gmra.mxu0 %v2724_v35 }
  0xc2   : > { %2535 = vmatpush3.bf16.msra.mxu0 %v2725_v32  ;;  %2527 = vmatmul.mubr.bf16.gmra.mxu1 %v2727_v37 }
  0xc3   : > { %2564 = vmatpush3.bf16.msra.mxu1 %v2725_v32  ;;  %2536 = vmatprep.subr.bf16.mxu0 %v2728_v42 }
  0xc4   : > { %2557 = vmatprep.subr.bf16.mxu1 %v2728_v42  ;;  %2546 = vmatprep.mubr.bf16.mxu0 %v1695_v43 }
  0xc5   : > { %2550 = vmatprep.mubr.bf16.mxu1 %v1711_v53 }
  0xc6   : > { %2537 = vmatpush3.bf16.msra.mxu0 %v2728_v42 }
  0xc7   : > { %2565 = vmatpush3.bf16.msra.mxu1 %v2728_v42  ;;  %2538 = vmatprep.subr.bf16.mxu0 %v2729_v54 }
  0xc8   : > { %2558 = vmatprep.subr.bf16.mxu1 %v2729_v54 }
  0xca   : > { %2539 = vmatpush3.bf16.msra.mxu0 %v2729_v54 }
  0xcb   : > { %2566 = vmatpush3.bf16.msra.mxu1 %v2729_v54  ;;  %2540 = vmatprep.subr.bf16.mxu0 %v2730_v55 }
  0xcc   : > { %2559 = vmatprep.subr.bf16.mxu1 %v2730_v55 }
  0xce   : > { %2541 = vmatpush3.bf16.msra.mxu0 %v2730_v55 }
  0xcf   : > { %2567 = vmatpush3.bf16.msra.mxu1 %v2730_v55  ;;  %2542 = vmatprep.subr.bf16.mxu0 %v2731_v44 }
  0xd0   : > { %2560 = vmatprep.subr.bf16.mxu1 %v2731_v44 }
  0xd2   : > { %2543 = vmatpush3.bf16.msra.mxu0 %v2731_v44 }
  0xd3   : > { %2568 = vmatpush3.bf16.msra.mxu1 %v2731_v44  ;;  %2544 = vmatprep.subr.bf16.mxu0 %v2732_v46 }
  0xd4   : > { %2561 = vmatprep.subr.bf16.mxu1 %v2732_v46 }
  0xd6   : > { %2545 = vmatpush3.bf16.msra.mxu0 %v2732_v46 }
  0xd7   : > { %2569 = vmatpush3.bf16.msra.mxu1 %v2732_v46 }
  0xd9   : > { %2547 = vmatmul.mubr.bf16.vlgmr.msra.gmra.mxu0 %v1703_v50 }
  0xda   : > { %2551 = vmatmul.mubr.bf16.vlgmr.msra.gmra.mxu1 %v1714_v49 }
 0x119   : > { %v2356_v51 = vpop.f32.mrf.mxu0 }
 0x11a   : > { %v2380_v52 = vpop.f32.mrf.mxu1 }
 0x11b   : > { %v575_v56 = vadd.f32 %v2380_v52, %v2356_v51  ;;  %v432_v57 = vpop.f32.mrf.mxu0 }
 0x11c   : > { %v566_v58 = vpop.f32.mrf.mxu1 }
 0x11d   : > { %v567_v59 = vadd.f32 %v566_v58, %v432_v57  ;;  %v2357_v60 = vpop.f32.mrf.mxu0 }
 0x11e   : > { %v2381_v61 = vpop.f32.mrf.mxu1 }
 0x11f   : > { %v578_v62 = vadd.f32 %v2381_v61, %v2357_v60  ;;  %v435_v63 = vpop.f32.mrf.mxu0 }
 0x120   : > { %v569_v0 = vpop.f32.mrf.mxu1 }
 0x121   : > { %v570_v1 = vadd.f32 %v569_v0, %v435_v63  ;;  %v2360_v2 = vpop.f32.mrf.mxu0 }
 0x122   : > { %v2384_v3 = vpop.f32.mrf.mxu1 }
 0x123   : > { %v591_v4 = vadd.f32 %v2384_v3, %v2360_v2  ;;  %v448_v5 = vpop.f32.mrf.mxu0 }
 0x124   : > { %v582_v6 = vpop.f32.mrf.mxu1 }
 0x125   : > { %v583_v7 = vadd.f32 %v582_v6, %v448_v5  ;;  %v2361_v8 = vpop.f32.mrf.mxu0 }
 0x126   : > { %v2385_v9 = vpop.f32.mrf.mxu1 }
 0x127   : > { %v451_v10 = vpop.f32.mrf.mxu0 }
 0x128   : > { %v585_v11 = vpop.f32.mrf.mxu1 }
 0x129   : > { %v586_v12 = vadd.f32 %v585_v11, %v451_v10 }
 0x139   : > { %v2404_v13 = vpop.f32.mrf.mxu0 }
 0x13a   : > { %v791_v14 = vadd.f32 %v2404_v13, %v575_v56  ;;  %v2428_v15 = vpop.f32.mrf.mxu1 }
 0x13b   : > { %v759_v16 = vpop.f32.mrf.mxu0 }
 0x13c   : > { %v957_v33 = vadd.f32 %v2428_v15, %v791_v14  ;;  %v789_v34 = vadd.f32 %v759_v16, %v567_v59  ;;  %v925_v41 = vpop.f32.mrf.mxu1 }
 0x13d   : > { %v2405_v17 = vpop.f32.mrf.mxu0 }
 0x13e   : > { %v955_v18 = vadd.f32 %v925_v41, %v789_v34  ;;  %v792_v19 = vadd.f32 %v2405_v17, %v578_v62  ;;  %v2429_v20 = vpop.f32.mrf.mxu1 }
 0x13f   : > { %v762_v21 = vpop.f32.mrf.mxu0 }
 0x140   : > { %v958_v22 = vadd.f32 %v2429_v20, %v792_v19  ;;  %v790_v23 = vadd.f32 %v762_v21, %v570_v1  ;;  %v928_v24 = vpop.f32.mrf.mxu1 }
 0x141   : > { %v2408_v25 = vpop.f32.mrf.mxu0 }
 0x142   : > { %v956_v26 = vadd.f32 %v928_v24, %v790_v23  ;;  %v795_v27 = vadd.f32 %v2408_v25, %v591_v4  ;;  %v2432_v28 = vpop.f32.mrf.mxu1 }
 0x143   : > { %v775_v29 = vpop.f32.mrf.mxu0 }
 0x144   : > { %v793_v30 = vadd.f32 %v775_v29, %v583_v7  ;;  %v961_v31 = vadd.f32 %v2432_v28, %v795_v27  ;;  %v941_v32 = vpop.f32.mrf.mxu1 }
 0x145   : > { %v2409_v35 = vpop.f32.mrf.mxu0 }
 0x146   : > { %v959_v36 = vadd.f32 %v941_v32, %v793_v30  ;;  %v2433_v39 = vpop.f32.mrf.mxu1 }
 0x147   : > { %v778_v37 = vpop.f32.mrf.mxu0 }
 0x148   : > { %v794_v38 = vadd.f32 %v778_v37, %v586_v12  ;;  %v944_v40 = vpop.f32.mrf.mxu1 }
 0x14a   : > { %v960_v42 = vadd.f32 %v944_v40, %v794_v38 }
 0x159   : > { %v2452_v43 = vpop.f32.mrf.mxu0 }
 0x15a   : > { %v2476_v53 = vpop.f32.mrf.mxu1  ;;  %v1123_v9 = vadd.f32 %v2452_v43, %v957_v33 }
 0x15b   : > { %v1091_v54 = vpop.f32.mrf.mxu0 }
 0x15c   : > { %v1290_v55 = vpop.f32.mrf.mxu1  ;;  %v1121_v11 = vadd.f32 %v1091_v54, %v955_v18  ;;  %v1322_v13 = vadd.f32 %v2476_v53, %v1123_v9 }
 0x15d   : > { %v2453_v44 = vpop.f32.mrf.mxu0 }
 0x15e   : > { %v2477_v45 = vpop.f32.mrf.mxu1  ;;  %v1124_v14 = vadd.f32 %v2453_v44, %v958_v22  ;;  %v1320_v16 = vadd.f32 %v1290_v55, %v1121_v11 }
 0x15f   : > { %v1094_v46 = vpop.f32.mrf.mxu0 }
 0x160   : > { %v1293_v47 = vpop.f32.mrf.mxu1  ;;  %v1122_v41 = vadd.f32 %v1094_v46, %v956_v26  ;;  %v1323_v20 = vadd.f32 %v2477_v45, %v1124_v14  ;;  %v2196_v26 = vld [vmem:[#allocation6] ss:$0 sm:$0xff] }
 0x161   : > { %v2456_v48 = vpop.f32.mrf.mxu0 }
 0x162   : > { %v2480_v49 = vpop.f32.mrf.mxu1  ;;  %v1127_v10 = vadd.f32 %v2456_v48, %v961_v31  ;;  %v1321_v29 = vadd.f32 %v1293_v47, %v1122_v41  ;;  %v2195_v31 = vld [vmem:[#allocation4] ss:$0 sm:$0xff] }
 0x163   : > { %v1107_v50 = vpop.f32.mrf.mxu0 }
 0x164   : > { %v1306_v51 = vpop.f32.mrf.mxu1  ;;  %v1125_v12 = vadd.f32 %v1107_v50, %v959_v36  ;;  %v1326_v15 = vadd.f32 %v2480_v49, %v1127_v10 }
 0x165   : > { %v2457_v52 = vpop.f32.mrf.mxu0 }
 0x166   : > { %v2481_v56 = vpop.f32.mrf.mxu1  ;;  %v1324_v17 = vadd.f32 %v1306_v51, %v1125_v12 }
 0x167   : > { %v1110_v57 = vpop.f32.mrf.mxu0 }
 0x168   : > { %v1309_v58 = vpop.f32.mrf.mxu1  ;;  %v1126_v33 = vadd.f32 %v1110_v57, %v960_v42 }
 0x16a   : > { %v1325_v55 = vadd.f32 %v1309_v58, %v1126_v33 }
 0x179   : > { %v2500_v59 = vpop.f32.mrf.mxu0 }
 0x17a   : > { %v2524_v60 = vpop.f32.mrf.mxu1  ;;  %v1469_v34 = vadd.f32 %v2500_v59, %v1322_v13 }
 0x17b   : > { %v1437_v61 = vpop.f32.mrf.mxu0 }
 0x17c   : > { %v1602_v62 = vpop.f32.mrf.mxu1  ;;  %v1467_v21 = vadd.f32 %v1437_v61, %v1320_v16  ;;  %v1634_v25 = vadd.f32 %v2524_v60, %v1469_v34 }
 0x17d   : > { %v2501_v63 = vpop.f32.mrf.mxu0 }
 0x17e   : > { %v2525_v0 = vpop.f32.mrf.mxu1  ;;  %v1470_v27 = vadd.f32 %v2501_v63, %v1323_v20  ;;  %v1632_v32 = vadd.f32 %v1602_v62, %v1467_v21 }
 0x17f   : > { %v1440_v1 = vpop.f32.mrf.mxu0 }
 0x180   : > { %v1605_v2 = vpop.f32.mrf.mxu1  ;;  %v1468_v36 = vadd.f32 %v1440_v1, %v1321_v29  ;;  %v1635_v40 = vadd.f32 %v2525_v0, %v1470_v27 }
 0x181   : > { %v2504_v3 = vpop.f32.mrf.mxu0 }
 0x182   : > { %v2528_v4 = vpop.f32.mrf.mxu1  ;;  %v1473_v19 = vadd.f32 %v2504_v3, %v1326_v15  ;;  %v1633_v50 = vadd.f32 %v1605_v2, %v1468_v36 }
 0x183   : > { %v1453_v5 = vpop.f32.mrf.mxu0 }
 0x184   : > { %v1618_v6 = vpop.f32.mrf.mxu1  ;;  %v1471_v23 = vadd.f32 %v1453_v5, %v1324_v17  ;;  %v1638_v30 = vadd.f32 %v2528_v4, %v1473_v19 }
 0x185   : > { %v2505_v7 = vpop.f32.mrf.mxu0 }
 0x186   : > { %v2529_v8 = vpop.f32.mrf.mxu1  ;;  %v1636_v39 = vadd.f32 %v1618_v6, %v1471_v23 }
 0x187   : > { %v1456_v24 = vpop.f32.mrf.mxu0 }
 0x188   : > { %v1621_v28 = vpop.f32.mrf.mxu1  ;;  %v1472_v51 = vadd.f32 %v1456_v24, %v1325_v55 }
 0x18a   : > { %v1637_v1 = vadd.f32 %v1621_v28, %v1472_v51 }
 0x199   : > { %v2548_v18 = vpop.f32.mrf.mxu0 }
 0x19a   : > { %v1833_v22 = vadd.f32 %v2548_v18, %v1634_v25  ;;  %v2552_v35 = vpop.f32.mrf.mxu1 }
 0x19b   : > { %v1837_v37 = vadd.f32 %v2552_v35, %v1638_v30  ;;  %v1801_v38 = vpop.f32.mrf.mxu0 }
 0x19c   : > { %v1847_v43 = vmul.f32 %v2195_v31, %v1833_v22  ;;  %v1831_v53 = vadd.f32 %v1801_v38, %v1632_v32  ;;  %v1817_v54 = vpop.f32.mrf.mxu1 }
 0x19d   : > { %v1851_v44 = vmul.f32 %v2195_v31, %v1837_v37  ;;  %v1835_v45 = vadd.f32 %v1817_v54, %v1636_v39  ;;  %v2549_v42 = vpop.f32.mrf.mxu0 }
 0x19e   : > { %v1861_v46 = vadd.f32 %v2196_v26, %v1847_v43  ;;  %v1845_v47 = vmul.f32 %v2195_v31, %v1831_v53  ;;  %v1834_v48 = vadd.f32 %v2549_v42, %v1635_v40  ;;  %v2553_v49 = vpop.f32.mrf.mxu1 }
 0x19f   : > { %v1865_v52 = vadd.f32 %v2196_v26, %v1851_v44  ;;  %v1804_v56 = vpop.f32.mrf.mxu0  ;;  %v1849_v57 = vmul.f32 %v2195_v31, %v1835_v45 }
 0x1a0   : > { %v1848_v59 = vmul.f32 %v2195_v31, %v1834_v48  ;;  %v1859_v61 = vadd.f32 %v2196_v26, %v1845_v47  ;;  %v1832_v62 = vadd.f32 %v1804_v56, %v1633_v50  ;;  %v1875_v63 = vmul.f32 0.1, %v1861_v46  ;;  %v1820_v0 = vpop.f32.mrf.mxu1 }
 0x1a1   : > { %vm1872_vm1 = vcmp.ge.f32.partialorder %v1865_v52, 0.0  ;;  %v1879_v60 = vmul.f32 0.1, %v1865_v52  ;;  %vm1868_vm2 = vcmp.ge.f32.partialorder %v1861_v46, 0.0  ;;  %v1863_v7 = vadd.f32 %v2196_v26, %v1849_v57 }
 0x1a2   : > { %v1862_v58 = vadd.f32 %v2196_v26, %v1848_v59  ;;  %v1846_v3 = vmul.f32 %v2195_v31, %v1832_v62  ;;  %v1873_v6 = vmul.f32 0.1, %v1859_v61  ;;  %v1836_v9 = vadd.f32 %v1820_v0, %v1637_v1 }
 0x1a3   : > { %v1886_v2 = vsel %vm1872_vm1, %v1865_v52, %v1879_v60  ;;  %v1882_v10 = vsel %vm1868_vm2, %v1861_v46, %v1875_v63  ;;  %vm1866_vm4 = vcmp.ge.f32.partialorder %v1859_v61, 0.0  ;;  %v1877_v16 = vmul.f32 0.1, %v1863_v7 }
 0x1a4   : > { %v2212_v4 = vpack.c.bf16 %v1886_v2, %v1886_v2  ;;  %vm1869_vm3 = vcmp.ge.f32.partialorder %v1862_v58, 0.0  ;;  %v1876_v5 = vmul.f32 0.1, %v1862_v58  ;;  %v1860_v8 = vadd.f32 %v2196_v26, %v1846_v3 }
 0x1a5   : > { %v1850_v14 = vmul.f32 %v2195_v31, %v1836_v9  ;;  %v1880_v15 = vsel %vm1866_vm4, %v1859_v61, %v1873_v6  ;;  %vm1870_vm6 = vcmp.ge.f32.partialorder %v1863_v7, 0.0 }
 0x1a6   : > { %1922 = vst [vmem:[%s3061_s28 + $0x18] sm:$0xf] %v2212_v4  ;;  %v1883_v11 = vsel %vm1869_vm3, %v1862_v58, %v1876_v5  ;;  %vm1867_vm5 = vcmp.ge.f32.partialorder %v1860_v8, 0.0  ;;  %v1874_v13 = vmul.f32 0.1, %v1860_v8  ;;  %v1884_v20 = vsel %vm1870_vm6, %v1863_v7, %v1877_v16 }
 0x1a7   : > { %v2221_v12 = vpack.c.bf16 %v1883_v11, %v1882_v10  ;;  %v1864_v41 = vadd.f32 %v2196_v26, %v1850_v14 }
 0x1a8   : > { %v1881_v34 = vsel %vm1867_vm5, %v1860_v8, %v1874_v13 }
 0x1a9   : > { %2228 = vst [vmem:[%s3061_s28 + $0x8] sm:$0xff] %v2221_v12   ;;  %v2216_v17 = vpack.c.bf16 %v1881_v34, %v1880_v15  ;;  %vm1871_vm7 = vcmp.ge.f32.partialorder %v1864_v41, 0.0  ;;  %v1878_v19 = vmul.f32 0.1, %v1864_v41 }
 0x1ab   : > { %2217 = vst [vmem:[%s3061_s28] sm:$0xff] %v2216_v17   ;;  %v1885_v21 = vsel %vm1871_vm7, %v1864_v41, %v1878_v19 }
 0x1ac   : > { %v2226_v23 = vpack.c.bf16 %v1885_v21, %v1884_v20 }
 0x1ae   : > { %2229 = vst [vmem:[%s3061_s28 + $0x10] sm:$0xff] %v2226_v23  }
 0x1af PF: > { %s16_s17 = sadd.s32 1, %s2845_s17   ;;  %s3085_s15 = smov %s2841_s16 }
 0x1b0   : > { %p13_p2 = scmp.ge.s32.totalorder %s16_s17, 4   ;;  %s3086_s16 = smov %s3088_s23 }
 0x1b2   :  { %15 = sbr.rel (!%p13_p2) target bundleno = 3 (0x3), region = 93 }
 0x1b7   :  { %1950 = vsyncpa [#allocation3], 1 }
 0x1b8   :  { %1952 = vsyncpa [#allocation3 + $0x1], 1 }
 0x1b9   :  { %1953 = vsyncpa [#allocation5], 1 }

// kernel: _lambda_.6
= control target key start
LH: loop header
LB: loop body
LE: loop exit
PB: predicated region body
PF: predicated region fallthrough
CT: control target
= control target key end

     0   :  { %9 = vsyncpa [#allocation3], 0  ;;  %s6044_s0 = inlined_call_operand.vmem [shape: bf16[2,1,264,128], index: 0, kind: input, shape index: {}]   ;;  %s6045_s1 = inlined_call_operand.hbm [shape: bf16[9,128,128], index: 1, kind: input, shape index: {}]   ;;  %s6046_s2 = inlined_call_operand.hbm [shape: f32[1,128], index: 2, kind: input, shape index: {}]   ;;  %s6047_s3 = inlined_call_operand.hbm [shape: f32[1,128], index: 3, kind: input, shape index: {}]   ;;  %s6048_s4 = inlined_call_operand.vmem [shape: bf16[2,224,128], index: 4, kind: output, shape index: {}]  }
   0x1   :  { %10 = vsyncpa [#allocation5], 0  ;;  %s5112_s15 = smov 0   ;;  %s5114_s16 = smov 0  }
   0x2   :  { %s5116_s17 = smov 0  }
   0x3 LB: > { %s5082_s18 = smov [#allocation4]   ;;  %s3851_s20 = sadd.s32 4294967295, %s5080_s17   ;;  %s5080_s17 = sphi %s5116_s17, %s16_s17   ;;  %s5076_s16 = sphi %s5114_s16, %s6106_s16   ;;  %s5072_s15 = sphi %s5112_s15, %s6105_s15  }
   0x4   : > { %s195_s19 = sshll.u32 %s5082_s18, 4  ;;  %p3853_p0 = scmp.ge.s32.totalorder %s5080_s17, 1  ;;  %s196_s19 = int_to_ptr.vmem [resolvable:$true] %s195_s19 }
   0x5   : > { %p165_p1 = scmp.lt.s32.totalorder %s5080_s17, 3  ;;  %p5130_p2 = scmp.eq.s32.totalorder %s3851_s20, 0 }
   0x6   : > { %s28_s23 = sadd.s32 1, %s5076_s16  ;;  %s5083_s26 = smov [#allocation2]  }
   0x7   : > { %p5134_p3 = pnand %p3853_p0, %p165_p1  ;;  %p5147_p6 = scmp.ge.s32.totalorder %s28_s23, 2 }
   0x8   : > { %s179_s27 = sshll.u32 %s5083_s26, 4  ;;  %s4983_s28 = scalar_lea.vmem %s196_s19, 16  ;;  %s180_s27 = int_to_ptr.vmem [resolvable:$true] %s179_s27 }
   0x9   : > { %p4779_p4 = pneg %p5134_p3  ;;  %p4984_p8 = scmp.ne.s32.totalorder %s196_s19, %s4983_s28 }
   0xa   : > { %s4990_s29 = scalar_lea.vmem %s196_s19, 32  ;;  %p4991_p11 = scmp.lt.s32.totalorder %s196_s19, %s196_s19 }
   0xb   : > { %p5143_p5 = pnand %p5130_p2, %p4779_p4  ;;  %p4992_p12 = scmp.lt.s32.totalorder %s4990_s29, %s4983_s28 }
   0xd   : > { %p4974_p7 = pneg %p5143_p5  ;;  %p4993_p13 = por %p4992_p12, %p4991_p11 }
   0xf   : > { %p4986_p9 = pnand %p4984_p8, %p4974_p7 }
  0x11   : > { %p4987_p10 = pneg %p4986_p9 }
  0x13   : > { %p4994_p0 = pnand %p4993_p13, %p4987_p10 }
  0x15   : > { %4997 = shalt.err (!%p4994_p0)
}
  0x16   : > { %4785 = dma.hbm_to_vmem [thread:$0]  (!%p5143_p5), %s6046_s2, 16, %s196_s19, [#allocation5]  }
  0x17   : > { %s6108_s23 = smov (%p5147_p6, %s28_s23), 0  ;;  %s5009_s6 = scalar_lea.vmem %s180_s27, 9216 }
  0x18   : > { %p5010_p1 = scmp.ne.s32.totalorder %s180_s27, %s5009_s6  ;;  %p5017_p9 = scmp.lt.s32.totalorder %s180_s27, %s180_s27 }
  0x19   : > { %p5018_p10 = scmp.lt.s32.totalorder %s5009_s6, %s5009_s6 }
  0x1a   : > { %p5012_p4 = pnand %p5010_p1, %p4974_p7 }
  0x1b   : > { %p5019_p11 = por %p5018_p10, %p5017_p9 }
  0x1c   : > { %p5013_p8 = pneg %p5012_p4 }
  0x1e   : > { %p5020_p12 = pnand %p5019_p11, %p5013_p8 }
  0x20   : > { %5023 = shalt.err (!%p5020_p12)
}
  0x21   : > { %s5084_s7 = smov 64   ;;  %s5085_s8 = smov 4  }
  0x22   : > { %4782 = dma.hbm_to_vmem [thread:$0]  (!%p5143_p5), %s6045_s1, 9216, %s180_s27, [#allocation3], %s5084_s7, %s5084_s7, %s5085_s8  }
  0x23   : > { %s5086_s11 = smov [#allocation6]  }
  0x24   : > { %s208_s12 = sshll.u32 %s5086_s11, 4  ;;  %s209_s12 = int_to_ptr.vmem [resolvable:$true] %s208_s12 }
  0x25   : > { %s5035_s13 = scalar_lea.vmem %s209_s12, 16  ;;  %s5042_s14 = scalar_lea.vmem %s209_s12, 32 }
  0x26   : > { %p5036_p6 = scmp.ne.s32.totalorder %s209_s12, %s5035_s13  ;;  %p5043_p1 = scmp.lt.s32.totalorder %s209_s12, %s209_s12 }
  0x27   : > { %p5044_p4 = scmp.lt.s32.totalorder %s5042_s14, %s5035_s13 }
  0x28   : > { %p5038_p13 = pnand %p5036_p6, %p4974_p7 }
  0x29   : > { %p5045_p8 = por %p5044_p4, %p5043_p1 }
  0x2a   : > { %p5039_p0 = pneg %p5038_p13 }
  0x2c   : > { %p5046_p9 = pnand %p5045_p8, %p5039_p0 }
  0x2e   : > { %5049 = shalt.err (!%p5046_p9)
}
  0x2f   : > { %4788 = dma.hbm_to_vmem [thread:$0]  (!%p5143_p5), %s6047_s3, 16, %s209_s12, [#allocation5]  }
  0x30   : > { %229 = sbr.rel (%p5134_p3) target bundleno = 550 (0x226), region = 36 }
  0x35   : > { %5063 = dma.done.wait (%p5130_p2), [#allocation3], 9216  }
  0x36   : > { %5065 = vsyncadd (%p5130_p2), [#allocation3], 4294958080 }
  0x37   : > { %5067 = dma.done.wait (%p5130_p2), [#allocation5], 32  }
  0x38   : > { %5069 = vsyncadd (%p5130_p2), [#allocation5], 4294967264  ;;  %p266_p7 = scmp.lt.s32.totalorder %s5072_s15, 1  ;;  %v4824_v0 = vld [vmem:[#allocation2 + $0x78] sm:$0xff]   ;;  %v4825_v1 = vld [vmem:[#allocation2 + $0x70] sm:$0xff]   ;;  %vm967_vm1 = vcmask 1046528  }
  0x39   : > { %4353 = vmatprep.subr.bf16.mxu0 %v4824_v0  ;;  %4749 = vmatprep.subr.bf16.mxu1 %v4824_v0  ;;  %v4826_v2 = vld [vmem:[#allocation2 + $0x68] sm:$0xff]   ;;  %v4827_v3 = vld [vmem:[#allocation2 + $0x60] sm:$0xff]   ;;  %v4828_v13 = vld [vmem:[#allocation2 + $0x58] sm:$0xff]   ;;  %vm415_vm0 = vsmask.f32 7424 }
  0x3a   : > { %s6110_s15 = smov (!%p266_p7, %s5072_s15), 1  ;;  %4354 = vmatpush3.bf16.msra.mxu0 %v4824_v0  ;;  %4757 = vmatpush3.bf16.msra.mxu1 %v4824_v0  ;;  %v4829_v21 = vld [vmem:[#allocation2 + $0x50] sm:$0xff]   ;;  %v4830_v28 = vld [vmem:[#allocation2 + $0x48] sm:$0xff]   ;;  %v4831_v36 = vld [vmem:[#allocation2 + $0x40] sm:$0xff]  }
  0x3b   : > { %s4765_s20 = smul.u32 132, %s6110_s15  ;;  %4355 = vmatprep.subr.bf16.mxu0 %v4825_v1  ;;  %4750 = vmatprep.subr.bf16.mxu1 %v4825_v1  ;;  %v4838_v41 = vld [vmem:[#allocation2 + $0x38] sm:$0xff]   ;;  %v4840_v52 = vld [vmem:[#allocation2 + $0x30] sm:$0xff]  }
  0x3c   : > { %v4839_v48 = vld [vmem:[#allocation2 + $0xb8] sm:$0xff]   ;;  %v4841_v53 = vld [vmem:[#allocation2 + $0xb0] sm:$0xff]   ;;  %s4766_s25 = smul.u32 112, %s6110_s15 }
  0x3d   : > { %s5199_s21 = scalar_lea.vmem %s6044_s0, %s4765_s20 }
  0x3e   : > { %4356 = vmatpush3.bf16.msra.mxu0 %v4825_v1  ;;  %4758 = vmatpush3.bf16.msra.mxu1 %v4825_v1  ;;  %v280_v4 = vld [vmem:[%s5199_s21] sm:$0xf]  ;;  %v5203_v5 = vld [vmem:[%s5199_s21 + $0x4] sm:$0xf]  ;;  %v5209_v7 = vld [vmem:[%s5199_s21 + $0x8] sm:$0xff]   ;;  %s5916_s27 = scalar_lea.vmem %s6048_s4, %s4766_s25 }
  0x3f   : > { %4357 = vmatprep.subr.bf16.mxu0 %v4826_v2  ;;  %4751 = vmatprep.subr.bf16.mxu1 %v4826_v2  ;;  %v5206_v6 = vcombine.low %v280_v4, %v5203_v5  ;;  %v424_v10 = vshll.u32 %v5209_v7, 16  ;;  %v5215_v11 = vld [vmem:[%s5199_s21 + $0x40] sm:$0xff]   ;;  %v5218_v12 = vld [vmem:[%s5199_s21 + $0x48] sm:$0xff]   ;;  %v5226_v23 = vld [vmem:[%s5199_s21 + $0x10] sm:$0xff]   ;;  %v428_v31 = vshrl.u32 %v5209_v7, 16 }
  0x40   : > { %v480_v16 = vshll.u32 %v5215_v11, 16  ;;  %v484_v17 = vshrl.u32 %v5215_v11, 16  ;;  %v488_v18 = vshll.u32 %v5218_v12, 16  ;;  %v5232_v27 = vld [vmem:[%s5199_s21 + $0x50] sm:$0xff]   ;;  %v432_v29 = vshll.u32 %v5226_v23, 16  ;;  %v5236_v30 = vld [vmem:[%s5199_s21 + $0x18] sm:$0xff]  }
  0x41   : > { %v417_v8 = vshrl.u32 %v5206_v6, 16  ;;  %v419_v9 = vshll.u32 %v5206_v6, 16  ;;  %v426_v15 = vrot.slane %v424_v10, 1  ;;  %v492_v32 = vshrl.u32 %v5218_v12, 16  ;;  %v5241_v33 = vld [vmem:[%s5199_s21 + $0x20] sm:$0xff]   ;;  %v5245_v35 = vld [vmem:[%s5199_s21 + $0x58] sm:$0xff]  }
  0x42   : > { %4358 = vmatpush3.bf16.msra.mxu0 %v4826_v2  ;;  %4759 = vmatpush3.bf16.msra.mxu1 %v4826_v2  ;;  %v5223_v20 = vrot.slane %v480_v16, 1  ;;  %v490_v22 = vrot.slane %v488_v18, 1  ;;  %v496_v34 = vshll.u32 %v5232_v27, 16  ;;  %v434_v37 = vrot.slane %v432_v29, 1  ;;  %v5253_v47 = vld [vmem:[%s5199_s21 + $0x60] sm:$0xff]   ;;  %v5257_v51 = vld [vmem:[%s5199_s21 + $0x28] sm:$0xff]  }
  0x43   : > { %4359 = vmatprep.subr.bf16.mxu0 %v4827_v3  ;;  %4752 = vmatprep.subr.bf16.mxu1 %v4827_v3  ;;  %v421_v14 = vrot.slane %v419_v9, 1  ;;  %v436_v38 = vshrl.u32 %v5226_v23, 16  ;;  %v440_v39 = vshll.u32 %v5236_v30, 16  ;;  %v500_v40 = vshrl.u32 %v5232_v27, 16  ;;  %v5265_v63 = vld [vmem:[%s5199_s21 + $0x30] sm:$0xff]   ;;  %v5269_v1 = vld [vmem:[%s5199_s21 + $0x68] sm:$0xff]  }
  0x44   : > { %v486_v25 = vor.u32 %v484_v17, %v5223_v20  ;;  %v448_v42 = vshll.u32 %v5241_v33, 16  ;;  %v504_v43 = vshll.u32 %v5245_v35, 16  ;;  %v430_v44 = vor.u32 %v428_v31, %v426_v15  ;;  %v5275_v9 = vld [vmem:[%s5199_s21 + $0x70] ss:$0 sps:$4 sm:$0x11]   ;;  %v4845_v16 = vld [vmem:[#allocation2 + $0xa8] sm:$0xff]  }
  0x45   : > { %v422_v19 = vor.u32 %v421_v14, %v417_v8  ;;  %v494_v45 = vor.u32 %v492_v32, %v490_v22  ;;  %v498_v46 = vrot.slane %v496_v34, 1  ;;  %v444_v49 = vshrl.u32 %v5236_v30, 16  ;;  %v4849_v34 = vld [vmem:[#allocation2 + $0xa0] sm:$0xff]  }
  0x46   : > { %4360 = vmatpush3.bf16.msra.mxu0 %v4827_v3  ;;  %4760 = vmatpush3.bf16.msra.mxu1 %v4827_v3  ;;  %v491_v26 = vsel %vm415_vm0, %v486_v25, %v490_v22  ;;  %v442_v50 = vrot.slane %v440_v39, 1  ;;  %v438_v54 = vor.u32 %v436_v38, %v434_v37  ;;  %v450_v55 = vrot.slane %v448_v42, 1  ;;  %v4844_v3 = vld [vmem:[#allocation2 + $0x28] sm:$0xff]  }
  0x47   : > { %4361 = vmatprep.subr.bf16.mxu0 %v4828_v13  ;;  %4753 = vmatprep.subr.bf16.mxu1 %v4828_v13  ;;  %v427_v24 = vsel %vm415_vm0, %v422_v19, %v426_v15  ;;  %v502_v56 = vor.u32 %v500_v40, %v498_v46  ;;  %v506_v57 = vrot.slane %v504_v43, 1  ;;  %v435_v58 = vsel %vm415_vm0, %v430_v44, %v434_v37  ;;  %v5280_v19 = vld [vmem:[%s5199_s21 + $0x38] sm:$0xff]  }
  0x48   : > { %4369 = vmatprep.mubr.bf16.mxu0 %v427_v24  ;;  %4385 = vmatprep.mubr.bf16.mxu1 %v491_v26  ;;  %v499_v59 = vsel %vm415_vm0, %v494_v45, %v498_v46  ;;  %v508_v60 = vshrl.u32 %v5245_v35, 16  ;;  %v512_v61 = vshll.u32 %v5253_v47, 16  ;;  %v452_v62 = vshrl.u32 %v5241_v33, 16  ;;  %v4852_v44 = vld [vmem:[#allocation2 + $0x18] sm:$0xff]   ;;  %v4856_v46 = vld [vmem:[#allocation2 + $0x10] sm:$0xff]  }
  0x49   : > { %v456_v0 = vshll.u32 %v5257_v51, 16  ;;  %v443_v2 = vsel %vm415_vm0, %v438_v54, %v442_v50  ;;  %v507_v4 = vsel %vm415_vm0, %v502_v56, %v506_v57  ;;  %v516_v8 = vshrl.u32 %v5253_v47, 16  ;;  %v4853_v45 = vld [vmem:[#allocation2 + $0x98] sm:$0xff]  }
  0x4a   : > { %4362 = vmatpush3.bf16.msra.mxu0 %v4828_v13  ;;  %4761 = vmatpush3.bf16.msra.mxu1 %v4828_v13  ;;  %v446_v10 = vor.u32 %v444_v49, %v442_v50  ;;  %v510_v13 = vor.u32 %v508_v60, %v506_v57  ;;  %v514_v14 = vrot.slane %v512_v61, 1  ;;  %v520_v15 = vshll.u32 %v5269_v1, 16  ;;  %v4860_v60 = vld [vmem:[#allocation2 + $0x88] sm:$0xff]  }
  0x4b   : > { %4363 = vmatprep.subr.bf16.mxu0 %v4829_v21  ;;  %4754 = vmatprep.subr.bf16.mxu1 %v4829_v21  ;;  %v458_v17 = vrot.slane %v456_v0, 1  ;;  %v460_v18 = vshrl.u32 %v5257_v51, 16  ;;  %v454_v22 = vor.u32 %v452_v62, %v450_v55  ;;  %v464_v24 = vshll.u32 %v5265_v63, 16 }
  0x4c   : > { %v518_v25 = vor.u32 %v516_v8, %v514_v14  ;;  %v522_v26 = vrot.slane %v520_v15, 1  ;;  %v515_v29 = vsel %vm415_vm0, %v510_v13, %v514_v14  ;;  %v524_v31 = vshrl.u32 %v5269_v1, 16  ;;  %v4865_v8 = vld [vmem:[#allocation2 + $0x138] sm:$0xff]   ;;  %v4866_v13 = vld [vmem:[#allocation2 + $0xf0] sm:$0xff]  }
  0x4d   : > { %v528_v32 = vshll.u32 %v5275_v9, 16  ;;  %v472_v37 = vshll.u32 %v5280_v19, 16  ;;  %v459_v38 = vsel %vm415_vm0, %v454_v22, %v458_v17  ;;  %v462_v40 = vor.u32 %v460_v18, %v458_v17  ;;  %v4867_v15 = vld [vmem:[#allocation2 + $0x130] sm:$0xff]   ;;  %v4868_v17 = vld [vmem:[#allocation2 + $0xe8] sm:$0xff]  }
  0x4e   : > { %4364 = vmatpush3.bf16.msra.mxu0 %v4829_v21  ;;  %4762 = vmatpush3.bf16.msra.mxu1 %v4829_v21  ;;  %v4848_v21 = vld [vmem:[#allocation2 + $0x20] sm:$0xff]   ;;  %v523_v39 = vsel %vm415_vm0, %v518_v25, %v522_v26  ;;  %v526_v42 = vor.u32 %v524_v31, %v522_v26  ;;  %v476_v50 = vshrl.u32 %v5280_v19, 16  ;;  %v969_v62 = vrot.slane %v5209_v7, 1 }
  0x4f   : > { %4365 = vmatprep.subr.bf16.mxu0 %v4830_v28  ;;  %4755 = vmatprep.subr.bf16.mxu1 %v4830_v28  ;;  %v530_v43 = vrot.slane %v528_v32, 1  ;;  %v474_v49 = vrot.slane %v472_v37, 1  ;;  %v977_v18 = vrot.slane %v5257_v51, 1  ;;  %v4871_v25 = vld [vmem:[#allocation2 + $0x120] sm:$0xff]   ;;  %v981_v26 = vrot.slane %v5280_v19, 1  ;;  %v4876_v37 = vld [vmem:[#allocation2 + $0xc8] sm:$0xff]  }
  0x51   : > { %v531_v54 = vsel %vm415_vm0, %v526_v42, %v530_v43  ;;  %v4879_v42 = vld [vmem:[#allocation2 + $0x100] sm:$0xff]   ;;  %v1582_v43 = vld [vmem:[%s5199_s21 + $0x8] sm:$0xf] }
  0x52   : > { %4366 = vmatpush3.bf16.msra.mxu0 %v4830_v28  ;;  %4763 = vmatpush3.bf16.msra.mxu1 %v4830_v28  ;;  %v451_v28 = vsel %vm415_vm0, %v446_v10, %v450_v55  ;;  %v4857_v55 = vld [vmem:[#allocation2 + $0x90] sm:$0xff]   ;;  %v973_v10 = vrot.slane %v5236_v30, 1 }
  0x53   : > { %4367 = vmatprep.subr.bf16.mxu0 %v4831_v36  ;;  %4756 = vmatprep.subr.bf16.mxu1 %v4831_v36 }
  0x56   : > { %4368 = vmatpush3.bf16.msra.mxu0 %v4831_v36  ;;  %4764 = vmatpush3.bf16.msra.mxu1 %v4831_v36  ;;  %v468_v36 = vshrl.u32 %v5265_v63, 16 }
  0x57   : > { %4397 = vmatprep.subr.bf16.mxu1 %v4838_v41  ;;  %4441 = vmatprep.subr.bf16.mxu0 %v4839_v48 }
  0x59   : > { %4370 = vmatmul.mubr.bf16.vlgmr.msra.gmra.mxu0 %v435_v58  ;;  %4386 = vmatmul.mubr.bf16.vlgmr.msra.gmra.mxu1 %v499_v59  ;;  %v478_v58 = vor.u32 %v476_v50, %v474_v49  ;;  %v4859_v59 = vld [vmem:[#allocation2 + $0x8] sm:$0xff]   ;;  %v993_v50 = vrot.slane %v5269_v1, 1 }
  0x5a   : > { %4398 = vmatpush3.bf16.msra.mxu1 %v4838_v41  ;;  %4442 = vmatpush3.bf16.msra.mxu0 %v4839_v48  ;;  %v466_v41 = vrot.slane %v464_v24, 1  ;;  %v4870_v24 = vld [vmem:[#allocation2 + $0xe0] sm:$0xff]  }
  0x5b   : > { %4399 = vmatprep.subr.bf16.mxu1 %v4840_v52  ;;  %4443 = vmatprep.subr.bf16.mxu0 %v4841_v53  ;;  %v483_v0 = vsel %vm415_vm0, %v478_v58, %v5223_v20  ;;  %v5349_v58 = vld [vmem:[%s5199_s21 + $0x18] sm:$0xff]  }
  0x5c   : > { %4373 = vmatprep.mubr.bf16.mxu0 %v443_v2  ;;  %4389 = vmatprep.mubr.bf16.mxu1 %v507_v4  ;;  %v470_v48 = vor.u32 %v468_v36, %v466_v41  ;;  %v4861_v2 = vld [vmem:[#allocation2] sm:$0xff]   ;;  %v4864_v4 = vld [vmem:[#allocation2 + $0xf8] sm:$0xff]   ;;  %v985_v36 = vrot.slane %v5218_v12, 1 }
  0x5e   : > { %4400 = vmatpush3.bf16.msra.mxu1 %v4840_v52  ;;  %4444 = vmatpush3.bf16.msra.mxu0 %v4841_v53  ;;  %v946_v52 = vld [vmem:[%s5199_s21] sm:$0xe]  ;;  %v467_v53 = vsel %vm415_vm0, %v462_v40, %v466_v41  ;;  %v475_v56 = vsel %vm415_vm0, %v470_v48, %v474_v49  ;;  %v989_v40 = vrot.slane %v5245_v35, 1 }
  0x5f   : > { %4401 = vmatprep.subr.bf16.mxu1 %v4844_v3  ;;  %4445 = vmatprep.subr.bf16.mxu0 %v4845_v16  ;;  %v3895_v57 = vcombine.low %v946_v52, %v5203_v5  ;;  %v4862_v5 = vld [vmem:[#allocation2 + $0x80] sm:$0xff]   ;;  %v5340_v52 = vld [vmem:[%s5199_s21 + $0x10] sm:$0xff]  }
  0x60   : > { %v4878_v41 = vld [vmem:[#allocation2 + $0xc0] sm:$0xff]  }
  0x61   : > { %4374 = vmatmul.mubr.bf16.gmra.mxu0 %v451_v28  ;;  %4390 = vmatmul.mubr.bf16.gmra.mxu1 %v515_v29  ;;  %v968_v61 = vrot.slane %v3895_v57, 1  ;;  %v4872_v28 = vld [vmem:[#allocation2 + $0xd8] sm:$0xff]  }
  0x62   : > { %4402 = vmatpush3.bf16.msra.mxu1 %v4844_v3  ;;  %4446 = vmatpush3.bf16.msra.mxu0 %v4845_v16  ;;  %v975_v16 = vrot.slane %v5241_v33, 1  ;;  %v4873_v29 = vld [vmem:[#allocation2 + $0x118] sm:$0xff]  }
  0x63   : > { %4403 = vmatprep.subr.bf16.mxu1 %v4848_v21  ;;  %4447 = vmatprep.subr.bf16.mxu0 %v4849_v34  ;;  %v970_v3 = vsel %vm967_vm1, %v968_v61, %v969_v62  ;;  %v5352_v61 = vld [vmem:[%s5199_s21 + $0x20] sm:$0xff]  }
  0x64   : > { %4377 = vmatprep.mubr.bf16.mxu0 %v459_v38  ;;  %4393 = vmatprep.mubr.bf16.mxu1 %v523_v39  ;;  %v976_v22 = vsel %vm967_vm1, %v973_v10, %v975_v16  ;;  %v4877_v38 = vld [vmem:[#allocation2 + $0x108] sm:$0xff]  }
  0x66   : > { %4404 = vmatpush3.bf16.msra.mxu1 %v4848_v21  ;;  %4448 = vmatpush3.bf16.msra.mxu0 %v4849_v34  ;;  %v4869_v21 = vld [vmem:[#allocation2 + $0x128] sm:$0xff]   ;;  %v983_v34 = vrot.slane %v5215_v11, 1 }
  0x67   : > { %4405 = vmatprep.subr.bf16.mxu1 %v4852_v44  ;;  %4449 = vmatprep.subr.bf16.mxu0 %v4853_v45 }
  0x68   : > { %v984_v39 = vsel %vm967_vm1, %v981_v26, %v983_v34 }
  0x69   : > { %4378 = vmatmul.mubr.bf16.gmra.mxu0 %v467_v53  ;;  %4394 = vmatmul.mubr.bf16.gmra.mxu1 %v531_v54 }
  0x6a   : > { %4406 = vmatpush3.bf16.msra.mxu1 %v4852_v44  ;;  %4450 = vmatpush3.bf16.msra.mxu0 %v4853_v45  ;;  %v5330_v44 = vld [vmem:[%s5199_s21 + $0xc] sm:$0xf]  ;;  %v4885_v45 = vld [vmem:[#allocation2 + $0x178] sm:$0xff]  }
  0x6b   : > { %4407 = vmatprep.subr.bf16.mxu1 %v4856_v46  ;;  %4451 = vmatprep.subr.bf16.mxu0 %v4857_v55  ;;  %v3926_v49 = vcombine.low %v1582_v43, %v5330_v44 }
  0x6c   : > { %4381 = vmatprep.mubr.bf16.mxu0 %v475_v56  ;;  %4413 = vmatprep.mubr.bf16.mxu1 %v5206_v6  ;;  %v971_v6 = vrot.slane %v5226_v23, 1 }
  0x6d   : > { %v1704_v53 = vshll.u32 %v3926_v49, 16 }
  0x6e   : > { %4408 = vmatpush3.bf16.msra.mxu1 %v4856_v46  ;;  %4452 = vmatpush3.bf16.msra.mxu0 %v4857_v55  ;;  %v972_v20 = vsel %vm967_vm1, %v969_v62, %v971_v6  ;;  %v974_v14 = vsel %vm967_vm1, %v971_v6, %v973_v10  ;;  %v4886_v46 = vld [vmem:[#allocation2 + $0x1b8] sm:$0xff]   ;;  %v1702_v55 = vshrl.u32 %v3926_v49, 16  ;;  %v4880_v62 = vld [vmem:[%s5199_s21 + $0x8] sm:$0xff]   ;;  %v4883_v10 = vld [vmem:[%s5199_s21 + $0x10] sm:$0xff]  }
  0x6f   : > { %4409 = vmatprep.subr.bf16.mxu1 %v4859_v59  ;;  %4453 = vmatprep.subr.bf16.mxu0 %v4860_v60  ;;  %v1706_v56 = vrot.slane %v1704_v53, 1  ;;  %v4905_v49 = vld [vmem:[#allocation2 + $0x158] sm:$0xff]  }
  0x71   : > { %4382 = vmatmul.mubr.bf16.gmra.mxu0 %v483_v0 }
  0x72   : > { %4410 = vmatpush3.bf16.msra.mxu1 %v4859_v59  ;;  %4454 = vmatpush3.bf16.msra.mxu0 %v4860_v60  ;;  %v1707_v59 = vor.u32 %v1706_v56, %v1702_v55 }
  0x73   : > { %4411 = vmatprep.subr.bf16.mxu1 %v4861_v2  ;;  %4455 = vmatprep.subr.bf16.mxu0 %v4862_v5 }
  0x74   : > { %4457 = vmatprep.mubr.bf16.mxu0 %v970_v3  ;;  %v5363_v3 = vld [vmem:[%s5199_s21 + $0x28] sm:$0xff]  }
  0x76   : > { %4412 = vmatpush3.bf16.msra.mxu1 %v4861_v2  ;;  %4456 = vmatpush3.bf16.msra.mxu0 %v4862_v5  ;;  %v1725_v5 = vshll.u32 %v5352_v61, 16 }
  0x77   : > { %4485 = vmatprep.subr.bf16.mxu1 %v4864_v4  ;;  %4529 = vmatprep.subr.bf16.mxu0 %v4865_v8 }
  0x79   : > { %4414 = vmatmul.mubr.bf16.vlgmr.msra.gmra.mxu1 %v5209_v7  ;;  %4458 = vmatmul.mubr.bf16.vlgmr.msra.gmra.mxu0 %v972_v20  ;;  %v978_v7 = vsel %vm967_vm1, %v975_v16, %v977_v18 }
  0x7a   : > { %4486 = vmatpush3.bf16.msra.mxu1 %v4864_v4  ;;  %4530 = vmatpush3.bf16.msra.mxu0 %v4865_v8  ;;  %v5366_v8 = vld [vmem:[%s5199_s21 + $0x30] sm:$0xff]  }
  0x7b   : > { %4417 = vmatprep.mubr.bf16.mxu1 %v5226_v23  ;;  %4461 = vmatprep.mubr.bf16.mxu0 %v974_v14  ;;  %v979_v23 = vrot.slane %v5265_v63, 1  ;;  %v4887_v14 = vld [vmem:[%s5199_s21 + $0x18] sm:$0xff]  }
  0x7c   : > { %4487 = vmatprep.subr.bf16.mxu1 %v4866_v13  ;;  %4531 = vmatprep.subr.bf16.mxu0 %v4867_v15 }
  0x7d   : > { %v980_v31 = vsel %vm967_vm1, %v977_v18, %v979_v23  ;;  %v982_v32 = vsel %vm967_vm1, %v979_v23, %v981_v26  ;;  %v1737_v18 = vshrl.u32 %v5363_v3, 16  ;;  %v5377_v23 = vld [vmem:[%s5199_s21 + $0x38] sm:$0xff]  }
  0x7e   : > { %4488 = vmatpush3.bf16.msra.mxu1 %v4866_v13  ;;  %4532 = vmatpush3.bf16.msra.mxu0 %v4867_v15  ;;  %v1727_v13 = vrot.slane %v1725_v5, 1  ;;  %v1733_v15 = vshll.u32 %v5363_v3, 16  ;;  %v4918_v5 = vld [vmem:[#allocation2 + $0x188] sm:$0xff]  }
  0x7f   : > { %4489 = vmatprep.subr.bf16.mxu1 %v4868_v17  ;;  %4533 = vmatprep.subr.bf16.mxu0 %v4869_v21 }
  0x81   : > { %4418 = vmatmul.mubr.bf16.gmra.mxu1 %v5236_v30  ;;  %4462 = vmatmul.mubr.bf16.gmra.mxu0 %v976_v22  ;;  %v4874_v30 = vld [vmem:[#allocation2 + $0xd0] sm:$0xff]  }
  0x82   : > { %4421 = vmatprep.mubr.bf16.mxu1 %v5241_v33  ;;  %4465 = vmatprep.mubr.bf16.mxu0 %v978_v7  ;;  %v4875_v33 = vld [vmem:[#allocation2 + $0x110] sm:$0xff]  }
  0x83   : > { %4490 = vmatpush3.bf16.msra.mxu1 %v4868_v17  ;;  %4534 = vmatpush3.bf16.msra.mxu0 %v4869_v21  ;;  %v4889_v17 = vld [vmem:[#allocation2 + $0x170] sm:$0xff]   ;;  %v1741_v21 = vshll.u32 %v5366_v8, 16 }
  0x84   : > { %4491 = vmatprep.subr.bf16.mxu1 %v4870_v24  ;;  %4535 = vmatprep.subr.bf16.mxu0 %v4871_v25  ;;  %v4892_v7 = vld [vmem:[#allocation2 + $0x1b0] sm:$0xff]  }
  0x87   : > { %4492 = vmatpush3.bf16.msra.mxu1 %v4870_v24  ;;  %4536 = vmatpush3.bf16.msra.mxu0 %v4871_v25  ;;  %v1735_v24 = vrot.slane %v1733_v15, 1  ;;  %v4893_v25 = vld [vmem:[#allocation2 + $0x168] sm:$0xff]  }
  0x88   : > { %4493 = vmatprep.subr.bf16.mxu1 %v4872_v28  ;;  %4537 = vmatprep.subr.bf16.mxu0 %v4873_v29 }
  0x89   : > { %4422 = vmatmul.mubr.bf16.gmra.mxu1 %v5257_v51  ;;  %4466 = vmatmul.mubr.bf16.gmra.mxu0 %v980_v31  ;;  %v986_v51 = vsel %vm967_vm1, %v983_v34, %v985_v36  ;;  %v1743_v31 = vrot.slane %v1741_v21, 1  ;;  %v1749_v34 = vshll.u32 %v5377_v23, 16  ;;  %v5419_v21 = vld [vmem:[%s5199_s21 + $0x68] sm:$0xff]  }
  0x8a   : > { %4425 = vmatprep.mubr.bf16.mxu1 %v5265_v63  ;;  %4469 = vmatprep.mubr.bf16.mxu0 %v982_v32  ;;  %v987_v63 = vrot.slane %v5232_v27, 1  ;;  %v5380_v32 = vld [vmem:[%s5199_s21 + $0x40] sm:$0xff]  }
  0x8b   : > { %4494 = vmatpush3.bf16.msra.mxu1 %v4872_v28  ;;  %4538 = vmatpush3.bf16.msra.mxu0 %v4873_v29  ;;  %v4898_v28 = vld [vmem:[#allocation2 + $0x1a8] sm:$0xff]   ;;  %v1739_v29 = vor.u32 %v1737_v18, %v1735_v24  ;;  %v1761_v55 = vshrl.u32 %v5380_v32, 16 }
  0x8c   : > { %4495 = vmatprep.subr.bf16.mxu1 %v4874_v30  ;;  %4539 = vmatprep.subr.bf16.mxu0 %v4875_v33  ;;  %v988_v48 = vsel %vm967_vm1, %v985_v36, %v987_v63 }
  0x8f   : > { %4496 = vmatpush3.bf16.msra.mxu1 %v4874_v30  ;;  %4540 = vmatpush3.bf16.msra.mxu0 %v4875_v33  ;;  %v4890_v30 = vld [vmem:[%s5199_s21 + $0x20] sm:$0xff]   ;;  %v4894_v33 = vld [vmem:[%s5199_s21 + $0x28] sm:$0xff]  }
  0x90   : > { %4497 = vmatprep.subr.bf16.mxu1 %v4876_v37  ;;  %4541 = vmatprep.subr.bf16.mxu0 %v4877_v38 }
  0x91   : > { %4426 = vmatmul.mubr.bf16.gmra.mxu1 %v5280_v19  ;;  %4470 = vmatmul.mubr.bf16.gmra.mxu0 %v984_v39  ;;  %v990_v19 = vsel %vm967_vm1, %v987_v63, %v989_v40  ;;  %v1744_v39 = vsel %vm415_vm0, %v1739_v29, %v1743_v31  ;;  %v1757_v63 = vshll.u32 %v5380_v32, 16  ;;  %v4909_v29 = vld [vmem:[%s5199_s21 + $0x50] sm:$0xff]  }
  0x92   : > { %4429 = vmatprep.mubr.bf16.mxu1 %v5215_v11  ;;  %4473 = vmatprep.mubr.bf16.mxu0 %v986_v51  ;;  %v991_v11 = vrot.slane %v5253_v47, 1  ;;  %v1753_v51 = vshrl.u32 %v5377_v23, 16 }
  0x93   : > { %4498 = vmatpush3.bf16.msra.mxu1 %v4876_v37  ;;  %4542 = vmatpush3.bf16.msra.mxu0 %v4877_v38  ;;  %v1745_v37 = vshrl.u32 %v5366_v8, 16  ;;  %v4899_v38 = vld [vmem:[#allocation2 + $0x160] sm:$0xff]  }
  0x94   : > { %4499 = vmatprep.subr.bf16.mxu1 %v4878_v41  ;;  %4543 = vmatprep.subr.bf16.mxu0 %v4879_v42  ;;  %v992_v54 = vsel %vm967_vm1, %v989_v40, %v991_v11  ;;  %v994_v57 = vsel %vm967_vm1, %v991_v11, %v993_v50  ;;  %v4902_v40 = vld [vmem:[#allocation2 + $0x1a0] sm:$0xff]   ;;  %v4896_v11 = vld [vmem:[%s5199_s21 + $0x30] sm:$0xff]  }
  0x95   : > { %v1747_v43 = vor.u32 %v1745_v37, %v1743_v31  ;;  %v1797_v31 = vshll.u32 %v5419_v21, 16  ;;  %v1801_v37 = vshrl.u32 %v5419_v21, 16 }
  0x97   : > { %4500 = vmatpush3.bf16.msra.mxu1 %v4878_v41  ;;  %4544 = vmatpush3.bf16.msra.mxu0 %v4879_v42  ;;  %v1751_v41 = vrot.slane %v1749_v34, 1  ;;  %v5391_v42 = vld [vmem:[%s5199_s21 + $0x48] sm:$0xff]  }
  0x98   : > { %4573 = vmatprep.subr.bf16.mxu1 %v4885_v45  ;;  %4617 = vmatprep.subr.bf16.mxu0 %v4886_v46 }
  0x99   : > { %4430 = vmatmul.mubr.bf16.gmra.mxu1 %v5218_v12  ;;  %4474 = vmatmul.mubr.bf16.gmra.mxu0 %v988_v48  ;;  %v1709_v12 = vshll.u32 %v5340_v52, 16  ;;  %v5394_v48 = vld [vmem:[%s5199_s21 + $0x50] sm:$0xff]   ;;  %v1752_v53 = vsel %vm415_vm0, %v1747_v43, %v1751_v41  ;;  %v2052_v43 = vld [vmem:[%s5199_s21 + $0x8] sm:$0xe] }
  0x9a   : > { %4433 = vmatprep.mubr.bf16.mxu1 %v5232_v27  ;;  %4477 = vmatprep.mubr.bf16.mxu0 %v990_v19  ;;  %v995_v27 = vrot.slane %v5275_v9, 1  ;;  %v1721_v9 = vshrl.u32 %v5349_v58, 16  ;;  %v4906_v19 = vld [vmem:[#allocation2 + $0x198] sm:$0xff]  }
  0x9b   : > { %v1711_v60 = vrot.slane %v1709_v12, 1  ;;  %v1769_v12 = vshrl.u32 %v5391_v42, 16 }
  0x9c   : > { %v996_v0 = vsel %vm967_vm1, %v993_v50, %v995_v27  ;;  %v1765_v50 = vshll.u32 %v5391_v42, 16  ;;  %v4911_v27 = vld [vmem:[#allocation2 + $0x150] sm:$0xff]  }
  0x9d   : > { %v1712_v2 = vsel %vm415_vm0, %v1707_v59, %v1711_v60  ;;  %v4912_v59 = vld [vmem:[#allocation2 + $0x190] sm:$0xff]  }
  0xa1   : > { %4434 = vmatmul.mubr.bf16.gmra.mxu1 %v5245_v35  ;;  %4478 = vmatmul.mubr.bf16.gmra.mxu0 %v992_v54  ;;  %v1713_v35 = vshrl.u32 %v5340_v52, 16  ;;  %v4900_v54 = vld [vmem:[%s5199_s21 + $0x38] sm:$0xff]  }
  0xa2   : > { %4437 = vmatprep.mubr.bf16.mxu1 %v5253_v47  ;;  %4481 = vmatprep.mubr.bf16.mxu0 %v994_v57  ;;  %v1717_v47 = vshll.u32 %v5349_v58, 16  ;;  %v1773_v57 = vshll.u32 %v5394_v48, 16 }
  0xa3   : > { %v1715_v6 = vor.u32 %v1713_v35, %v1711_v60  ;;  %v1767_v60 = vrot.slane %v1765_v50, 1  ;;  %v5408_v35 = vld [vmem:[%s5199_s21 + $0x60] sm:$0xff]  }
  0xa4   : > { %v1719_v4 = vrot.slane %v1717_v47, 1  ;;  %v1793_v34 = vshrl.u32 %v5408_v35, 16 }
  0xa5   : > { %v1771_v47 = vor.u32 %v1769_v12, %v1767_v60  ;;  %v2074_v12 = vrot.slane %v5340_v52, 1 }
  0xa6   : > { %v1723_v20 = vor.u32 %v1721_v9, %v1719_v4  ;;  %v1720_v16 = vsel %vm415_vm0, %v1715_v6, %v1719_v4  ;;  %v4917_v9 = vld [vmem:[#allocation2 + $0x148] sm:$0xff]   ;;  %v4903_v6 = vld [vmem:[%s5199_s21 + $0x40] sm:$0xff]  }
  0xa8   : > { %v1728_v22 = vsel %vm415_vm0, %v1723_v20, %v1727_v13  ;;  %v4907_v20 = vld [vmem:[%s5199_s21 + $0x48] sm:$0xff]  }
  0xa9   : > { %4438 = vmatmul.mubr.bf16.gmra.mxu1 %v5269_v1  ;;  %4482 = vmatmul.mubr.bf16.gmra.mxu0 %v996_v0  ;;  %v1729_v1 = vshrl.u32 %v5352_v61, 16 }
  0xaa   : > { %4501 = vmatprep.mubr.bf16.mxu1 %v4880_v62  ;;  %4545 = vmatprep.mubr.bf16.mxu0 %v1712_v2  ;;  %v5405_v62 = vld [vmem:[%s5199_s21 + $0x58] sm:$0xff]   ;;  %v1775_v2 = vrot.slane %v1773_v57, 1  ;;  %v4921_v57 = vld [vmem:[%s5199_s21 + $0x70] sm:$0xff]  }
  0xab   : > { %v1731_v26 = vor.u32 %v1729_v1, %v1727_v13  ;;  %v1781_v4 = vshll.u32 %v5405_v62, 16  ;;  %v1777_v13 = vshrl.u32 %v5394_v48, 16  ;;  %v1785_v15 = vshrl.u32 %v5405_v62, 16  ;;  %v4924_v1 = vld [vmem:[#allocation2 + $0x180] sm:$0xff]  }
  0xad   : > { %v1736_v36 = vsel %vm415_vm0, %v1731_v26, %v1735_v24  ;;  %v1783_v18 = vrot.slane %v1781_v4, 1  ;;  %v4928_v26 = vld [vmem:[#allocation2 + $0x1f8] sm:$0xff]   ;;  %v2080_v4 = vrot.slane %v5363_v3, 1  ;;  %v4938_v3 = vld [vmem:[#allocation2 + $0x1e0] sm:$0xff]  }
  0xb1   : > { %4502 = vmatmul.mubr.bf16.vlgmr.msra.gmra.mxu1 %v4883_v10  ;;  %4546 = vmatmul.mubr.bf16.vlgmr.msra.gmra.mxu0 %v1720_v16  ;;  %v1789_v16 = vshll.u32 %v5408_v35, 16 }
  0xb2   : > { %4574 = vmatpush3.bf16.msra.mxu1 %v4885_v45  ;;  %4618 = vmatpush3.bf16.msra.mxu0 %v4886_v46  ;;  %v1755_v45 = vor.u32 %v1753_v51, %v1751_v41  ;;  %v1759_v46 = vrot.slane %v1757_v63, 1  ;;  %v5433_v63 = vld [vmem:[%s5199_s21 + $0x78] ss:$0 sps:$4 sm:$0x11]  }
  0xb3   : > { %4505 = vmatprep.mubr.bf16.mxu1 %v4887_v14  ;;  %4549 = vmatprep.mubr.bf16.mxu0 %v1728_v22  ;;  %v1776_v14 = vsel %vm415_vm0, %v1771_v47, %v1775_v2  ;;  %v1779_v22 = vor.u32 %v1777_v13, %v1775_v2  ;;  %v1791_v24 = vrot.slane %v1789_v16, 1  ;;  %v4927_v47 = vld [vmem:[%s5199_s21 + $0x18] sm:$0xff]   ;;  %v4940_v16 = vld [vmem:[#allocation2 + $0x220] sm:$0xff]  }
  0xb4   : > { %4575 = vmatprep.subr.bf16.mxu1 %v4889_v17  ;;  %4619 = vmatprep.subr.bf16.mxu0 %v4892_v7  ;;  %v1760_v56 = vsel %vm415_vm0, %v1755_v45, %v1759_v46  ;;  %v1763_v0 = vor.u32 %v1761_v55, %v1759_v46  ;;  %v4915_v45 = vld [vmem:[%s5199_s21 + $0x60] sm:$0xff]  }
  0xb5   : > { %v1795_v51 = vor.u32 %v1793_v34, %v1791_v24 }
  0xb6   : > { %4576 = vmatpush3.bf16.msra.mxu1 %v4889_v17  ;;  %4620 = vmatpush3.bf16.msra.mxu0 %v4892_v7  ;;  %v1768_v10 = vsel %vm415_vm0, %v1763_v0, %v1767_v60  ;;  %v4923_v17 = vld [vmem:[#allocation2 + $0x140] sm:$0xff]   ;;  %v1787_v7 = vor.u32 %v1785_v15, %v1783_v18  ;;  %v2078_v0 = vrot.slane %v5352_v61, 1  ;;  %v2082_v61 = vrot.slane %v5366_v8, 1 }
  0xb7   : > { %4577 = vmatprep.subr.bf16.mxu1 %v4893_v25  ;;  %4621 = vmatprep.subr.bf16.mxu0 %v4898_v28  ;;  %v2084_v8 = vrot.slane %v5377_v23, 1  ;;  %v4946_v23 = vld [vmem:[#allocation2 + $0x1d0] sm:$0xff]  }
  0xb8   : > { %v2081_v13 = vsel %vm967_vm1, %v2078_v0, %v2080_v4  ;;  %v2083_v15 = vsel %vm967_vm1, %v2080_v4, %v2082_v61 }
  0xb9   : > { %4506 = vmatmul.mubr.bf16.gmra.mxu1 %v4890_v30  ;;  %4550 = vmatmul.mubr.bf16.gmra.mxu0 %v1736_v36  ;;  %v1784_v30 = vsel %vm415_vm0, %v1779_v22, %v1783_v18  ;;  %v1792_v36 = vsel %vm415_vm0, %v1787_v7, %v1791_v24  ;;  %v4943_v18 = vld [vmem:[#allocation2 + $0x218] sm:$0xff]   ;;  %v2085_v7 = vsel %vm967_vm1, %v2082_v61, %v2084_v8  ;;  %v4939_v24 = vld [vmem:[%s5199_s21 + $0x40] sm:$0xff]  }
  0xba   : > { %4509 = vmatprep.mubr.bf16.mxu1 %v4894_v33  ;;  %4553 = vmatprep.mubr.bf16.mxu0 %v1744_v39  ;;  %v4913_v33 = vld [vmem:[%s5199_s21 + $0x58] sm:$0xff]   ;;  %v1799_v39 = vrot.slane %v1797_v31, 1  ;;  %v4950_v31 = vld [vmem:[#allocation2 + $0x1c8] sm:$0xff]  }
  0xbb   : > { %4578 = vmatpush3.bf16.msra.mxu1 %v4893_v25  ;;  %4622 = vmatpush3.bf16.msra.mxu0 %v4898_v28  ;;  %v5422_v25 = vld [vmem:[%s5199_s21 + $0x70] sm:$0xff]   ;;  %v4929_v28 = vld [vmem:[#allocation2 + $0x238] sm:$0xff]  }
  0xbc   : > { %4579 = vmatprep.subr.bf16.mxu1 %v4899_v38  ;;  %4623 = vmatprep.subr.bf16.mxu0 %v4902_v40  ;;  %v1800_v46 = vsel %vm415_vm0, %v1795_v51, %v1799_v39  ;;  %v4936_v22 = vld [vmem:[%s5199_s21 + $0x38] sm:$0xff]   ;;  %v2687_v51 = vld [vmem:[%s5199_s21 + $0x10] sm:$0xf] }
  0xbf   : > { %4580 = vmatpush3.bf16.msra.mxu1 %v4899_v38  ;;  %4624 = vmatpush3.bf16.msra.mxu0 %v4902_v40  ;;  %v1805_v38 = vshll.u32 %v5422_v25, 16  ;;  %v1803_v40 = vor.u32 %v1801_v37, %v1799_v39  ;;  %v2094_v39 = vrot.slane %v5408_v35, 1  ;;  %v2096_v35 = vrot.slane %v5419_v21, 1  ;;  %v4959_v21 = vld [vmem:[%s5199_s21 + $0x20] sm:$0xff]  }
  0xc0   : > { %4581 = vmatprep.subr.bf16.mxu1 %v4905_v49  ;;  %4625 = vmatprep.subr.bf16.mxu0 %v4906_v19  ;;  %v2826_v61 = vshrl.u32 %v4959_v21, 16 }
  0xc1   : > { %4510 = vmatmul.mubr.bf16.gmra.mxu1 %v4896_v11  ;;  %4554 = vmatmul.mubr.bf16.gmra.mxu0 %v1752_v53  ;;  %v1807_v41 = vrot.slane %v1805_v38, 1  ;;  %v1813_v11 = vshll.u32 %v5433_v63, 16  ;;  %v3949_v53 = vcombine.low %v2052_v43, %v5330_v44  ;;  %v2076_v44 = vrot.slane %v5349_v58, 1  ;;  %v4934_v58 = vld [vmem:[#allocation2 + $0x1e8] sm:$0xff]  }
  0xc2   : > { %4513 = vmatprep.mubr.bf16.mxu1 %v4900_v54  ;;  %4557 = vmatprep.mubr.bf16.mxu0 %v1760_v56  ;;  %v2092_v38 = vrot.slane %v5405_v62, 1 }
  0xc3   : > { %4582 = vmatpush3.bf16.msra.mxu1 %v4905_v49  ;;  %4626 = vmatpush3.bf16.msra.mxu0 %v4906_v19  ;;  %v4919_v49 = vld [vmem:[%s5199_s21 + $0x68] sm:$0xff]   ;;  %v1809_v19 = vshrl.u32 %v5422_v25, 16  ;;  %v1808_v50 = vsel %vm415_vm0, %v1803_v40, %v1807_v41  ;;  %v1815_v55 = vrot.slane %v1813_v11, 1  ;;  %v2073_v56 = vrot.slane %v3949_v53, 1  ;;  %v2688_v40 = vld [vmem:[%s5199_s21 + $0x14] sm:$0xf] }
  0xc4   : > { %4583 = vmatprep.subr.bf16.mxu1 %v4911_v27  ;;  %4627 = vmatprep.subr.bf16.mxu0 %v4912_v59  ;;  %v2077_v2 = vsel %vm967_vm1, %v2074_v12, %v2076_v44  ;;  %v2079_v52 = vsel %vm967_vm1, %v2076_v44, %v2078_v0  ;;  %v3980_v62 = vcombine.low %v2687_v51, %v2688_v40  ;;  %v4949_v53 = vld [vmem:[%s5199_s21 + $0x68] sm:$0xff]  }
  0xc5   : > { %v1811_v54 = vor.u32 %v1809_v19, %v1807_v41  ;;  %v2075_v60 = vsel %vm967_vm1, %v2073_v56, %v2074_v12  ;;  %v4945_v41 = vld [vmem:[%s5199_s21 + $0x58] sm:$0xff]   ;;  %v4952_v56 = vld [vmem:[%s5199_s21 + $0x70] sm:$0xff]  }
  0xc6   : > { %v4957_v19 = vld [vmem:[%s5199_s21 + $0x18] sm:$0xff]   ;;  %v2809_v11 = vshll.u32 %v3980_v62, 16  ;;  %v2807_v12 = vshrl.u32 %v3980_v62, 16  ;;  %v4964_v62 = vld [vmem:[%s5199_s21 + $0x48] sm:$0xff]  }
  0xc7   : > { %4584 = vmatpush3.bf16.msra.mxu1 %v4911_v27  ;;  %4628 = vmatpush3.bf16.msra.mxu0 %v4912_v59  ;;  %v1816_v27 = vsel %vm415_vm0, %v1811_v54, %v1815_v55  ;;  %v4926_v59 = vld [vmem:[%s5199_s21 + $0x10] sm:$0xff]   ;;  %v2097_v54 = vsel %vm967_vm1, %v2094_v39, %v2096_v35 }
  0xc8   : > { %4585 = vmatprep.subr.bf16.mxu1 %v4917_v9  ;;  %4629 = vmatprep.subr.bf16.mxu0 %v4918_v5 }
  0xc9   : > { %4514 = vmatmul.mubr.bf16.gmra.mxu1 %v4903_v6  ;;  %4558 = vmatmul.mubr.bf16.gmra.mxu0 %v1768_v10  ;;  %v4933_v6 = vld [vmem:[#allocation2 + $0x230] sm:$0xff]   ;;  %v4937_v10 = vld [vmem:[#allocation2 + $0x228] sm:$0xff]  }
  0xca   : > { %4517 = vmatprep.mubr.bf16.mxu1 %v4907_v20  ;;  %4561 = vmatprep.mubr.bf16.mxu0 %v1776_v14  ;;  %v4932_v20 = vld [vmem:[%s5199_s21 + $0x28] sm:$0xff]   ;;  %v4935_v14 = vld [vmem:[%s5199_s21 + $0x30] sm:$0xff]  }
  0xcb   : > { %4586 = vmatpush3.bf16.msra.mxu1 %v4917_v9  ;;  %4630 = vmatpush3.bf16.msra.mxu0 %v4918_v5  ;;  %v4930_v9 = vld [vmem:[%s5199_s21 + $0x20] sm:$0xff]   ;;  %v4931_v5 = vld [vmem:[#allocation2 + $0x1f0] sm:$0xff]  }
  0xcc   : > { %4587 = vmatprep.subr.bf16.mxu1 %v4923_v17  ;;  %4631 = vmatprep.subr.bf16.mxu0 %v4924_v1 }
  0xcf   : > { %4588 = vmatpush3.bf16.msra.mxu1 %v4923_v17  ;;  %4632 = vmatpush3.bf16.msra.mxu0 %v4924_v1  ;;  %v2086_v17 = vrot.slane %v5380_v32, 1  ;;  %v4942_v1 = vld [vmem:[#allocation2 + $0x1d8] sm:$0xff]   ;;  %v2088_v32 = vrot.slane %v5391_v42, 1  ;;  %v4954_v42 = vld [vmem:[#allocation2 + $0x1c0] sm:$0xff]  }
  0xd0   : > { %4661 = vmatprep.subr.bf16.mxu1 %v4928_v26  ;;  %4705 = vmatprep.subr.bf16.mxu0 %v4929_v28 }
  0xd1   : > { %4518 = vmatmul.mubr.bf16.gmra.mxu1 %v4909_v29  ;;  %4562 = vmatmul.mubr.bf16.gmra.mxu0 %v1784_v30  ;;  %v2090_v29 = vrot.slane %v5394_v48, 1  ;;  %v4951_v30 = vld [vmem:[#allocation2 + $0x208] sm:$0xff]   ;;  %v2089_v34 = vsel %vm967_vm1, %v2086_v17, %v2088_v32  ;;  %v4955_v48 = vld [vmem:[#allocation2 + $0x200] sm:$0xff]  }
  0xd2   : > { %4521 = vmatprep.mubr.bf16.mxu1 %v4913_v33  ;;  %4565 = vmatprep.mubr.bf16.mxu0 %v1792_v36  ;;  %v4941_v33 = vld [vmem:[%s5199_s21 + $0x48] sm:$0xff]   ;;  %v4944_v36 = vld [vmem:[%s5199_s21 + $0x50] sm:$0xff]  }
  0xd3   : > { %v2091_v37 = vsel %vm967_vm1, %v2088_v32, %v2090_v29  ;;  %v2093_v43 = vsel %vm967_vm1, %v2090_v29, %v2092_v38 }
  0xd9   : > { %4522 = vmatmul.mubr.bf16.gmra.mxu1 %v4915_v45  ;;  %4566 = vmatmul.mubr.bf16.gmra.mxu0 %v1800_v46  ;;  %v4948_v45 = vld [vmem:[%s5199_s21 + $0x60] sm:$0xff]   ;;  %v2095_v46 = vsel %vm967_vm1, %v2092_v38, %v2094_v39 }
  0xda   : > { %4525 = vmatprep.mubr.bf16.mxu1 %v4919_v49  ;;  %4569 = vmatprep.mubr.bf16.mxu0 %v1808_v50  ;;  %v2098_v49 = vrot.slane %v5422_v25, 1  ;;  %v3157_v50 = vld [vmem:[%s5199_s21 + $0x10] sm:$0xe]  ;;  %v2100_v25 = vrot.slane %v5433_v63, 1  ;;  %v4963_v38 = vld [vmem:[%s5199_s21 + $0x40] sm:$0xff]  }
  0xdc   : > { %v2099_v55 = vsel %vm967_vm1, %v2096_v35, %v2098_v49 }
  0xe1   : > { %4526 = vmatmul.mubr.bf16.gmra.mxu1 %v4921_v57  ;;  %4570 = vmatmul.mubr.bf16.gmra.mxu0 %v1816_v27  ;;  %v2811_v57 = vrot.slane %v2809_v11, 1  ;;  %v2814_v27 = vshll.u32 %v4957_v19, 16 }
  0xe2   : > { %4589 = vmatprep.mubr.bf16.mxu1 %v2075_v60  ;;  %4633 = vmatprep.mubr.bf16.mxu0 %v4926_v59  ;;  %v4003_v59 = vcombine.low %v3157_v50, %v2688_v40 }
  0xe3   : > { %v2812_v60 = vor.u32 %v2811_v57, %v2807_v12  ;;  %v2816_v44 = vrot.slane %v2814_v27, 1  ;;  %v2858_v57 = vshrl.u32 %v4963_v38, 16  ;;  %v2862_v27 = vshll.u32 %v4964_v62, 16 }
  0xe4   : > { %v3178_v0 = vrot.slane %v4003_v59, 1 }
  0xe5   : > { %v2817_v4 = vsel %vm415_vm0, %v2812_v60, %v2816_v44 }
  0xe9   : > { %4590 = vmatmul.mubr.bf16.vlgmr.msra.gmra.mxu1 %v2077_v2  ;;  %4634 = vmatmul.mubr.bf16.vlgmr.msra.gmra.mxu0 %v4927_v47  ;;  %v3179_v47 = vrot.slane %v4957_v19, 1  ;;  %v4960_v2 = vld [vmem:[%s5199_s21 + $0x28] sm:$0xff]  }
  0xea   : > { %4662 = vmatpush3.bf16.msra.mxu1 %v4928_v26  ;;  %4706 = vmatpush3.bf16.msra.mxu0 %v4929_v28  ;;  %v2087_v26 = vsel %vm967_vm1, %v2084_v8, %v2086_v17  ;;  %v4947_v28 = vld [vmem:[#allocation2 + $0x210] sm:$0xff]   ;;  %v2834_v32 = vshrl.u32 %v4960_v2, 16 }
  0xeb   : > { %4593 = vmatprep.mubr.bf16.mxu1 %v2079_v52  ;;  %4637 = vmatprep.mubr.bf16.mxu0 %v4930_v9  ;;  %v4953_v9 = vld [vmem:[%s5199_s21 + $0x78] sm:$0xff]   ;;  %v2822_v52 = vshll.u32 %v4959_v21, 16 }
  0xec   : > { %4663 = vmatprep.subr.bf16.mxu1 %v4931_v5  ;;  %4707 = vmatprep.subr.bf16.mxu0 %v4933_v6 }
  0xee   : > { %4664 = vmatpush3.bf16.msra.mxu1 %v4931_v5  ;;  %4708 = vmatpush3.bf16.msra.mxu0 %v4933_v6  ;;  %v2101_v5 = vsel %vm967_vm1, %v2098_v49, %v2100_v25  ;;  %v2818_v6 = vshrl.u32 %v4957_v19, 16  ;;  %v2854_v19 = vshll.u32 %v4963_v38, 16  ;;  %v4965_v25 = vld [vmem:[%s5199_s21 + $0x50] sm:$0xff]  }
  0xef   : > { %4665 = vmatprep.subr.bf16.mxu1 %v4934_v58  ;;  %4709 = vmatprep.subr.bf16.mxu0 %v4937_v10 }
  0xf1   : > { %4594 = vmatmul.mubr.bf16.gmra.mxu1 %v2081_v13  ;;  %4638 = vmatmul.mubr.bf16.gmra.mxu0 %v4932_v20  ;;  %v2824_v13 = vrot.slane %v2822_v52, 1  ;;  %v3191_v52 = vrot.slane %v4964_v62, 1 }
  0xf2   : > { %4597 = vmatprep.mubr.bf16.mxu1 %v2083_v15  ;;  %4641 = vmatprep.mubr.bf16.mxu0 %v4935_v14  ;;  %v4961_v14 = vld [vmem:[%s5199_s21 + $0x30] sm:$0xff]   ;;  %v2820_v15 = vor.u32 %v2818_v6, %v2816_v44  ;;  %v3189_v44 = vrot.slane %v4963_v38, 1 }
  0xf3   : > { %4666 = vmatpush3.bf16.msra.mxu1 %v4934_v58  ;;  %4710 = vmatpush3.bf16.msra.mxu0 %v4937_v10  ;;  %v3180_v58 = vsel %vm967_vm1, %v3178_v0, %v3179_v47  ;;  %v2830_v10 = vshll.u32 %v4960_v2, 16  ;;  %v2828_v17 = vor.u32 %v2826_v61, %v2824_v13  ;;  %v3185_v51 = vrot.slane %v4961_v14, 1 }
  0xf4   : > { %4667 = vmatprep.subr.bf16.mxu1 %v4938_v3  ;;  %4711 = vmatprep.subr.bf16.mxu0 %v4940_v16 }
  0xf7   : > { %4668 = vmatpush3.bf16.msra.mxu1 %v4938_v3  ;;  %4712 = vmatpush3.bf16.msra.mxu0 %v4940_v16  ;;  %v3181_v3 = vrot.slane %v4959_v21, 1  ;;  %v2856_v21 = vrot.slane %v2854_v19, 1 }
  0xf8   : > { %4669 = vmatprep.subr.bf16.mxu1 %v4942_v1  ;;  %4713 = vmatprep.subr.bf16.mxu0 %v4943_v18 }
  0xf9   : > { %4598 = vmatmul.mubr.bf16.gmra.mxu1 %v2085_v7  ;;  %4642 = vmatmul.mubr.bf16.gmra.mxu0 %v4936_v22  ;;  %v4962_v22 = vld [vmem:[%s5199_s21 + $0x38] sm:$0xff]  }
  0xfa   : > { %4601 = vmatprep.mubr.bf16.mxu1 %v2087_v26  ;;  %4645 = vmatprep.mubr.bf16.mxu0 %v4939_v24  ;;  %v2838_v26 = vshll.u32 %v4961_v14, 16 }
  0xfb   : > { %4670 = vmatpush3.bf16.msra.mxu1 %v4942_v1  ;;  %4714 = vmatpush3.bf16.msra.mxu0 %v4943_v18  ;;  %v2832_v1 = vrot.slane %v2830_v10, 1  ;;  %v3183_v18 = vrot.slane %v4960_v2, 1  ;;  %v2860_v2 = vor.u32 %v2858_v57, %v2856_v21  ;;  %v2866_v10 = vshrl.u32 %v4964_v62, 16 }
  0xfc   : > { %4671 = vmatprep.subr.bf16.mxu1 %v4946_v23  ;;  %4715 = vmatprep.subr.bf16.mxu0 %v4947_v28 }
  0xfd   : > { %v2836_v39 = vor.u32 %v2834_v32, %v2832_v1  ;;  %v3186_v50 = vsel %vm967_vm1, %v3183_v18, %v3185_v51 }
  0xff   : > { %4672 = vmatpush3.bf16.msra.mxu1 %v4946_v23  ;;  %4716 = vmatpush3.bf16.msra.mxu0 %v4947_v28  ;;  %v2825_v23 = vsel %vm415_vm0, %v2820_v15, %v2824_v13  ;;  %v3182_v28 = vsel %vm967_vm1, %v3179_v47, %v3181_v3 }
 0x100   : > { %4673 = vmatprep.subr.bf16.mxu1 %v4950_v31  ;;  %4717 = vmatprep.subr.bf16.mxu0 %v4951_v30 }
 0x101   : > { %4602 = vmatmul.mubr.bf16.gmra.mxu1 %v2089_v34  ;;  %4646 = vmatmul.mubr.bf16.gmra.mxu0 %v4941_v33  ;;  %v3184_v33 = vsel %vm967_vm1, %v3181_v3, %v3183_v18  ;;  %v2842_v34 = vshrl.u32 %v4961_v14, 16  ;;  %v3192_v3 = vsel %vm967_vm1, %v3189_v44, %v3191_v52 }
 0x102   : > { %4605 = vmatprep.mubr.bf16.mxu1 %v2091_v37  ;;  %4649 = vmatprep.mubr.bf16.mxu0 %v4944_v36  ;;  %v2846_v36 = vshll.u32 %v4962_v22, 16 }
 0x103   : > { %4674 = vmatpush3.bf16.msra.mxu1 %v4950_v31  ;;  %4718 = vmatpush3.bf16.msra.mxu0 %v4951_v30  ;;  %v2833_v30 = vsel %vm415_vm0, %v2828_v17, %v2832_v1  ;;  %v2874_v17 = vshrl.u32 %v4965_v25, 16 }
 0x104   : > { %4675 = vmatprep.subr.bf16.mxu1 %v4954_v42  ;;  %4719 = vmatprep.subr.bf16.mxu0 %v4955_v48 }
 0x107   : > { %4676 = vmatpush3.bf16.msra.mxu1 %v4954_v42  ;;  %4720 = vmatpush3.bf16.msra.mxu0 %v4955_v48  ;;  %v2840_v48 = vrot.slane %v2838_v26, 1  ;;  %v4967_v26 = vld [vmem:[%s5199_s21 + $0x60] sm:$0xff]  }
 0x109   : > { %4606 = vmatmul.mubr.bf16.gmra.mxu1 %v2093_v43  ;;  %4650 = vmatmul.mubr.bf16.gmra.mxu0 %v4945_v41  ;;  %v2844_v43 = vor.u32 %v2842_v34, %v2840_v48  ;;  %v2841_v11 = vsel %vm415_vm0, %v2836_v39, %v2840_v48  ;;  %v5565_v48 = vld [vmem:[%s5199_s21 + $0x68] sm:$0xff]   ;;  %v2886_v39 = vshll.u32 %v4967_v26, 16 }
 0x10a   : > { %4609 = vmatprep.mubr.bf16.mxu1 %v2095_v46  ;;  %4653 = vmatprep.mubr.bf16.mxu0 %v4948_v45  ;;  %v2848_v45 = vrot.slane %v2846_v36, 1  ;;  %v3187_v46 = vrot.slane %v4962_v22, 1 }
 0x10b   : > { %v2888_v57 = vrot.slane %v2886_v39, 1 }
 0x10c   : > { %v3188_v12 = vsel %vm967_vm1, %v3185_v51, %v3187_v46  ;;  %v3190_v61 = vsel %vm967_vm1, %v3187_v46, %v3189_v44 }
 0x111   : > { %4610 = vmatmul.mubr.bf16.gmra.mxu1 %v2097_v54  ;;  %4654 = vmatmul.mubr.bf16.gmra.mxu0 %v4949_v53  ;;  %v2850_v53 = vshrl.u32 %v4962_v22, 16 }
 0x112   : > { %4613 = vmatprep.mubr.bf16.mxu1 %v2099_v55  ;;  %4657 = vmatprep.mubr.bf16.mxu0 %v4952_v56  ;;  %v2849_v56 = vsel %vm415_vm0, %v2844_v43, %v2848_v45 }
 0x113   : > { %v2852_v60 = vor.u32 %v2850_v53, %v2848_v45  ;;  %v2894_v53 = vshll.u32 %v5565_v48, 16 }
 0x119   : > { %v5495_v20 = vpop.f32.mrf.mxu0  ;;  %v5497_v63 = vpop.f32.mrf.mxu1  ;;  %4614 = vmatmul.mubr.bf16.gmra.mxu1 %v2101_v5  ;;  %4658 = vmatmul.mubr.bf16.gmra.mxu0 %v4953_v9  ;;  %v2864_v9 = vrot.slane %v2862_v27, 1  ;;  %v4966_v5 = vld [vmem:[%s5199_s21 + $0x58] sm:$0xff]   ;;  %v3197_v27 = vrot.slane %v4967_v26, 1 }
 0x11a   : > { %4677 = vmatprep.mubr.bf16.mxu1 %v2817_v4  ;;  %4721 = vmatprep.mubr.bf16.mxu0 %v3180_v58  ;;  %v2870_v4 = vshll.u32 %v4965_v25, 16  ;;  %v2857_v58 = vsel %vm415_vm0, %v2852_v60, %v2856_v21  ;;  %v2878_v1 = vshll.u32 %v4966_v5, 16  ;;  %v3195_v36 = vrot.slane %v4966_v5, 1  ;;  %v4969_v21 = vld [vmem:[%s5199_s21 + $0x70] sm:$0xff]  }
 0x11b   : > { %v5500_v16 = vpop.f32.mrf.mxu0  ;;  %v5502_v8 = vpop.f32.mrf.mxu1  ;;  %v2865_v15 = vsel %vm415_vm0, %v2860_v2, %v2864_v9  ;;  %v2882_v45 = vshrl.u32 %v4966_v5, 16  ;;  %v3199_v5 = vrot.slane %v5565_v48, 1 }
 0x11c   : > { %v2872_v22 = vrot.slane %v2870_v4, 1  ;;  %v2880_v34 = vrot.slane %v2878_v1, 1  ;;  %v5582_v4 = vld [vmem:[%s5199_s21 + $0x78] sm:$0xff]  }
 0x11d   : > { %v5505_v7 = vpop.f32.mrf.mxu0  ;;  %v5507_v24 = vpop.f32.mrf.mxu1  ;;  %v2910_v39 = vshll.u32 %v5582_v4, 16 }
 0x11e   : > { %v2884_v60 = vor.u32 %v2882_v45, %v2880_v34 }
 0x11f   : > { %v5511_v29 = vpop.f32.mrf.mxu0  ;;  %v5513_v31 = vpop.f32.mrf.mxu1 }
 0x121   : > { %v5517_v37 = vpop.f32.mrf.mxu0  ;;  %4678 = vmatmul.mubr.bf16.vlgmr.msra.gmra.mxu1 %v2825_v23  ;;  %4722 = vmatmul.mubr.bf16.vlgmr.msra.gmra.mxu0 %v3182_v28  ;;  %v5519_v42 = vpop.f32.mrf.mxu1  ;;  %v2868_v23 = vor.u32 %v2866_v10, %v2864_v9  ;;  %v3193_v28 = vrot.slane %v4965_v25, 1 }
 0x122   : > { %4681 = vmatprep.mubr.bf16.mxu1 %v2833_v30  ;;  %4725 = vmatprep.mubr.bf16.mxu0 %v3184_v33  ;;  %v2876_v33 = vor.u32 %v2874_v17, %v2872_v22 }
 0x123   : > { %v5522_v40 = vpop.f32.mrf.mxu0  ;;  %v5524_v41 = vpop.f32.mrf.mxu1  ;;  %v2873_v51 = vsel %vm415_vm0, %v2868_v23, %v2872_v22  ;;  %v3194_v43 = vsel %vm967_vm1, %v3191_v52, %v3193_v28  ;;  %v2896_v52 = vrot.slane %v2894_v53, 1  ;;  %v2889_v22 = vsel %vm415_vm0, %v2884_v60, %v2888_v57 }
 0x124   : > { %v2881_v19 = vsel %vm415_vm0, %v2876_v33, %v2880_v34  ;;  %v2906_v34 = vshrl.u32 %v4969_v21, 16 }
 0x125   : > { %v5527_v35 = vpop.f32.mrf.mxu0  ;;  %v5529_v49 = vpop.f32.mrf.mxu1 }
 0x127   : > { %v5533_v54 = vpop.f32.mrf.mxu0  ;;  %v5535_v55 = vpop.f32.mrf.mxu1 }
 0x129   : > { %v5539_v59 = vpop.f32.mrf.mxu0  ;;  %4682 = vmatmul.mubr.bf16.gmra.mxu1 %v2841_v11  ;;  %4726 = vmatmul.mubr.bf16.gmra.mxu0 %v3186_v50  ;;  %v5544_v47 = vpop.f32.mrf.mxu1  ;;  %v3196_v11 = vsel %vm967_vm1, %v3193_v28, %v3195_v36  ;;  %v2890_v50 = vshrl.u32 %v4967_v26, 16  ;;  %v2898_v26 = vshrl.u32 %v5565_v48, 16  ;;  %v4971_v48 = vld [vmem:[%s5199_s21 + $0x80] ss:$0 sps:$4 sm:$0x11]  }
 0x12a   : > { %4685 = vmatprep.mubr.bf16.mxu1 %v2849_v56  ;;  %4729 = vmatprep.mubr.bf16.mxu0 %v3188_v12 }
 0x12b   : > { %v5542_v0 = vpop.f32.mrf.mxu0  ;;  %v5551_v13 = vpop.f32.mrf.mxu1  ;;  %v2892_v9 = vor.u32 %v2890_v50, %v2888_v57  ;;  %v2900_v53 = vor.u32 %v2898_v26, %v2896_v52 }
 0x12d   : > { %v5547_v6 = vpop.f32.mrf.mxu0  ;;  %v5560_v32 = vpop.f32.mrf.mxu1  ;;  %v2897_v33 = vsel %vm415_vm0, %v2892_v9, %v2896_v52  ;;  %v2918_v9 = vshll.u32 %v4971_v48, 16 }
 0x12f   : > { %v5553_v14 = vpop.f32.mrf.mxu0  ;;  %v5571_v46 = vpop.f32.mrf.mxu1 }
 0x131   : > { %v5557_v18 = vpop.f32.mrf.mxu0  ;;  %4686 = vmatmul.mubr.bf16.gmra.mxu1 %v2857_v58  ;;  %4730 = vmatmul.mubr.bf16.gmra.mxu0 %v3190_v61 }
 0x132   : > { %4689 = vmatprep.mubr.bf16.mxu1 %v2865_v15  ;;  %4733 = vmatprep.mubr.bf16.mxu0 %v3192_v3  ;;  %v3198_v3 = vsel %vm967_vm1, %v3195_v36, %v3197_v27 }
 0x133   : > { %v5562_v30 = vpop.f32.mrf.mxu0 }
 0x135   : > { %v5567_v38 = vpop.f32.mrf.mxu0 }
 0x137   : > { %v5573_v62 = vpop.f32.mrf.mxu0 }
 0x139   : > { %v4415_v56 = vpop.f32.mrf.mxu1  ;;  %v4459_v12 = vpop.f32.mrf.mxu0  ;;  %4690 = vmatmul.mubr.bf16.gmra.mxu1 %v2873_v51  ;;  %4734 = vmatmul.mubr.bf16.gmra.mxu0 %v3194_v43 }
 0x13a   : > { %v844_v25 = vadd.f32 %v4415_v56, %v5495_v20  ;;  %4693 = vmatprep.mubr.bf16.mxu1 %v2881_v19  ;;  %4737 = vmatprep.mubr.bf16.mxu0 %v3196_v11  ;;  %v2902_v20 = vshll.u32 %v4969_v21, 16  ;;  %v3201_v19 = vrot.slane %v4969_v21, 1 }
 0x13b   : > { %v835_v44 = vpop.f32.mrf.mxu1  ;;  %v1093_v2 = vpop.f32.mrf.mxu0 }
 0x13c   : > { %v5584_v58 = vadd.f32 %v4459_v12, %v844_v25  ;;  %v836_v61 = vadd.f32 %v835_v44, %v5500_v16  ;;  %v3200_v16 = vsel %vm967_vm1, %v3197_v27, %v3199_v5  ;;  %v2904_v45 = vrot.slane %v2902_v20, 1 }
 0x13d   : > { %v4416_v10 = vpop.f32.mrf.mxu1  ;;  %v4460_v15 = vpop.f32.mrf.mxu0  ;;  %v2912_v27 = vrot.slane %v2910_v39, 1 }
 0x13e   : > { %v5588_v17 = vadd.f32 %v1093_v2, %v836_v61  ;;  %v847_v1 = vadd.f32 %v4416_v10, %v5505_v7  ;;  %v2908_v57 = vor.u32 %v2906_v34, %v2904_v45  ;;  %v3202_v2 = vsel %vm967_vm1, %v3199_v5, %v3201_v19 }
 0x13f   : > { %v838_v23 = vpop.f32.mrf.mxu1  ;;  %v1096_v28 = vpop.f32.mrf.mxu0  ;;  %v2905_v52 = vsel %vm415_vm0, %v2900_v53, %v2904_v45  ;;  %v2914_v10 = vshrl.u32 %v5582_v4, 16 }
 0x140   : > { %v5596_v36 = vadd.f32 %v4460_v15, %v847_v1  ;;  %v839_v51 = vadd.f32 %v838_v23, %v5511_v29  ;;  %v3203_v29 = vrot.slane %v5582_v4, 1  ;;  %v2913_v20 = vsel %vm415_vm0, %v2908_v57, %v2912_v27 }
 0x141   : > { %v4419_v43 = vpop.f32.mrf.mxu1  ;;  %v4463_v7 = vpop.f32.mrf.mxu0  ;;  %4694 = vmatmul.mubr.bf16.gmra.mxu1 %v2889_v22  ;;  %4738 = vmatmul.mubr.bf16.gmra.mxu0 %v3198_v3  ;;  %v2920_v23 = vrot.slane %v2918_v9, 1  ;;  %v2916_v4 = vor.u32 %v2914_v10, %v2912_v27 }
 0x142   : > { %v5600_v11 = vadd.f32 %v1096_v28, %v839_v51  ;;  %v860_v50 = vadd.f32 %v4419_v43, %v5517_v37  ;;  %4697 = vmatprep.mubr.bf16.mxu1 %v2897_v33  ;;  %4741 = vmatprep.mubr.bf16.mxu0 %v3200_v16  ;;  %v3204_v1 = vsel %vm967_vm1, %v3201_v19, %v3203_v29  ;;  %v3205_v33 = vrot.slane %v4971_v48, 1 }
 0x143   : > { %v851_v56 = vpop.f32.mrf.mxu1  ;;  %v1109_v12 = vpop.f32.mrf.mxu0  ;;  %v2921_v19 = vsel %vm415_vm0, %v2916_v4, %v2920_v23 }
 0x144   : > { %v5604_v25 = vadd.f32 %v4463_v7, %v860_v50  ;;  %v852_v60 = vadd.f32 %v851_v56, %v5522_v40 }
 0x145   : > { %v4420_v44 = vpop.f32.mrf.mxu1  ;;  %v4464_v21 = vpop.f32.mrf.mxu0 }
 0x146   : > { %v5608_v61 = vadd.f32 %v1109_v12, %v852_v60  ;;  %v863_v37 = vadd.f32 %v4420_v44, %v5527_v35 }
 0x147   : > { %v854_v15 = vpop.f32.mrf.mxu1  ;;  %v1112_v3 = vpop.f32.mrf.mxu0 }
 0x148   : > { %v5615_v40 = vadd.f32 %v4464_v21, %v863_v37  ;;  %v855_v22 = vadd.f32 %v854_v15, %v5533_v54 }
 0x149   : > { %v4423_v5 = vpop.f32.mrf.mxu1  ;;  %v4467_v26 = vpop.f32.mrf.mxu0  ;;  %4698 = vmatmul.mubr.bf16.gmra.mxu1 %v2905_v52  ;;  %4742 = vmatmul.mubr.bf16.gmra.mxu0 %v3202_v2 }
 0x14a   : > { %v5618_v35 = vadd.f32 %v1112_v3, %v855_v22  ;;  %v876_v28 = vadd.f32 %v4423_v5, %v5539_v59  ;;  %4701 = vmatprep.mubr.bf16.mxu1 %v2913_v20  ;;  %4745 = vmatprep.mubr.bf16.mxu0 %v3204_v1  ;;  %v3206_v59 = vsel %vm967_vm1, %v3203_v29, %v3205_v33 }
 0x14b   : > { %v867_v16 = vpop.f32.mrf.mxu1  ;;  %v1125_v34 = vpop.f32.mrf.mxu0 }
 0x14c   : > { %v5621_v39 = vadd.f32 %v4467_v26, %v876_v28  ;;  %v868_v51 = vadd.f32 %v867_v16, %v5542_v0 }
 0x14d   : > { %v4424_v54 = vpop.f32.mrf.mxu1  ;;  %v4468_v43 = vpop.f32.mrf.mxu0 }
 0x14e   : > { %v5624_v7 = vadd.f32 %v1125_v34, %v868_v51  ;;  %v879_v45 = vadd.f32 %v4424_v54, %v5547_v6 }
 0x14f   : > { %v870_v50 = vpop.f32.mrf.mxu1  ;;  %v1128_v53 = vpop.f32.mrf.mxu0 }
 0x150   : > { %v5629_v56 = vadd.f32 %v4468_v43, %v879_v45  ;;  %v871_v48 = vadd.f32 %v870_v50, %v5553_v14 }
 0x151   : > { %v4427_v12 = vpop.f32.mrf.mxu1  ;;  %v4471_v57 = vpop.f32.mrf.mxu0  ;;  %4702 = vmatmul.mubr.bf16.gmra.mxu1 %v2921_v19  ;;  %4746 = vmatmul.mubr.bf16.gmra.mxu0 %v3206_v59 }
 0x152   : > { %v5632_v0 = vadd.f32 %v1128_v53, %v871_v48  ;;  %v892_v27 = vadd.f32 %v4427_v12, %v5557_v18 }
 0x153   : > { %v883_v60 = vpop.f32.mrf.mxu1  ;;  %v1141_v6 = vpop.f32.mrf.mxu0 }
 0x154   : > { %v5635_v44 = vadd.f32 %v4471_v57, %v892_v27  ;;  %v884_v29 = vadd.f32 %v883_v60, %v5562_v30 }
 0x155   : > { %v4428_v21 = vpop.f32.mrf.mxu1  ;;  %v4472_v2 = vpop.f32.mrf.mxu0 }
 0x156   : > { %v5638_v9 = vadd.f32 %v1141_v6, %v884_v29  ;;  %v895_v14 = vadd.f32 %v4428_v21, %v5567_v38 }
 0x157   : > { %v886_v37 = vpop.f32.mrf.mxu1  ;;  %v1144_v52 = vpop.f32.mrf.mxu0 }
 0x158   : > { %v5641_v10 = vadd.f32 %v4472_v2, %v895_v14  ;;  %v887_v15 = vadd.f32 %v886_v37, %v5573_v62 }
 0x159   : > { %v4431_v3 = vpop.f32.mrf.mxu1  ;;  %v4475_v18 = vpop.f32.mrf.mxu0 }
 0x15a   : > { %v5644_v20 = vadd.f32 %v1144_v52, %v887_v15  ;;  %v908_v1 = vadd.f32 %v4431_v3, %v5497_v63 }
 0x15b   : > { %v899_v22 = vpop.f32.mrf.mxu1  ;;  %v1157_v30 = vpop.f32.mrf.mxu0 }
 0x15c   : > { %v5647_v5 = vadd.f32 %v4475_v18, %v908_v1  ;;  %v900_v26 = vadd.f32 %v899_v22, %v5502_v8 }
 0x15d   : > { %v4432_v23 = vpop.f32.mrf.mxu1  ;;  %v4476_v38 = vpop.f32.mrf.mxu0 }
 0x15e   : > { %v5650_v28 = vadd.f32 %v1157_v30, %v900_v26  ;;  %v911_v4 = vadd.f32 %v4432_v23, %v5507_v24 }
 0x15f   : > { %v902_v33 = vpop.f32.mrf.mxu1  ;;  %v1160_v62 = vpop.f32.mrf.mxu0 }
 0x160   : > { %v5653_v16 = vadd.f32 %v4476_v38, %v911_v4  ;;  %v903_v34 = vadd.f32 %v902_v33, %v5513_v31 }
 0x161   : > { %v4435_v51 = vpop.f32.mrf.mxu1  ;;  %v4479_v63 = vpop.f32.mrf.mxu0 }
 0x162   : > { %v5656_v54 = vadd.f32 %v1160_v62, %v903_v34  ;;  %v924_v43 = vadd.f32 %v4435_v51, %v5519_v42 }
 0x163   : > { %v915_v45 = vpop.f32.mrf.mxu1  ;;  %v1173_v8 = vpop.f32.mrf.mxu0 }
 0x164   : > { %v5659_v19 = vadd.f32 %v4479_v63, %v924_v43  ;;  %v916_v59 = vadd.f32 %v915_v45, %v5524_v41 }
 0x165   : > { %v4436_v50 = vpop.f32.mrf.mxu1  ;;  %v4480_v24 = vpop.f32.mrf.mxu0 }
 0x166   : > { %v5662_v53 = vadd.f32 %v1173_v8, %v916_v59  ;;  %v927_v48 = vadd.f32 %v4436_v50, %v5529_v49 }
 0x167   : > { %v918_v12 = vpop.f32.mrf.mxu1  ;;  %v1176_v31 = vpop.f32.mrf.mxu0 }
 0x168   : > { %v5665_v57 = vadd.f32 %v4480_v24, %v927_v48  ;;  %v919_v27 = vadd.f32 %v918_v12, %v5535_v55 }
 0x169   : > { %v4439_v60 = vpop.f32.mrf.mxu1  ;;  %v4483_v42 = vpop.f32.mrf.mxu0 }
 0x16a   : > { %v5668_v6 = vadd.f32 %v1176_v31, %v919_v27  ;;  %v940_v29 = vadd.f32 %v4439_v60, %v5544_v47 }
 0x16b   : > { %v931_v21 = vpop.f32.mrf.mxu1  ;;  %v1189_v41 = vpop.f32.mrf.mxu0 }
 0x16c   : > { %v5671_v2 = vadd.f32 %v4483_v42, %v940_v29  ;;  %v932_v14 = vadd.f32 %v931_v21, %v5551_v13 }
 0x16d   : > { %v4440_v37 = vpop.f32.mrf.mxu1  ;;  %v4484_v49 = vpop.f32.mrf.mxu0 }
 0x16e   : > { %v5674_v52 = vadd.f32 %v1189_v41, %v932_v14  ;;  %v943_v15 = vadd.f32 %v4440_v37, %v5560_v32 }
 0x16f   : > { %v934_v3 = vpop.f32.mrf.mxu1  ;;  %v1192_v55 = vpop.f32.mrf.mxu0 }
 0x170   : > { %v5677_v18 = vadd.f32 %v4484_v49, %v943_v15  ;;  %v935_v1 = vadd.f32 %v934_v3, %v5571_v46 }
 0x171   : > { %v4503_v22 = vpop.f32.mrf.mxu1  ;;  %v4547_v47 = vpop.f32.mrf.mxu0 }
 0x172   : > { %v5680_v30 = vadd.f32 %v1192_v55, %v935_v1  ;;  %v1556_v26 = vadd.f32 %v4503_v22, %v5584_v58 }
 0x173   : > { %v1443_v23 = vpop.f32.mrf.mxu1  ;;  %v1913_v13 = vpop.f32.mrf.mxu0 }
 0x174   : > { %v5683_v38 = vadd.f32 %v4547_v47, %v1556_v26  ;;  %v1554_v4 = vadd.f32 %v1443_v23, %v5588_v17 }
 0x175   : > { %v4504_v33 = vpop.f32.mrf.mxu1  ;;  %v4548_v32 = vpop.f32.mrf.mxu0 }
 0x176   : > { %v5686_v62 = vadd.f32 %v1913_v13, %v1554_v4  ;;  %v1557_v34 = vadd.f32 %v4504_v33, %v5596_v36 }
 0x177   : > { %v1446_v51 = vpop.f32.mrf.mxu1  ;;  %v1916_v46 = vpop.f32.mrf.mxu0 }
 0x178   : > { %v5689_v63 = vadd.f32 %v4548_v32, %v1557_v34  ;;  %v1555_v43 = vadd.f32 %v1446_v51, %v5600_v11 }
 0x179   : > { %v4507_v45 = vpop.f32.mrf.mxu1  ;;  %v4551_v58 = vpop.f32.mrf.mxu0 }
 0x17a   : > { %v5692_v8 = vadd.f32 %v1916_v46, %v1555_v43  ;;  %v1560_v59 = vadd.f32 %v4507_v45, %v5604_v25 }
 0x17b   : > { %v1459_v50 = vpop.f32.mrf.mxu1  ;;  %v1929_v17 = vpop.f32.mrf.mxu0 }
 0x17c   : > { %v5695_v24 = vadd.f32 %v4551_v58, %v1560_v59  ;;  %v1558_v48 = vadd.f32 %v1459_v50, %v5608_v61 }
 0x17d   : > { %v4508_v12 = vpop.f32.mrf.mxu1  ;;  %v4552_v36 = vpop.f32.mrf.mxu0 }
 0x17e   : > { %v5698_v31 = vadd.f32 %v1929_v17, %v1558_v48  ;;  %v1561_v27 = vadd.f32 %v4508_v12, %v5615_v40 }
 0x17f   : > { %v1462_v60 = vpop.f32.mrf.mxu1  ;;  %v1932_v11 = vpop.f32.mrf.mxu0 }
 0x180   : > { %v5701_v42 = vadd.f32 %v4552_v36, %v1561_v27  ;;  %v1559_v29 = vadd.f32 %v1462_v60, %v5618_v35 }
 0x181   : > { %v4511_v21 = vpop.f32.mrf.mxu1  ;;  %v4555_v25 = vpop.f32.mrf.mxu0 }
 0x182   : > { %v5704_v41 = vadd.f32 %v1932_v11, %v1559_v29  ;;  %v1564_v14 = vadd.f32 %v4511_v21, %v5621_v39 }
 0x183   : > { %v1475_v37 = vpop.f32.mrf.mxu1  ;;  %v1945_v61 = vpop.f32.mrf.mxu0 }
 0x184   : > { %v5707_v49 = vadd.f32 %v4555_v25, %v1564_v14  ;;  %v1562_v15 = vadd.f32 %v1475_v37, %v5624_v7 }
 0x185   : > { %v4512_v3 = vpop.f32.mrf.mxu1  ;;  %v4556_v40 = vpop.f32.mrf.mxu0 }
 0x186   : > { %v5710_v55 = vadd.f32 %v1945_v61, %v1562_v15  ;;  %v1565_v1 = vadd.f32 %v4512_v3, %v5629_v56 }
 0x187   : > { %v1478_v22 = vpop.f32.mrf.mxu1  ;;  %v1948_v35 = vpop.f32.mrf.mxu0 }
 0x188   : > { %v5713_v47 = vadd.f32 %v4556_v40, %v1565_v1  ;;  %v1563_v26 = vadd.f32 %v1478_v22, %v5632_v0 }
 0x189   : > { %v4515_v23 = vpop.f32.mrf.mxu1  ;;  %v4559_v39 = vpop.f32.mrf.mxu0 }
 0x18a   : > { %v5716_v13 = vadd.f32 %v1948_v35, %v1563_v26  ;;  %v1568_v4 = vadd.f32 %v4515_v23, %v5635_v44 }
 0x18b   : > { %v1491_v33 = vpop.f32.mrf.mxu1  ;;  %v1961_v7 = vpop.f32.mrf.mxu0 }
 0x18c   : > { %v5719_v32 = vadd.f32 %v4559_v39, %v1568_v4  ;;  %v1566_v34 = vadd.f32 %v1491_v33, %v5638_v9 }
 0x18d   : > { %v4516_v51 = vpop.f32.mrf.mxu1  ;;  %v4560_v56 = vpop.f32.mrf.mxu0 }
 0x18e   : > { %v5722_v46 = vadd.f32 %v1961_v7, %v1566_v34  ;;  %v1569_v43 = vadd.f32 %v4516_v51, %v5641_v10 }
 0x18f   : > { %v1494_v45 = vpop.f32.mrf.mxu1  ;;  %v1964_v0 = vpop.f32.mrf.mxu0 }
 0x190   : > { %v5725_v58 = vadd.f32 %v4560_v56, %v1569_v43  ;;  %v1567_v59 = vadd.f32 %v1494_v45, %v5644_v20 }
 0x191   : > { %v4519_v50 = vpop.f32.mrf.mxu1  ;;  %v4563_v44 = vpop.f32.mrf.mxu0 }
 0x192   : > { %v5728_v17 = vadd.f32 %v1964_v0, %v1567_v59  ;;  %v1572_v48 = vadd.f32 %v4519_v50, %v5647_v5 }
 0x193   : > { %v1507_v12 = vpop.f32.mrf.mxu1  ;;  %v1977_v9 = vpop.f32.mrf.mxu0 }
 0x194   : > { %v5731_v36 = vadd.f32 %v4563_v44, %v1572_v48  ;;  %v1570_v27 = vadd.f32 %v1507_v12, %v5650_v28 }
 0x195   : > { %v4520_v60 = vpop.f32.mrf.mxu1  ;;  %v4564_v10 = vpop.f32.mrf.mxu0 }
 0x196   : > { %v5734_v11 = vadd.f32 %v1977_v9, %v1570_v27  ;;  %v1573_v29 = vadd.f32 %v4520_v60, %v5653_v16 }
 0x197   : > { %v1510_v21 = vpop.f32.mrf.mxu1  ;;  %v1980_v20 = vpop.f32.mrf.mxu0 }
 0x198   : > { %v5737_v25 = vadd.f32 %v4564_v10, %v1573_v29  ;;  %v1571_v14 = vadd.f32 %v1510_v21, %v5656_v54 }
 0x199   : > { %v4523_v37 = vpop.f32.mrf.mxu1  ;;  %v4567_v5 = vpop.f32.mrf.mxu0 }
 0x19a   : > { %v5740_v61 = vadd.f32 %v1980_v20, %v1571_v14  ;;  %v1576_v15 = vadd.f32 %v4523_v37, %v5659_v19 }
 0x19b   : > { %v1523_v3 = vpop.f32.mrf.mxu1  ;;  %v1993_v28 = vpop.f32.mrf.mxu0 }
 0x19c   : > { %v5743_v40 = vadd.f32 %v4567_v5, %v1576_v15  ;;  %v1574_v1 = vadd.f32 %v1523_v3, %v5662_v53 }
 0x19d   : > { %v4524_v22 = vpop.f32.mrf.mxu1  ;;  %v4568_v16 = vpop.f32.mrf.mxu0 }
 0x19e   : > { %6053 = vst [vmem:[#allocation9_spill] sm:$0xff] %v5743_v40  ;;  %v5746_v35 = vadd.f32 %v1993_v28, %v1574_v1  ;;  %v1577_v26 = vadd.f32 %v4524_v22, %v5665_v57 }
 0x19f   : > { %v1526_v23 = vpop.f32.mrf.mxu1  ;;  %v1996_v54 = vpop.f32.mrf.mxu0 }
 0x1a0   : > { %6054 = vst [vmem:[#allocation10_spill] sm:$0xff] %v5746_v35  ;;  %v5749_v39 = vadd.f32 %v4568_v16, %v1577_v26  ;;  %v1575_v4 = vadd.f32 %v1526_v23, %v5668_v6 }
 0x1a1   : > { %v4527_v33 = vpop.f32.mrf.mxu1  ;;  %v4571_v19 = vpop.f32.mrf.mxu0 }
 0x1a2   : > { %6055 = vst [vmem:[#allocation11_spill] sm:$0xff] %v5749_v39  ;;  %v5752_v7 = vadd.f32 %v1996_v54, %v1575_v4  ;;  %v1580_v34 = vadd.f32 %v4527_v33, %v5671_v2 }
 0x1a3   : > { %v1539_v51 = vpop.f32.mrf.mxu1  ;;  %v2009_v53 = vpop.f32.mrf.mxu0 }
 0x1a4   : > { %6056 = vst [vmem:[#allocation12_spill] sm:$0xff] %v5752_v7  ;;  %v5755_v56 = vadd.f32 %v4571_v19, %v1580_v34  ;;  %v1578_v43 = vadd.f32 %v1539_v51, %v5674_v52 }
 0x1a5   : > { %v4528_v45 = vpop.f32.mrf.mxu1  ;;  %v4572_v57 = vpop.f32.mrf.mxu0 }
 0x1a6   : > { %6057 = vst [vmem:[#allocation13_spill] sm:$0xff] %v5755_v56  ;;  %v5758_v0 = vadd.f32 %v2009_v53, %v1578_v43  ;;  %v1581_v59 = vadd.f32 %v4528_v45, %v5677_v18 }
 0x1a7   : > { %v1542_v50 = vpop.f32.mrf.mxu1  ;;  %v2012_v6 = vpop.f32.mrf.mxu0 }
 0x1a8   : > { %6058 = vst [vmem:[#allocation14_spill] sm:$0xff] %v5758_v0  ;;  %v5761_v44 = vadd.f32 %v4572_v57, %v1581_v59  ;;  %v1579_v48 = vadd.f32 %v1542_v50, %v5680_v30 }
 0x1a9   : > { %v4591_v12 = vpop.f32.mrf.mxu1  ;;  %v5764_v2 = vpop.f32.mrf.mxu0 }
 0x1aa   : > { %6059 = vst [vmem:[#allocation15_spill] sm:$0xff] %v5761_v44  ;;  %v5766_v9 = vadd.f32 %v2012_v6, %v1579_v48 }
 0x1ab   : > { %v2198_v27 = vpop.f32.mrf.mxu1  ;;  %v5768_v60 = vpop.f32.mrf.mxu0 }
 0x1ac   : > { %6060 = vst [vmem:[#allocation16_spill] sm:$0xff] %v5766_v9 }
 0x1ad   : > { %v4592_v52 = vpop.f32.mrf.mxu1  ;;  %v5770_v10 = vpop.f32.mrf.mxu0 }
 0x1af   : > { %v2201_v29 = vpop.f32.mrf.mxu1  ;;  %v2551_v21 = vpop.f32.mrf.mxu0 }
 0x1b1   : > { %v4595_v18 = vpop.f32.mrf.mxu1  ;;  %v4639_v20 = vpop.f32.mrf.mxu0 }
 0x1b3   : > { %v2214_v14 = vpop.f32.mrf.mxu1  ;;  %v2564_v37 = vpop.f32.mrf.mxu0 }
 0x1b5   : > { %v4596_v5 = vpop.f32.mrf.mxu1  ;;  %v4640_v15 = vpop.f32.mrf.mxu0 }
 0x1b7   : > { %v2217_v30 = vpop.f32.mrf.mxu1  ;;  %v2567_v3 = vpop.f32.mrf.mxu0 }
 0x1b9   : > { %v4599_v28 = vpop.f32.mrf.mxu1  ;;  %v4643_v1 = vpop.f32.mrf.mxu0 }
 0x1bb   : > { %v2230_v22 = vpop.f32.mrf.mxu1  ;;  %v5772_v16 = vpop.f32.mrf.mxu0 }
 0x1bd   : > { %v4600_v26 = vpop.f32.mrf.mxu1  ;;  %v5774_v23 = vpop.f32.mrf.mxu0 }
 0x1bf   : > { %v2233_v54 = vpop.f32.mrf.mxu1  ;;  %v5776_v4 = vpop.f32.mrf.mxu0 }
 0x1c1   : > { %v4603_v33 = vpop.f32.mrf.mxu1  ;;  %v5778_v19 = vpop.f32.mrf.mxu0 }
 0x1c3   : > { %v2246_v34 = vpop.f32.mrf.mxu1  ;;  %v5780_v51 = vpop.f32.mrf.mxu0 }
 0x1c4   : > { %6061 = vst [vmem:[#allocation17_spill] sm:$0xff] %v5780_v51 }
 0x1c5   : > { %v4604_v53 = vpop.f32.mrf.mxu1  ;;  %v5782_v43 = vpop.f32.mrf.mxu0 }
 0x1c6   : > { %6062 = vst [vmem:[#allocation18_spill] sm:$0xff] %v5782_v43 }
 0x1c7   : > { %v2249_v45 = vpop.f32.mrf.mxu1  ;;  %v5784_v57 = vpop.f32.mrf.mxu0 }
 0x1c8   : > { %6063 = vst [vmem:[#allocation19_spill] sm:$0xff] %v5784_v57 }
 0x1c9   : > { %v4607_v59 = vpop.f32.mrf.mxu1  ;;  %v5786_v50 = vpop.f32.mrf.mxu0 }
 0x1ca   : > { %6064 = vst [vmem:[#allocation20_spill] sm:$0xff] %v5786_v50 }
 0x1cb   : > { %v2262_v6 = vpop.f32.mrf.mxu1  ;;  %v5788_v48 = vpop.f32.mrf.mxu0 }
 0x1cc   : > { %6065 = vst [vmem:[#allocation21_spill] sm:$0xff] %v5788_v48 }
 0x1cd   : > { %v4608_v9 = vpop.f32.mrf.mxu1  ;;  %v5790_v44 = vpop.f32.mrf.mxu0 }
 0x1ce   : > { %6066 = vst [vmem:[#allocation22_spill] sm:$0xff] %v5790_v44 }
 0x1cf   : > { %v5792_v0 = vpop.f32.mrf.mxu1  ;;  %v5794_v56 = vpop.f32.mrf.mxu0 }
 0x1d0   : > { %6067 = vst [vmem:[#allocation23_spill] sm:$0xff] %v5794_v56 }
 0x1d1   : > { %v5796_v7 = vpop.f32.mrf.mxu1  ;;  %v5798_v39 = vpop.f32.mrf.mxu0 }
 0x1d2   : > { %6068 = vst [vmem:[#allocation24_spill] sm:$0xff] %v5796_v7  ;;  %6069 = vst [vmem:[#allocation25_spill] sm:$0xff] %v5798_v39  ;;  %v2311_v39 = vadd.f32 %v4591_v12, %v5683_v38  ;;  %v2319_v38 = vadd.f32 %v4599_v28, %v5707_v49  ;;  %v2328_v28 = vadd.f32 %v4608_v9, %v5737_v25 }
 0x1d3   : > { %v5800_v35 = vpop.f32.mrf.mxu1  ;;  %v5802_v40 = vpop.f32.mrf.mxu0 }
 0x1d4   : > { %6070 = vst [vmem:[#allocation26_spill] sm:$0xff] %v5800_v35  ;;  %6071 = vst [vmem:[#allocation27_spill] sm:$0xff] %v5802_v40  ;;  %v2309_v40 = vadd.f32 %v2198_v27, %v5686_v62 }
 0x1d5   : > { %v5804_v57 = vpop.f32.mrf.mxu1  ;;  %v5806_v50 = vpop.f32.mrf.mxu0 }
 0x1d6   : > { %6072 = vst [vmem:[#allocation28_spill] sm:$0xff] %v5804_v57  ;;  %6073 = vst [vmem:[#allocation29_spill] sm:$0xff] %v5806_v50  ;;  %v2312_v57 = vadd.f32 %v4592_v52, %v5689_v63  ;;  %v2310_v50 = vadd.f32 %v2201_v29, %v5692_v8  ;;  %v2661_v63 = vadd.f32 %v5764_v2, %v2311_v39  ;;  %v5850_v2 = vld [vmem:[#allocation4] ss:$0 sm:$0xff] }
 0x1d7   : > { %v5808_v48 = vpop.f32.mrf.mxu1  ;;  %v5810_v43 = vpop.f32.mrf.mxu0  ;;  %v2317_v8 = vadd.f32 %v2230_v22, %v5710_v55  ;;  %v2320_v39 = vadd.f32 %v4600_v26, %v5713_v47  ;;  %v2318_v55 = vadd.f32 %v2233_v54, %v5716_v13  ;;  %v2327_v47 = vadd.f32 %v4607_v59, %v5731_v36  ;;  %v6083_v59 = vld [vmem:[#allocation21_spill] sm:$0xff] }
 0x1d8   : > { %6074 = vst [vmem:[#allocation30_spill] sm:$0xff] %v5808_v48  ;;  %6075 = vst [vmem:[#allocation31_spill] sm:$0xff] %v5810_v43  ;;  %v2315_v48 = vadd.f32 %v4595_v18, %v5695_v24  ;;  %v2659_v24 = vadd.f32 %v5768_v60, %v2309_v40  ;;  %v2662_v27 = vadd.f32 %v5770_v10, %v2312_v57 }
 0x1d9   : > { %v5812_v44 = vpop.f32.mrf.mxu1  ;;  %v5814_v51 = vpop.f32.mrf.mxu0  ;;  %v2660_v52 = vadd.f32 %v2551_v21, %v2310_v50  ;;  %v2323_v40 = vadd.f32 %v4603_v33, %v5719_v32  ;;  %v5853_v21 = vadd.f32 %v5772_v16, %v2317_v8  ;;  %v2325_v13 = vadd.f32 %v2262_v6, %v5734_v11  ;;  %v5860_v32 = vld [vmem:[#allocation6] ss:$0 sm:$0xff]  ;;  %v6084_v6 = vld [vmem:[#allocation22_spill] sm:$0xff] }
 0x1da   : > { %6076 = vst [vmem:[#allocation32_spill] sm:$0xff] %v5814_v51  ;;  %v2313_v51 = vadd.f32 %v2214_v14, %v5698_v31  ;;  %v2665_v31 = vadd.f32 %v4639_v20, %v2315_v48  ;;  %v5865_v16 = vadd.f32 %v5774_v23, %v2320_v39  ;;  %v2326_v36 = vadd.f32 %v5792_v0, %v5740_v61  ;;  %v6086_v39 = vld [vmem:[#allocation9_spill] sm:$0xff] }
 0x1db   : > { %v5816_v56 = vpop.f32.mrf.mxu1  ;;  %v5818_v7 = vpop.f32.mrf.mxu0  ;;  %v5890_v50 = vadd.f32 %v6083_v59, %v2325_v13  ;;  %v5893_v48 = vadd.f32 %v6084_v6, %v2328_v28 }
 0x1dc   : > { %6077 = vst [vmem:[#allocation33_spill] sm:$0xff] %v5816_v56  ;;  %6078 = vst [vmem:[#allocation34_spill] sm:$0xff] %v5818_v7  ;;  %v2316_v56 = vadd.f32 %v4596_v5, %v5701_v42  ;;  %v2314_v7 = vadd.f32 %v2217_v30, %v5704_v41  ;;  %v2663_v18 = vadd.f32 %v2564_v37, %v2313_v51  ;;  %v6080_v51 = vld [vmem:[#allocation18_spill] sm:$0xff] }
 0x1dd   : > { %v5825_v35 = vpop.f32.mrf.mxu1  ;;  %v5827_v43 = vpop.f32.mrf.mxu0  ;;  %v5845_v5 = vadd.f32 %v4643_v1, %v2319_v38  ;;  %v2324_v37 = vadd.f32 %v4604_v53, %v5725_v58  ;;  %v5868_v58 = vadd.f32 %v5776_v4, %v2318_v55  ;;  %v6081_v53 = vld [vmem:[#allocation19_spill] sm:$0xff]  ;;  %v6087_v55 = vld [vmem:[#allocation24_spill] sm:$0xff] }
 0x1de   : > { %v5841_v41 = vadd.f32 %v4640_v15, %v2316_v56  ;;  %v5843_v49 = vadd.f32 %v2567_v3, %v2314_v7  ;;  %v2321_v56 = vadd.f32 %v2246_v34, %v5722_v46  ;;  %v2322_v15 = vadd.f32 %v2249_v45, %v5728_v17  ;;  %v6079_v34 = vld [vmem:[#allocation17_spill] sm:$0xff]  ;;  %v6082_v45 = vld [vmem:[#allocation20_spill] sm:$0xff] }
 0x1df   : > { %v5833_v12 = vpop.f32.mrf.mxu1  ;;  %v5835_v62 = vpop.f32.mrf.mxu0  ;;  %v5871_v17 = vadd.f32 %v5778_v19, %v2323_v40  ;;  %v5881_v4 = vadd.f32 %v6080_v51, %v2324_v37  ;;  %v5887_v57 = vadd.f32 %v6082_v45, %v2327_v47  ;;  %v2331_v40 = vadd.f32 %v6087_v55, %v6086_v39  ;;  %v6091_v37 = vld [vmem:[#allocation28_spill] sm:$0xff] }
 0x1e0   : > { %v5878_v23 = vadd.f32 %v6079_v34, %v2321_v56  ;;  %v5884_v19 = vadd.f32 %v6081_v53, %v2322_v15 }
 0x1e1   : > { %v4679_v29 = vpop.f32.mrf.mxu1  ;;  %v4723_v42 = vpop.f32.mrf.mxu0 }
 0x1e2   : > { %v3131_v14 = vadd.f32 %v4679_v29, %v2661_v63 }
 0x1e3   : > { %v3018_v60 = vpop.f32.mrf.mxu1  ;;  %v3303_v10 = vpop.f32.mrf.mxu0 }
 0x1e4   : > { %v3416_v7 = vadd.f32 %v4723_v42, %v3131_v14  ;;  %v3129_v20 = vadd.f32 %v3018_v60, %v2659_v24  ;;  %v6085_v42 = vld [vmem:[#allocation23_spill] sm:$0xff]  ;;  %v6088_v60 = vld [vmem:[#allocation10_spill] sm:$0xff] }
 0x1e5   : > { %v4680_v30 = vpop.f32.mrf.mxu1  ;;  %v4724_v3 = vpop.f32.mrf.mxu0  ;;  %v5898_v14 = vadd.f32 %v6085_v42, %v2326_v36 }
 0x1e6   : > { %v3451_v1 = vmul.f32 %v5850_v2, %v3416_v7  ;;  %v3414_v22 = vadd.f32 %v3303_v10, %v3129_v20  ;;  %v3132_v46 = vadd.f32 %v4680_v30, %v2662_v27  ;;  %v6089_v10 = vld [vmem:[#allocation26_spill] sm:$0xff]  ;;  %v6090_v20 = vld [vmem:[#allocation11_spill] sm:$0xff] }
 0x1e7   : > { %v3021_v11 = vpop.f32.mrf.mxu1  ;;  %v3306_v26 = vpop.f32.mrf.mxu0  ;;  %v2329_v56 = vadd.f32 %v6089_v10, %v6088_v60  ;;  %v2332_v15 = vadd.f32 %v6091_v37, %v6090_v20  ;;  %v6093_v10 = vld [vmem:[#allocation27_spill] sm:$0xff]  ;;  %v6094_v37 = vld [vmem:[#allocation29_spill] sm:$0xff] }
 0x1e8   : > { %v3486_v25 = vadd.f32 %v5860_v32, %v3451_v1  ;;  %v3449_v9 = vmul.f32 %v5850_v2, %v3414_v22  ;;  %v3417_v54 = vadd.f32 %v4724_v3, %v3132_v46  ;;  %v3130_v33 = vadd.f32 %v3021_v11, %v2660_v52 }
 0x1e9   : > { %v4683_v61 = vpop.f32.mrf.mxu1  ;;  %v4727_v0 = vpop.f32.mrf.mxu0 }
 0x1ea   : > { %v3542_v38 = vmul.f32 0.1, %v3486_v25  ;;  %v3452_v63 = vmul.f32 %v5850_v2, %v3417_v54  ;;  %vm3514_vm2 = vcmp.ge.f32.partialorder %v3486_v25, 0.0  ;;  %v3484_v8 = vadd.f32 %v5860_v32, %v3449_v9 }
 0x1eb   : > { %v3415_v24 = vadd.f32 %v3306_v26, %v3130_v33  ;;  %v3135_v27 = vadd.f32 %v4683_v61, %v2665_v31  ;;  %v3034_v52 = vpop.f32.mrf.mxu1  ;;  %v3319_v29 = vpop.f32.mrf.mxu0 }
 0x1ec   : > { %v3487_v7 = vadd.f32 %v5860_v32, %v3452_v63  ;;  %v3133_v13 = vadd.f32 %v3034_v52, %v2663_v18  ;;  %v3570_v28 = vsel %vm3514_vm2, %v3486_v25, %v3542_v38  ;;  %v3540_v46 = vmul.f32 0.1, %v3484_v8  ;;  %v6092_v38 = vld [vmem:[#allocation25_spill] sm:$0xff] }
 0x1ed   : > { %v3450_v47 = vmul.f32 %v5850_v2, %v3415_v24  ;;  %v3420_v31 = vadd.f32 %v4727_v0, %v3135_v27  ;;  %v4684_v30 = vpop.f32.mrf.mxu1  ;;  %v4728_v3 = vpop.f32.mrf.mxu0  ;;  %vm3512_vm4 = vcmp.ge.f32.partialorder %v3484_v8, 0.0  ;;  %v5924_v63 = vadd.f32 %v6092_v38, %v2331_v40 }
 0x1ee   : > { %vm3515_vm3 = vcmp.ge.f32.partialorder %v3487_v7, 0.0  ;;  %v3543_v1 = vmul.f32 0.1, %v3487_v7  ;;  %v3136_v22 = vadd.f32 %v4684_v30, %v5841_v41  ;;  %v3418_v26 = vadd.f32 %v3319_v29, %v3133_v13 }
 0x1ef   : > { %v3485_v36 = vadd.f32 %v5860_v32, %v3450_v47  ;;  %v3455_v11 = vmul.f32 %v5850_v2, %v3420_v31  ;;  %v3037_v9 = vpop.f32.mrf.mxu1  ;;  %v3322_v54 = vpop.f32.mrf.mxu0  ;;  %v3568_v24 = vsel %vm3512_vm4, %v3484_v8, %v3540_v46  ;;  %v5936_v47 = vadd.f32 %v6094_v37, %v2332_v15 }
 0x1f0   : > { %v3571_v18 = vsel %vm3515_vm3, %v3487_v7, %v3543_v1  ;;  %v3421_v25 = vadd.f32 %v4728_v3, %v3136_v22  ;;  %v3134_v33 = vadd.f32 %v3037_v9, %v5843_v49  ;;  %v3453_v61 = vmul.f32 %v5850_v2, %v3418_v26 }
 0x1f1   : > { %v4080_v41 = vpack.c.bf16 %v3571_v18, %v3570_v28  ;;  %vm3513_vm5 = vcmp.ge.f32.partialorder %v3485_v36, 0.0  ;;  %v3541_v34 = vmul.f32 0.1, %v3485_v36  ;;  %v3490_v51 = vadd.f32 %v5860_v32, %v3455_v11  ;;  %v4687_v53 = vpop.f32.mrf.mxu1  ;;  %v4731_v45 = vpop.f32.mrf.mxu0 }
 0x1f2   : > { %v3456_v0 = vmul.f32 %v5850_v2, %v3421_v25  ;;  %v3419_v59 = vadd.f32 %v3322_v54, %v3134_v33  ;;  %v3139_v6 = vadd.f32 %v4687_v53, %v5845_v5  ;;  %v3488_v39 = vadd.f32 %v5860_v32, %v3453_v61 }
 0x1f3   : > { %4142 = vst [vmem:[%s5916_s27 + $0x8] sm:$0xff] %v4080_v41   ;;  %v3569_v49 = vsel %vm3513_vm5, %v3485_v36, %v3541_v34  ;;  %v3546_v27 = vmul.f32 0.1, %v3490_v51  ;;  %v3050_v52 = vpop.f32.mrf.mxu1  ;;  %v3335_v29 = vpop.f32.mrf.mxu0  ;;  %v5932_v5 = vadd.f32 %v6093_v10, %v2329_v56  ;;  %vm3518_vm6 = vcmp.ge.f32.partialorder %v3490_v51, 0.0  ;;  %v6095_v41 = vld [vmem:[#allocation12_spill] sm:$0xff]  ;;  %v6096_v34 = vld [vmem:[#allocation30_spill] sm:$0xff] }
 0x1f4   : > { %v4075_v42 = vpack.c.bf16 %v3569_v49, %v3568_v24  ;;  %v3491_v55 = vadd.f32 %v5860_v32, %v3456_v0  ;;  %v3454_v60 = vmul.f32 %v5850_v2, %v3419_v59  ;;  %v3424_v40 = vadd.f32 %v4731_v45, %v3139_v6  ;;  %v6097_v49 = vld [vmem:[#allocation13_spill] sm:$0xff] }
 0x1f5   : > { %v3137_v8 = vadd.f32 %v3050_v52, %v5853_v21  ;;  %v4688_v7 = vpop.f32.mrf.mxu1  ;;  %v4732_v20 = vpop.f32.mrf.mxu0  ;;  %v3544_v31 = vmul.f32 0.1, %v3488_v39  ;;  %v3574_v21 = vsel %vm3518_vm6, %v3490_v51, %v3546_v27  ;;  %vm3516_vm8 = vcmp.ge.f32.partialorder %v3488_v39, 0.0 }
 0x1f6   : > { %4076 = vst [vmem:[%s5916_s27] sm:$0xff] %v4075_v42   ;;  %vm3519_vm7 = vcmp.ge.f32.partialorder %v3491_v55, 0.0  ;;  %v3547_v13 = vmul.f32 0.1, %v3491_v55  ;;  %v3489_v30 = vadd.f32 %v5860_v32, %v3454_v60  ;;  %v3459_v3 = vmul.f32 %v5850_v2, %v3424_v40 }
 0x1f7   : > { %v3422_v28 = vadd.f32 %v3335_v29, %v3137_v8  ;;  %v3140_v56 = vadd.f32 %v4688_v7, %v5865_v16  ;;  %v3053_v1 = vpop.f32.mrf.mxu1  ;;  %v3338_v22 = vpop.f32.mrf.mxu0  ;;  %v2330_v51 = vadd.f32 %v6096_v34, %v6095_v41  ;;  %v3572_v53 = vsel %vm3516_vm8, %v3488_v39, %v3544_v31  ;;  %v6098_v39 = vld [vmem:[#allocation14_spill] sm:$0xff]  ;;  %v6100_v41 = vld [vmem:[#allocation31_spill] sm:$0xff] }
 0x1f8   : > { %v3575_v46 = vsel %vm3519_vm7, %v3491_v55, %v3547_v13  ;;  %v3138_v15 = vadd.f32 %v3053_v1, %v5868_v58  ;;  %vm3517_vm9 = vcmp.ge.f32.partialorder %v3489_v30, 0.0  ;;  %v3545_v11 = vmul.f32 0.1, %v3489_v30  ;;  %v6099_v55 = vld [vmem:[#allocation33_spill] sm:$0xff] }
 0x1f9   : > { %v4090_v36 = vpack.c.bf16 %v3575_v46, %v3574_v21  ;;  %v3494_v26 = vadd.f32 %v5860_v32, %v3459_v3  ;;  %v4691_v9 = vpop.f32.mrf.mxu1  ;;  %v4735_v54 = vpop.f32.mrf.mxu0  ;;  %v3457_v18 = vmul.f32 %v5850_v2, %v3422_v28  ;;  %v3425_v25 = vadd.f32 %v4732_v20, %v3140_v56 }
 0x1fa   : > { %v3423_v16 = vadd.f32 %v3338_v22, %v3138_v15  ;;  %v3143_v33 = vadd.f32 %v4691_v9, %v5871_v17  ;;  %v3573_v58 = vsel %vm3517_vm9, %v3489_v30, %v3545_v11  ;;  %v2335_v17 = vadd.f32 %v5812_v44, %v6097_v49 }
 0x1fb   : > { %4144 = vst [vmem:[%s5916_s27 + $0x18] sm:$0xff] %v4090_v36   ;;  %v3550_v45 = vmul.f32 0.1, %v3494_v26  ;;  %v3066_v61 = vpop.f32.mrf.mxu1  ;;  %v3351_v0 = vpop.f32.mrf.mxu0  ;;  %v4085_v59 = vpack.c.bf16 %v3573_v58, %v3572_v53  ;;  %v3492_v6 = vadd.f32 %v5860_v32, %v3457_v18  ;;  %v3460_v38 = vmul.f32 %v5850_v2, %v3425_v25  ;;  %v6101_v53 = vld [vmem:[#allocation32_spill] sm:$0xff] }
 0x1fc   : > { %v3458_v24 = vmul.f32 %v5850_v2, %v3423_v16  ;;  %vm3522_vm10 = vcmp.ge.f32.partialorder %v3494_v26, 0.0  ;;  %v3428_v27 = vadd.f32 %v4735_v54, %v3143_v33  ;;  %v3141_v52 = vadd.f32 %v3066_v61, %v5878_v23 }
 0x1fd   : > { %v4692_v29 = vpop.f32.mrf.mxu1  ;;  %v4736_v42 = vpop.f32.mrf.mxu0  ;;  %v2333_v60 = vadd.f32 %v6099_v55, %v6098_v39  ;;  %4143 = vst [vmem:[%s5916_s27 + $0x10] sm:$0xff] %v4085_v59   ;;  %v3548_v10 = vmul.f32 0.1, %v3492_v6  ;;  %v3495_v40 = vadd.f32 %v5860_v32, %v3460_v38  ;;  %vm3520_vm11 = vcmp.ge.f32.partialorder %v3492_v6, 0.0 }
 0x1fe   : > { %v3493_v8 = vadd.f32 %v5860_v32, %v3458_v24  ;;  %v3463_v7 = vmul.f32 %v5850_v2, %v3428_v27  ;;  %v3426_v20 = vadd.f32 %v3351_v0, %v3141_v52  ;;  %v3144_v44 = vadd.f32 %v4692_v29, %v5881_v4  ;;  %v6102_v0 = vld [vmem:[#allocation34_spill] sm:$0xff] }
 0x1ff   : > { %v3069_v37 = vpop.f32.mrf.mxu1  ;;  %v3354_v31 = vpop.f32.mrf.mxu0  ;;  %v3578_v23 = vsel %vm3522_vm10, %v3494_v26, %v3550_v45  ;;  %vm3523_vm12 = vcmp.ge.f32.partialorder %v3495_v40, 0.0  ;;  %v3551_v13 = vmul.f32 0.1, %v3495_v40  ;;  %v3576_v21 = vsel %vm3520_vm11, %v3492_v6, %v3548_v10 }
 0x200   : > { %vm3521_vm13 = vcmp.ge.f32.partialorder %v3493_v8, 0.0  ;;  %v3549_v30 = vmul.f32 0.1, %v3493_v8  ;;  %v3498_v3 = vadd.f32 %v5860_v32, %v3463_v7  ;;  %v3461_v28 = vmul.f32 %v5850_v2, %v3426_v20 }
 0x201   : > { %v3429_v56 = vadd.f32 %v4736_v42, %v3144_v44  ;;  %v4695_v1 = vpop.f32.mrf.mxu1  ;;  %v4739_v22 = vpop.f32.mrf.mxu0  ;;  %v3579_v46 = vsel %vm3523_vm12, %v3495_v40, %v3551_v13  ;;  %v3142_v4 = vadd.f32 %v3069_v37, %v5884_v19  ;;  %v5972_v34 = vadd.f32 %v6100_v41, %v2330_v51  ;;  %v6103_v44 = vld [vmem:[#allocation15_spill] sm:$0xff] }
 0x202   : > { %v3147_v15 = vadd.f32 %v4695_v1, %v5887_v57  ;;  %v4100_v36 = vpack.c.bf16 %v3579_v46, %v3578_v23  ;;  %v3577_v11 = vsel %vm3521_vm13, %v3493_v8, %v3549_v30  ;;  %vm3526_vm14 = vcmp.ge.f32.partialorder %v3498_v3, 0.0 }
 0x203   : > { %v3554_v26 = vmul.f32 0.1, %v3498_v3  ;;  %v3082_v9 = vpop.f32.mrf.mxu1  ;;  %v3367_v54 = vpop.f32.mrf.mxu0  ;;  %v4095_v18 = vpack.c.bf16 %v3577_v11, %v3576_v21  ;;  %v3496_v25 = vadd.f32 %v5860_v32, %v3461_v28  ;;  %v3464_v16 = vmul.f32 %v5850_v2, %v3429_v56 }
 0x204   : > { %v3427_v33 = vadd.f32 %v3354_v31, %v3142_v4  ;;  %v5975_v19 = vadd.f32 %v6101_v53, %v2335_v17  ;;  %4146 = vst [vmem:[%s5916_s27 + $0x28] sm:$0xff] %v4100_v36   ;;  %v3432_v57 = vadd.f32 %v4739_v22, %v3147_v15  ;;  %v3145_v58 = vadd.f32 %v3082_v9, %v5890_v50  ;;  %v6104_v9 = vld [vmem:[#allocation16_spill] sm:$0xff] }
 0x205   : > { %v4696_v45 = vpop.f32.mrf.mxu1  ;;  %v4740_v61 = vpop.f32.mrf.mxu0  ;;  %v5980_v59 = vadd.f32 %v6102_v0, %v2333_v60  ;;  %4145 = vst [vmem:[%s5916_s27 + $0x20] sm:$0xff] %v4095_v18   ;;  %v3582_v6 = vsel %vm3526_vm14, %v3498_v3, %v3554_v26  ;;  %v3499_v38 = vadd.f32 %v5860_v32, %v3464_v16  ;;  %v3552_v24 = vmul.f32 0.1, %v3496_v25 }
 0x206   : > { %v3462_v51 = vmul.f32 %v5850_v2, %v3427_v33  ;;  %v3467_v49 = vmul.f32 %v5850_v2, %v3432_v57  ;;  %v3430_v17 = vadd.f32 %v3367_v54, %v3145_v58  ;;  %v3148_v27 = vadd.f32 %v4696_v45, %v5893_v48 }
 0x207   : > { %v3085_v52 = vpop.f32.mrf.mxu1  ;;  %v3370_v50 = vpop.f32.mrf.mxu0  ;;  %vm3524_vm15 = vcmp.ge.f32.partialorder %v3496_v25, 0.0  ;;  %vm3527_vm0 = vcmp.ge.f32.partialorder %v3499_v38, 0.0  ;;  %v3555_v29 = vmul.f32 0.1, %v3499_v38  ;;  %v2336_v37 = vadd.f32 %v5825_v35, %v6103_v44 }
 0x208   : > { %v3497_v42 = vadd.f32 %v5860_v32, %v3462_v51  ;;  %v3502_v39 = vadd.f32 %v5860_v32, %v3467_v49  ;;  %v3465_v55 = vmul.f32 %v5850_v2, %v3430_v17  ;;  %v3433_v60 = vadd.f32 %v4740_v61, %v3148_v27 }
 0x209   : > { %v3146_v10 = vadd.f32 %v3085_v52, %v5898_v14  ;;  %v4699_v40 = vpop.f32.mrf.mxu1  ;;  %v4743_v8 = vpop.f32.mrf.mxu0  ;;  %v3583_v7 = vsel %vm3527_vm0, %v3499_v38, %v3555_v29  ;;  %v3580_v31 = vsel %vm3524_vm15, %v3496_v25, %v3552_v24  ;;  %v2686_v26 = vadd.f32 %v5827_v43, %v2336_v37 }
 0x20a   : > { %vm3525_vm1 = vcmp.ge.f32.partialorder %v3497_v42, 0.0  ;;  %v3553_v48 = vmul.f32 0.1, %v3497_v42  ;;  %v3151_v20 = vadd.f32 %v4699_v40, %v5924_v63  ;;  %v4110_v23 = vpack.c.bf16 %v3583_v7, %v3582_v6 }
 0x20b   : > { %v3500_v13 = vadd.f32 %v5860_v32, %v3465_v55  ;;  %v3098_v30 = vpop.f32.mrf.mxu1  ;;  %v3383_v3 = vpop.f32.mrf.mxu0  ;;  %v3468_v14 = vmul.f32 %v5850_v2, %v3433_v60  ;;  %v3431_v56 = vadd.f32 %v3370_v50, %v3146_v10  ;;  %vm3530_vm2 = vcmp.ge.f32.partialorder %v3502_v39, 0.0 }
 0x20c   : > { %v3581_v28 = vsel %vm3525_vm1, %v3497_v42, %v3553_v48  ;;  %v3436_v1 = vadd.f32 %v4743_v8, %v3151_v20  ;;  %4148 = vst [vmem:[%s5916_s27 + $0x38] sm:$0xff] %v4110_v23   ;;  %v3558_v21 = vmul.f32 0.1, %v3502_v39  ;;  %v3149_v11 = vadd.f32 %v3098_v30, %v5932_v5 }
 0x20d   : > { %v4105_v22 = vpack.c.bf16 %v3581_v28, %v3580_v31  ;;  %v3556_v63 = vmul.f32 0.1, %v3500_v13  ;;  %v4700_v46 = vpop.f32.mrf.mxu1  ;;  %v4744_v4 = vpop.f32.mrf.mxu0  ;;  %v3503_v35 = vadd.f32 %v5860_v32, %v3468_v14  ;;  %v3466_v15 = vmul.f32 %v5850_v2, %v3431_v56 }
 0x20e   : > { %v3471_v36 = vmul.f32 %v5850_v2, %v3436_v1  ;;  %v2334_v54 = vadd.f32 %v5833_v12, %v6104_v9  ;;  %vm3528_vm3 = vcmp.ge.f32.partialorder %v3500_v13, 0.0  ;;  %v3152_v18 = vadd.f32 %v4700_v46, %v5936_v47 }
 0x20f   : > { %4147 = vst [vmem:[%s5916_s27 + $0x30] sm:$0xff] %v4105_v22   ;;  %v3101_v25 = vpop.f32.mrf.mxu1  ;;  %v3386_v16 = vpop.f32.mrf.mxu0  ;;  %vm3531_vm4 = vcmp.ge.f32.partialorder %v3503_v35, 0.0  ;;  %v3559_v33 = vmul.f32 0.1, %v3503_v35  ;;  %v3501_v41 = vadd.f32 %v5860_v32, %v3466_v15  ;;  %v3586_v57 = vsel %vm3530_vm2, %v3502_v39, %v3558_v21 }
 0x210   : > { %v3506_v53 = vadd.f32 %v5860_v32, %v3471_v36  ;;  %v3434_v5 = vadd.f32 %v3383_v3, %v3149_v11  ;;  %v3437_v58 = vadd.f32 %v4744_v4, %v3152_v18  ;;  %v3150_v43 = vadd.f32 %v3101_v25, %v5972_v34 }
 0x211   : > { %v4703_v45 = vpop.f32.mrf.mxu1  ;;  %v4747_v12 = vpop.f32.mrf.mxu0  ;;  %v3584_v61 = vsel %vm3528_vm3, %v3500_v13, %v3556_v63  ;;  %v3587_v0 = vsel %vm3531_vm4, %v3503_v35, %v3559_v33  ;;  %vm3529_vm5 = vcmp.ge.f32.partialorder %v3501_v41, 0.0  ;;  %v3557_v47 = vmul.f32 0.1, %v3501_v41 }
 0x212   : > { %v4120_v6 = vpack.c.bf16 %v3587_v0, %v3586_v57  ;;  %vm3534_vm6 = vcmp.ge.f32.partialorder %v3506_v53, 0.0  ;;  %v3469_v38 = vmul.f32 %v5850_v2, %v3434_v5  ;;  %v3472_v51 = vmul.f32 %v5850_v2, %v3437_v58 }
 0x213   : > { %v3114_v24 = vpop.f32.mrf.mxu1  ;;  %v3399_v49 = vpop.f32.mrf.mxu0  ;;  %v3585_v17 = vsel %vm3529_vm5, %v3501_v41, %v3557_v47  ;;  %v3435_v27 = vadd.f32 %v3386_v16, %v3150_v43  ;;  %v3155_v34 = vadd.f32 %v4703_v45, %v5975_v19  ;;  %v3562_v29 = vmul.f32 0.1, %v3506_v53 }
 0x214   : > { %v3153_v52 = vadd.f32 %v3114_v24, %v5980_v59  ;;  %4150 = vst [vmem:[%s5916_s27 + $0x48] sm:$0xff] %v4120_v6   ;;  %v4115_v50 = vpack.c.bf16 %v3585_v17, %v3584_v61  ;;  %v3504_v42 = vadd.f32 %v5860_v32, %v3469_v38  ;;  %v3507_v39 = vadd.f32 %v5860_v32, %v3472_v51 }
 0x215   : > { %v4704_v55 = vpop.f32.mrf.mxu1  ;;  %v3470_v60 = vmul.f32 %v5850_v2, %v3435_v27  ;;  %v3440_v10 = vadd.f32 %v4747_v12, %v3155_v34  ;;  %v4748_v7 = vpop.f32.mrf.mxu0  ;;  %v2684_v48 = vadd.f32 %v5835_v62, %v2334_v54  ;;  %v3590_v13 = vsel %vm3534_vm6, %v3506_v53, %v3562_v29 }
 0x216   : > { %v3438_v40 = vadd.f32 %v3399_v49, %v3153_v52  ;;  %v3156_v8 = vadd.f32 %v4704_v55, %v2686_v26  ;;  %4149 = vst [vmem:[%s5916_s27 + $0x40] sm:$0xff] %v4115_v50   ;;  %v3560_v19 = vmul.f32 0.1, %v3504_v42  ;;  %vm3535_vm7 = vcmp.ge.f32.partialorder %v3507_v39, 0.0 }
 0x217   : > { %v3563_v59 = vmul.f32 0.1, %v3507_v39  ;;  %v3117_v20 = vpop.f32.mrf.mxu1  ;;  %v3505_v44 = vadd.f32 %v5860_v32, %v3470_v60  ;;  %v3475_v37 = vmul.f32 %v5850_v2, %v3440_v10  ;;  %vm3532_vm8 = vcmp.ge.f32.partialorder %v3504_v42, 0.0  ;;  %v3402_v56 = vpop.f32.mrf.mxu0 }
 0x218   : > { %v3473_v31 = vmul.f32 %v5850_v2, %v3438_v40  ;;  %v3441_v23 = vadd.f32 %v4748_v7, %v3156_v8  ;;  %v3154_v3 = vadd.f32 %v3117_v20, %v2684_v48  ;;  %v3588_v21 = vsel %vm3532_vm8, %v3504_v42, %v3560_v19 }
 0x219   : > { %v3591_v30 = vsel %vm3535_vm7, %v3507_v39, %v3563_v59  ;;  %vm3533_vm9 = vcmp.ge.f32.partialorder %v3505_v44, 0.0  ;;  %v3561_v62 = vmul.f32 0.1, %v3505_v44  ;;  %v3510_v14 = vadd.f32 %v5860_v32, %v3475_v37 }
 0x21a   : > { %v4130_v28 = vpack.c.bf16 %v3591_v30, %v3590_v13  ;;  %v3476_v1 = vmul.f32 %v5850_v2, %v3441_v23  ;;  %v3439_v22 = vadd.f32 %v3402_v56, %v3154_v3  ;;  %v3508_v46 = vadd.f32 %v5860_v32, %v3473_v31 }
 0x21b   : > { %v3589_v63 = vsel %vm3533_vm9, %v3505_v44, %v3561_v62  ;;  %v3566_v35 = vmul.f32 0.1, %v3510_v14  ;;  %vm3538_vm10 = vcmp.ge.f32.partialorder %v3510_v14, 0.0 }
 0x21c   : > { %4152 = vst [vmem:[%s5916_s27 + $0x58] sm:$0xff] %v4130_v28   ;;  %v4125_v4 = vpack.c.bf16 %v3589_v63, %v3588_v21  ;;  %v3511_v15 = vadd.f32 %v5860_v32, %v3476_v1  ;;  %v3474_v36 = vmul.f32 %v5850_v2, %v3439_v22  ;;  %v3564_v26 = vmul.f32 0.1, %v3508_v46 }
 0x21d   : > { %v3594_v54 = vsel %vm3538_vm10, %v3510_v14, %v3566_v35  ;;  %vm3536_vm12 = vcmp.ge.f32.partialorder %v3508_v46, 0.0 }
 0x21e   : > { %4151 = vst [vmem:[%s5916_s27 + $0x50] sm:$0xff] %v4125_v4   ;;  %vm3539_vm11 = vcmp.ge.f32.partialorder %v3511_v15, 0.0  ;;  %v3567_v11 = vmul.f32 0.1, %v3511_v15  ;;  %v3509_v9 = vadd.f32 %v5860_v32, %v3474_v36  ;;  %v3592_v33 = vsel %vm3536_vm12, %v3508_v46, %v3564_v26 }
 0x220   : > { %v3595_v18 = vsel %vm3539_vm11, %v3511_v15, %v3567_v11  ;;  %vm3537_vm13 = vcmp.ge.f32.partialorder %v3509_v9, 0.0  ;;  %v3565_v16 = vmul.f32 0.1, %v3509_v9 }
 0x221   : > { %v4140_v25 = vpack.c.bf16 %v3595_v18, %v3594_v54 }
 0x222   : > { %v3593_v41 = vsel %vm3537_vm13, %v3509_v9, %v3565_v16 }
 0x223   : > { %4154 = vst [vmem:[%s5916_s27 + $0x68] sm:$0xff] %v4140_v25   ;;  %v4135_v53 = vpack.c.bf16 %v3593_v41, %v3592_v33 }
 0x225   : > { %4153 = vst [vmem:[%s5916_s27 + $0x60] sm:$0xff] %v4135_v53  }
 0x226 PF: > { %s16_s17 = sadd.s32 1, %s5080_s17   ;;  %s6105_s15 = smov %s5076_s16 }
 0x227   : > { %p13_p2 = scmp.ge.s32.totalorder %s16_s17, 4   ;;  %s6106_s16 = smov %s6108_s23 }
 0x229   :  { %15 = sbr.rel (!%p13_p2) target bundleno = 3 (0x3), region = 90 }
 0x22e   :  { %3763 = vsyncpa [#allocation3], 1 }
 0x22f   :  { %3765 = vsyncpa [#allocation3 + $0x1], 1 }
 0x230   :  { %3766 = vsyncpa [#allocation5], 1 }

// kernel: _lambda_.11
= control target key start
LH: loop header
LB: loop body
LE: loop exit
PB: predicated region body
PF: predicated region fallthrough
CT: control target
= control target key end

     0   :  { %s1338_s12 = smov 0   ;;  %s1340_s13 = smov 0   ;;  %s1616_s0 = inlined_call_operand.vmem [shape: bf16[16,512], index: 0, kind: input, shape index: {}]   ;;  %s1617_s1 = inlined_call_operand.vmem [shape: bf16[512,1536], index: 1, kind: input, shape index: {}]   ;;  %s1618_s2 = inlined_call_operand.vmem [shape: f32[1,1536], index: 2, kind: input, shape index: {}]   ;;  %s1619_s3 = inlined_call_operand.vmem [shape: f32[16,1536], index: 3, kind: output, shape index: {}]  }
   0x1   :  { %s1342_s14 = smov 0  }
   0x2 LB: > { %s1354_s15 = sadd.s32 4294967295, %s1316_s14   ;;  %s1357_s16 = sadd.s32 1, %s1316_s14   ;;  %s1316_s14 = sphi %s1342_s14, %s1623_s14   ;;  %s1312_s13 = sphi %s1340_s13, %s1622_s13   ;;  %s1308_s12 = sphi %s1338_s12, %s1621_s12  }
   0x3   : > { %s38_s17 = ssub.s32 %s1316_s14, %s1357_s16  ;;  %s41_s18 = sadd.s32 1, %s1312_s13 }
   0x4   : > { %p39_p0 = scmp.eq.s32.totalorder %s38_s17, 0  ;;  %p48_p1 = scmp.ne.s32.totalorder %s1312_s13, %s1308_s12 }
   0x5   : > { %p49_p2 = scmp.eq.s32.totalorder %s1316_s14, 0  ;;  %p104_p3 = scmp.eq.s32.totalorder %s1354_s15, 5 }
   0x6   : > { %s1367_s19 = scalar_select %p39_p0, %s1312_s13, %s41_s18  }
   0x7   : > { %p50_p4 = por %p49_p2, %p48_p1  ;;  %p1369_p5 = por %p104_p3, %p48_p1 }
   0x8   : > { %p1085_p6 = scmp.ge.s32.totalorder %s1316_s14, 6 }
   0xa   : > { %129 = sbr.rel (%p1085_p6) target bundleno = 51 (0x33), region = 20 }
   0xf   : > { %132 = sbr.rel (!%p50_p4) target bundleno = 51 (0x33), region = 24  ;;  %s134_s21 = sand.u32 (%p50_p4), 1, %s1312_s13  }
  0x10   : > { %s1166_s22 = sshll.u32 (%p50_p4), %s1316_s14, 3  ;;  %s1086_s23 = sshll.u32 (%p50_p4), %s134_s21, 9 }
  0x11   : > { %s1379_s26 = scalar_lea.vmem (%p50_p4), %s1617_s1, %s1166_s22  ;;  %s1384_s27 = scalar_lea.vmem (%p50_p4), [#allocation2], %s1086_s23 }
  0x12   : > { %v294_v0 = vld [vmem:[%s1379_s26] sm:$0xff] (%p50_p4)  ;;  %v296_v1 = vld [vmem:[%s1379_s26 + $0x30] sm:$0xff] (%p50_p4) }
  0x13   : > { %v298_v2 = vld [vmem:[%s1379_s26 + $0x60] sm:$0xff] (%p50_p4)  ;;  %295 = vst [vmem:[%s1384_s27] sm:$0xff] (%p50_p4), %v294_v0  ;;  %297 = vst [vmem:[%s1384_s27 + $0x8] sm:$0xff] (%p50_p4), %v296_v1  ;;  %v300_v3 = vld [vmem:[%s1379_s26 + $0x90] sm:$0xff] (%p50_p4) }
  0x14   : > { %299 = vst [vmem:[%s1384_s27 + $0x10] sm:$0xff] %v298_v2  ;;  %v302_v4 = vld [vmem:[%s1379_s26 + $0xc0] sm:$0xff]  ;;  %v304_v5 = vld [vmem:[%s1379_s26 + $0xf0] sm:$0xff]  ;;  %301 = vst [vmem:[%s1384_s27 + $0x18] sm:$0xff] %v300_v3 }
  0x15   : > { %303 = vst [vmem:[%s1384_s27 + $0x20] sm:$0xff] %v302_v4  ;;  %305 = vst [vmem:[%s1384_s27 + $0x28] sm:$0xff] %v304_v5  ;;  %v306_v6 = vld [vmem:[%s1379_s26 + $0x120] sm:$0xff]  ;;  %v308_v7 = vld [vmem:[%s1379_s26 + $0x150] sm:$0xff] }
  0x16   : > { %v310_v8 = vld [vmem:[%s1379_s26 + $0x180] sm:$0xff]  ;;  %307 = vst [vmem:[%s1384_s27 + $0x30] sm:$0xff] %v306_v6  ;;  %309 = vst [vmem:[%s1384_s27 + $0x38] sm:$0xff] %v308_v7  ;;  %v312_v9 = vld [vmem:[%s1379_s26 + $0x1b0] sm:$0xff] }
  0x17   : > { %311 = vst [vmem:[%s1384_s27 + $0x40] sm:$0xff] %v310_v8  ;;  %v314_v10 = vld [vmem:[%s1379_s26 + $0x1e0] sm:$0xff]  ;;  %v316_v11 = vld [vmem:[%s1379_s26 + $0x210] sm:$0xff]  ;;  %313 = vst [vmem:[%s1384_s27 + $0x48] sm:$0xff] %v312_v9 }
  0x18   : > { %315 = vst [vmem:[%s1384_s27 + $0x50] sm:$0xff] %v314_v10  ;;  %317 = vst [vmem:[%s1384_s27 + $0x58] sm:$0xff] %v316_v11  ;;  %v318_v12 = vld [vmem:[%s1379_s26 + $0x240] sm:$0xff]  ;;  %v320_v13 = vld [vmem:[%s1379_s26 + $0x270] sm:$0xff] }
  0x19   : > { %v322_v14 = vld [vmem:[%s1379_s26 + $0x2a0] sm:$0xff]  ;;  %319 = vst [vmem:[%s1384_s27 + $0x60] sm:$0xff] %v318_v12  ;;  %321 = vst [vmem:[%s1384_s27 + $0x68] sm:$0xff] %v320_v13  ;;  %v324_v15 = vld [vmem:[%s1379_s26 + $0x2d0] sm:$0xff] }
  0x1a   : > { %323 = vst [vmem:[%s1384_s27 + $0x70] sm:$0xff] %v322_v14  ;;  %v326_v16 = vld [vmem:[%s1379_s26 + $0x300] sm:$0xff]  ;;  %v328_v17 = vld [vmem:[%s1379_s26 + $0x330] sm:$0xff]  ;;  %325 = vst [vmem:[%s1384_s27 + $0x78] sm:$0xff] %v324_v15 }
  0x1b   : > { %327 = vst [vmem:[%s1384_s27 + $0x80] sm:$0xff] %v326_v16  ;;  %329 = vst [vmem:[%s1384_s27 + $0x88] sm:$0xff] %v328_v17  ;;  %v330_v18 = vld [vmem:[%s1379_s26 + $0x360] sm:$0xff]  ;;  %v332_v19 = vld [vmem:[%s1379_s26 + $0x390] sm:$0xff] }
  0x1c   : > { %v334_v20 = vld [vmem:[%s1379_s26 + $0x3c0] sm:$0xff]  ;;  %331 = vst [vmem:[%s1384_s27 + $0x90] sm:$0xff] %v330_v18  ;;  %333 = vst [vmem:[%s1384_s27 + $0x98] sm:$0xff] %v332_v19  ;;  %v336_v21 = vld [vmem:[%s1379_s26 + $0x3f0] sm:$0xff] }
  0x1d   : > { %335 = vst [vmem:[%s1384_s27 + $0xa0] sm:$0xff] %v334_v20  ;;  %v338_v22 = vld [vmem:[%s1379_s26 + $0x420] sm:$0xff]  ;;  %v340_v23 = vld [vmem:[%s1379_s26 + $0x450] sm:$0xff]  ;;  %337 = vst [vmem:[%s1384_s27 + $0xa8] sm:$0xff] %v336_v21 }
  0x1e   : > { %339 = vst [vmem:[%s1384_s27 + $0xb0] sm:$0xff] %v338_v22  ;;  %341 = vst [vmem:[%s1384_s27 + $0xb8] sm:$0xff] %v340_v23  ;;  %v342_v24 = vld [vmem:[%s1379_s26 + $0x480] sm:$0xff]  ;;  %v344_v25 = vld [vmem:[%s1379_s26 + $0x4b0] sm:$0xff] }
  0x1f   : > { %v346_v26 = vld [vmem:[%s1379_s26 + $0x4e0] sm:$0xff]  ;;  %343 = vst [vmem:[%s1384_s27 + $0xc0] sm:$0xff] %v342_v24  ;;  %345 = vst [vmem:[%s1384_s27 + $0xc8] sm:$0xff] %v344_v25  ;;  %v348_v27 = vld [vmem:[%s1379_s26 + $0x510] sm:$0xff] }
  0x20   : > { %347 = vst [vmem:[%s1384_s27 + $0xd0] sm:$0xff] %v346_v26  ;;  %v350_v28 = vld [vmem:[%s1379_s26 + $0x540] sm:$0xff]  ;;  %v352_v29 = vld [vmem:[%s1379_s26 + $0x570] sm:$0xff]  ;;  %349 = vst [vmem:[%s1384_s27 + $0xd8] sm:$0xff] %v348_v27 }
  0x21   : > { %351 = vst [vmem:[%s1384_s27 + $0xe0] sm:$0xff] %v350_v28  ;;  %353 = vst [vmem:[%s1384_s27 + $0xe8] sm:$0xff] %v352_v29  ;;  %v354_v30 = vld [vmem:[%s1379_s26 + $0x5a0] sm:$0xff]  ;;  %v356_v31 = vld [vmem:[%s1379_s26 + $0x5d0] sm:$0xff] }
  0x22   : > { %v358_v32 = vld [vmem:[%s1379_s26 + $0x600] sm:$0xff]  ;;  %355 = vst [vmem:[%s1384_s27 + $0xf0] sm:$0xff] %v354_v30  ;;  %357 = vst [vmem:[%s1384_s27 + $0xf8] sm:$0xff] %v356_v31  ;;  %v360_v33 = vld [vmem:[%s1379_s26 + $0x630] sm:$0xff] }
  0x23   : > { %359 = vst [vmem:[%s1384_s27 + $0x100] sm:$0xff] %v358_v32  ;;  %v362_v34 = vld [vmem:[%s1379_s26 + $0x660] sm:$0xff]  ;;  %v364_v35 = vld [vmem:[%s1379_s26 + $0x690] sm:$0xff]  ;;  %361 = vst [vmem:[%s1384_s27 + $0x108] sm:$0xff] %v360_v33 }
  0x24   : > { %363 = vst [vmem:[%s1384_s27 + $0x110] sm:$0xff] %v362_v34  ;;  %365 = vst [vmem:[%s1384_s27 + $0x118] sm:$0xff] %v364_v35  ;;  %v366_v36 = vld [vmem:[%s1379_s26 + $0x6c0] sm:$0xff]  ;;  %v368_v37 = vld [vmem:[%s1379_s26 + $0x6f0] sm:$0xff] }
  0x25   : > { %v370_v38 = vld [vmem:[%s1379_s26 + $0x720] sm:$0xff]  ;;  %367 = vst [vmem:[%s1384_s27 + $0x120] sm:$0xff] %v366_v36  ;;  %369 = vst [vmem:[%s1384_s27 + $0x128] sm:$0xff] %v368_v37  ;;  %v372_v39 = vld [vmem:[%s1379_s26 + $0x750] sm:$0xff] }
  0x26   : > { %371 = vst [vmem:[%s1384_s27 + $0x130] sm:$0xff] %v370_v38  ;;  %v374_v40 = vld [vmem:[%s1379_s26 + $0x780] sm:$0xff]  ;;  %v376_v41 = vld [vmem:[%s1379_s26 + $0x7b0] sm:$0xff]  ;;  %373 = vst [vmem:[%s1384_s27 + $0x138] sm:$0xff] %v372_v39 }
  0x27   : > { %375 = vst [vmem:[%s1384_s27 + $0x140] sm:$0xff] %v374_v40  ;;  %377 = vst [vmem:[%s1384_s27 + $0x148] sm:$0xff] %v376_v41  ;;  %v378_v42 = vld [vmem:[%s1379_s26 + $0x7e0] sm:$0xff]  ;;  %v380_v43 = vld [vmem:[%s1379_s26 + $0x810] sm:$0xff] }
  0x28   : > { %v382_v44 = vld [vmem:[%s1379_s26 + $0x840] sm:$0xff]  ;;  %379 = vst [vmem:[%s1384_s27 + $0x150] sm:$0xff] %v378_v42  ;;  %381 = vst [vmem:[%s1384_s27 + $0x158] sm:$0xff] %v380_v43  ;;  %v384_v45 = vld [vmem:[%s1379_s26 + $0x870] sm:$0xff] }
  0x29   : > { %383 = vst [vmem:[%s1384_s27 + $0x160] sm:$0xff] %v382_v44  ;;  %v386_v46 = vld [vmem:[%s1379_s26 + $0x8a0] sm:$0xff]  ;;  %v388_v47 = vld [vmem:[%s1379_s26 + $0x8d0] sm:$0xff]  ;;  %385 = vst [vmem:[%s1384_s27 + $0x168] sm:$0xff] %v384_v45 }
  0x2a   : > { %387 = vst [vmem:[%s1384_s27 + $0x170] sm:$0xff] %v386_v46  ;;  %389 = vst [vmem:[%s1384_s27 + $0x178] sm:$0xff] %v388_v47  ;;  %v390_v48 = vld [vmem:[%s1379_s26 + $0x900] sm:$0xff]  ;;  %v392_v49 = vld [vmem:[%s1379_s26 + $0x930] sm:$0xff] }
  0x2b   : > { %v394_v50 = vld [vmem:[%s1379_s26 + $0x960] sm:$0xff]  ;;  %391 = vst [vmem:[%s1384_s27 + $0x180] sm:$0xff] %v390_v48  ;;  %393 = vst [vmem:[%s1384_s27 + $0x188] sm:$0xff] %v392_v49  ;;  %v396_v51 = vld [vmem:[%s1379_s26 + $0x990] sm:$0xff] }
  0x2c   : > { %395 = vst [vmem:[%s1384_s27 + $0x190] sm:$0xff] %v394_v50  ;;  %v398_v52 = vld [vmem:[%s1379_s26 + $0x9c0] sm:$0xff]  ;;  %v400_v53 = vld [vmem:[%s1379_s26 + $0x9f0] sm:$0xff]  ;;  %397 = vst [vmem:[%s1384_s27 + $0x198] sm:$0xff] %v396_v51 }
  0x2d   : > { %399 = vst [vmem:[%s1384_s27 + $0x1a0] sm:$0xff] %v398_v52  ;;  %401 = vst [vmem:[%s1384_s27 + $0x1a8] sm:$0xff] %v400_v53  ;;  %v402_v54 = vld [vmem:[%s1379_s26 + $0xa20] sm:$0xff]  ;;  %v404_v55 = vld [vmem:[%s1379_s26 + $0xa50] sm:$0xff] }
  0x2e   : > { %v406_v56 = vld [vmem:[%s1379_s26 + $0xa80] sm:$0xff]  ;;  %403 = vst [vmem:[%s1384_s27 + $0x1b0] sm:$0xff] %v402_v54  ;;  %405 = vst [vmem:[%s1384_s27 + $0x1b8] sm:$0xff] %v404_v55  ;;  %v408_v57 = vld [vmem:[%s1379_s26 + $0xab0] sm:$0xff] }
  0x2f   : > { %407 = vst [vmem:[%s1384_s27 + $0x1c0] sm:$0xff] %v406_v56  ;;  %v410_v58 = vld [vmem:[%s1379_s26 + $0xae0] sm:$0xff]  ;;  %v412_v59 = vld [vmem:[%s1379_s26 + $0xb10] sm:$0xff]  ;;  %409 = vst [vmem:[%s1384_s27 + $0x1c8] sm:$0xff] %v408_v57 }
  0x30   : > { %411 = vst [vmem:[%s1384_s27 + $0x1d0] sm:$0xff] %v410_v58  ;;  %413 = vst [vmem:[%s1384_s27 + $0x1d8] sm:$0xff] %v412_v59  ;;  %v414_v60 = vld [vmem:[%s1379_s26 + $0xb40] sm:$0xff]  ;;  %v416_v61 = vld [vmem:[%s1379_s26 + $0xb70] sm:$0xff] }
  0x31   : > { %v418_v62 = vld [vmem:[%s1379_s26 + $0xba0] sm:$0xff]  ;;  %415 = vst [vmem:[%s1384_s27 + $0x1e0] sm:$0xff] %v414_v60  ;;  %417 = vst [vmem:[%s1384_s27 + $0x1e8] sm:$0xff] %v416_v61  ;;  %v420_v63 = vld [vmem:[%s1379_s26 + $0xbd0] sm:$0xff] }
  0x32   : > { %419 = vst [vmem:[%s1384_s27 + $0x1f0] sm:$0xff] %v418_v62  ;;  %421 = vst [vmem:[%s1384_s27 + $0x1f8] sm:$0xff] %v420_v63 }
  0x33 PF: > { %p1089_p7 = scmp.ge.s32.totalorder %s1316_s14, 1  ;;  %p434_p8 = scmp.lt.s32.totalorder %s1316_s14, 7 }
  0x35   : > { %p435_p9 = pnand %p1089_p7, %p434_p8 }
  0x36   : > { %s441_s28 = sand.u32 (!%p435_p9), 1, %s1308_s12   ;;  %s1092_s14 = sshll.u32 (!%p435_p9), %s1354_s15, 1 }
  0x37   : > { %438 = sbr.rel (%p435_p9) target bundleno = 338 (0x152), region = 66  ;;  %s1090_s29 = sshll.u32 (!%p435_p9), %s441_s28, 9 }
  0x38   : > { %s1522_s7 = scalar_lea.vmem (!%p435_p9), [#allocation2], %s1090_s29  ;;  %p469_p10 = scmp.lt.s32.totalorder (!%p435_p9), %s1092_s14, 11 }
  0x39   : > { %s1091_s22 = sshll.u32 (!%p435_p9), %s441_s28, 5 }
  0x3a   : > { %s466_s23 = scalar_lea.vmem (!%p435_p9), [#allocation3], %s1091_s22 }
  0x3c   : > { %v1290_v0 = vld [vmem:[%s1616_s0 + $0x4] ss:$16 sps:$4 sm:$0xff]   ;;  %v1293_v1 = vld [vmem:[%s1616_s0 + $0xc] ss:$16 sps:$4 sm:$0xff]   ;;  %v1196_v4 = vld [vmem:[%s1522_s7 + $0x70] ss:$8 sps:$4 sm:$0xff]  }
  0x3d   : > { %v1192_v2 = vld [vmem:[%s1522_s7 + $0x74] ss:$8 sps:$4 sm:$0xff]   ;;  %926 = vmatprep.mubr.bf16.mxu0 %v1290_v0  ;;  %969 = vmatprep.mubr.bf16.mxu1 %v1293_v1  ;;  %v1197_v5 = vld [vmem:[%s1522_s7 + $0x170] ss:$8 sps:$4 sm:$0xff]   ;;  %v1198_v6 = vld [vmem:[%s1522_s7 + $0x64] ss:$8 sps:$4 sm:$0xff]  }
  0x3e   : > { %v1194_v3 = vld [vmem:[%s1522_s7 + $0x174] ss:$8 sps:$4 sm:$0xff]   ;;  %894 = vmatprep.subr.bf16.mxu0 %v1192_v2  ;;  %v1200_v7 = vld [vmem:[%s1522_s7 + $0x164] ss:$8 sps:$4 sm:$0xff]   ;;  %v1202_v8 = vld [vmem:[%s1522_s7 + $0x60] ss:$8 sps:$4 sm:$0xff]  }
  0x3f   : > { %937 = vmatprep.subr.bf16.mxu1 %v1194_v3  ;;  %895 = vmatpush1.bf16.msra.mxu0 %v1196_v4  ;;  %v1203_v9 = vld [vmem:[%s1522_s7 + $0x160] ss:$8 sps:$4 sm:$0xff]   ;;  %v1204_v10 = vld [vmem:[%s1522_s7 + $0x54] ss:$8 sps:$4 sm:$0xff]   ;;  %v1208_v12 = vld [vmem:[%s1522_s7 + $0x50] ss:$8 sps:$4 sm:$0xff]   ;;  %v544_v4 = vlaneseq }
  0x40   : > { %938 = vmatpush1.bf16.msra.mxu1 %v1197_v5  ;;  %896 = vmatprep.subr.bf16.mxu0 %v1198_v6  ;;  %v1206_v11 = vld [vmem:[%s1522_s7 + $0x154] ss:$8 sps:$4 sm:$0xff]   ;;  %v1209_v13 = vld [vmem:[%s1522_s7 + $0x150] ss:$8 sps:$4 sm:$0xff]   ;;  %v1210_v14 = vld [vmem:[%s1522_s7 + $0x44] ss:$8 sps:$4 sm:$0xff]  }
  0x41   : > { %939 = vmatprep.subr.bf16.mxu1 %v1200_v7  ;;  %v1212_v15 = vld [vmem:[%s1522_s7 + $0x144] ss:$8 sps:$4 sm:$0xff]   ;;  %v1214_v16 = vld [vmem:[%s1522_s7 + $0x40] ss:$8 sps:$4 sm:$0xff]   ;;  %v1216_v18 = vld [vmem:[%s1522_s7 + $0x34] ss:$8 sps:$4 sm:$0xff]  }
  0x42   : > { %v1215_v17 = vld [vmem:[%s1522_s7 + $0x140] ss:$8 sps:$4 sm:$0xff]   ;;  %v1218_v19 = vld [vmem:[%s1522_s7 + $0x134] ss:$8 sps:$4 sm:$0xff]   ;;  %v1220_v20 = vld [vmem:[%s1522_s7 + $0x30] ss:$8 sps:$4 sm:$0xff]  }
  0x43   : > { %897 = vmatpush1.bf16.msra.mxu0 %v1202_v8  ;;  %v1221_v21 = vld [vmem:[%s1522_s7 + $0x130] ss:$8 sps:$4 sm:$0xff]   ;;  %v1222_v22 = vld [vmem:[%s1522_s7 + $0x24] ss:$8 sps:$4 sm:$0xff]   ;;  %v1226_v24 = vld [vmem:[%s1522_s7 + $0x20] ss:$8 sps:$4 sm:$0xff]  }
  0x44   : > { %940 = vmatpush1.bf16.msra.mxu1 %v1203_v9  ;;  %898 = vmatprep.subr.bf16.mxu0 %v1204_v10  ;;  %v1224_v23 = vld [vmem:[%s1522_s7 + $0x124] ss:$8 sps:$4 sm:$0xff]   ;;  %v1227_v25 = vld [vmem:[%s1522_s7 + $0x120] ss:$8 sps:$4 sm:$0xff]   ;;  %v1228_v26 = vld [vmem:[%s1522_s7 + $0x14] ss:$8 sps:$4 sm:$0xff]  }
  0x45   : > { %941 = vmatprep.subr.bf16.mxu1 %v1206_v11  ;;  %v1230_v27 = vld [vmem:[%s1522_s7 + $0x114] ss:$8 sps:$4 sm:$0xff]   ;;  %v1232_v28 = vld [vmem:[%s1522_s7 + $0x10] ss:$8 sps:$4 sm:$0xff]   ;;  %v1234_v30 = vld [vmem:[%s1522_s7 + $0x4] ss:$8 sps:$4 sm:$0xff]  }
  0x46   : > { %v1233_v29 = vld [vmem:[%s1522_s7 + $0x110] ss:$8 sps:$4 sm:$0xff]   ;;  %v1236_v31 = vld [vmem:[%s1522_s7 + $0x104] ss:$8 sps:$4 sm:$0xff]   ;;  %v1238_v32 = vld [vmem:[%s1522_s7] ss:$8 sps:$4 sm:$0xff]  }
  0x47   : > { %899 = vmatpush1.bf16.msra.mxu0 %v1208_v12  ;;  %v1239_v33 = vld [vmem:[%s1522_s7 + $0x100] ss:$8 sps:$4 sm:$0xff]   ;;  %v1240_v34 = vld [vmem:[%s1522_s7 + $0xf4] ss:$8 sps:$4 sm:$0xff]   ;;  %v1244_v36 = vld [vmem:[%s1522_s7 + $0xf0] ss:$8 sps:$4 sm:$0xff]  }
  0x48   : > { %942 = vmatpush1.bf16.msra.mxu1 %v1209_v13  ;;  %900 = vmatprep.subr.bf16.mxu0 %v1210_v14  ;;  %v1242_v35 = vld [vmem:[%s1522_s7 + $0x1f4] ss:$8 sps:$4 sm:$0xff]   ;;  %v1245_v37 = vld [vmem:[%s1522_s7 + $0x1f0] ss:$8 sps:$4 sm:$0xff]   ;;  %v1246_v38 = vld [vmem:[%s1522_s7 + $0xe4] ss:$8 sps:$4 sm:$0xff]  }
  0x49   : > { %943 = vmatprep.subr.bf16.mxu1 %v1212_v15  ;;  %v1248_v39 = vld [vmem:[%s1522_s7 + $0x1e4] ss:$8 sps:$4 sm:$0xff]   ;;  %v1250_v40 = vld [vmem:[%s1522_s7 + $0xe0] ss:$8 sps:$4 sm:$0xff]   ;;  %v1252_v42 = vld [vmem:[%s1522_s7 + $0xd4] ss:$8 sps:$4 sm:$0xff]  }
  0x4a   : > { %v1251_v41 = vld [vmem:[%s1522_s7 + $0x1e0] ss:$8 sps:$4 sm:$0xff]   ;;  %v1254_v43 = vld [vmem:[%s1522_s7 + $0x1d4] ss:$8 sps:$4 sm:$0xff]   ;;  %v1256_v44 = vld [vmem:[%s1522_s7 + $0xd0] ss:$8 sps:$4 sm:$0xff]  }
  0x4b   : > { %901 = vmatpush1.bf16.msra.mxu0 %v1214_v16  ;;  %v1257_v45 = vld [vmem:[%s1522_s7 + $0x1d0] ss:$8 sps:$4 sm:$0xff]   ;;  %v1258_v46 = vld [vmem:[%s1522_s7 + $0xc4] ss:$8 sps:$4 sm:$0xff]   ;;  %v1262_v48 = vld [vmem:[%s1522_s7 + $0xc0] ss:$8 sps:$4 sm:$0xff]  }
  0x4c   : > { %944 = vmatpush1.bf16.msra.mxu1 %v1215_v17  ;;  %902 = vmatprep.subr.bf16.mxu0 %v1216_v18  ;;  %v1260_v47 = vld [vmem:[%s1522_s7 + $0x1c4] ss:$8 sps:$4 sm:$0xff]   ;;  %v1263_v49 = vld [vmem:[%s1522_s7 + $0x1c0] ss:$8 sps:$4 sm:$0xff]   ;;  %v1264_v50 = vld [vmem:[%s1522_s7 + $0xb4] ss:$8 sps:$4 sm:$0xff]  }
  0x4d   : > { %945 = vmatprep.subr.bf16.mxu1 %v1218_v19  ;;  %v1266_v51 = vld [vmem:[%s1522_s7 + $0x1b4] ss:$8 sps:$4 sm:$0xff]   ;;  %v1268_v52 = vld [vmem:[%s1522_s7 + $0xb0] ss:$8 sps:$4 sm:$0xff]   ;;  %v1270_v54 = vld [vmem:[%s1522_s7 + $0xa4] ss:$8 sps:$4 sm:$0xff]  }
  0x4e   : > { %v1269_v53 = vld [vmem:[%s1522_s7 + $0x1b0] ss:$8 sps:$4 sm:$0xff]   ;;  %v1272_v55 = vld [vmem:[%s1522_s7 + $0x1a4] ss:$8 sps:$4 sm:$0xff]   ;;  %v1274_v56 = vld [vmem:[%s1522_s7 + $0xa0] ss:$8 sps:$4 sm:$0xff]  }
  0x4f   : > { %903 = vmatpush1.bf16.msra.mxu0 %v1220_v20  ;;  %v1275_v57 = vld [vmem:[%s1522_s7 + $0x1a0] ss:$8 sps:$4 sm:$0xff]   ;;  %v1276_v58 = vld [vmem:[%s1522_s7 + $0x94] ss:$8 sps:$4 sm:$0xff]   ;;  %v1280_v60 = vld [vmem:[%s1522_s7 + $0x90] ss:$8 sps:$4 sm:$0xff]  }
  0x50   : > { %946 = vmatpush1.bf16.msra.mxu1 %v1221_v21  ;;  %904 = vmatprep.subr.bf16.mxu0 %v1222_v22  ;;  %v1278_v59 = vld [vmem:[%s1522_s7 + $0x194] ss:$8 sps:$4 sm:$0xff]   ;;  %v1281_v61 = vld [vmem:[%s1522_s7 + $0x190] ss:$8 sps:$4 sm:$0xff]   ;;  %v1282_v62 = vld [vmem:[%s1522_s7 + $0x84] ss:$8 sps:$4 sm:$0xff]  }
  0x51   : > { %947 = vmatprep.subr.bf16.mxu1 %v1224_v23  ;;  %v1284_v63 = vld [vmem:[%s1522_s7 + $0x184] ss:$8 sps:$4 sm:$0xff]   ;;  %v1286_v0 = vld [vmem:[%s1522_s7 + $0x80] ss:$8 sps:$4 sm:$0xff]   ;;  %s1625_s14 = smov (!%p469_p10, %s1092_s14), 11  ;;  %v545_v5 = vshrl.u32 %v544_v4, 7 }
  0x52   : > { %v1287_v1 = vld [vmem:[%s1522_s7 + $0x180] ss:$8 sps:$4 sm:$0xff]   ;;  %s471_s21 = scalar_lea.vmem %s1618_s2, %s1625_s14  ;;  %s1167_s12 = sshll.u32 (%p1369_p5), %s1354_s15, 4 }
  0x53   : > { %905 = vmatpush1.bf16.msra.mxu0 %v1226_v24  ;;  %v1288_v2 = vld [vmem:[%s1616_s0] ss:$16 sps:$4 sm:$0xff]   ;;  %v1291_v3 = vld [vmem:[%s1616_s0 + $0x8] ss:$16 sps:$4 sm:$0xff]   ;;  %v546_v6 = vsub.s32 0, %v545_v5  ;;  %v550_v8 = vsub.s32 1, %v545_v5  ;;  %s993_s26 = scalar_lea.vmem (%p1369_p5), %s1619_s3, %s1167_s12 }
  0x54   : > { %948 = vmatpush1.bf16.msra.mxu1 %v1227_v25  ;;  %906 = vmatprep.subr.bf16.mxu0 %v1228_v26  ;;  %v542_v7 = vld [vmem:[%s471_s21] sm:$0x3] }
  0x55   : > { %949 = vmatprep.subr.bf16.mxu1 %v1230_v27  ;;  %v547_v9 = vrot.slane %v542_v7, %v546_v6  ;;  %v551_v10 = vrot.slane %v542_v7, %v550_v8 }
  0x57   : > { %907 = vmatpush1.bf16.msra.mxu0 %v1232_v28 }
  0x58   : > { %950 = vmatpush1.bf16.msra.mxu1 %v1233_v29  ;;  %908 = vmatprep.subr.bf16.mxu0 %v1234_v30 }
  0x59   : > { %951 = vmatprep.subr.bf16.mxu1 %v1236_v31 }
  0x5b   : > { %909 = vmatpush1.bf16.msra.mxu0 %v1238_v32 }
  0x5c   : > { %952 = vmatpush1.bf16.msra.mxu1 %v1239_v33  ;;  %910 = vmatprep.subr.bf16.mxu0 %v1240_v34 }
  0x5d   : > { %953 = vmatprep.subr.bf16.mxu1 %v1242_v35 }
  0x5f   : > { %911 = vmatpush2.bf16.msra.mxu0 %v1244_v36 }
  0x60   : > { %954 = vmatpush2.bf16.msra.mxu1 %v1245_v37  ;;  %912 = vmatprep.subr.bf16.mxu0 %v1246_v38 }
  0x61   : > { %955 = vmatprep.subr.bf16.mxu1 %v1248_v39 }
  0x63   : > { %913 = vmatpush2.bf16.msra.mxu0 %v1250_v40 }
  0x64   : > { %956 = vmatpush2.bf16.msra.mxu1 %v1251_v41  ;;  %914 = vmatprep.subr.bf16.mxu0 %v1252_v42 }
  0x65   : > { %957 = vmatprep.subr.bf16.mxu1 %v1254_v43 }
  0x67   : > { %915 = vmatpush2.bf16.msra.mxu0 %v1256_v44 }
  0x68   : > { %958 = vmatpush2.bf16.msra.mxu1 %v1257_v45  ;;  %916 = vmatprep.subr.bf16.mxu0 %v1258_v46 }
  0x69   : > { %959 = vmatprep.subr.bf16.mxu1 %v1260_v47 }
  0x6b   : > { %917 = vmatpush2.bf16.msra.mxu0 %v1262_v48 }
  0x6c   : > { %960 = vmatpush2.bf16.msra.mxu1 %v1263_v49  ;;  %918 = vmatprep.subr.bf16.mxu0 %v1264_v50 }
  0x6d   : > { %961 = vmatprep.subr.bf16.mxu1 %v1266_v51 }
  0x6f   : > { %919 = vmatpush2.bf16.msra.mxu0 %v1268_v52 }
  0x70   : > { %962 = vmatpush2.bf16.msra.mxu1 %v1269_v53  ;;  %920 = vmatprep.subr.bf16.mxu0 %v1270_v54 }
  0x71   : > { %963 = vmatprep.subr.bf16.mxu1 %v1272_v55 }
  0x73   : > { %921 = vmatpush2.bf16.msra.mxu0 %v1274_v56 }
  0x74   : > { %964 = vmatpush2.bf16.msra.mxu1 %v1275_v57  ;;  %922 = vmatprep.subr.bf16.mxu0 %v1276_v58 }
  0x75   : > { %965 = vmatprep.subr.bf16.mxu1 %v1278_v59 }
  0x77   : > { %923 = vmatpush2.bf16.msra.mxu0 %v1280_v60 }
  0x78   : > { %966 = vmatpush2.bf16.msra.mxu1 %v1281_v61  ;;  %924 = vmatprep.subr.bf16.mxu0 %v1282_v62 }
  0x79   : > { %967 = vmatprep.subr.bf16.mxu1 %v1284_v63 }
  0x7b   : > { %925 = vmatpush2.bf16.msra.mxu0 %v1286_v0 }
  0x7c   : > { %968 = vmatpush2.bf16.msra.mxu1 %v1287_v1 }
  0x7e   : > { %927 = vmatmul.mubr.bf16.vlgmr.msra.gmra.mxu0 %v1288_v2 }
  0x7f   : > { %970 = vmatmul.mubr.bf16.vlgmr.msra.gmra.mxu1 %v1291_v3 }
 0x13e   : > { %v928_v11 = vpop.f32.mrf.mxu0 }
 0x13f   : > { %v971_v12 = vpop.f32.mrf.mxu1  ;;  %v929_v13 = vadd.f32 %v928_v11, %v547_v9 }
 0x140   : > { %v930_v14 = vpop.f32.mrf.mxu0 }
 0x141   : > { %v973_v15 = vpop.f32.mrf.mxu1  ;;  %v972_v16 = vadd.f32 %v971_v12, %v929_v13  ;;  %v931_v17 = vadd.f32 %v930_v14, %v551_v10 }
 0x142   : > { %v932_v18 = vpop.f32.mrf.mxu0 }
 0x143   : > { %v975_v19 = vpop.f32.mrf.mxu1  ;;  %980 = vst [vmem:[%s466_s23] sm:$0xff] %v972_v16  ;;  %v974_v20 = vadd.f32 %v973_v15, %v931_v17  ;;  %v933_v21 = vadd.f32 %v932_v18, %v547_v9 }
 0x144   : > { %v934_v22 = vpop.f32.mrf.mxu0 }
 0x145   : > { %981 = vst [vmem:[%s466_s23 + $0x8] sm:$0xff] %v974_v20  ;;  %v976_v23 = vadd.f32 %v975_v19, %v933_v21  ;;  %v935_v24 = vadd.f32 %v934_v22, %v551_v10  ;;  %v977_v25 = vpop.f32.mrf.mxu1  ;;  %990 = sbr.rel (!%p1369_p5) target bundleno = 338 (0x152), region = 74 }
 0x147   : > { %982 = vst [vmem:[%s466_s23 + $0x10] sm:$0xff] %v976_v23  ;;  %v978_v26 = vadd.f32 %v977_v25, %v935_v24 }
 0x149   : > { %983 = vst [vmem:[%s466_s23 + $0x18] sm:$0xff] %v978_v26 }
 0x14a   : > { %v1006_v27 = vld [vmem:[%s466_s23] sm:$0xff] }
 0x14b   : > { %1007 = vst [vmem:[%s993_s26] sm:$0xff] %v1006_v27 }
 0x14c   : > { %v1008_v28 = vld [vmem:[%s466_s23 + $0x8] sm:$0xff] }
 0x14d   : > { %1009 = vst [vmem:[%s993_s26 + $0x8] sm:$0xff] %v1008_v28 }
 0x14e   : > { %v1010_v29 = vld [vmem:[%s466_s23 + $0x10] sm:$0xff] }
 0x14f   : > { %1011 = vst [vmem:[%s993_s26 + $0x60] sm:$0xff] %v1010_v29 }
 0x150   : > { %v1012_v30 = vld [vmem:[%s466_s23 + $0x18] sm:$0xff] }
 0x151   : > { %1013 = vst [vmem:[%s993_s26 + $0x68] sm:$0xff] %v1012_v30 }
 0x152 PF: > { %p10_p11 = scmp.ge.s32.totalorder %s1357_s16, 8   ;;  %s1621_s12 = smov %s1312_s13 }
 0x153   : > { %s1622_s13 = smov %s1367_s19  ;;  %s1623_s14 = smov %s1357_s16 }
 0x154   :  { %12 = sbr.rel (!%p10_p11) target bundleno = 2 (0x2), region = 131 }

// kernel: _lambda_.10
= control target key start
LH: loop header
LB: loop body
LE: loop exit
PB: predicated region body
PF: predicated region fallthrough
CT: control target
= control target key end

     0   :  { %8 = vsyncpa [#allocation3], 0  ;;  %s10000_s0 = inlined_call_operand.vmem [shape: bf16[16,6272], index: 0, kind: input, shape index: {}]   ;;  %s10001_s1 = inlined_call_operand.hbm [shape: bf16[6272,512], index: 1, kind: input, shape index: {}]   ;;  %s10002_s2 = inlined_call_operand.hbm [shape: f32[1,512], index: 2, kind: input, shape index: {}]   ;;  %s10003_s3 = inlined_call_operand.vmem [shape: f32[16,512], index: 3, kind: output, shape index: {}]  }
   0x1   :  { %10 = vsyncpa [#allocation3 + $0x1], 0 }
   0x2   :  { %11 = vsyncpa [#allocation5], 0 }
   0x3   :  { %13 = vsyncpa [#allocation5 + $0x1], 0  ;;  %s8721_s12 = smov 0   ;;  %s8723_s13 = smov 0  }
   0x4   :  { %s8725_s14 = smov 0   ;;  %s8727_s15 = smov 0  }
   0x5 LB: > { %s8740_s16 = sadd.s32 4294967295, %s8693_s15   ;;  %s8743_s17 = sadd.s32 1, %s8693_s15   ;;  %s8693_s15 = sphi %s8727_s15, %s10027_s15   ;;  %s8689_s14 = sphi %s8725_s14, %s10026_s14   ;;  %s8685_s13 = sphi %s8723_s13, %s10025_s13   ;;  %s8681_s12 = sphi %s8721_s12, %s10024_s12  }
   0x6   : > { %s44_s18 = ssub.s32 %s8693_s15, %s8743_s17  ;;  %s47_s19 = sadd.s32 1, %s8689_s14 }
   0x7   : > { %p45_p0 = scmp.eq.s32.totalorder %s44_s18, 0  ;;  %p54_p1 = scmp.ne.s32.totalorder %s8689_s14, %s8685_s13 }
   0x8   : > { %p55_p2 = scmp.eq.s32.totalorder %s8693_s15, 0  ;;  %p60_p3 = scmp.ne.s32.totalorder %s8685_s13, %s8681_s12 }
   0x9   : > { %s8753_s20 = scalar_select %p45_p0, %s8689_s14, %s47_s19  }
   0xa   : > { %p56_p4 = por %p55_p2, %p54_p1  ;;  %p61_p5 = scmp.eq.s32.totalorder %s8740_s16, 0 }
   0xb   : > { %p110_p6 = scmp.eq.s32.totalorder %s8740_s16, 1  ;;  %p7313_p8 = scmp.lt.s32.totalorder %s8693_s15, 2 }
   0xc   : > { %p8757_p7 = por %p61_p5, %p60_p3  ;;  %s8767_s23 = sand.u32 1, %s8689_s14  }
   0xd   : > { %p8762_p9 = por %p110_p6, %p54_p1  ;;  %s7300_s24 = smul.u32 6272, %s8767_s23 }
   0xe   : > { %s10005_s21 = scalar_select %p8757_p7, 1, 0 }
   0xf   : > { %s10006_s22 = scalar_select %p8762_p9, 1, 0 }
  0x10   : > { %s7297_s25 = sshll.u32 %s8693_s15, 7  ;;  %p8771_p10 = pnand %p7313_p8, %p56_p4 }
  0x11   : > { %s8778_s29 = scalar_lea.hbm %s10001_s1, %s7297_s25  ;;  %s143_s30 = scalar_lea.vmem [#allocation2], %s7300_s24 }
  0x12   : > { %s150_s4 = sshll.u32 %s143_s30, 4  ;;  %s140_s5 = scalar_lea.sflag [#allocation3], %s8767_s23  ;;  %s8780_s4 = int_to_ptr.vmem [resolvable:$true] %s150_s4 }
  0x13   : > { %s8599_s6 = scalar_lea.hbm %s8778_s29, 100352  ;;  %p8601_p12 = pneg %p8771_p10 }
  0x14   : > { %p8600_p11 = scmp.ne.s32.totalorder %s8778_s29, %s8599_s6  ;;  %s8604_s9 = scalar_lea.hbm %s10001_s1, 200704 }
  0x15   : > { %p8605_p1 = scmp.lt.s32.totalorder %s8778_s29, %s10001_s1  ;;  %p8606_p2 = scmp.lt.s32.totalorder %s8604_s9, %s8599_s6 }
  0x16   : > { %p8602_p13 = pnand %p8601_p12, %p8600_p11 }
  0x17   : > { %p8607_p3 = por %p8606_p2, %p8605_p1 }
  0x18   : > { %p8603_p0 = pneg %p8602_p13 }
  0x1a   : > { %p8608_p4 = pnand %p8607_p3, %p8603_p0 }
  0x1c   : > { %8611 = shalt.err (!%p8608_p4)
}
  0x1d   : > { %s8612_s12 = scalar_lea.vmem %s8780_s4, 100352  ;;  %s8695_s18 = smov [#allocation2]  }
  0x1e   : > { %p8613_p5 = scmp.ne.s32.totalorder %s8780_s4, %s8612_s12  ;;  %s8617_s19 = sshll.u32 %s8695_s18, 4  ;;  %s8618_s19 = int_to_ptr.vmem [resolvable:$false] %s8617_s19 }
  0x1f   : > { %s8619_s24 = scalar_lea.vmem %s8618_s19, 200704  ;;  %p8620_p11 = scmp.lt.s32.totalorder %s8780_s4, %s8618_s19 }
  0x20   : > { %p8615_p6 = pnand %p8613_p5, %p8601_p12  ;;  %p8621_p13 = scmp.lt.s32.totalorder %s8619_s24, %s8612_s12 }
  0x22   : > { %p8616_p8 = pneg %p8615_p6  ;;  %p8622_p9 = por %p8621_p13, %p8620_p11 }
  0x24   : > { %p8623_p1 = pnand %p8622_p9, %p8616_p8 }
  0x26   : > { %8626 = shalt.err (!%p8623_p1)
}
  0x27   : > { %s8696_s25 = smov 256   ;;  %s8697_s27 = smov 128  }
  0x28   : > { %s8698_s28 = smov 8   ;;  %p6456_p0 = scmp.ge.s32.totalorder %s8693_s15, 1 }
  0x29   : > { %7309 = dma.hbm_to_vmem [thread:$0]  (!%p8771_p10), %s8778_s29, 100352, %s8780_s4, %s140_s5, %s8696_s25, %s8697_s27, %s8698_s28  }
  0x2a   : > { %p177_p2 = scmp.lt.s32.totalorder %s8693_s15, 3  ;;  %s6453_s30 = sshll.u32 %s8767_s23, 1 }
  0x2b   : > { %s7298_s7 = sshll.u32 %s8693_s15, 5  ;;  %s164_s8 = scalar_lea.vmem [#allocation4], %s6453_s30 }
  0x2c   : > { %p8812_p9 = pnand %p6456_p0, %p177_p2  ;;  %s172_s9 = sshll.u32 %s164_s8, 4  ;;  %s173_s9 = int_to_ptr.vmem [resolvable:$true] %s172_s9 }
  0x2d   : > { %s170_s12 = scalar_lea.hbm %s10002_s2, %s7298_s7  ;;  %s161_s18 = scalar_lea.sflag [#allocation5], %s8767_s23 }
  0x2e   : > { %s10008_s6 = scalar_select %p8812_p9, 1, 0 }
  0x2f   : > { %s8627_s19 = scalar_lea.hbm %s170_s12, 32  ;;  %s8632_s5 = scalar_lea.hbm %s10002_s2, 64 }
  0x30   : > { %p8628_p3 = scmp.ne.s32.totalorder %s170_s12, %s8627_s19  ;;  %p8633_p6 = scmp.lt.s32.totalorder %s170_s12, %s10002_s2 }
  0x31   : > { %p8634_p8 = scmp.lt.s32.totalorder %s8632_s5, %s8627_s19 }
  0x32   : > { %p8630_p4 = pnand %p8628_p3, %p8601_p12 }
  0x33   : > { %p8635_p11 = por %p8634_p8, %p8633_p6 }
  0x34   : > { %p8631_p5 = pneg %p8630_p4 }
  0x36   : > { %p8636_p13 = pnand %p8635_p11, %p8631_p5 }
  0x38   : > { %8639 = shalt.err (!%p8636_p13)
}
  0x39   : > { %s8640_s25 = scalar_lea.vmem %s173_s9, 32  ;;  %s8699_s23 = smov [#allocation4]  }
  0x3a   : > { %p8641_p1 = scmp.ne.s32.totalorder %s173_s9, %s8640_s25  ;;  %s8645_s27 = sshll.u32 %s8699_s23, 4  ;;  %s8646_s27 = int_to_ptr.vmem [resolvable:$false] %s8645_s27 }
  0x3b   : > { %s8647_s28 = scalar_lea.vmem %s8646_s27, 64  ;;  %p8648_p3 = scmp.lt.s32.totalorder %s173_s9, %s8646_s27 }
  0x3c   : > { %p8643_p0 = pnand %p8641_p1, %p8601_p12  ;;  %p8649_p4 = scmp.lt.s32.totalorder %s8647_s28, %s8640_s25 }
  0x3e   : > { %p8644_p2 = pneg %p8643_p0  ;;  %p8650_p7 = por %p8649_p4, %p8648_p3 }
  0x40   : > { %p8651_p9 = pnand %p8650_p7, %p8644_p2 }
  0x42   : > { %8654 = shalt.err (!%p8651_p9)
}
  0x43   : > { %7312 = dma.hbm_to_vmem [thread:$0]  (!%p8771_p10), %s170_s12, 32, %s173_s9, %s161_s18  }
  0x44   : > { %p10009_p5 = scmp.ne.s32.totalorder %s10008_s6, 0 }
  0x46   : > { %181 = sbr.rel (%p10009_p5) target bundleno = 1097 (0x449), region = 32 }
  0x4b   : > { %s8838_s30 = sand.u32 1, %s8685_s13   ;;  %p10010_p12 = scmp.ne.s32.totalorder %s10005_s21, 0 }
  0x4c   : > { %s7301_s7 = smul.u32 6272, %s8838_s30  ;;  %s184_s8 = scalar_lea.sflag [#allocation3], %s8838_s30 }
  0x4e   : > { %s8842_s10 = scalar_lea.vmem [#allocation2], %s7301_s7 }
  0x4f   : > { %8672 = dma.done.wait (%p10010_p12), %s184_s8, 100352  }
  0x50   : > { %8674 = vsyncadd (%p10010_p12), %s184_s8, 4294866944  ;;  %s6457_s26 = sshll.u32 %s8838_s30, 1  ;;  %s193_s6 = scalar_lea.sflag [#allocation5], %s8838_s30 }
  0x51   : > { %s8850_s9 = scalar_lea.vmem [#allocation4], %s6457_s26 }
  0x52   : > { %8676 = dma.done.wait (%p10010_p12), %s193_s6, 32  }
  0x53   : > { %8678 = vsyncadd (%p10010_p12), %s193_s6, 4294967264  ;;  %v7350_v0 = vld [vmem:[%s8842_s10 + $0x74] ss:$8 sps:$4 sm:$0xff]   ;;  %v7352_v1 = vld [vmem:[%s8842_s10 + $0x70] ss:$8 sps:$4 sm:$0xff]   ;;  %p10023_p7 = scmp.ne.s32.totalorder %s10006_s22, 0 }
  0x54   : > { %5239 = vmatprep.subr.bf16.mxu0 %v7350_v0  ;;  %v7353_v2 = vld [vmem:[%s8842_s10 + $0x174] ss:$8 sps:$4 sm:$0xff]   ;;  %v7355_v3 = vld [vmem:[%s8842_s10 + $0x170] ss:$8 sps:$4 sm:$0xff]   ;;  %v7356_v4 = vld [vmem:[%s8842_s10 + $0x64] ss:$8 sps:$4 sm:$0xff]  }
  0x55   : > { %5240 = vmatpush1.bf16.msra.mxu0 %v7352_v1  ;;  %v7358_v5 = vld [vmem:[%s8842_s10 + $0x60] ss:$8 sps:$4 sm:$0xff]   ;;  %5282 = vmatprep.subr.bf16.mxu1 %v7353_v2  ;;  %v7359_v6 = vld [vmem:[%s8842_s10 + $0x164] ss:$8 sps:$4 sm:$0xff]   ;;  %v7362_v8 = vld [vmem:[%s8842_s10 + $0x54] ss:$8 sps:$4 sm:$0xff]  }
  0x56   : > { %5283 = vmatpush1.bf16.msra.mxu1 %v7355_v3  ;;  %5241 = vmatprep.subr.bf16.mxu0 %v7356_v4  ;;  %v7361_v7 = vld [vmem:[%s8842_s10 + $0x160] ss:$8 sps:$4 sm:$0xff]   ;;  %v7364_v9 = vld [vmem:[%s8842_s10 + $0x50] ss:$8 sps:$4 sm:$0xff]   ;;  %v7365_v10 = vld [vmem:[%s8842_s10 + $0x154] ss:$8 sps:$4 sm:$0xff]  }
  0x57   : > { %5284 = vmatprep.subr.bf16.mxu1 %v7359_v6  ;;  %v7368_v11 = vld [vmem:[%s8842_s10 + $0x44] ss:$8 sps:$4 sm:$0xff]   ;;  %v7367_v12 = vld [vmem:[%s8842_s10 + $0x150] ss:$8 sps:$4 sm:$0xff]   ;;  %v7370_v14 = vld [vmem:[%s8842_s10 + $0x40] ss:$8 sps:$4 sm:$0xff]  }
  0x58   : > { %v7371_v13 = vld [vmem:[%s8842_s10 + $0x144] ss:$8 sps:$4 sm:$0xff]   ;;  %v7374_v15 = vld [vmem:[%s8842_s10 + $0x34] ss:$8 sps:$4 sm:$0xff]   ;;  %v7373_v16 = vld [vmem:[%s8842_s10 + $0x140] ss:$8 sps:$4 sm:$0xff]  }
  0x59   : > { %5242 = vmatpush1.bf16.msra.mxu0 %v7358_v5  ;;  %v7377_v17 = vld [vmem:[%s8842_s10 + $0x134] ss:$8 sps:$4 sm:$0xff]   ;;  %v7376_v18 = vld [vmem:[%s8842_s10 + $0x30] ss:$8 sps:$4 sm:$0xff]   ;;  %v7380_v19 = vld [vmem:[%s8842_s10 + $0x24] ss:$8 sps:$4 sm:$0xff]  }
  0x5a   : > { %5243 = vmatprep.subr.bf16.mxu0 %v7362_v8  ;;  %5285 = vmatpush1.bf16.msra.mxu1 %v7361_v7  ;;  %v7379_v20 = vld [vmem:[%s8842_s10 + $0x130] ss:$8 sps:$4 sm:$0xff]   ;;  %v7383_v21 = vld [vmem:[%s8842_s10 + $0x124] ss:$8 sps:$4 sm:$0xff]   ;;  %v7382_v22 = vld [vmem:[%s8842_s10 + $0x20] ss:$8 sps:$4 sm:$0xff]  }
  0x5b   : > { %5286 = vmatprep.subr.bf16.mxu1 %v7365_v10  ;;  %v7386_v23 = vld [vmem:[%s8842_s10 + $0x14] ss:$8 sps:$4 sm:$0xff]   ;;  %v7385_v24 = vld [vmem:[%s8842_s10 + $0x120] ss:$8 sps:$4 sm:$0xff]   ;;  %v7388_v26 = vld [vmem:[%s8842_s10 + $0x10] ss:$8 sps:$4 sm:$0xff]  }
  0x5c   : > { %v7389_v25 = vld [vmem:[%s8842_s10 + $0x114] ss:$8 sps:$4 sm:$0xff]   ;;  %v7392_v27 = vld [vmem:[%s8842_s10 + $0x4] ss:$8 sps:$4 sm:$0xff]   ;;  %v7391_v28 = vld [vmem:[%s8842_s10 + $0x110] ss:$8 sps:$4 sm:$0xff]  }
  0x5d   : > { %5244 = vmatpush1.bf16.msra.mxu0 %v7364_v9  ;;  %v7395_v29 = vld [vmem:[%s8842_s10 + $0x104] ss:$8 sps:$4 sm:$0xff]   ;;  %v7394_v30 = vld [vmem:[%s8842_s10] ss:$8 sps:$4 sm:$0xff]   ;;  %v7398_v31 = vld [vmem:[%s8842_s10 + $0xf4] ss:$8 sps:$4 sm:$0xff]  }
  0x5e   : > { %5245 = vmatprep.subr.bf16.mxu0 %v7368_v11  ;;  %5287 = vmatpush1.bf16.msra.mxu1 %v7367_v12  ;;  %v7397_v32 = vld [vmem:[%s8842_s10 + $0x100] ss:$8 sps:$4 sm:$0xff]   ;;  %v7401_v33 = vld [vmem:[%s8842_s10 + $0x1f4] ss:$8 sps:$4 sm:$0xff]   ;;  %v7400_v34 = vld [vmem:[%s8842_s10 + $0xf0] ss:$8 sps:$4 sm:$0xff]  }
  0x5f   : > { %5288 = vmatprep.subr.bf16.mxu1 %v7371_v13  ;;  %v7404_v35 = vld [vmem:[%s8842_s10 + $0xe4] ss:$8 sps:$4 sm:$0xff]   ;;  %v7403_v36 = vld [vmem:[%s8842_s10 + $0x1f0] ss:$8 sps:$4 sm:$0xff]   ;;  %v7406_v38 = vld [vmem:[%s8842_s10 + $0xe0] ss:$8 sps:$4 sm:$0xff]  }
  0x60   : > { %v7407_v37 = vld [vmem:[%s8842_s10 + $0x1e4] ss:$8 sps:$4 sm:$0xff]   ;;  %v7410_v39 = vld [vmem:[%s8842_s10 + $0xd4] ss:$8 sps:$4 sm:$0xff]   ;;  %v7409_v40 = vld [vmem:[%s8842_s10 + $0x1e0] ss:$8 sps:$4 sm:$0xff]  }
  0x61   : > { %5246 = vmatpush1.bf16.msra.mxu0 %v7370_v14  ;;  %v7413_v41 = vld [vmem:[%s8842_s10 + $0x1d4] ss:$8 sps:$4 sm:$0xff]   ;;  %v7412_v42 = vld [vmem:[%s8842_s10 + $0xd0] ss:$8 sps:$4 sm:$0xff]   ;;  %v7416_v43 = vld [vmem:[%s8842_s10 + $0xc4] ss:$8 sps:$4 sm:$0xff]  }
  0x62   : > { %5247 = vmatprep.subr.bf16.mxu0 %v7374_v15  ;;  %5289 = vmatpush1.bf16.msra.mxu1 %v7373_v16  ;;  %v7415_v44 = vld [vmem:[%s8842_s10 + $0x1d0] ss:$8 sps:$4 sm:$0xff]   ;;  %v7419_v45 = vld [vmem:[%s8842_s10 + $0x1c4] ss:$8 sps:$4 sm:$0xff]   ;;  %v7418_v46 = vld [vmem:[%s8842_s10 + $0xc0] ss:$8 sps:$4 sm:$0xff]  }
  0x63   : > { %5290 = vmatprep.subr.bf16.mxu1 %v7377_v17  ;;  %v7447_v47 = vld [vmem:[%s10000_s0 + $0x4] ss:$196 sps:$4 sm:$0xff]   ;;  %v7422_v48 = vld [vmem:[%s8842_s10 + $0xb4] ss:$8 sps:$4 sm:$0xff]   ;;  %v7454_v51 = vld [vmem:[%s10000_s0 + $0xc] ss:$196 sps:$4 sm:$0xff]  }
  0x64   : > { %v7421_v49 = vld [vmem:[%s8842_s10 + $0x1c0] ss:$8 sps:$4 sm:$0xff]   ;;  %5271 = vmatprep.mubr.bf16.mxu0 %v7447_v47  ;;  %v7425_v50 = vld [vmem:[%s8842_s10 + $0x1b4] ss:$8 sps:$4 sm:$0xff]   ;;  %v7424_v52 = vld [vmem:[%s8842_s10 + $0xb0] ss:$8 sps:$4 sm:$0xff]   ;;  %5314 = vmatprep.mubr.bf16.mxu1 %v7454_v51 }
  0x65   : > { %5248 = vmatpush1.bf16.msra.mxu0 %v7376_v18  ;;  %v7428_v53 = vld [vmem:[%s8842_s10 + $0xa4] ss:$8 sps:$4 sm:$0xff]   ;;  %v7427_v54 = vld [vmem:[%s8842_s10 + $0x1b0] ss:$8 sps:$4 sm:$0xff]   ;;  %v7430_v56 = vld [vmem:[%s8842_s10 + $0xa0] ss:$8 sps:$4 sm:$0xff]  }
  0x66   : > { %5249 = vmatprep.subr.bf16.mxu0 %v7380_v19  ;;  %5291 = vmatpush1.bf16.msra.mxu1 %v7379_v20  ;;  %v7431_v55 = vld [vmem:[%s8842_s10 + $0x1a4] ss:$8 sps:$4 sm:$0xff]   ;;  %v7434_v57 = vld [vmem:[%s8842_s10 + $0x94] ss:$8 sps:$4 sm:$0xff]   ;;  %v7433_v58 = vld [vmem:[%s8842_s10 + $0x1a0] ss:$8 sps:$4 sm:$0xff]  }
  0x67   : > { %5292 = vmatprep.subr.bf16.mxu1 %v7383_v21  ;;  %v7437_v59 = vld [vmem:[%s8842_s10 + $0x194] ss:$8 sps:$4 sm:$0xff]   ;;  %v7436_v60 = vld [vmem:[%s8842_s10 + $0x90] ss:$8 sps:$4 sm:$0xff]   ;;  %v7440_v61 = vld [vmem:[%s8842_s10 + $0x84] ss:$8 sps:$4 sm:$0xff]  }
  0x68   : > { %v7439_v62 = vld [vmem:[%s8842_s10 + $0x190] ss:$8 sps:$4 sm:$0xff]   ;;  %v7443_v63 = vld [vmem:[%s8842_s10 + $0x184] ss:$8 sps:$4 sm:$0xff]   ;;  %v7442_v0 = vld [vmem:[%s8842_s10 + $0x80] ss:$8 sps:$4 sm:$0xff]  }
  0x69   : > { %5250 = vmatpush1.bf16.msra.mxu0 %v7382_v22  ;;  %v7451_v1 = vld [vmem:[%s8842_s10 + $0x274] ss:$8 sps:$4 sm:$0xff]   ;;  %v7448_v2 = vld [vmem:[%s8842_s10 + $0x180] ss:$8 sps:$4 sm:$0xff]   ;;  %v7449_v5 = vld [vmem:[%s8842_s10 + $0x270] ss:$8 sps:$4 sm:$0xff]  }
  0x6a   : > { %5251 = vmatprep.subr.bf16.mxu0 %v7386_v23  ;;  %5293 = vmatpush1.bf16.msra.mxu1 %v7385_v24  ;;  %v7445_v3 = vld [vmem:[%s10000_s0] ss:$196 sps:$4 sm:$0xff]   ;;  %v7457_v4 = vld [vmem:[%s8842_s10 + $0x374] ss:$8 sps:$4 sm:$0xff]   ;;  %v7452_v6 = vld [vmem:[%s10000_s0 + $0x8] ss:$196 sps:$4 sm:$0xff]  }
  0x6b   : > { %5294 = vmatprep.subr.bf16.mxu1 %v7389_v25  ;;  %v7460_v7 = vld [vmem:[%s8842_s10 + $0x264] ss:$8 sps:$4 sm:$0xff]   ;;  %v7455_v8 = vld [vmem:[%s8842_s10 + $0x370] ss:$8 sps:$4 sm:$0xff]   ;;  %v7458_v10 = vld [vmem:[%s8842_s10 + $0x260] ss:$8 sps:$4 sm:$0xff]  }
  0x6c   : > { %v7463_v9 = vld [vmem:[%s8842_s10 + $0x364] ss:$8 sps:$4 sm:$0xff]   ;;  %v7466_v11 = vld [vmem:[%s8842_s10 + $0x254] ss:$8 sps:$4 sm:$0xff]   ;;  %v7461_v12 = vld [vmem:[%s8842_s10 + $0x360] ss:$8 sps:$4 sm:$0xff]  }
  0x6d   : > { %5252 = vmatpush1.bf16.msra.mxu0 %v7388_v26  ;;  %v7469_v13 = vld [vmem:[%s8842_s10 + $0x354] ss:$8 sps:$4 sm:$0xff]   ;;  %v7464_v14 = vld [vmem:[%s8842_s10 + $0x250] ss:$8 sps:$4 sm:$0xff]   ;;  %v7472_v15 = vld [vmem:[%s8842_s10 + $0x244] ss:$8 sps:$4 sm:$0xff]  }
  0x6e   : > { %5253 = vmatprep.subr.bf16.mxu0 %v7392_v27  ;;  %5295 = vmatpush1.bf16.msra.mxu1 %v7391_v28  ;;  %v7467_v16 = vld [vmem:[%s8842_s10 + $0x350] ss:$8 sps:$4 sm:$0xff]   ;;  %v7475_v17 = vld [vmem:[%s8842_s10 + $0x344] ss:$8 sps:$4 sm:$0xff]   ;;  %v7470_v18 = vld [vmem:[%s8842_s10 + $0x240] ss:$8 sps:$4 sm:$0xff]  }
  0x6f   : > { %5296 = vmatprep.subr.bf16.mxu1 %v7395_v29  ;;  %v7478_v19 = vld [vmem:[%s8842_s10 + $0x234] ss:$8 sps:$4 sm:$0xff]   ;;  %v7473_v20 = vld [vmem:[%s8842_s10 + $0x340] ss:$8 sps:$4 sm:$0xff]   ;;  %v7476_v22 = vld [vmem:[%s8842_s10 + $0x230] ss:$8 sps:$4 sm:$0xff]  }
  0x70   : > { %v7481_v21 = vld [vmem:[%s8842_s10 + $0x334] ss:$8 sps:$4 sm:$0xff]   ;;  %v7484_v23 = vld [vmem:[%s8842_s10 + $0x224] ss:$8 sps:$4 sm:$0xff]   ;;  %v7479_v24 = vld [vmem:[%s8842_s10 + $0x330] ss:$8 sps:$4 sm:$0xff]  }
  0x71   : > { %5254 = vmatpush1.bf16.msra.mxu0 %v7394_v30  ;;  %v7487_v25 = vld [vmem:[%s8842_s10 + $0x324] ss:$8 sps:$4 sm:$0xff]   ;;  %v7482_v26 = vld [vmem:[%s8842_s10 + $0x220] ss:$8 sps:$4 sm:$0xff]   ;;  %v7490_v27 = vld [vmem:[%s8842_s10 + $0x214] ss:$8 sps:$4 sm:$0xff]  }
  0x72   : > { %5255 = vmatprep.subr.bf16.mxu0 %v7398_v31  ;;  %5297 = vmatpush1.bf16.msra.mxu1 %v7397_v32  ;;  %v7485_v28 = vld [vmem:[%s8842_s10 + $0x320] ss:$8 sps:$4 sm:$0xff]   ;;  %v7493_v29 = vld [vmem:[%s8842_s10 + $0x314] ss:$8 sps:$4 sm:$0xff]   ;;  %v7488_v30 = vld [vmem:[%s8842_s10 + $0x210] ss:$8 sps:$4 sm:$0xff]  }
  0x73   : > { %5298 = vmatprep.subr.bf16.mxu1 %v7401_v33  ;;  %v7491_v31 = vld [vmem:[%s8842_s10 + $0x310] ss:$8 sps:$4 sm:$0xff]   ;;  %v7496_v32 = vld [vmem:[%s8842_s10 + $0x204] ss:$8 sps:$4 sm:$0xff]   ;;  %v7517_v47 = vld [vmem:[%s8842_s10 + $0x3d4] ss:$8 sps:$4 sm:$0xff]  }
  0x74   : > { %v7550_v33 = vld [vmem:[%s10000_s0 + $0x14] ss:$196 sps:$4 sm:$0xff]   ;;  %v7523_v51 = vld [vmem:[%s8842_s10 + $0x3c4] ss:$8 sps:$4 sm:$0xff]  }
  0x75   : > { %5256 = vmatpush2.bf16.msra.mxu0 %v7400_v34  ;;  %v7499_v34 = vld [vmem:[%s8842_s10 + $0x304] ss:$8 sps:$4 sm:$0xff]  }
  0x76   : > { %5257 = vmatprep.subr.bf16.mxu0 %v7404_v35  ;;  %5299 = vmatpush2.bf16.msra.mxu1 %v7403_v36  ;;  %v7494_v35 = vld [vmem:[%s8842_s10 + $0x200] ss:$8 sps:$4 sm:$0xff]  }
  0x77   : > { %5300 = vmatprep.subr.bf16.mxu1 %v7407_v37  ;;  %v7556_v36 = vld [vmem:[%s10000_s0 + $0x1c] ss:$196 sps:$4 sm:$0xff]  }
  0x78   : > { %v7502_v37 = vld [vmem:[%s8842_s10 + $0x2f4] ss:$8 sps:$4 sm:$0xff]  }
  0x79   : > { %5258 = vmatpush2.bf16.msra.mxu0 %v7406_v38  ;;  %v7497_v38 = vld [vmem:[%s8842_s10 + $0x300] ss:$8 sps:$4 sm:$0xff]  }
  0x7a   : > { %5259 = vmatprep.subr.bf16.mxu0 %v7410_v39  ;;  %5301 = vmatpush2.bf16.msra.mxu1 %v7409_v40  ;;  %v7505_v39 = vld [vmem:[%s8842_s10 + $0x3f4] ss:$8 sps:$4 sm:$0xff]   ;;  %v7500_v40 = vld [vmem:[%s8842_s10 + $0x2f0] ss:$8 sps:$4 sm:$0xff]  }
  0x7b   : > { %5302 = vmatprep.subr.bf16.mxu1 %v7413_v41  ;;  %v7508_v41 = vld [vmem:[%s8842_s10 + $0x2e4] ss:$8 sps:$4 sm:$0xff]  }
  0x7d   : > { %5260 = vmatpush2.bf16.msra.mxu0 %v7412_v42  ;;  %v7503_v42 = vld [vmem:[%s8842_s10 + $0x3f0] ss:$8 sps:$4 sm:$0xff]  }
  0x7e   : > { %5261 = vmatprep.subr.bf16.mxu0 %v7416_v43  ;;  %5303 = vmatpush2.bf16.msra.mxu1 %v7415_v44  ;;  %v7511_v43 = vld [vmem:[%s8842_s10 + $0x3e4] ss:$8 sps:$4 sm:$0xff]   ;;  %v7506_v44 = vld [vmem:[%s8842_s10 + $0x2e0] ss:$8 sps:$4 sm:$0xff]  }
  0x7f   : > { %5304 = vmatprep.subr.bf16.mxu1 %v7419_v45  ;;  %v7514_v45 = vld [vmem:[%s8842_s10 + $0x2d4] ss:$8 sps:$4 sm:$0xff]  }
  0x81   : > { %5262 = vmatpush2.bf16.msra.mxu0 %v7418_v46  ;;  %v7509_v46 = vld [vmem:[%s8842_s10 + $0x3e0] ss:$8 sps:$4 sm:$0xff]  }
  0x82   : > { %5263 = vmatprep.subr.bf16.mxu0 %v7422_v48  ;;  %5305 = vmatpush2.bf16.msra.mxu1 %v7421_v49  ;;  %v7512_v48 = vld [vmem:[%s8842_s10 + $0x2d0] ss:$8 sps:$4 sm:$0xff]   ;;  %v7520_v49 = vld [vmem:[%s8842_s10 + $0x2c4] ss:$8 sps:$4 sm:$0xff]  }
  0x83   : > { %5306 = vmatprep.subr.bf16.mxu1 %v7425_v50  ;;  %v7515_v50 = vld [vmem:[%s8842_s10 + $0x3d0] ss:$8 sps:$4 sm:$0xff]  }
  0x85   : > { %5264 = vmatpush2.bf16.msra.mxu0 %v7424_v52  ;;  %v7518_v52 = vld [vmem:[%s8842_s10 + $0x2c0] ss:$8 sps:$4 sm:$0xff]  }
  0x86   : > { %5265 = vmatprep.subr.bf16.mxu0 %v7428_v53  ;;  %5307 = vmatpush2.bf16.msra.mxu1 %v7427_v54  ;;  %v7526_v53 = vld [vmem:[%s8842_s10 + $0x2b4] ss:$8 sps:$4 sm:$0xff]   ;;  %v7521_v54 = vld [vmem:[%s8842_s10 + $0x3c0] ss:$8 sps:$4 sm:$0xff]  }
  0x87   : > { %5308 = vmatprep.subr.bf16.mxu1 %v7431_v55  ;;  %v7529_v55 = vld [vmem:[%s8842_s10 + $0x3b4] ss:$8 sps:$4 sm:$0xff]  }
  0x89   : > { %5266 = vmatpush2.bf16.msra.mxu0 %v7430_v56  ;;  %v7524_v56 = vld [vmem:[%s8842_s10 + $0x2b0] ss:$8 sps:$4 sm:$0xff]  }
  0x8a   : > { %5267 = vmatprep.subr.bf16.mxu0 %v7434_v57  ;;  %5309 = vmatpush2.bf16.msra.mxu1 %v7433_v58  ;;  %v7532_v57 = vld [vmem:[%s8842_s10 + $0x2a4] ss:$8 sps:$4 sm:$0xff]   ;;  %v7527_v58 = vld [vmem:[%s8842_s10 + $0x3b0] ss:$8 sps:$4 sm:$0xff]  }
  0x8b   : > { %5310 = vmatprep.subr.bf16.mxu1 %v7437_v59  ;;  %v7535_v59 = vld [vmem:[%s8842_s10 + $0x3a4] ss:$8 sps:$4 sm:$0xff]  }
  0x8d   : > { %5268 = vmatpush2.bf16.msra.mxu0 %v7436_v60  ;;  %v7530_v60 = vld [vmem:[%s8842_s10 + $0x2a0] ss:$8 sps:$4 sm:$0xff]  }
  0x8e   : > { %5269 = vmatprep.subr.bf16.mxu0 %v7440_v61  ;;  %5311 = vmatpush2.bf16.msra.mxu1 %v7439_v62  ;;  %v7538_v61 = vld [vmem:[%s8842_s10 + $0x294] ss:$8 sps:$4 sm:$0xff]   ;;  %v7533_v62 = vld [vmem:[%s8842_s10 + $0x3a0] ss:$8 sps:$4 sm:$0xff]  }
  0x8f   : > { %5312 = vmatprep.subr.bf16.mxu1 %v7443_v63  ;;  %v7541_v63 = vld [vmem:[%s8842_s10 + $0x394] ss:$8 sps:$4 sm:$0xff]  }
  0x91   : > { %5270 = vmatpush2.bf16.msra.mxu0 %v7442_v0  ;;  %v7536_v0 = vld [vmem:[%s8842_s10 + $0x290] ss:$8 sps:$4 sm:$0xff]  }
  0x92   : > { %5325 = vmatprep.subr.bf16.mxu0 %v7451_v1  ;;  %5313 = vmatpush2.bf16.msra.mxu1 %v7448_v2  ;;  %v7544_v1 = vld [vmem:[%s8842_s10 + $0x284] ss:$8 sps:$4 sm:$0xff]   ;;  %v7539_v2 = vld [vmem:[%s8842_s10 + $0x390] ss:$8 sps:$4 sm:$0xff]  }
  0x93   : > { %5368 = vmatprep.subr.bf16.mxu1 %v7457_v4  ;;  %v7542_v4 = vld [vmem:[%s8842_s10 + $0x280] ss:$8 sps:$4 sm:$0xff]  }
  0x94   : > { %5272 = vmatmul.mubr.bf16.vlgmr.msra.gmra.mxu0 %v7445_v3  ;;  %v7547_v3 = vld [vmem:[%s8842_s10 + $0x384] ss:$8 sps:$4 sm:$0xff]  }
  0x95   : > { %5326 = vmatpush1.bf16.msra.mxu0 %v7449_v5  ;;  %5315 = vmatmul.mubr.bf16.vlgmr.msra.gmra.mxu1 %v7452_v6  ;;  %v7553_v5 = vld [vmem:[%s8842_s10 + $0x474] ss:$8 sps:$4 sm:$0xff]   ;;  %v7545_v6 = vld [vmem:[%s8842_s10 + $0x380] ss:$8 sps:$4 sm:$0xff]  }
  0x96   : > { %5327 = vmatprep.subr.bf16.mxu0 %v7460_v7  ;;  %5369 = vmatpush1.bf16.msra.mxu1 %v7455_v8  ;;  %v7548_v7 = vld [vmem:[%s10000_s0 + $0x10] ss:$196 sps:$4 sm:$0xff]  }
  0x97   : > { %5370 = vmatprep.subr.bf16.mxu1 %v7463_v9  ;;  %5357 = vmatprep.mubr.bf16.mxu0 %v7550_v33  ;;  %v7559_v8 = vld [vmem:[%s8842_s10 + $0x574] ss:$8 sps:$4 sm:$0xff]   ;;  %v7551_v9 = vld [vmem:[%s8842_s10 + $0x470] ss:$8 sps:$4 sm:$0xff]  }
  0x98   : > { %5400 = vmatprep.mubr.bf16.mxu1 %v7556_v36  ;;  %v7592_v33 = vld [vmem:[%s8842_s10 + $0x414] ss:$8 sps:$4 sm:$0xff]   ;;  %v7590_v36 = vld [vmem:[%s8842_s10 + $0x410] ss:$8 sps:$4 sm:$0xff]  }
  0x99   : > { %5328 = vmatpush1.bf16.msra.mxu0 %v7458_v10  ;;  %v7554_v10 = vld [vmem:[%s10000_s0 + $0x18] ss:$196 sps:$4 sm:$0xff]  }
  0x9a   : > { %5329 = vmatprep.subr.bf16.mxu0 %v7466_v11  ;;  %5371 = vmatpush1.bf16.msra.mxu1 %v7461_v12  ;;  %v7562_v11 = vld [vmem:[%s8842_s10 + $0x464] ss:$8 sps:$4 sm:$0xff]   ;;  %v7557_v12 = vld [vmem:[%s8842_s10 + $0x570] ss:$8 sps:$4 sm:$0xff]  }
  0x9b   : > { %5372 = vmatprep.subr.bf16.mxu1 %v7469_v13  ;;  %v7565_v13 = vld [vmem:[%s8842_s10 + $0x564] ss:$8 sps:$4 sm:$0xff]  }
  0x9d   : > { %5330 = vmatpush1.bf16.msra.mxu0 %v7464_v14  ;;  %v7560_v14 = vld [vmem:[%s8842_s10 + $0x460] ss:$8 sps:$4 sm:$0xff]  }
  0x9e   : > { %5331 = vmatprep.subr.bf16.mxu0 %v7472_v15  ;;  %5373 = vmatpush1.bf16.msra.mxu1 %v7467_v16  ;;  %v7568_v15 = vld [vmem:[%s8842_s10 + $0x454] ss:$8 sps:$4 sm:$0xff]   ;;  %v7563_v16 = vld [vmem:[%s8842_s10 + $0x560] ss:$8 sps:$4 sm:$0xff]  }
  0x9f   : > { %5374 = vmatprep.subr.bf16.mxu1 %v7475_v17  ;;  %v7571_v17 = vld [vmem:[%s8842_s10 + $0x554] ss:$8 sps:$4 sm:$0xff]  }
  0xa1   : > { %5332 = vmatpush1.bf16.msra.mxu0 %v7470_v18  ;;  %v7652_v18 = vld [vmem:[%s10000_s0 + $0x24] ss:$196 sps:$4 sm:$0xff]  }
  0xa2   : > { %5333 = vmatprep.subr.bf16.mxu0 %v7478_v19  ;;  %5375 = vmatpush1.bf16.msra.mxu1 %v7473_v20  ;;  %v7566_v19 = vld [vmem:[%s8842_s10 + $0x450] ss:$8 sps:$4 sm:$0xff]  }
  0xa3   : > { %5376 = vmatprep.subr.bf16.mxu1 %v7481_v21  ;;  %v7569_v20 = vld [vmem:[%s8842_s10 + $0x550] ss:$8 sps:$4 sm:$0xff]   ;;  %v7574_v21 = vld [vmem:[%s8842_s10 + $0x444] ss:$8 sps:$4 sm:$0xff]  }
  0xa5   : > { %5334 = vmatpush1.bf16.msra.mxu0 %v7476_v22  ;;  %v7658_v22 = vld [vmem:[%s10000_s0 + $0x2c] ss:$196 sps:$4 sm:$0xff]  }
  0xa6   : > { %5335 = vmatprep.subr.bf16.mxu0 %v7484_v23  ;;  %5377 = vmatpush1.bf16.msra.mxu1 %v7479_v24  ;;  %v7577_v23 = vld [vmem:[%s8842_s10 + $0x544] ss:$8 sps:$4 sm:$0xff]   ;;  %v7572_v24 = vld [vmem:[%s8842_s10 + $0x440] ss:$8 sps:$4 sm:$0xff]  }
  0xa7   : > { %5378 = vmatprep.subr.bf16.mxu1 %v7487_v25  ;;  %v7580_v25 = vld [vmem:[%s8842_s10 + $0x434] ss:$8 sps:$4 sm:$0xff]  }
  0xa9   : > { %5336 = vmatpush1.bf16.msra.mxu0 %v7482_v26  ;;  %v7575_v26 = vld [vmem:[%s8842_s10 + $0x540] ss:$8 sps:$4 sm:$0xff]  }
  0xaa   : > { %5337 = vmatprep.subr.bf16.mxu0 %v7490_v27  ;;  %5379 = vmatpush1.bf16.msra.mxu1 %v7485_v28  ;;  %v7583_v27 = vld [vmem:[%s8842_s10 + $0x534] ss:$8 sps:$4 sm:$0xff]   ;;  %v7578_v28 = vld [vmem:[%s8842_s10 + $0x430] ss:$8 sps:$4 sm:$0xff]  }
  0xab   : > { %5380 = vmatprep.subr.bf16.mxu1 %v7493_v29  ;;  %v7586_v29 = vld [vmem:[%s8842_s10 + $0x424] ss:$8 sps:$4 sm:$0xff]  }
  0xad   : > { %5338 = vmatpush1.bf16.msra.mxu0 %v7488_v30  ;;  %v7581_v30 = vld [vmem:[%s8842_s10 + $0x530] ss:$8 sps:$4 sm:$0xff]  }
  0xae   : > { %5339 = vmatprep.subr.bf16.mxu0 %v7496_v32  ;;  %5381 = vmatpush1.bf16.msra.mxu1 %v7491_v31  ;;  %v7589_v31 = vld [vmem:[%s8842_s10 + $0x524] ss:$8 sps:$4 sm:$0xff]   ;;  %v7584_v32 = vld [vmem:[%s8842_s10 + $0x420] ss:$8 sps:$4 sm:$0xff]  }
  0xaf   : > { %5382 = vmatprep.subr.bf16.mxu1 %v7499_v34  ;;  %v7587_v34 = vld [vmem:[%s8842_s10 + $0x520] ss:$8 sps:$4 sm:$0xff]  }
  0xb1   : > { %5340 = vmatpush1.bf16.msra.mxu0 %v7494_v35  ;;  %v7595_v35 = vld [vmem:[%s8842_s10 + $0x514] ss:$8 sps:$4 sm:$0xff]  }
  0xb2   : > { %5341 = vmatprep.subr.bf16.mxu0 %v7502_v37  ;;  %5383 = vmatpush1.bf16.msra.mxu1 %v7497_v38  ;;  %v7598_v37 = vld [vmem:[%s8842_s10 + $0x404] ss:$8 sps:$4 sm:$0xff]   ;;  %v7593_v38 = vld [vmem:[%s8842_s10 + $0x510] ss:$8 sps:$4 sm:$0xff]  }
  0xb3   : > { %5384 = vmatprep.subr.bf16.mxu1 %v7505_v39  ;;  %v7601_v39 = vld [vmem:[%s8842_s10 + $0x504] ss:$8 sps:$4 sm:$0xff]  }
  0xb5   : > { %5342 = vmatpush2.bf16.msra.mxu0 %v7500_v40  ;;  %v7596_v40 = vld [vmem:[%s8842_s10 + $0x400] ss:$8 sps:$4 sm:$0xff]  }
  0xb6   : > { %5343 = vmatprep.subr.bf16.mxu0 %v7508_v41  ;;  %5385 = vmatpush2.bf16.msra.mxu1 %v7503_v42  ;;  %v7604_v41 = vld [vmem:[%s8842_s10 + $0x4f4] ss:$8 sps:$4 sm:$0xff]   ;;  %v7599_v42 = vld [vmem:[%s8842_s10 + $0x500] ss:$8 sps:$4 sm:$0xff]  }
  0xb7   : > { %5386 = vmatprep.subr.bf16.mxu1 %v7511_v43  ;;  %v7607_v43 = vld [vmem:[%s8842_s10 + $0x5f4] ss:$8 sps:$4 sm:$0xff]  }
  0xb9   : > { %5344 = vmatpush2.bf16.msra.mxu0 %v7506_v44  ;;  %v7602_v44 = vld [vmem:[%s8842_s10 + $0x4f0] ss:$8 sps:$4 sm:$0xff]  }
  0xba   : > { %5345 = vmatprep.subr.bf16.mxu0 %v7514_v45  ;;  %5387 = vmatpush2.bf16.msra.mxu1 %v7509_v46  ;;  %v7610_v45 = vld [vmem:[%s8842_s10 + $0x4e4] ss:$8 sps:$4 sm:$0xff]   ;;  %v7605_v46 = vld [vmem:[%s8842_s10 + $0x5f0] ss:$8 sps:$4 sm:$0xff]  }
  0xbb   : > { %5388 = vmatprep.subr.bf16.mxu1 %v7517_v47  ;;  %v7613_v47 = vld [vmem:[%s8842_s10 + $0x5e4] ss:$8 sps:$4 sm:$0xff]  }
  0xbd   : > { %5346 = vmatpush2.bf16.msra.mxu0 %v7512_v48  ;;  %v7608_v48 = vld [vmem:[%s8842_s10 + $0x4e0] ss:$8 sps:$4 sm:$0xff]  }
  0xbe   : > { %5347 = vmatprep.subr.bf16.mxu0 %v7520_v49  ;;  %5389 = vmatpush2.bf16.msra.mxu1 %v7515_v50  ;;  %v7616_v49 = vld [vmem:[%s8842_s10 + $0x4d4] ss:$8 sps:$4 sm:$0xff]   ;;  %v7611_v50 = vld [vmem:[%s8842_s10 + $0x5e0] ss:$8 sps:$4 sm:$0xff]  }
  0xbf   : > { %5390 = vmatprep.subr.bf16.mxu1 %v7523_v51  ;;  %v7619_v51 = vld [vmem:[%s8842_s10 + $0x5d4] ss:$8 sps:$4 sm:$0xff]  }
  0xc1   : > { %5348 = vmatpush2.bf16.msra.mxu0 %v7518_v52  ;;  %v7614_v52 = vld [vmem:[%s8842_s10 + $0x4d0] ss:$8 sps:$4 sm:$0xff]  }
  0xc2   : > { %5349 = vmatprep.subr.bf16.mxu0 %v7526_v53  ;;  %5391 = vmatpush2.bf16.msra.mxu1 %v7521_v54  ;;  %v7622_v53 = vld [vmem:[%s8842_s10 + $0x4c4] ss:$8 sps:$4 sm:$0xff]   ;;  %v7617_v54 = vld [vmem:[%s8842_s10 + $0x5d0] ss:$8 sps:$4 sm:$0xff]  }
  0xc3   : > { %5392 = vmatprep.subr.bf16.mxu1 %v7529_v55  ;;  %v7625_v55 = vld [vmem:[%s8842_s10 + $0x5c4] ss:$8 sps:$4 sm:$0xff]  }
  0xc5   : > { %5350 = vmatpush2.bf16.msra.mxu0 %v7524_v56  ;;  %v7620_v56 = vld [vmem:[%s8842_s10 + $0x4c0] ss:$8 sps:$4 sm:$0xff]  }
  0xc6   : > { %5351 = vmatprep.subr.bf16.mxu0 %v7532_v57  ;;  %5393 = vmatpush2.bf16.msra.mxu1 %v7527_v58  ;;  %v7628_v57 = vld [vmem:[%s8842_s10 + $0x4b4] ss:$8 sps:$4 sm:$0xff]   ;;  %v7623_v58 = vld [vmem:[%s8842_s10 + $0x5c0] ss:$8 sps:$4 sm:$0xff]  }
  0xc7   : > { %5394 = vmatprep.subr.bf16.mxu1 %v7535_v59  ;;  %v7631_v59 = vld [vmem:[%s8842_s10 + $0x5b4] ss:$8 sps:$4 sm:$0xff]  }
  0xc9   : > { %5352 = vmatpush2.bf16.msra.mxu0 %v7530_v60  ;;  %v7626_v60 = vld [vmem:[%s8842_s10 + $0x4b0] ss:$8 sps:$4 sm:$0xff]  }
  0xca   : > { %5353 = vmatprep.subr.bf16.mxu0 %v7538_v61  ;;  %5395 = vmatpush2.bf16.msra.mxu1 %v7533_v62  ;;  %v7634_v61 = vld [vmem:[%s8842_s10 + $0x4a4] ss:$8 sps:$4 sm:$0xff]   ;;  %v7629_v62 = vld [vmem:[%s8842_s10 + $0x5b0] ss:$8 sps:$4 sm:$0xff]  }
  0xcb   : > { %5396 = vmatprep.subr.bf16.mxu1 %v7541_v63  ;;  %v7637_v63 = vld [vmem:[%s8842_s10 + $0x5a4] ss:$8 sps:$4 sm:$0xff]  }
  0xcd   : > { %5354 = vmatpush2.bf16.msra.mxu0 %v7536_v0  ;;  %v7632_v0 = vld [vmem:[%s8842_s10 + $0x4a0] ss:$8 sps:$4 sm:$0xff]  }
  0xce   : > { %5355 = vmatprep.subr.bf16.mxu0 %v7544_v1  ;;  %5397 = vmatpush2.bf16.msra.mxu1 %v7539_v2  ;;  %v7640_v1 = vld [vmem:[%s8842_s10 + $0x494] ss:$8 sps:$4 sm:$0xff]   ;;  %v7635_v2 = vld [vmem:[%s8842_s10 + $0x5a0] ss:$8 sps:$4 sm:$0xff]  }
  0xcf   : > { %5398 = vmatprep.subr.bf16.mxu1 %v7547_v3  ;;  %v7643_v3 = vld [vmem:[%s8842_s10 + $0x594] ss:$8 sps:$4 sm:$0xff]  }
  0xd1   : > { %5356 = vmatpush2.bf16.msra.mxu0 %v7542_v4  ;;  %v7638_v4 = vld [vmem:[%s8842_s10 + $0x490] ss:$8 sps:$4 sm:$0xff]  }
  0xd2   : > { %5411 = vmatprep.subr.bf16.mxu0 %v7553_v5  ;;  %5399 = vmatpush2.bf16.msra.mxu1 %v7545_v6  ;;  %v7646_v5 = vld [vmem:[%s8842_s10 + $0x484] ss:$8 sps:$4 sm:$0xff]   ;;  %v7641_v6 = vld [vmem:[%s8842_s10 + $0x590] ss:$8 sps:$4 sm:$0xff]  }
  0xd3   : > { %5454 = vmatprep.subr.bf16.mxu1 %v7559_v8  ;;  %v7649_v8 = vld [vmem:[%s8842_s10 + $0x584] ss:$8 sps:$4 sm:$0xff]  }
  0xd4   : > { %5358 = vmatmul.mubr.bf16.vlgmr.msra.gmra.mxu0 %v7548_v7  ;;  %v7644_v7 = vld [vmem:[%s8842_s10 + $0x480] ss:$8 sps:$4 sm:$0xff]  }
  0xd5   : > { %5412 = vmatpush1.bf16.msra.mxu0 %v7551_v9  ;;  %5401 = vmatmul.mubr.bf16.vlgmr.msra.gmra.mxu1 %v7554_v10  ;;  %v7647_v9 = vld [vmem:[%s8842_s10 + $0x580] ss:$8 sps:$4 sm:$0xff]   ;;  %v7655_v10 = vld [vmem:[%s8842_s10 + $0x674] ss:$8 sps:$4 sm:$0xff]  }
  0xd6   : > { %5413 = vmatprep.subr.bf16.mxu0 %v7562_v11  ;;  %5455 = vmatpush1.bf16.msra.mxu1 %v7557_v12  ;;  %v7650_v11 = vld [vmem:[%s10000_s0 + $0x20] ss:$196 sps:$4 sm:$0xff]   ;;  %v7653_v12 = vld [vmem:[%s8842_s10 + $0x670] ss:$8 sps:$4 sm:$0xff]  }
  0xd7   : > { %5456 = vmatprep.subr.bf16.mxu1 %v7565_v13  ;;  %5443 = vmatprep.mubr.bf16.mxu0 %v7652_v18  ;;  %v7656_v13 = vld [vmem:[%s10000_s0 + $0x28] ss:$196 sps:$4 sm:$0xff]   ;;  %v7760_v18 = vld [vmem:[%s10000_s0 + $0x3c] ss:$196 sps:$4 sm:$0xff]  }
  0xd8   : > { %5486 = vmatprep.mubr.bf16.mxu1 %v7658_v22  ;;  %v7665_v22 = vld [vmem:[%s8842_s10 + $0x760] ss:$8 sps:$4 sm:$0xff]  }
  0xd9   : > { %5414 = vmatpush1.bf16.msra.mxu0 %v7560_v14  ;;  %v7661_v14 = vld [vmem:[%s8842_s10 + $0x774] ss:$8 sps:$4 sm:$0xff]  }
  0xda   : > { %5415 = vmatprep.subr.bf16.mxu0 %v7568_v15  ;;  %5457 = vmatpush1.bf16.msra.mxu1 %v7563_v16  ;;  %v7754_v15 = vld [vmem:[%s10000_s0 + $0x34] ss:$196 sps:$4 sm:$0xff]   ;;  %v7664_v16 = vld [vmem:[%s8842_s10 + $0x664] ss:$8 sps:$4 sm:$0xff]  }
  0xdb   : > { %5458 = vmatprep.subr.bf16.mxu1 %v7571_v17  ;;  %v7659_v17 = vld [vmem:[%s8842_s10 + $0x770] ss:$8 sps:$4 sm:$0xff]  }
  0xdd   : > { %5416 = vmatpush1.bf16.msra.mxu0 %v7566_v19  ;;  %v7667_v19 = vld [vmem:[%s8842_s10 + $0x764] ss:$8 sps:$4 sm:$0xff]  }
  0xde   : > { %5417 = vmatprep.subr.bf16.mxu0 %v7574_v21  ;;  %5459 = vmatpush1.bf16.msra.mxu1 %v7569_v20  ;;  %v7662_v20 = vld [vmem:[%s8842_s10 + $0x660] ss:$8 sps:$4 sm:$0xff]   ;;  %v7670_v21 = vld [vmem:[%s8842_s10 + $0x654] ss:$8 sps:$4 sm:$0xff]  }
  0xdf   : > { %5460 = vmatprep.subr.bf16.mxu1 %v7577_v23  ;;  %v7673_v23 = vld [vmem:[%s8842_s10 + $0x754] ss:$8 sps:$4 sm:$0xff]  }
  0xe1   : > { %5418 = vmatpush1.bf16.msra.mxu0 %v7572_v24  ;;  %v7668_v24 = vld [vmem:[%s8842_s10 + $0x650] ss:$8 sps:$4 sm:$0xff]  }
  0xe2   : > { %5419 = vmatprep.subr.bf16.mxu0 %v7580_v25  ;;  %5461 = vmatpush1.bf16.msra.mxu1 %v7575_v26  ;;  %v7676_v25 = vld [vmem:[%s8842_s10 + $0x644] ss:$8 sps:$4 sm:$0xff]   ;;  %v7671_v26 = vld [vmem:[%s8842_s10 + $0x750] ss:$8 sps:$4 sm:$0xff]  }
  0xe3   : > { %5462 = vmatprep.subr.bf16.mxu1 %v7583_v27  ;;  %v7679_v27 = vld [vmem:[%s8842_s10 + $0x744] ss:$8 sps:$4 sm:$0xff]  }
  0xe5   : > { %5420 = vmatpush1.bf16.msra.mxu0 %v7578_v28  ;;  %v7674_v28 = vld [vmem:[%s8842_s10 + $0x640] ss:$8 sps:$4 sm:$0xff]  }
  0xe6   : > { %5421 = vmatprep.subr.bf16.mxu0 %v7586_v29  ;;  %5463 = vmatpush1.bf16.msra.mxu1 %v7581_v30  ;;  %v7682_v29 = vld [vmem:[%s8842_s10 + $0x634] ss:$8 sps:$4 sm:$0xff]   ;;  %v7677_v30 = vld [vmem:[%s8842_s10 + $0x740] ss:$8 sps:$4 sm:$0xff]  }
  0xe7   : > { %5464 = vmatprep.subr.bf16.mxu1 %v7589_v31  ;;  %v7685_v31 = vld [vmem:[%s8842_s10 + $0x734] ss:$8 sps:$4 sm:$0xff]  }
  0xe9   : > { %5422 = vmatpush1.bf16.msra.mxu0 %v7584_v32  ;;  %v7680_v32 = vld [vmem:[%s8842_s10 + $0x630] ss:$8 sps:$4 sm:$0xff]  }
  0xea   : > { %5423 = vmatprep.subr.bf16.mxu0 %v7592_v33  ;;  %5465 = vmatpush1.bf16.msra.mxu1 %v7587_v34  ;;  %v7688_v33 = vld [vmem:[%s8842_s10 + $0x624] ss:$8 sps:$4 sm:$0xff]   ;;  %v7683_v34 = vld [vmem:[%s8842_s10 + $0x730] ss:$8 sps:$4 sm:$0xff]  }
  0xeb   : > { %5466 = vmatprep.subr.bf16.mxu1 %v7595_v35  ;;  %v7691_v35 = vld [vmem:[%s8842_s10 + $0x724] ss:$8 sps:$4 sm:$0xff]  }
  0xed   : > { %5424 = vmatpush1.bf16.msra.mxu0 %v7590_v36  ;;  %v7686_v36 = vld [vmem:[%s8842_s10 + $0x620] ss:$8 sps:$4 sm:$0xff]  }
  0xee   : > { %5425 = vmatprep.subr.bf16.mxu0 %v7598_v37  ;;  %5467 = vmatpush1.bf16.msra.mxu1 %v7593_v38  ;;  %v7694_v37 = vld [vmem:[%s8842_s10 + $0x614] ss:$8 sps:$4 sm:$0xff]   ;;  %v7689_v38 = vld [vmem:[%s8842_s10 + $0x720] ss:$8 sps:$4 sm:$0xff]  }
  0xef   : > { %5468 = vmatprep.subr.bf16.mxu1 %v7601_v39  ;;  %v7697_v39 = vld [vmem:[%s8842_s10 + $0x714] ss:$8 sps:$4 sm:$0xff]  }
  0xf1   : > { %5426 = vmatpush1.bf16.msra.mxu0 %v7596_v40  ;;  %v7692_v40 = vld [vmem:[%s8842_s10 + $0x610] ss:$8 sps:$4 sm:$0xff]  }
  0xf2   : > { %5427 = vmatprep.subr.bf16.mxu0 %v7604_v41  ;;  %5469 = vmatpush1.bf16.msra.mxu1 %v7599_v42  ;;  %v7700_v41 = vld [vmem:[%s8842_s10 + $0x604] ss:$8 sps:$4 sm:$0xff]   ;;  %v7695_v42 = vld [vmem:[%s8842_s10 + $0x710] ss:$8 sps:$4 sm:$0xff]  }
  0xf3   : > { %5470 = vmatprep.subr.bf16.mxu1 %v7607_v43  ;;  %v7703_v43 = vld [vmem:[%s8842_s10 + $0x704] ss:$8 sps:$4 sm:$0xff]  }
  0xf5   : > { %5428 = vmatpush2.bf16.msra.mxu0 %v7602_v44  ;;  %v7698_v44 = vld [vmem:[%s8842_s10 + $0x600] ss:$8 sps:$4 sm:$0xff]  }
  0xf6   : > { %5429 = vmatprep.subr.bf16.mxu0 %v7610_v45  ;;  %5471 = vmatpush2.bf16.msra.mxu1 %v7605_v46  ;;  %v7706_v45 = vld [vmem:[%s8842_s10 + $0x6f4] ss:$8 sps:$4 sm:$0xff]   ;;  %v7701_v46 = vld [vmem:[%s8842_s10 + $0x700] ss:$8 sps:$4 sm:$0xff]  }
  0xf7   : > { %5472 = vmatprep.subr.bf16.mxu1 %v7613_v47  ;;  %v7709_v47 = vld [vmem:[%s8842_s10 + $0x7f4] ss:$8 sps:$4 sm:$0xff]  }
  0xf9   : > { %5430 = vmatpush2.bf16.msra.mxu0 %v7608_v48  ;;  %v7704_v48 = vld [vmem:[%s8842_s10 + $0x6f0] ss:$8 sps:$4 sm:$0xff]  }
  0xfa   : > { %5431 = vmatprep.subr.bf16.mxu0 %v7616_v49  ;;  %5473 = vmatpush2.bf16.msra.mxu1 %v7611_v50  ;;  %v7712_v49 = vld [vmem:[%s8842_s10 + $0x6e4] ss:$8 sps:$4 sm:$0xff]   ;;  %v7707_v50 = vld [vmem:[%s8842_s10 + $0x7f0] ss:$8 sps:$4 sm:$0xff]  }
  0xfb   : > { %5474 = vmatprep.subr.bf16.mxu1 %v7619_v51  ;;  %v7715_v51 = vld [vmem:[%s8842_s10 + $0x7e4] ss:$8 sps:$4 sm:$0xff]  }
  0xfd   : > { %5432 = vmatpush2.bf16.msra.mxu0 %v7614_v52  ;;  %v7710_v52 = vld [vmem:[%s8842_s10 + $0x6e0] ss:$8 sps:$4 sm:$0xff]  }
  0xfe   : > { %5433 = vmatprep.subr.bf16.mxu0 %v7622_v53  ;;  %5475 = vmatpush2.bf16.msra.mxu1 %v7617_v54  ;;  %v7718_v53 = vld [vmem:[%s8842_s10 + $0x6d4] ss:$8 sps:$4 sm:$0xff]   ;;  %v7713_v54 = vld [vmem:[%s8842_s10 + $0x7e0] ss:$8 sps:$4 sm:$0xff]  }
  0xff   : > { %5476 = vmatprep.subr.bf16.mxu1 %v7625_v55  ;;  %v7721_v55 = vld [vmem:[%s8842_s10 + $0x7d4] ss:$8 sps:$4 sm:$0xff]  }
 0x101   : > { %5434 = vmatpush2.bf16.msra.mxu0 %v7620_v56  ;;  %v7716_v56 = vld [vmem:[%s8842_s10 + $0x6d0] ss:$8 sps:$4 sm:$0xff]  }
 0x102   : > { %5435 = vmatprep.subr.bf16.mxu0 %v7628_v57  ;;  %5477 = vmatpush2.bf16.msra.mxu1 %v7623_v58  ;;  %v7724_v57 = vld [vmem:[%s8842_s10 + $0x6c4] ss:$8 sps:$4 sm:$0xff]   ;;  %v7719_v58 = vld [vmem:[%s8842_s10 + $0x7d0] ss:$8 sps:$4 sm:$0xff]  }
 0x103   : > { %5478 = vmatprep.subr.bf16.mxu1 %v7631_v59  ;;  %v7727_v59 = vld [vmem:[%s8842_s10 + $0x7c4] ss:$8 sps:$4 sm:$0xff]  }
 0x105   : > { %5436 = vmatpush2.bf16.msra.mxu0 %v7626_v60  ;;  %v7722_v60 = vld [vmem:[%s8842_s10 + $0x6c0] ss:$8 sps:$4 sm:$0xff]  }
 0x106   : > { %5437 = vmatprep.subr.bf16.mxu0 %v7634_v61  ;;  %5479 = vmatpush2.bf16.msra.mxu1 %v7629_v62  ;;  %v7730_v61 = vld [vmem:[%s8842_s10 + $0x6b4] ss:$8 sps:$4 sm:$0xff]   ;;  %v7725_v62 = vld [vmem:[%s8842_s10 + $0x7c0] ss:$8 sps:$4 sm:$0xff]  }
 0x107   : > { %5480 = vmatprep.subr.bf16.mxu1 %v7637_v63  ;;  %v7733_v63 = vld [vmem:[%s8842_s10 + $0x7b4] ss:$8 sps:$4 sm:$0xff]  }
 0x109   : > { %5438 = vmatpush2.bf16.msra.mxu0 %v7632_v0  ;;  %v7728_v0 = vld [vmem:[%s8842_s10 + $0x6b0] ss:$8 sps:$4 sm:$0xff]  }
 0x10a   : > { %5439 = vmatprep.subr.bf16.mxu0 %v7640_v1  ;;  %5481 = vmatpush2.bf16.msra.mxu1 %v7635_v2  ;;  %v7736_v1 = vld [vmem:[%s8842_s10 + $0x6a4] ss:$8 sps:$4 sm:$0xff]   ;;  %v7731_v2 = vld [vmem:[%s8842_s10 + $0x7b0] ss:$8 sps:$4 sm:$0xff]  }
 0x10b   : > { %5482 = vmatprep.subr.bf16.mxu1 %v7643_v3  ;;  %v7739_v3 = vld [vmem:[%s8842_s10 + $0x7a4] ss:$8 sps:$4 sm:$0xff]  }
 0x10d   : > { %5440 = vmatpush2.bf16.msra.mxu0 %v7638_v4  ;;  %v7734_v4 = vld [vmem:[%s8842_s10 + $0x6a0] ss:$8 sps:$4 sm:$0xff]  }
 0x10e   : > { %5441 = vmatprep.subr.bf16.mxu0 %v7646_v5  ;;  %5483 = vmatpush2.bf16.msra.mxu1 %v7641_v6  ;;  %v7742_v5 = vld [vmem:[%s8842_s10 + $0x694] ss:$8 sps:$4 sm:$0xff]   ;;  %v7737_v6 = vld [vmem:[%s8842_s10 + $0x7a0] ss:$8 sps:$4 sm:$0xff]  }
 0x10f   : > { %5484 = vmatprep.subr.bf16.mxu1 %v7649_v8  ;;  %v7740_v8 = vld [vmem:[%s8842_s10 + $0x690] ss:$8 sps:$4 sm:$0xff]  }
 0x111   : > { %5442 = vmatpush2.bf16.msra.mxu0 %v7644_v7  ;;  %v7745_v7 = vld [vmem:[%s8842_s10 + $0x794] ss:$8 sps:$4 sm:$0xff]  }
 0x112   : > { %5497 = vmatprep.subr.bf16.mxu0 %v7655_v10  ;;  %5485 = vmatpush2.bf16.msra.mxu1 %v7647_v9  ;;  %v7748_v9 = vld [vmem:[%s8842_s10 + $0x684] ss:$8 sps:$4 sm:$0xff]   ;;  %v7743_v10 = vld [vmem:[%s8842_s10 + $0x790] ss:$8 sps:$4 sm:$0xff]  }
 0x113   : > { %5540 = vmatprep.subr.bf16.mxu1 %v7661_v14  ;;  %v7757_v14 = vld [vmem:[%s8842_s10 + $0x874] ss:$8 sps:$4 sm:$0xff]  }
 0x114   : > { %5444 = vmatmul.mubr.bf16.vlgmr.msra.gmra.mxu0 %v7650_v11  ;;  %v7746_v11 = vld [vmem:[%s8842_s10 + $0x680] ss:$8 sps:$4 sm:$0xff]  }
 0x115   : > { %5498 = vmatpush1.bf16.msra.mxu0 %v7653_v12  ;;  %5529 = vmatprep.mubr.bf16.mxu0 %v7754_v15  ;;  %v7751_v12 = vld [vmem:[%s8842_s10 + $0x784] ss:$8 sps:$4 sm:$0xff]   ;;  %v7752_v15 = vld [vmem:[%s10000_s0 + $0x30] ss:$196 sps:$4 sm:$0xff]  }
 0x116   : > { %5487 = vmatmul.mubr.bf16.vlgmr.msra.gmra.mxu1 %v7656_v13  ;;  %5499 = vmatprep.subr.bf16.mxu0 %v7664_v16  ;;  %v7749_v13 = vld [vmem:[%s8842_s10 + $0x780] ss:$8 sps:$4 sm:$0xff]   ;;  %v7755_v16 = vld [vmem:[%s8842_s10 + $0x870] ss:$8 sps:$4 sm:$0xff]  }
 0x117   : > { %5541 = vmatpush1.bf16.msra.mxu1 %v7659_v17  ;;  %5572 = vmatprep.mubr.bf16.mxu1 %v7760_v18  ;;  %v7758_v17 = vld [vmem:[%s10000_s0 + $0x38] ss:$196 sps:$4 sm:$0xff]  }
 0x118   : > { %5542 = vmatprep.subr.bf16.mxu1 %v7667_v19  ;;  %v7763_v18 = vld [vmem:[%s8842_s10 + $0x974] ss:$8 sps:$4 sm:$0xff]   ;;  %v7856_v19 = vld [vmem:[%s10000_s0 + $0x44] ss:$196 sps:$4 sm:$0xff]  }
 0x119   : > { %5500 = vmatpush1.bf16.msra.mxu0 %v7662_v20  ;;  %v7766_v20 = vld [vmem:[%s8842_s10 + $0x864] ss:$8 sps:$4 sm:$0xff]  }
 0x11a   : > { %5501 = vmatprep.subr.bf16.mxu0 %v7670_v21  ;;  %v7761_v21 = vld [vmem:[%s8842_s10 + $0x970] ss:$8 sps:$4 sm:$0xff]  }
 0x11b   : > { %5543 = vmatpush1.bf16.msra.mxu1 %v7665_v22  ;;  %v7862_v22 = vld [vmem:[%s10000_s0 + $0x4c] ss:$196 sps:$4 sm:$0xff]  }
 0x11c   : > { %5544 = vmatprep.subr.bf16.mxu1 %v7673_v23  ;;  %v7769_v23 = vld [vmem:[%s8842_s10 + $0x964] ss:$8 sps:$4 sm:$0xff]  }
 0x11d   : > { %5502 = vmatpush1.bf16.msra.mxu0 %v7668_v24  ;;  %v7764_v24 = vld [vmem:[%s8842_s10 + $0x860] ss:$8 sps:$4 sm:$0xff]  }
 0x11e   : > { %5503 = vmatprep.subr.bf16.mxu0 %v7676_v25  ;;  %v7772_v25 = vld [vmem:[%s8842_s10 + $0x854] ss:$8 sps:$4 sm:$0xff]  }
 0x11f   : > { %5545 = vmatpush1.bf16.msra.mxu1 %v7671_v26  ;;  %v7767_v26 = vld [vmem:[%s8842_s10 + $0x960] ss:$8 sps:$4 sm:$0xff]  }
 0x120   : > { %5546 = vmatprep.subr.bf16.mxu1 %v7679_v27  ;;  %v7775_v27 = vld [vmem:[%s8842_s10 + $0x954] ss:$8 sps:$4 sm:$0xff]  }
 0x121   : > { %5504 = vmatpush1.bf16.msra.mxu0 %v7674_v28  ;;  %v7770_v28 = vld [vmem:[%s8842_s10 + $0x850] ss:$8 sps:$4 sm:$0xff]  }
 0x122   : > { %5505 = vmatprep.subr.bf16.mxu0 %v7682_v29  ;;  %v7778_v29 = vld [vmem:[%s8842_s10 + $0x844] ss:$8 sps:$4 sm:$0xff]  }
 0x123   : > { %5547 = vmatpush1.bf16.msra.mxu1 %v7677_v30  ;;  %v7773_v30 = vld [vmem:[%s8842_s10 + $0x950] ss:$8 sps:$4 sm:$0xff]  }
 0x124   : > { %5548 = vmatprep.subr.bf16.mxu1 %v7685_v31  ;;  %v7781_v31 = vld [vmem:[%s8842_s10 + $0x944] ss:$8 sps:$4 sm:$0xff]  }
 0x125   : > { %5506 = vmatpush1.bf16.msra.mxu0 %v7680_v32  ;;  %v7776_v32 = vld [vmem:[%s8842_s10 + $0x840] ss:$8 sps:$4 sm:$0xff]  }
 0x126   : > { %5507 = vmatprep.subr.bf16.mxu0 %v7688_v33  ;;  %v7784_v33 = vld [vmem:[%s8842_s10 + $0x834] ss:$8 sps:$4 sm:$0xff]  }
 0x127   : > { %5549 = vmatpush1.bf16.msra.mxu1 %v7683_v34  ;;  %v7779_v34 = vld [vmem:[%s8842_s10 + $0x940] ss:$8 sps:$4 sm:$0xff]  }
 0x128   : > { %5550 = vmatprep.subr.bf16.mxu1 %v7691_v35  ;;  %v7787_v35 = vld [vmem:[%s8842_s10 + $0x934] ss:$8 sps:$4 sm:$0xff]  }
 0x129   : > { %5508 = vmatpush1.bf16.msra.mxu0 %v7686_v36  ;;  %v7782_v36 = vld [vmem:[%s8842_s10 + $0x830] ss:$8 sps:$4 sm:$0xff]  }
 0x12a   : > { %5509 = vmatprep.subr.bf16.mxu0 %v7694_v37  ;;  %v7790_v37 = vld [vmem:[%s8842_s10 + $0x824] ss:$8 sps:$4 sm:$0xff]  }
 0x12b   : > { %5551 = vmatpush1.bf16.msra.mxu1 %v7689_v38  ;;  %v7785_v38 = vld [vmem:[%s8842_s10 + $0x930] ss:$8 sps:$4 sm:$0xff]  }
 0x12c   : > { %5552 = vmatprep.subr.bf16.mxu1 %v7697_v39  ;;  %v7793_v39 = vld [vmem:[%s8842_s10 + $0x924] ss:$8 sps:$4 sm:$0xff]  }
 0x12d   : > { %5510 = vmatpush1.bf16.msra.mxu0 %v7692_v40  ;;  %v7788_v40 = vld [vmem:[%s8842_s10 + $0x820] ss:$8 sps:$4 sm:$0xff]  }
 0x12e   : > { %5511 = vmatprep.subr.bf16.mxu0 %v7700_v41  ;;  %v7796_v41 = vld [vmem:[%s8842_s10 + $0x814] ss:$8 sps:$4 sm:$0xff]  }
 0x12f   : > { %5553 = vmatpush1.bf16.msra.mxu1 %v7695_v42  ;;  %v7791_v42 = vld [vmem:[%s8842_s10 + $0x920] ss:$8 sps:$4 sm:$0xff]  }
 0x130   : > { %5554 = vmatprep.subr.bf16.mxu1 %v7703_v43  ;;  %v7799_v43 = vld [vmem:[%s8842_s10 + $0x914] ss:$8 sps:$4 sm:$0xff]  }
 0x131   : > { %5512 = vmatpush1.bf16.msra.mxu0 %v7698_v44  ;;  %v7794_v44 = vld [vmem:[%s8842_s10 + $0x810] ss:$8 sps:$4 sm:$0xff]  }
 0x132   : > { %5513 = vmatprep.subr.bf16.mxu0 %v7706_v45  ;;  %v7802_v45 = vld [vmem:[%s8842_s10 + $0x804] ss:$8 sps:$4 sm:$0xff]  }
 0x133   : > { %5555 = vmatpush1.bf16.msra.mxu1 %v7701_v46  ;;  %v7797_v46 = vld [vmem:[%s8842_s10 + $0x910] ss:$8 sps:$4 sm:$0xff]  }
 0x134   : > { %5556 = vmatprep.subr.bf16.mxu1 %v7709_v47  ;;  %v7805_v47 = vld [vmem:[%s8842_s10 + $0x904] ss:$8 sps:$4 sm:$0xff]  }
 0x135   : > { %5514 = vmatpush2.bf16.msra.mxu0 %v7704_v48  ;;  %v7800_v48 = vld [vmem:[%s8842_s10 + $0x800] ss:$8 sps:$4 sm:$0xff]  }
 0x136   : > { %5515 = vmatprep.subr.bf16.mxu0 %v7712_v49  ;;  %v7808_v49 = vld [vmem:[%s8842_s10 + $0x8f4] ss:$8 sps:$4 sm:$0xff]  }
 0x137   : > { %5557 = vmatpush2.bf16.msra.mxu1 %v7707_v50  ;;  %v7803_v50 = vld [vmem:[%s8842_s10 + $0x900] ss:$8 sps:$4 sm:$0xff]  }
 0x138   : > { %5558 = vmatprep.subr.bf16.mxu1 %v7715_v51  ;;  %v7811_v51 = vld [vmem:[%s8842_s10 + $0x9f4] ss:$8 sps:$4 sm:$0xff]  }
 0x139   : > { %5516 = vmatpush2.bf16.msra.mxu0 %v7710_v52  ;;  %v7806_v52 = vld [vmem:[%s8842_s10 + $0x8f0] ss:$8 sps:$4 sm:$0xff]  }
 0x13a   : > { %5517 = vmatprep.subr.bf16.mxu0 %v7718_v53  ;;  %v7814_v53 = vld [vmem:[%s8842_s10 + $0x8e4] ss:$8 sps:$4 sm:$0xff]  }
 0x13b   : > { %5559 = vmatpush2.bf16.msra.mxu1 %v7713_v54  ;;  %v7809_v54 = vld [vmem:[%s8842_s10 + $0x9f0] ss:$8 sps:$4 sm:$0xff]  }
 0x13c   : > { %5560 = vmatprep.subr.bf16.mxu1 %v7721_v55  ;;  %v7817_v55 = vld [vmem:[%s8842_s10 + $0x9e4] ss:$8 sps:$4 sm:$0xff]  }
 0x13d   : > { %5518 = vmatpush2.bf16.msra.mxu0 %v7716_v56  ;;  %v7812_v56 = vld [vmem:[%s8842_s10 + $0x8e0] ss:$8 sps:$4 sm:$0xff]  }
 0x13e   : > { %5519 = vmatprep.subr.bf16.mxu0 %v7724_v57  ;;  %v7820_v57 = vld [vmem:[%s8842_s10 + $0x8d4] ss:$8 sps:$4 sm:$0xff]  }
 0x13f   : > { %5561 = vmatpush2.bf16.msra.mxu1 %v7719_v58  ;;  %v7815_v58 = vld [vmem:[%s8842_s10 + $0x9e0] ss:$8 sps:$4 sm:$0xff]  }
 0x140   : > { %5562 = vmatprep.subr.bf16.mxu1 %v7727_v59  ;;  %v7823_v59 = vld [vmem:[%s8842_s10 + $0x9d4] ss:$8 sps:$4 sm:$0xff]  }
 0x141   : > { %5520 = vmatpush2.bf16.msra.mxu0 %v7722_v60  ;;  %v7818_v60 = vld [vmem:[%s8842_s10 + $0x8d0] ss:$8 sps:$4 sm:$0xff]  }
 0x142   : > { %5521 = vmatprep.subr.bf16.mxu0 %v7730_v61  ;;  %v7826_v61 = vld [vmem:[%s8842_s10 + $0x8c4] ss:$8 sps:$4 sm:$0xff]  }
 0x143   : > { %5563 = vmatpush2.bf16.msra.mxu1 %v7725_v62  ;;  %v7821_v62 = vld [vmem:[%s8842_s10 + $0x9d0] ss:$8 sps:$4 sm:$0xff]  }
 0x144   : > { %5564 = vmatprep.subr.bf16.mxu1 %v7733_v63  ;;  %v7829_v63 = vld [vmem:[%s8842_s10 + $0x9c4] ss:$8 sps:$4 sm:$0xff]  }
 0x145   : > { %5522 = vmatpush2.bf16.msra.mxu0 %v7728_v0  ;;  %v7824_v0 = vld [vmem:[%s8842_s10 + $0x8c0] ss:$8 sps:$4 sm:$0xff]  }
 0x146   : > { %5523 = vmatprep.subr.bf16.mxu0 %v7736_v1  ;;  %v7832_v1 = vld [vmem:[%s8842_s10 + $0x8b4] ss:$8 sps:$4 sm:$0xff]  }
 0x147   : > { %5565 = vmatpush2.bf16.msra.mxu1 %v7731_v2  ;;  %v7827_v2 = vld [vmem:[%s8842_s10 + $0x9c0] ss:$8 sps:$4 sm:$0xff]  }
 0x148   : > { %5566 = vmatprep.subr.bf16.mxu1 %v7739_v3  ;;  %v7835_v3 = vld [vmem:[%s8842_s10 + $0x9b4] ss:$8 sps:$4 sm:$0xff]  }
 0x149   : > { %5524 = vmatpush2.bf16.msra.mxu0 %v7734_v4  ;;  %v7830_v4 = vld [vmem:[%s8842_s10 + $0x8b0] ss:$8 sps:$4 sm:$0xff]  }
 0x14a   : > { %5525 = vmatprep.subr.bf16.mxu0 %v7742_v5  ;;  %v7838_v5 = vld [vmem:[%s8842_s10 + $0x8a4] ss:$8 sps:$4 sm:$0xff]  }
 0x14b   : > { %5567 = vmatpush2.bf16.msra.mxu1 %v7737_v6  ;;  %v7833_v6 = vld [vmem:[%s8842_s10 + $0x9b0] ss:$8 sps:$4 sm:$0xff]  }
 0x14c   : > { %5568 = vmatprep.subr.bf16.mxu1 %v7745_v7  ;;  %v7836_v7 = vld [vmem:[%s8842_s10 + $0x8a0] ss:$8 sps:$4 sm:$0xff]  }
 0x14d   : > { %5526 = vmatpush2.bf16.msra.mxu0 %v7740_v8  ;;  %v7841_v8 = vld [vmem:[%s8842_s10 + $0x9a4] ss:$8 sps:$4 sm:$0xff]  }
 0x14e   : > { %5527 = vmatprep.subr.bf16.mxu0 %v7748_v9  ;;  %v7839_v9 = vld [vmem:[%s8842_s10 + $0x9a0] ss:$8 sps:$4 sm:$0xff]  }
 0x14f   : > { %5569 = vmatpush2.bf16.msra.mxu1 %v7743_v10  ;;  %v7844_v10 = vld [vmem:[%s8842_s10 + $0x894] ss:$8 sps:$4 sm:$0xff]  }
 0x150   : > { %5570 = vmatprep.subr.bf16.mxu1 %v7751_v12  ;;  %v7847_v12 = vld [vmem:[%s8842_s10 + $0x994] ss:$8 sps:$4 sm:$0xff]  }
 0x151   : > { %5528 = vmatpush2.bf16.msra.mxu0 %v7746_v11  ;;  %v7842_v11 = vld [vmem:[%s8842_s10 + $0x890] ss:$8 sps:$4 sm:$0xff]  }
 0x152   : > { %5583 = vmatprep.subr.bf16.mxu0 %v7757_v14  ;;  %v7850_v14 = vld [vmem:[%s8842_s10 + $0x884] ss:$8 sps:$4 sm:$0xff]  }
 0x153   : > { %5571 = vmatpush2.bf16.msra.mxu1 %v7749_v13  ;;  %v7845_v13 = vld [vmem:[%s8842_s10 + $0x990] ss:$8 sps:$4 sm:$0xff]  }
 0x154   : > { %5530 = vmatmul.mubr.bf16.vlgmr.msra.gmra.mxu0 %v7752_v15  ;;  %5626 = vmatprep.subr.bf16.mxu1 %v7763_v18  ;;  %v7848_v15 = vld [vmem:[%s8842_s10 + $0x880] ss:$8 sps:$4 sm:$0xff]   ;;  %v7859_v18 = vld [vmem:[%s8842_s10 + $0xa74] ss:$8 sps:$4 sm:$0xff]  }
 0x155   : > { %5584 = vmatpush1.bf16.msra.mxu0 %v7755_v16  ;;  %5615 = vmatprep.mubr.bf16.mxu0 %v7856_v19  ;;  %v7853_v16 = vld [vmem:[%s8842_s10 + $0x984] ss:$8 sps:$4 sm:$0xff]  }
 0x156   : > { %5573 = vmatmul.mubr.bf16.vlgmr.msra.gmra.mxu1 %v7758_v17  ;;  %5585 = vmatprep.subr.bf16.mxu0 %v7766_v20  ;;  %v7851_v17 = vld [vmem:[%s8842_s10 + $0x980] ss:$8 sps:$4 sm:$0xff]   ;;  %v7865_v20 = vld [vmem:[%s8842_s10 + $0xb74] ss:$8 sps:$4 sm:$0xff]  }
 0x157   : > { %5627 = vmatpush1.bf16.msra.mxu1 %v7761_v21  ;;  %5658 = vmatprep.mubr.bf16.mxu1 %v7862_v22  ;;  %v7854_v19 = vld [vmem:[%s10000_s0 + $0x40] ss:$196 sps:$4 sm:$0xff]   ;;  %v7857_v21 = vld [vmem:[%s8842_s10 + $0xa70] ss:$8 sps:$4 sm:$0xff]   ;;  %v7860_v22 = vld [vmem:[%s10000_s0 + $0x48] ss:$196 sps:$4 sm:$0xff]  }
 0x158   : > { %5628 = vmatprep.subr.bf16.mxu1 %v7769_v23  ;;  %v7958_v23 = vld [vmem:[%s10000_s0 + $0x54] ss:$196 sps:$4 sm:$0xff]  }
 0x159   : > { %5586 = vmatpush1.bf16.msra.mxu0 %v7764_v24  ;;  %v7868_v24 = vld [vmem:[%s8842_s10 + $0xa64] ss:$8 sps:$4 sm:$0xff]  }
 0x15a   : > { %5587 = vmatprep.subr.bf16.mxu0 %v7772_v25  ;;  %v7863_v25 = vld [vmem:[%s8842_s10 + $0xb70] ss:$8 sps:$4 sm:$0xff]  }
 0x15b   : > { %5629 = vmatpush1.bf16.msra.mxu1 %v7767_v26  ;;  %v7964_v26 = vld [vmem:[%s10000_s0 + $0x5c] ss:$196 sps:$4 sm:$0xff]  }
 0x15c   : > { %5630 = vmatprep.subr.bf16.mxu1 %v7775_v27  ;;  %v7866_v27 = vld [vmem:[%s8842_s10 + $0xa60] ss:$8 sps:$4 sm:$0xff]  }
 0x15d   : > { %5588 = vmatpush1.bf16.msra.mxu0 %v7770_v28  ;;  %v7871_v28 = vld [vmem:[%s8842_s10 + $0xb64] ss:$8 sps:$4 sm:$0xff]  }
 0x15e   : > { %5589 = vmatprep.subr.bf16.mxu0 %v7778_v29  ;;  %v7869_v29 = vld [vmem:[%s8842_s10 + $0xb60] ss:$8 sps:$4 sm:$0xff]  }
 0x15f   : > { %5631 = vmatpush1.bf16.msra.mxu1 %v7773_v30  ;;  %v7874_v30 = vld [vmem:[%s8842_s10 + $0xa54] ss:$8 sps:$4 sm:$0xff]  }
 0x160   : > { %5632 = vmatprep.subr.bf16.mxu1 %v7781_v31  ;;  %v7872_v31 = vld [vmem:[%s8842_s10 + $0xa50] ss:$8 sps:$4 sm:$0xff]  }
 0x161   : > { %5590 = vmatpush1.bf16.msra.mxu0 %v7776_v32  ;;  %v7877_v32 = vld [vmem:[%s8842_s10 + $0xb54] ss:$8 sps:$4 sm:$0xff]  }
 0x162   : > { %5591 = vmatprep.subr.bf16.mxu0 %v7784_v33  ;;  %v7875_v33 = vld [vmem:[%s8842_s10 + $0xb50] ss:$8 sps:$4 sm:$0xff]  }
 0x163   : > { %5633 = vmatpush1.bf16.msra.mxu1 %v7779_v34  ;;  %v7880_v34 = vld [vmem:[%s8842_s10 + $0xa44] ss:$8 sps:$4 sm:$0xff]  }
 0x164   : > { %5634 = vmatprep.subr.bf16.mxu1 %v7787_v35  ;;  %v7878_v35 = vld [vmem:[%s8842_s10 + $0xa40] ss:$8 sps:$4 sm:$0xff]  }
 0x165   : > { %5592 = vmatpush1.bf16.msra.mxu0 %v7782_v36  ;;  %v7883_v36 = vld [vmem:[%s8842_s10 + $0xb44] ss:$8 sps:$4 sm:$0xff]  }
 0x166   : > { %5593 = vmatprep.subr.bf16.mxu0 %v7790_v37  ;;  %v7881_v37 = vld [vmem:[%s8842_s10 + $0xb40] ss:$8 sps:$4 sm:$0xff]  }
 0x167   : > { %5635 = vmatpush1.bf16.msra.mxu1 %v7785_v38  ;;  %v7886_v38 = vld [vmem:[%s8842_s10 + $0xa34] ss:$8 sps:$4 sm:$0xff]  }
 0x168   : > { %5636 = vmatprep.subr.bf16.mxu1 %v7793_v39  ;;  %v7884_v39 = vld [vmem:[%s8842_s10 + $0xa30] ss:$8 sps:$4 sm:$0xff]  }
 0x169   : > { %5594 = vmatpush1.bf16.msra.mxu0 %v7788_v40  ;;  %v7889_v40 = vld [vmem:[%s8842_s10 + $0xb34] ss:$8 sps:$4 sm:$0xff]  }
 0x16a   : > { %5595 = vmatprep.subr.bf16.mxu0 %v7796_v41  ;;  %v7887_v41 = vld [vmem:[%s8842_s10 + $0xb30] ss:$8 sps:$4 sm:$0xff]  }
 0x16b   : > { %5637 = vmatpush1.bf16.msra.mxu1 %v7791_v42  ;;  %v7892_v42 = vld [vmem:[%s8842_s10 + $0xa24] ss:$8 sps:$4 sm:$0xff]  }
 0x16c   : > { %5638 = vmatprep.subr.bf16.mxu1 %v7799_v43  ;;  %v7890_v43 = vld [vmem:[%s8842_s10 + $0xa20] ss:$8 sps:$4 sm:$0xff]  }
 0x16d   : > { %5596 = vmatpush1.bf16.msra.mxu0 %v7794_v44  ;;  %v7895_v44 = vld [vmem:[%s8842_s10 + $0xb24] ss:$8 sps:$4 sm:$0xff]  }
 0x16e   : > { %5597 = vmatprep.subr.bf16.mxu0 %v7802_v45  ;;  %v7893_v45 = vld [vmem:[%s8842_s10 + $0xb20] ss:$8 sps:$4 sm:$0xff]  }
 0x16f   : > { %5639 = vmatpush1.bf16.msra.mxu1 %v7797_v46  ;;  %v7898_v46 = vld [vmem:[%s8842_s10 + $0xa14] ss:$8 sps:$4 sm:$0xff]  }
 0x170   : > { %5640 = vmatprep.subr.bf16.mxu1 %v7805_v47  ;;  %v7896_v47 = vld [vmem:[%s8842_s10 + $0xa10] ss:$8 sps:$4 sm:$0xff]  }
 0x171   : > { %5598 = vmatpush1.bf16.msra.mxu0 %v7800_v48  ;;  %v7901_v48 = vld [vmem:[%s8842_s10 + $0xb14] ss:$8 sps:$4 sm:$0xff]  }
 0x172   : > { %5599 = vmatprep.subr.bf16.mxu0 %v7808_v49  ;;  %v7899_v49 = vld [vmem:[%s8842_s10 + $0xb10] ss:$8 sps:$4 sm:$0xff]  }
 0x173   : > { %5641 = vmatpush1.bf16.msra.mxu1 %v7803_v50  ;;  %v7904_v50 = vld [vmem:[%s8842_s10 + $0xa04] ss:$8 sps:$4 sm:$0xff]  }
 0x174   : > { %5642 = vmatprep.subr.bf16.mxu1 %v7811_v51  ;;  %v7902_v51 = vld [vmem:[%s8842_s10 + $0xa00] ss:$8 sps:$4 sm:$0xff]  }
 0x175   : > { %5600 = vmatpush2.bf16.msra.mxu0 %v7806_v52  ;;  %v7907_v52 = vld [vmem:[%s8842_s10 + $0xb04] ss:$8 sps:$4 sm:$0xff]  }
 0x176   : > { %5601 = vmatprep.subr.bf16.mxu0 %v7814_v53  ;;  %v7905_v53 = vld [vmem:[%s8842_s10 + $0xb00] ss:$8 sps:$4 sm:$0xff]  }
 0x177   : > { %5643 = vmatpush2.bf16.msra.mxu1 %v7809_v54  ;;  %v7910_v54 = vld [vmem:[%s8842_s10 + $0xaf4] ss:$8 sps:$4 sm:$0xff]  }
 0x178   : > { %5644 = vmatprep.subr.bf16.mxu1 %v7817_v55  ;;  %v7908_v55 = vld [vmem:[%s8842_s10 + $0xaf0] ss:$8 sps:$4 sm:$0xff]  }
 0x179   : > { %5602 = vmatpush2.bf16.msra.mxu0 %v7812_v56  ;;  %v7913_v56 = vld [vmem:[%s8842_s10 + $0xbf4] ss:$8 sps:$4 sm:$0xff]  }
 0x17a   : > { %5603 = vmatprep.subr.bf16.mxu0 %v7820_v57  ;;  %v7911_v57 = vld [vmem:[%s8842_s10 + $0xbf0] ss:$8 sps:$4 sm:$0xff]  }
 0x17b   : > { %5645 = vmatpush2.bf16.msra.mxu1 %v7815_v58  ;;  %v7916_v58 = vld [vmem:[%s8842_s10 + $0xae4] ss:$8 sps:$4 sm:$0xff]  }
 0x17c   : > { %5646 = vmatprep.subr.bf16.mxu1 %v7823_v59  ;;  %v7914_v59 = vld [vmem:[%s8842_s10 + $0xae0] ss:$8 sps:$4 sm:$0xff]  }
 0x17d   : > { %5604 = vmatpush2.bf16.msra.mxu0 %v7818_v60  ;;  %v7919_v60 = vld [vmem:[%s8842_s10 + $0xbe4] ss:$8 sps:$4 sm:$0xff]  }
 0x17e   : > { %5605 = vmatprep.subr.bf16.mxu0 %v7826_v61  ;;  %v7917_v61 = vld [vmem:[%s8842_s10 + $0xbe0] ss:$8 sps:$4 sm:$0xff]  }
 0x17f   : > { %5647 = vmatpush2.bf16.msra.mxu1 %v7821_v62  ;;  %v7922_v62 = vld [vmem:[%s8842_s10 + $0xad4] ss:$8 sps:$4 sm:$0xff]  }
 0x180   : > { %5648 = vmatprep.subr.bf16.mxu1 %v7829_v63  ;;  %v7920_v63 = vld [vmem:[%s8842_s10 + $0xad0] ss:$8 sps:$4 sm:$0xff]  }
 0x181   : > { %5606 = vmatpush2.bf16.msra.mxu0 %v7824_v0  ;;  %v7925_v0 = vld [vmem:[%s8842_s10 + $0xbd4] ss:$8 sps:$4 sm:$0xff]  }
 0x182   : > { %5607 = vmatprep.subr.bf16.mxu0 %v7832_v1  ;;  %v7923_v1 = vld [vmem:[%s8842_s10 + $0xbd0] ss:$8 sps:$4 sm:$0xff]  }
 0x183   : > { %5649 = vmatpush2.bf16.msra.mxu1 %v7827_v2  ;;  %v7928_v2 = vld [vmem:[%s8842_s10 + $0xac4] ss:$8 sps:$4 sm:$0xff]  }
 0x184   : > { %5650 = vmatprep.subr.bf16.mxu1 %v7835_v3  ;;  %v7926_v3 = vld [vmem:[%s8842_s10 + $0xac0] ss:$8 sps:$4 sm:$0xff]  }
 0x185   : > { %5608 = vmatpush2.bf16.msra.mxu0 %v7830_v4  ;;  %v7931_v4 = vld [vmem:[%s8842_s10 + $0xbc4] ss:$8 sps:$4 sm:$0xff]  }
 0x186   : > { %5609 = vmatprep.subr.bf16.mxu0 %v7838_v5  ;;  %v7929_v5 = vld [vmem:[%s8842_s10 + $0xbc0] ss:$8 sps:$4 sm:$0xff]  }
 0x187   : > { %5651 = vmatpush2.bf16.msra.mxu1 %v7833_v6  ;;  %v7934_v6 = vld [vmem:[%s8842_s10 + $0xab4] ss:$8 sps:$4 sm:$0xff]  }
 0x188   : > { %5652 = vmatprep.subr.bf16.mxu1 %v7841_v8  ;;  %v7937_v8 = vld [vmem:[%s8842_s10 + $0xbb4] ss:$8 sps:$4 sm:$0xff]  }
 0x189   : > { %5610 = vmatpush2.bf16.msra.mxu0 %v7836_v7  ;;  %v7932_v7 = vld [vmem:[%s8842_s10 + $0xab0] ss:$8 sps:$4 sm:$0xff]  }
 0x18a   : > { %5611 = vmatprep.subr.bf16.mxu0 %v7844_v10  ;;  %v7940_v10 = vld [vmem:[%s8842_s10 + $0xaa4] ss:$8 sps:$4 sm:$0xff]  }
 0x18b   : > { %5653 = vmatpush2.bf16.msra.mxu1 %v7839_v9  ;;  %v7935_v9 = vld [vmem:[%s8842_s10 + $0xbb0] ss:$8 sps:$4 sm:$0xff]  }
 0x18c   : > { %5654 = vmatprep.subr.bf16.mxu1 %v7847_v12  ;;  %v7943_v12 = vld [vmem:[%s8842_s10 + $0xba4] ss:$8 sps:$4 sm:$0xff]  }
 0x18d   : > { %5612 = vmatpush2.bf16.msra.mxu0 %v7842_v11  ;;  %v7938_v11 = vld [vmem:[%s8842_s10 + $0xaa0] ss:$8 sps:$4 sm:$0xff]  }
 0x18e   : > { %5613 = vmatprep.subr.bf16.mxu0 %v7850_v14  ;;  %v7946_v14 = vld [vmem:[%s8842_s10 + $0xa94] ss:$8 sps:$4 sm:$0xff]  }
 0x18f   : > { %5655 = vmatpush2.bf16.msra.mxu1 %v7845_v13  ;;  %v7941_v13 = vld [vmem:[%s8842_s10 + $0xba0] ss:$8 sps:$4 sm:$0xff]  }
 0x190   : > { %5656 = vmatprep.subr.bf16.mxu1 %v7853_v16  ;;  %v7949_v16 = vld [vmem:[%s8842_s10 + $0xb94] ss:$8 sps:$4 sm:$0xff]  }
 0x191   : > { %5614 = vmatpush2.bf16.msra.mxu0 %v7848_v15  ;;  %v7944_v15 = vld [vmem:[%s8842_s10 + $0xa90] ss:$8 sps:$4 sm:$0xff]  }
 0x192   : > { %5669 = vmatprep.subr.bf16.mxu0 %v7859_v18  ;;  %v7952_v18 = vld [vmem:[%s8842_s10 + $0xa84] ss:$8 sps:$4 sm:$0xff]  }
 0x193   : > { %5657 = vmatpush2.bf16.msra.mxu1 %v7851_v17  ;;  %v7947_v17 = vld [vmem:[%s8842_s10 + $0xb90] ss:$8 sps:$4 sm:$0xff]  }
 0x194   : > { %5616 = vmatmul.mubr.bf16.vlgmr.msra.gmra.mxu0 %v7854_v19  ;;  %5712 = vmatprep.subr.bf16.mxu1 %v7865_v20  ;;  %v7950_v19 = vld [vmem:[%s8842_s10 + $0xa80] ss:$8 sps:$4 sm:$0xff]   ;;  %v7955_v20 = vld [vmem:[%s8842_s10 + $0xb84] ss:$8 sps:$4 sm:$0xff]  }
 0x195   : > { %5670 = vmatpush1.bf16.msra.mxu0 %v7857_v21  ;;  %5701 = vmatprep.mubr.bf16.mxu0 %v7958_v23  ;;  %v7953_v21 = vld [vmem:[%s8842_s10 + $0xb80] ss:$8 sps:$4 sm:$0xff]   ;;  %v7956_v23 = vld [vmem:[%s10000_s0 + $0x50] ss:$196 sps:$4 sm:$0xff]  }
 0x196   : > { %5659 = vmatmul.mubr.bf16.vlgmr.msra.gmra.mxu1 %v7860_v22  ;;  %5671 = vmatprep.subr.bf16.mxu0 %v7868_v24  ;;  %v7961_v22 = vld [vmem:[%s8842_s10 + $0xc74] ss:$8 sps:$4 sm:$0xff]  }
 0x197   : > { %5713 = vmatpush1.bf16.msra.mxu1 %v7863_v25  ;;  %5744 = vmatprep.mubr.bf16.mxu1 %v7964_v26  ;;  %v7967_v24 = vld [vmem:[%s8842_s10 + $0xd74] ss:$8 sps:$4 sm:$0xff]   ;;  %v7959_v25 = vld [vmem:[%s8842_s10 + $0xc70] ss:$8 sps:$4 sm:$0xff]  }
 0x198   : > { %5714 = vmatprep.subr.bf16.mxu1 %v7871_v28  ;;  %v7962_v26 = vld [vmem:[%s10000_s0 + $0x58] ss:$196 sps:$4 sm:$0xff]   ;;  %v7970_v28 = vld [vmem:[%s8842_s10 + $0xc64] ss:$8 sps:$4 sm:$0xff]  }
 0x199   : > { %5672 = vmatpush1.bf16.msra.mxu0 %v7866_v27  ;;  %v8060_v27 = vld [vmem:[%s10000_s0 + $0x64] ss:$196 sps:$4 sm:$0xff]  }
 0x19a   : > { %5673 = vmatprep.subr.bf16.mxu0 %v7874_v30  ;;  %v8066_v30 = vld [vmem:[%s10000_s0 + $0x6c] ss:$196 sps:$4 sm:$0xff]  }
 0x19b   : > { %5715 = vmatpush1.bf16.msra.mxu1 %v7869_v29  ;;  %v7965_v29 = vld [vmem:[%s8842_s10 + $0xd70] ss:$8 sps:$4 sm:$0xff]  }
 0x19c   : > { %5716 = vmatprep.subr.bf16.mxu1 %v7877_v32  ;;  %v7973_v32 = vld [vmem:[%s8842_s10 + $0xd64] ss:$8 sps:$4 sm:$0xff]  }
 0x19d   : > { %5674 = vmatpush1.bf16.msra.mxu0 %v7872_v31  ;;  %v7968_v31 = vld [vmem:[%s8842_s10 + $0xc60] ss:$8 sps:$4 sm:$0xff]  }
 0x19e   : > { %5675 = vmatprep.subr.bf16.mxu0 %v7880_v34  ;;  %v7976_v34 = vld [vmem:[%s8842_s10 + $0xc54] ss:$8 sps:$4 sm:$0xff]  }
 0x19f   : > { %5717 = vmatpush1.bf16.msra.mxu1 %v7875_v33  ;;  %v7971_v33 = vld [vmem:[%s8842_s10 + $0xd60] ss:$8 sps:$4 sm:$0xff]  }
 0x1a0   : > { %5718 = vmatprep.subr.bf16.mxu1 %v7883_v36  ;;  %v7979_v36 = vld [vmem:[%s8842_s10 + $0xd54] ss:$8 sps:$4 sm:$0xff]  }
 0x1a1   : > { %5676 = vmatpush1.bf16.msra.mxu0 %v7878_v35  ;;  %v7974_v35 = vld [vmem:[%s8842_s10 + $0xc50] ss:$8 sps:$4 sm:$0xff]  }
 0x1a2   : > { %5677 = vmatprep.subr.bf16.mxu0 %v7886_v38  ;;  %v7982_v38 = vld [vmem:[%s8842_s10 + $0xc44] ss:$8 sps:$4 sm:$0xff]  }
 0x1a3   : > { %5719 = vmatpush1.bf16.msra.mxu1 %v7881_v37  ;;  %v7977_v37 = vld [vmem:[%s8842_s10 + $0xd50] ss:$8 sps:$4 sm:$0xff]  }
 0x1a4   : > { %5720 = vmatprep.subr.bf16.mxu1 %v7889_v40  ;;  %v7985_v40 = vld [vmem:[%s8842_s10 + $0xd44] ss:$8 sps:$4 sm:$0xff]  }
 0x1a5   : > { %5678 = vmatpush1.bf16.msra.mxu0 %v7884_v39  ;;  %v7980_v39 = vld [vmem:[%s8842_s10 + $0xc40] ss:$8 sps:$4 sm:$0xff]  }
 0x1a6   : > { %5679 = vmatprep.subr.bf16.mxu0 %v7892_v42  ;;  %v7988_v42 = vld [vmem:[%s8842_s10 + $0xc34] ss:$8 sps:$4 sm:$0xff]  }
 0x1a7   : > { %5721 = vmatpush1.bf16.msra.mxu1 %v7887_v41  ;;  %v7983_v41 = vld [vmem:[%s8842_s10 + $0xd40] ss:$8 sps:$4 sm:$0xff]  }
 0x1a8   : > { %5722 = vmatprep.subr.bf16.mxu1 %v7895_v44  ;;  %v7991_v44 = vld [vmem:[%s8842_s10 + $0xd34] ss:$8 sps:$4 sm:$0xff]  }
 0x1a9   : > { %5680 = vmatpush1.bf16.msra.mxu0 %v7890_v43  ;;  %v7986_v43 = vld [vmem:[%s8842_s10 + $0xc30] ss:$8 sps:$4 sm:$0xff]  }
 0x1aa   : > { %5681 = vmatprep.subr.bf16.mxu0 %v7898_v46  ;;  %v7994_v46 = vld [vmem:[%s8842_s10 + $0xc24] ss:$8 sps:$4 sm:$0xff]  }
 0x1ab   : > { %5723 = vmatpush1.bf16.msra.mxu1 %v7893_v45  ;;  %v7989_v45 = vld [vmem:[%s8842_s10 + $0xd30] ss:$8 sps:$4 sm:$0xff]  }
 0x1ac   : > { %5724 = vmatprep.subr.bf16.mxu1 %v7901_v48  ;;  %v7997_v48 = vld [vmem:[%s8842_s10 + $0xd24] ss:$8 sps:$4 sm:$0xff]  }
 0x1ad   : > { %5682 = vmatpush1.bf16.msra.mxu0 %v7896_v47  ;;  %v7992_v47 = vld [vmem:[%s8842_s10 + $0xc20] ss:$8 sps:$4 sm:$0xff]  }
 0x1ae   : > { %5683 = vmatprep.subr.bf16.mxu0 %v7904_v50  ;;  %v8000_v50 = vld [vmem:[%s8842_s10 + $0xc14] ss:$8 sps:$4 sm:$0xff]  }
 0x1af   : > { %5725 = vmatpush1.bf16.msra.mxu1 %v7899_v49  ;;  %v7995_v49 = vld [vmem:[%s8842_s10 + $0xd20] ss:$8 sps:$4 sm:$0xff]  }
 0x1b0   : > { %5726 = vmatprep.subr.bf16.mxu1 %v7907_v52  ;;  %v8003_v52 = vld [vmem:[%s8842_s10 + $0xd14] ss:$8 sps:$4 sm:$0xff]  }
 0x1b1   : > { %5684 = vmatpush1.bf16.msra.mxu0 %v7902_v51  ;;  %v7998_v51 = vld [vmem:[%s8842_s10 + $0xc10] ss:$8 sps:$4 sm:$0xff]  }
 0x1b2   : > { %5685 = vmatprep.subr.bf16.mxu0 %v7910_v54  ;;  %v8006_v54 = vld [vmem:[%s8842_s10 + $0xc04] ss:$8 sps:$4 sm:$0xff]  }
 0x1b3   : > { %5727 = vmatpush1.bf16.msra.mxu1 %v7905_v53  ;;  %v8001_v53 = vld [vmem:[%s8842_s10 + $0xd10] ss:$8 sps:$4 sm:$0xff]  }
 0x1b4   : > { %5728 = vmatprep.subr.bf16.mxu1 %v7913_v56  ;;  %v8009_v56 = vld [vmem:[%s8842_s10 + $0xd04] ss:$8 sps:$4 sm:$0xff]  }
 0x1b5   : > { %5686 = vmatpush2.bf16.msra.mxu0 %v7908_v55  ;;  %v8004_v55 = vld [vmem:[%s8842_s10 + $0xc00] ss:$8 sps:$4 sm:$0xff]  }
 0x1b6   : > { %5687 = vmatprep.subr.bf16.mxu0 %v7916_v58  ;;  %v8012_v58 = vld [vmem:[%s8842_s10 + $0xcf4] ss:$8 sps:$4 sm:$0xff]  }
 0x1b7   : > { %5729 = vmatpush2.bf16.msra.mxu1 %v7911_v57  ;;  %v8007_v57 = vld [vmem:[%s8842_s10 + $0xd00] ss:$8 sps:$4 sm:$0xff]  }
 0x1b8   : > { %5730 = vmatprep.subr.bf16.mxu1 %v7919_v60  ;;  %v8015_v60 = vld [vmem:[%s8842_s10 + $0xdf4] ss:$8 sps:$4 sm:$0xff]  }
 0x1b9   : > { %5688 = vmatpush2.bf16.msra.mxu0 %v7914_v59  ;;  %v8010_v59 = vld [vmem:[%s8842_s10 + $0xcf0] ss:$8 sps:$4 sm:$0xff]  }
 0x1ba   : > { %5689 = vmatprep.subr.bf16.mxu0 %v7922_v62  ;;  %v8018_v62 = vld [vmem:[%s8842_s10 + $0xce4] ss:$8 sps:$4 sm:$0xff]  }
 0x1bb   : > { %5731 = vmatpush2.bf16.msra.mxu1 %v7917_v61  ;;  %v8013_v61 = vld [vmem:[%s8842_s10 + $0xdf0] ss:$8 sps:$4 sm:$0xff]  }
 0x1bc   : > { %5732 = vmatprep.subr.bf16.mxu1 %v7925_v0  ;;  %v8021_v0 = vld [vmem:[%s8842_s10 + $0xde4] ss:$8 sps:$4 sm:$0xff]  }
 0x1bd   : > { %5690 = vmatpush2.bf16.msra.mxu0 %v7920_v63  ;;  %v8016_v63 = vld [vmem:[%s8842_s10 + $0xce0] ss:$8 sps:$4 sm:$0xff]  }
 0x1be   : > { %5691 = vmatprep.subr.bf16.mxu0 %v7928_v2  ;;  %v8024_v2 = vld [vmem:[%s8842_s10 + $0xcd4] ss:$8 sps:$4 sm:$0xff]  }
 0x1bf   : > { %5733 = vmatpush2.bf16.msra.mxu1 %v7923_v1  ;;  %v8019_v1 = vld [vmem:[%s8842_s10 + $0xde0] ss:$8 sps:$4 sm:$0xff]  }
 0x1c0   : > { %5734 = vmatprep.subr.bf16.mxu1 %v7931_v4  ;;  %v8027_v4 = vld [vmem:[%s8842_s10 + $0xdd4] ss:$8 sps:$4 sm:$0xff]  }
 0x1c1   : > { %5692 = vmatpush2.bf16.msra.mxu0 %v7926_v3  ;;  %v8022_v3 = vld [vmem:[%s8842_s10 + $0xcd0] ss:$8 sps:$4 sm:$0xff]  }
 0x1c2   : > { %5693 = vmatprep.subr.bf16.mxu0 %v7934_v6  ;;  %v8030_v6 = vld [vmem:[%s8842_s10 + $0xcc4] ss:$8 sps:$4 sm:$0xff]  }
 0x1c3   : > { %5735 = vmatpush2.bf16.msra.mxu1 %v7929_v5  ;;  %v8025_v5 = vld [vmem:[%s8842_s10 + $0xdd0] ss:$8 sps:$4 sm:$0xff]  }
 0x1c4   : > { %5736 = vmatprep.subr.bf16.mxu1 %v7937_v8  ;;  %v8033_v8 = vld [vmem:[%s8842_s10 + $0xdc4] ss:$8 sps:$4 sm:$0xff]  }
 0x1c5   : > { %5694 = vmatpush2.bf16.msra.mxu0 %v7932_v7  ;;  %v8028_v7 = vld [vmem:[%s8842_s10 + $0xcc0] ss:$8 sps:$4 sm:$0xff]  }
 0x1c6   : > { %5695 = vmatprep.subr.bf16.mxu0 %v7940_v10  ;;  %v8036_v10 = vld [vmem:[%s8842_s10 + $0xcb4] ss:$8 sps:$4 sm:$0xff]  }
 0x1c7   : > { %5737 = vmatpush2.bf16.msra.mxu1 %v7935_v9  ;;  %v8031_v9 = vld [vmem:[%s8842_s10 + $0xdc0] ss:$8 sps:$4 sm:$0xff]  }
 0x1c8   : > { %5738 = vmatprep.subr.bf16.mxu1 %v7943_v12  ;;  %v8039_v12 = vld [vmem:[%s8842_s10 + $0xdb4] ss:$8 sps:$4 sm:$0xff]  }
 0x1c9   : > { %5696 = vmatpush2.bf16.msra.mxu0 %v7938_v11  ;;  %v8034_v11 = vld [vmem:[%s8842_s10 + $0xcb0] ss:$8 sps:$4 sm:$0xff]  }
 0x1ca   : > { %5697 = vmatprep.subr.bf16.mxu0 %v7946_v14  ;;  %v8042_v14 = vld [vmem:[%s8842_s10 + $0xca4] ss:$8 sps:$4 sm:$0xff]  }
 0x1cb   : > { %5739 = vmatpush2.bf16.msra.mxu1 %v7941_v13  ;;  %v8037_v13 = vld [vmem:[%s8842_s10 + $0xdb0] ss:$8 sps:$4 sm:$0xff]  }
 0x1cc   : > { %5740 = vmatprep.subr.bf16.mxu1 %v7949_v16  ;;  %v8045_v16 = vld [vmem:[%s8842_s10 + $0xda4] ss:$8 sps:$4 sm:$0xff]  }
 0x1cd   : > { %5698 = vmatpush2.bf16.msra.mxu0 %v7944_v15  ;;  %v8040_v15 = vld [vmem:[%s8842_s10 + $0xca0] ss:$8 sps:$4 sm:$0xff]  }
 0x1ce   : > { %5699 = vmatprep.subr.bf16.mxu0 %v7952_v18  ;;  %v8048_v18 = vld [vmem:[%s8842_s10 + $0xc94] ss:$8 sps:$4 sm:$0xff]  }
 0x1cf   : > { %5741 = vmatpush2.bf16.msra.mxu1 %v7947_v17  ;;  %v8043_v17 = vld [vmem:[%s8842_s10 + $0xda0] ss:$8 sps:$4 sm:$0xff]  }
 0x1d0   : > { %5742 = vmatprep.subr.bf16.mxu1 %v7955_v20  ;;  %v8051_v20 = vld [vmem:[%s8842_s10 + $0xd94] ss:$8 sps:$4 sm:$0xff]  }
 0x1d1   : > { %5700 = vmatpush2.bf16.msra.mxu0 %v7950_v19  ;;  %v8046_v19 = vld [vmem:[%s8842_s10 + $0xc90] ss:$8 sps:$4 sm:$0xff]  }
 0x1d2   : > { %5755 = vmatprep.subr.bf16.mxu0 %v7961_v22  ;;  %v8054_v22 = vld [vmem:[%s8842_s10 + $0xc84] ss:$8 sps:$4 sm:$0xff]  }
 0x1d3   : > { %5743 = vmatpush2.bf16.msra.mxu1 %v7953_v21  ;;  %v8049_v21 = vld [vmem:[%s8842_s10 + $0xd90] ss:$8 sps:$4 sm:$0xff]  }
 0x1d4   : > { %5702 = vmatmul.mubr.bf16.vlgmr.msra.gmra.mxu0 %v7956_v23  ;;  %5798 = vmatprep.subr.bf16.mxu1 %v7967_v24  ;;  %v8052_v23 = vld [vmem:[%s8842_s10 + $0xc80] ss:$8 sps:$4 sm:$0xff]   ;;  %v8057_v24 = vld [vmem:[%s8842_s10 + $0xd84] ss:$8 sps:$4 sm:$0xff]  }
 0x1d5   : > { %5756 = vmatpush1.bf16.msra.mxu0 %v7959_v25  ;;  %5787 = vmatprep.mubr.bf16.mxu0 %v8060_v27  ;;  %v8055_v25 = vld [vmem:[%s8842_s10 + $0xd80] ss:$8 sps:$4 sm:$0xff]  }
 0x1d6   : > { %5745 = vmatmul.mubr.bf16.vlgmr.msra.gmra.mxu1 %v7962_v26  ;;  %5757 = vmatprep.subr.bf16.mxu0 %v7970_v28  ;;  %v8063_v26 = vld [vmem:[%s8842_s10 + $0xe74] ss:$8 sps:$4 sm:$0xff]   ;;  %v8058_v27 = vld [vmem:[%s10000_s0 + $0x60] ss:$196 sps:$4 sm:$0xff]  }
 0x1d7   : > { %5799 = vmatpush1.bf16.msra.mxu1 %v7965_v29  ;;  %5830 = vmatprep.mubr.bf16.mxu1 %v8066_v30  ;;  %v8069_v28 = vld [vmem:[%s8842_s10 + $0xf74] ss:$8 sps:$4 sm:$0xff]   ;;  %v8061_v29 = vld [vmem:[%s8842_s10 + $0xe70] ss:$8 sps:$4 sm:$0xff]   ;;  %v8064_v30 = vld [vmem:[%s10000_s0 + $0x68] ss:$196 sps:$4 sm:$0xff]  }
 0x1d8   : > { %5800 = vmatprep.subr.bf16.mxu1 %v7973_v32  ;;  %v8072_v32 = vld [vmem:[%s8842_s10 + $0xe64] ss:$8 sps:$4 sm:$0xff]  }
 0x1d9   : > { %5758 = vmatpush1.bf16.msra.mxu0 %v7968_v31  ;;  %v8162_v31 = vld [vmem:[%s10000_s0 + $0x74] ss:$196 sps:$4 sm:$0xff]  }
 0x1da   : > { %5759 = vmatprep.subr.bf16.mxu0 %v7976_v34  ;;  %v8168_v34 = vld [vmem:[%s10000_s0 + $0x7c] ss:$196 sps:$4 sm:$0xff]  }
 0x1db   : > { %5801 = vmatpush1.bf16.msra.mxu1 %v7971_v33  ;;  %v8067_v33 = vld [vmem:[%s8842_s10 + $0xf70] ss:$8 sps:$4 sm:$0xff]  }
 0x1dc   : > { %5802 = vmatprep.subr.bf16.mxu1 %v7979_v36  ;;  %v8070_v36 = vld [vmem:[%s8842_s10 + $0xe60] ss:$8 sps:$4 sm:$0xff]  }
 0x1dd   : > { %5760 = vmatpush1.bf16.msra.mxu0 %v7974_v35  ;;  %v8075_v35 = vld [vmem:[%s8842_s10 + $0xf64] ss:$8 sps:$4 sm:$0xff]  }
 0x1de   : > { %5761 = vmatprep.subr.bf16.mxu0 %v7982_v38  ;;  %v8073_v38 = vld [vmem:[%s8842_s10 + $0xf60] ss:$8 sps:$4 sm:$0xff]  }
 0x1df   : > { %5803 = vmatpush1.bf16.msra.mxu1 %v7977_v37  ;;  %v8078_v37 = vld [vmem:[%s8842_s10 + $0xe54] ss:$8 sps:$4 sm:$0xff]  }
 0x1e0   : > { %5804 = vmatprep.subr.bf16.mxu1 %v7985_v40  ;;  %v8076_v40 = vld [vmem:[%s8842_s10 + $0xe50] ss:$8 sps:$4 sm:$0xff]  }
 0x1e1   : > { %5762 = vmatpush1.bf16.msra.mxu0 %v7980_v39  ;;  %v8081_v39 = vld [vmem:[%s8842_s10 + $0xf54] ss:$8 sps:$4 sm:$0xff]  }
 0x1e2   : > { %5763 = vmatprep.subr.bf16.mxu0 %v7988_v42  ;;  %v8079_v42 = vld [vmem:[%s8842_s10 + $0xf50] ss:$8 sps:$4 sm:$0xff]  }
 0x1e3   : > { %5805 = vmatpush1.bf16.msra.mxu1 %v7983_v41  ;;  %v8084_v41 = vld [vmem:[%s8842_s10 + $0xe44] ss:$8 sps:$4 sm:$0xff]  }
 0x1e4   : > { %5806 = vmatprep.subr.bf16.mxu1 %v7991_v44  ;;  %v8082_v44 = vld [vmem:[%s8842_s10 + $0xe40] ss:$8 sps:$4 sm:$0xff]  }
 0x1e5   : > { %5764 = vmatpush1.bf16.msra.mxu0 %v7986_v43  ;;  %v8087_v43 = vld [vmem:[%s8842_s10 + $0xf44] ss:$8 sps:$4 sm:$0xff]  }
 0x1e6   : > { %5765 = vmatprep.subr.bf16.mxu0 %v7994_v46  ;;  %v8085_v46 = vld [vmem:[%s8842_s10 + $0xf40] ss:$8 sps:$4 sm:$0xff]  }
 0x1e7   : > { %5807 = vmatpush1.bf16.msra.mxu1 %v7989_v45  ;;  %v8090_v45 = vld [vmem:[%s8842_s10 + $0xe34] ss:$8 sps:$4 sm:$0xff]  }
 0x1e8   : > { %5808 = vmatprep.subr.bf16.mxu1 %v7997_v48  ;;  %v8088_v48 = vld [vmem:[%s8842_s10 + $0xe30] ss:$8 sps:$4 sm:$0xff]  }
 0x1e9   : > { %5766 = vmatpush1.bf16.msra.mxu0 %v7992_v47  ;;  %v8093_v47 = vld [vmem:[%s8842_s10 + $0xf34] ss:$8 sps:$4 sm:$0xff]  }
 0x1ea   : > { %5767 = vmatprep.subr.bf16.mxu0 %v8000_v50  ;;  %v8091_v50 = vld [vmem:[%s8842_s10 + $0xf30] ss:$8 sps:$4 sm:$0xff]  }
 0x1eb   : > { %5809 = vmatpush1.bf16.msra.mxu1 %v7995_v49  ;;  %v8096_v49 = vld [vmem:[%s8842_s10 + $0xe24] ss:$8 sps:$4 sm:$0xff]  }
 0x1ec   : > { %5810 = vmatprep.subr.bf16.mxu1 %v8003_v52  ;;  %v8094_v52 = vld [vmem:[%s8842_s10 + $0xe20] ss:$8 sps:$4 sm:$0xff]  }
 0x1ed   : > { %5768 = vmatpush1.bf16.msra.mxu0 %v7998_v51  ;;  %v8099_v51 = vld [vmem:[%s8842_s10 + $0xf24] ss:$8 sps:$4 sm:$0xff]  }
 0x1ee   : > { %5769 = vmatprep.subr.bf16.mxu0 %v8006_v54  ;;  %v8097_v54 = vld [vmem:[%s8842_s10 + $0xf20] ss:$8 sps:$4 sm:$0xff]  }
 0x1ef   : > { %5811 = vmatpush1.bf16.msra.mxu1 %v8001_v53  ;;  %v8102_v53 = vld [vmem:[%s8842_s10 + $0xe14] ss:$8 sps:$4 sm:$0xff]  }
 0x1f0   : > { %5812 = vmatprep.subr.bf16.mxu1 %v8009_v56  ;;  %v8100_v56 = vld [vmem:[%s8842_s10 + $0xe10] ss:$8 sps:$4 sm:$0xff]  }
 0x1f1   : > { %5770 = vmatpush1.bf16.msra.mxu0 %v8004_v55  ;;  %v8105_v55 = vld [vmem:[%s8842_s10 + $0xf14] ss:$8 sps:$4 sm:$0xff]  }
 0x1f2   : > { %5771 = vmatprep.subr.bf16.mxu0 %v8012_v58  ;;  %v8103_v58 = vld [vmem:[%s8842_s10 + $0xf10] ss:$8 sps:$4 sm:$0xff]  }
 0x1f3   : > { %5813 = vmatpush1.bf16.msra.mxu1 %v8007_v57  ;;  %v8108_v57 = vld [vmem:[%s8842_s10 + $0xe04] ss:$8 sps:$4 sm:$0xff]  }
 0x1f4   : > { %5814 = vmatprep.subr.bf16.mxu1 %v8015_v60  ;;  %v8106_v60 = vld [vmem:[%s8842_s10 + $0xe00] ss:$8 sps:$4 sm:$0xff]  }
 0x1f5   : > { %5772 = vmatpush2.bf16.msra.mxu0 %v8010_v59  ;;  %v8111_v59 = vld [vmem:[%s8842_s10 + $0xf04] ss:$8 sps:$4 sm:$0xff]  }
 0x1f6   : > { %5773 = vmatprep.subr.bf16.mxu0 %v8018_v62  ;;  %v8109_v62 = vld [vmem:[%s8842_s10 + $0xf00] ss:$8 sps:$4 sm:$0xff]  }
 0x1f7   : > { %5815 = vmatpush2.bf16.msra.mxu1 %v8013_v61  ;;  %v8114_v61 = vld [vmem:[%s8842_s10 + $0xef4] ss:$8 sps:$4 sm:$0xff]  }
 0x1f8   : > { %5816 = vmatprep.subr.bf16.mxu1 %v8021_v0  ;;  %v8112_v0 = vld [vmem:[%s8842_s10 + $0xef0] ss:$8 sps:$4 sm:$0xff]  }
 0x1f9   : > { %5774 = vmatpush2.bf16.msra.mxu0 %v8016_v63  ;;  %v8117_v63 = vld [vmem:[%s8842_s10 + $0xff4] ss:$8 sps:$4 sm:$0xff]  }
 0x1fa   : > { %5775 = vmatprep.subr.bf16.mxu0 %v8024_v2  ;;  %v8115_v2 = vld [vmem:[%s8842_s10 + $0xff0] ss:$8 sps:$4 sm:$0xff]  }
 0x1fb   : > { %5817 = vmatpush2.bf16.msra.mxu1 %v8019_v1  ;;  %v8120_v1 = vld [vmem:[%s8842_s10 + $0xee4] ss:$8 sps:$4 sm:$0xff]  }
 0x1fc   : > { %5818 = vmatprep.subr.bf16.mxu1 %v8027_v4  ;;  %v8118_v4 = vld [vmem:[%s8842_s10 + $0xee0] ss:$8 sps:$4 sm:$0xff]  }
 0x1fd   : > { %5776 = vmatpush2.bf16.msra.mxu0 %v8022_v3  ;;  %v8123_v3 = vld [vmem:[%s8842_s10 + $0xfe4] ss:$8 sps:$4 sm:$0xff]  }
 0x1fe   : > { %5777 = vmatprep.subr.bf16.mxu0 %v8030_v6  ;;  %v8121_v6 = vld [vmem:[%s8842_s10 + $0xfe0] ss:$8 sps:$4 sm:$0xff]  }
 0x1ff   : > { %5819 = vmatpush2.bf16.msra.mxu1 %v8025_v5  ;;  %v8126_v5 = vld [vmem:[%s8842_s10 + $0xed4] ss:$8 sps:$4 sm:$0xff]  }
 0x200   : > { %5820 = vmatprep.subr.bf16.mxu1 %v8033_v8  ;;  %v8124_v8 = vld [vmem:[%s8842_s10 + $0xed0] ss:$8 sps:$4 sm:$0xff]  }
 0x201   : > { %5778 = vmatpush2.bf16.msra.mxu0 %v8028_v7  ;;  %v8129_v7 = vld [vmem:[%s8842_s10 + $0xfd4] ss:$8 sps:$4 sm:$0xff]  }
 0x202   : > { %5779 = vmatprep.subr.bf16.mxu0 %v8036_v10  ;;  %v8127_v10 = vld [vmem:[%s8842_s10 + $0xfd0] ss:$8 sps:$4 sm:$0xff]  }
 0x203   : > { %5821 = vmatpush2.bf16.msra.mxu1 %v8031_v9  ;;  %v8132_v9 = vld [vmem:[%s8842_s10 + $0xec4] ss:$8 sps:$4 sm:$0xff]  }
 0x204   : > { %5822 = vmatprep.subr.bf16.mxu1 %v8039_v12  ;;  %v8130_v12 = vld [vmem:[%s8842_s10 + $0xec0] ss:$8 sps:$4 sm:$0xff]  }
 0x205   : > { %5780 = vmatpush2.bf16.msra.mxu0 %v8034_v11  ;;  %v8135_v11 = vld [vmem:[%s8842_s10 + $0xfc4] ss:$8 sps:$4 sm:$0xff]  }
 0x206   : > { %5781 = vmatprep.subr.bf16.mxu0 %v8042_v14  ;;  %v8133_v14 = vld [vmem:[%s8842_s10 + $0xfc0] ss:$8 sps:$4 sm:$0xff]  }
 0x207   : > { %5823 = vmatpush2.bf16.msra.mxu1 %v8037_v13  ;;  %v8138_v13 = vld [vmem:[%s8842_s10 + $0xeb4] ss:$8 sps:$4 sm:$0xff]  }
 0x208   : > { %5824 = vmatprep.subr.bf16.mxu1 %v8045_v16  ;;  %v8136_v16 = vld [vmem:[%s8842_s10 + $0xeb0] ss:$8 sps:$4 sm:$0xff]  }
 0x209   : > { %5782 = vmatpush2.bf16.msra.mxu0 %v8040_v15  ;;  %v8141_v15 = vld [vmem:[%s8842_s10 + $0xfb4] ss:$8 sps:$4 sm:$0xff]  }
 0x20a   : > { %5783 = vmatprep.subr.bf16.mxu0 %v8048_v18  ;;  %v8139_v18 = vld [vmem:[%s8842_s10 + $0xfb0] ss:$8 sps:$4 sm:$0xff]  }
 0x20b   : > { %5825 = vmatpush2.bf16.msra.mxu1 %v8043_v17  ;;  %v8144_v17 = vld [vmem:[%s8842_s10 + $0xea4] ss:$8 sps:$4 sm:$0xff]  }
 0x20c   : > { %5826 = vmatprep.subr.bf16.mxu1 %v8051_v20  ;;  %v8142_v20 = vld [vmem:[%s8842_s10 + $0xea0] ss:$8 sps:$4 sm:$0xff]  }
 0x20d   : > { %5784 = vmatpush2.bf16.msra.mxu0 %v8046_v19  ;;  %v8147_v19 = vld [vmem:[%s8842_s10 + $0xfa4] ss:$8 sps:$4 sm:$0xff]  }
 0x20e   : > { %5785 = vmatprep.subr.bf16.mxu0 %v8054_v22  ;;  %v8145_v22 = vld [vmem:[%s8842_s10 + $0xfa0] ss:$8 sps:$4 sm:$0xff]  }
 0x20f   : > { %5827 = vmatpush2.bf16.msra.mxu1 %v8049_v21  ;;  %v8150_v21 = vld [vmem:[%s8842_s10 + $0xe94] ss:$8 sps:$4 sm:$0xff]  }
 0x210   : > { %5828 = vmatprep.subr.bf16.mxu1 %v8057_v24  ;;  %v8148_v24 = vld [vmem:[%s8842_s10 + $0xe90] ss:$8 sps:$4 sm:$0xff]  }
 0x211   : > { %5786 = vmatpush2.bf16.msra.mxu0 %v8052_v23  ;;  %v8153_v23 = vld [vmem:[%s8842_s10 + $0xf94] ss:$8 sps:$4 sm:$0xff]  }
 0x212   : > { %5841 = vmatprep.subr.bf16.mxu0 %v8063_v26  ;;  %v8151_v26 = vld [vmem:[%s8842_s10 + $0xf90] ss:$8 sps:$4 sm:$0xff]  }
 0x213   : > { %5829 = vmatpush2.bf16.msra.mxu1 %v8055_v25  ;;  %v8156_v25 = vld [vmem:[%s8842_s10 + $0xe84] ss:$8 sps:$4 sm:$0xff]  }
 0x214   : > { %5788 = vmatmul.mubr.bf16.vlgmr.msra.gmra.mxu0 %v8058_v27  ;;  %5884 = vmatprep.subr.bf16.mxu1 %v8069_v28  ;;  %v8159_v27 = vld [vmem:[%s8842_s10 + $0xf84] ss:$8 sps:$4 sm:$0xff]   ;;  %v8154_v28 = vld [vmem:[%s8842_s10 + $0xe80] ss:$8 sps:$4 sm:$0xff]  }
 0x215   : > { %5842 = vmatpush1.bf16.msra.mxu0 %v8061_v29  ;;  %5873 = vmatprep.mubr.bf16.mxu0 %v8162_v31  ;;  %v8165_v29 = vld [vmem:[%s8842_s10 + $0x1074] ss:$8 sps:$4 sm:$0xff]  }
 0x216   : > { %5831 = vmatmul.mubr.bf16.vlgmr.msra.gmra.mxu1 %v8064_v30  ;;  %5843 = vmatprep.subr.bf16.mxu0 %v8072_v32  ;;  %v8157_v30 = vld [vmem:[%s8842_s10 + $0xf80] ss:$8 sps:$4 sm:$0xff]   ;;  %v8160_v31 = vld [vmem:[%s10000_s0 + $0x70] ss:$196 sps:$4 sm:$0xff]  }
 0x217   : > { %5885 = vmatpush1.bf16.msra.mxu1 %v8067_v33  ;;  %5916 = vmatprep.mubr.bf16.mxu1 %v8168_v34  ;;  %v8171_v32 = vld [vmem:[%s8842_s10 + $0x1174] ss:$8 sps:$4 sm:$0xff]   ;;  %v8163_v33 = vld [vmem:[%s8842_s10 + $0x1070] ss:$8 sps:$4 sm:$0xff]   ;;  %v8264_v34 = vld [vmem:[%s10000_s0 + $0x84] ss:$196 sps:$4 sm:$0xff]  }
 0x218   : > { %5886 = vmatprep.subr.bf16.mxu1 %v8075_v35  ;;  %v8166_v35 = vld [vmem:[%s10000_s0 + $0x78] ss:$196 sps:$4 sm:$0xff]  }
 0x219   : > { %5844 = vmatpush1.bf16.msra.mxu0 %v8070_v36  ;;  %v8174_v36 = vld [vmem:[%s8842_s10 + $0x1064] ss:$8 sps:$4 sm:$0xff]  }
 0x21a   : > { %5845 = vmatprep.subr.bf16.mxu0 %v8078_v37  ;;  %v8169_v37 = vld [vmem:[%s8842_s10 + $0x1170] ss:$8 sps:$4 sm:$0xff]  }
 0x21b   : > { %5887 = vmatpush1.bf16.msra.mxu1 %v8073_v38  ;;  %v8270_v38 = vld [vmem:[%s10000_s0 + $0x8c] ss:$196 sps:$4 sm:$0xff]  }
 0x21c   : > { %5888 = vmatprep.subr.bf16.mxu1 %v8081_v39  ;;  %v8177_v39 = vld [vmem:[%s8842_s10 + $0x1164] ss:$8 sps:$4 sm:$0xff]  }
 0x21d   : > { %5846 = vmatpush1.bf16.msra.mxu0 %v8076_v40  ;;  %v8172_v40 = vld [vmem:[%s8842_s10 + $0x1060] ss:$8 sps:$4 sm:$0xff]  }
 0x21e   : > { %5847 = vmatprep.subr.bf16.mxu0 %v8084_v41  ;;  %v8180_v41 = vld [vmem:[%s8842_s10 + $0x1054] ss:$8 sps:$4 sm:$0xff]  }
 0x21f   : > { %5889 = vmatpush1.bf16.msra.mxu1 %v8079_v42  ;;  %v8175_v42 = vld [vmem:[%s8842_s10 + $0x1160] ss:$8 sps:$4 sm:$0xff]  }
 0x220   : > { %5890 = vmatprep.subr.bf16.mxu1 %v8087_v43  ;;  %v8183_v43 = vld [vmem:[%s8842_s10 + $0x1154] ss:$8 sps:$4 sm:$0xff]  }
 0x221   : > { %5848 = vmatpush1.bf16.msra.mxu0 %v8082_v44  ;;  %v8178_v44 = vld [vmem:[%s8842_s10 + $0x1050] ss:$8 sps:$4 sm:$0xff]  }
 0x222   : > { %5849 = vmatprep.subr.bf16.mxu0 %v8090_v45  ;;  %v8186_v45 = vld [vmem:[%s8842_s10 + $0x1044] ss:$8 sps:$4 sm:$0xff]  }
 0x223   : > { %5891 = vmatpush1.bf16.msra.mxu1 %v8085_v46  ;;  %v8181_v46 = vld [vmem:[%s8842_s10 + $0x1150] ss:$8 sps:$4 sm:$0xff]  }
 0x224   : > { %5892 = vmatprep.subr.bf16.mxu1 %v8093_v47  ;;  %v8189_v47 = vld [vmem:[%s8842_s10 + $0x1144] ss:$8 sps:$4 sm:$0xff]  }
 0x225   : > { %5850 = vmatpush1.bf16.msra.mxu0 %v8088_v48  ;;  %v8184_v48 = vld [vmem:[%s8842_s10 + $0x1040] ss:$8 sps:$4 sm:$0xff]  }
 0x226   : > { %5851 = vmatprep.subr.bf16.mxu0 %v8096_v49  ;;  %v8192_v49 = vld [vmem:[%s8842_s10 + $0x1034] ss:$8 sps:$4 sm:$0xff]  }
 0x227   : > { %5893 = vmatpush1.bf16.msra.mxu1 %v8091_v50  ;;  %v8187_v50 = vld [vmem:[%s8842_s10 + $0x1140] ss:$8 sps:$4 sm:$0xff]  }
 0x228   : > { %5894 = vmatprep.subr.bf16.mxu1 %v8099_v51  ;;  %v8195_v51 = vld [vmem:[%s8842_s10 + $0x1134] ss:$8 sps:$4 sm:$0xff]  }
 0x229   : > { %5852 = vmatpush1.bf16.msra.mxu0 %v8094_v52  ;;  %v8190_v52 = vld [vmem:[%s8842_s10 + $0x1030] ss:$8 sps:$4 sm:$0xff]  }
 0x22a   : > { %5853 = vmatprep.subr.bf16.mxu0 %v8102_v53  ;;  %v8198_v53 = vld [vmem:[%s8842_s10 + $0x1024] ss:$8 sps:$4 sm:$0xff]  }
 0x22b   : > { %5895 = vmatpush1.bf16.msra.mxu1 %v8097_v54  ;;  %v8193_v54 = vld [vmem:[%s8842_s10 + $0x1130] ss:$8 sps:$4 sm:$0xff]  }
 0x22c   : > { %5896 = vmatprep.subr.bf16.mxu1 %v8105_v55  ;;  %v8201_v55 = vld [vmem:[%s8842_s10 + $0x1124] ss:$8 sps:$4 sm:$0xff]  }
 0x22d   : > { %5854 = vmatpush1.bf16.msra.mxu0 %v8100_v56  ;;  %v8196_v56 = vld [vmem:[%s8842_s10 + $0x1020] ss:$8 sps:$4 sm:$0xff]  }
 0x22e   : > { %5855 = vmatprep.subr.bf16.mxu0 %v8108_v57  ;;  %v8204_v57 = vld [vmem:[%s8842_s10 + $0x1014] ss:$8 sps:$4 sm:$0xff]  }
 0x22f   : > { %5897 = vmatpush1.bf16.msra.mxu1 %v8103_v58  ;;  %v8199_v58 = vld [vmem:[%s8842_s10 + $0x1120] ss:$8 sps:$4 sm:$0xff]  }
 0x230   : > { %5898 = vmatprep.subr.bf16.mxu1 %v8111_v59  ;;  %v8207_v59 = vld [vmem:[%s8842_s10 + $0x1114] ss:$8 sps:$4 sm:$0xff]  }
 0x231   : > { %5856 = vmatpush1.bf16.msra.mxu0 %v8106_v60  ;;  %v8202_v60 = vld [vmem:[%s8842_s10 + $0x1010] ss:$8 sps:$4 sm:$0xff]  }
 0x232   : > { %5857 = vmatprep.subr.bf16.mxu0 %v8114_v61  ;;  %v8210_v61 = vld [vmem:[%s8842_s10 + $0x1004] ss:$8 sps:$4 sm:$0xff]  }
 0x233   : > { %5899 = vmatpush1.bf16.msra.mxu1 %v8109_v62  ;;  %v8205_v62 = vld [vmem:[%s8842_s10 + $0x1110] ss:$8 sps:$4 sm:$0xff]  }
 0x234   : > { %5900 = vmatprep.subr.bf16.mxu1 %v8117_v63  ;;  %v8213_v63 = vld [vmem:[%s8842_s10 + $0x1104] ss:$8 sps:$4 sm:$0xff]  }
 0x235   : > { %5858 = vmatpush2.bf16.msra.mxu0 %v8112_v0  ;;  %v8208_v0 = vld [vmem:[%s8842_s10 + $0x1000] ss:$8 sps:$4 sm:$0xff]  }
 0x236   : > { %5859 = vmatprep.subr.bf16.mxu0 %v8120_v1  ;;  %v8216_v1 = vld [vmem:[%s8842_s10 + $0x10f4] ss:$8 sps:$4 sm:$0xff]  }
 0x237   : > { %5901 = vmatpush2.bf16.msra.mxu1 %v8115_v2  ;;  %v8211_v2 = vld [vmem:[%s8842_s10 + $0x1100] ss:$8 sps:$4 sm:$0xff]  }
 0x238   : > { %5902 = vmatprep.subr.bf16.mxu1 %v8123_v3  ;;  %v8219_v3 = vld [vmem:[%s8842_s10 + $0x11f4] ss:$8 sps:$4 sm:$0xff]  }
 0x239   : > { %5860 = vmatpush2.bf16.msra.mxu0 %v8118_v4  ;;  %v8214_v4 = vld [vmem:[%s8842_s10 + $0x10f0] ss:$8 sps:$4 sm:$0xff]  }
 0x23a   : > { %5861 = vmatprep.subr.bf16.mxu0 %v8126_v5  ;;  %v8222_v5 = vld [vmem:[%s8842_s10 + $0x10e4] ss:$8 sps:$4 sm:$0xff]  }
 0x23b   : > { %5903 = vmatpush2.bf16.msra.mxu1 %v8121_v6  ;;  %v8217_v6 = vld [vmem:[%s8842_s10 + $0x11f0] ss:$8 sps:$4 sm:$0xff]  }
 0x23c   : > { %5904 = vmatprep.subr.bf16.mxu1 %v8129_v7  ;;  %v8225_v7 = vld [vmem:[%s8842_s10 + $0x11e4] ss:$8 sps:$4 sm:$0xff]  }
 0x23d   : > { %5862 = vmatpush2.bf16.msra.mxu0 %v8124_v8  ;;  %v8220_v8 = vld [vmem:[%s8842_s10 + $0x10e0] ss:$8 sps:$4 sm:$0xff]  }
 0x23e   : > { %5863 = vmatprep.subr.bf16.mxu0 %v8132_v9  ;;  %v8228_v9 = vld [vmem:[%s8842_s10 + $0x10d4] ss:$8 sps:$4 sm:$0xff]  }
 0x23f   : > { %5905 = vmatpush2.bf16.msra.mxu1 %v8127_v10  ;;  %v8223_v10 = vld [vmem:[%s8842_s10 + $0x11e0] ss:$8 sps:$4 sm:$0xff]  }
 0x240   : > { %5906 = vmatprep.subr.bf16.mxu1 %v8135_v11  ;;  %v8231_v11 = vld [vmem:[%s8842_s10 + $0x11d4] ss:$8 sps:$4 sm:$0xff]  }
 0x241   : > { %5864 = vmatpush2.bf16.msra.mxu0 %v8130_v12  ;;  %v8226_v12 = vld [vmem:[%s8842_s10 + $0x10d0] ss:$8 sps:$4 sm:$0xff]  }
 0x242   : > { %5865 = vmatprep.subr.bf16.mxu0 %v8138_v13  ;;  %v8234_v13 = vld [vmem:[%s8842_s10 + $0x10c4] ss:$8 sps:$4 sm:$0xff]  }
 0x243   : > { %5907 = vmatpush2.bf16.msra.mxu1 %v8133_v14  ;;  %v8229_v14 = vld [vmem:[%s8842_s10 + $0x11d0] ss:$8 sps:$4 sm:$0xff]  }
 0x244   : > { %5908 = vmatprep.subr.bf16.mxu1 %v8141_v15  ;;  %v8237_v15 = vld [vmem:[%s8842_s10 + $0x11c4] ss:$8 sps:$4 sm:$0xff]  }
 0x245   : > { %5866 = vmatpush2.bf16.msra.mxu0 %v8136_v16  ;;  %v8232_v16 = vld [vmem:[%s8842_s10 + $0x10c0] ss:$8 sps:$4 sm:$0xff]  }
 0x246   : > { %5867 = vmatprep.subr.bf16.mxu0 %v8144_v17  ;;  %v8240_v17 = vld [vmem:[%s8842_s10 + $0x10b4] ss:$8 sps:$4 sm:$0xff]  }
 0x247   : > { %5909 = vmatpush2.bf16.msra.mxu1 %v8139_v18  ;;  %v8235_v18 = vld [vmem:[%s8842_s10 + $0x11c0] ss:$8 sps:$4 sm:$0xff]  }
 0x248   : > { %5910 = vmatprep.subr.bf16.mxu1 %v8147_v19  ;;  %v8243_v19 = vld [vmem:[%s8842_s10 + $0x11b4] ss:$8 sps:$4 sm:$0xff]  }
 0x249   : > { %5868 = vmatpush2.bf16.msra.mxu0 %v8142_v20  ;;  %v8238_v20 = vld [vmem:[%s8842_s10 + $0x10b0] ss:$8 sps:$4 sm:$0xff]  }
 0x24a   : > { %5869 = vmatprep.subr.bf16.mxu0 %v8150_v21  ;;  %v8246_v21 = vld [vmem:[%s8842_s10 + $0x10a4] ss:$8 sps:$4 sm:$0xff]  }
 0x24b   : > { %5911 = vmatpush2.bf16.msra.mxu1 %v8145_v22  ;;  %v8241_v22 = vld [vmem:[%s8842_s10 + $0x11b0] ss:$8 sps:$4 sm:$0xff]  }
 0x24c   : > { %5912 = vmatprep.subr.bf16.mxu1 %v8153_v23  ;;  %v8249_v23 = vld [vmem:[%s8842_s10 + $0x11a4] ss:$8 sps:$4 sm:$0xff]  }
 0x24d   : > { %5870 = vmatpush2.bf16.msra.mxu0 %v8148_v24  ;;  %v8244_v24 = vld [vmem:[%s8842_s10 + $0x10a0] ss:$8 sps:$4 sm:$0xff]  }
 0x24e   : > { %5871 = vmatprep.subr.bf16.mxu0 %v8156_v25  ;;  %v8252_v25 = vld [vmem:[%s8842_s10 + $0x1094] ss:$8 sps:$4 sm:$0xff]  }
 0x24f   : > { %5913 = vmatpush2.bf16.msra.mxu1 %v8151_v26  ;;  %v8247_v26 = vld [vmem:[%s8842_s10 + $0x11a0] ss:$8 sps:$4 sm:$0xff]  }
 0x250   : > { %5914 = vmatprep.subr.bf16.mxu1 %v8159_v27  ;;  %v8255_v27 = vld [vmem:[%s8842_s10 + $0x1194] ss:$8 sps:$4 sm:$0xff]  }
 0x251   : > { %5872 = vmatpush2.bf16.msra.mxu0 %v8154_v28  ;;  %v8250_v28 = vld [vmem:[%s8842_s10 + $0x1090] ss:$8 sps:$4 sm:$0xff]  }
 0x252   : > { %5927 = vmatprep.subr.bf16.mxu0 %v8165_v29  ;;  %v8258_v29 = vld [vmem:[%s8842_s10 + $0x1084] ss:$8 sps:$4 sm:$0xff]  }
 0x253   : > { %5915 = vmatpush2.bf16.msra.mxu1 %v8157_v30  ;;  %v8253_v30 = vld [vmem:[%s8842_s10 + $0x1190] ss:$8 sps:$4 sm:$0xff]  }
 0x254   : > { %5874 = vmatmul.mubr.bf16.vlgmr.msra.gmra.mxu0 %v8160_v31  ;;  %5970 = vmatprep.subr.bf16.mxu1 %v8171_v32  ;;  %v8261_v31 = vld [vmem:[%s8842_s10 + $0x1184] ss:$8 sps:$4 sm:$0xff]   ;;  %v8256_v32 = vld [vmem:[%s8842_s10 + $0x1080] ss:$8 sps:$4 sm:$0xff]  }
 0x255   : > { %5928 = vmatpush1.bf16.msra.mxu0 %v8163_v33  ;;  %5959 = vmatprep.mubr.bf16.mxu0 %v8264_v34  ;;  %v8267_v33 = vld [vmem:[%s8842_s10 + $0x1274] ss:$8 sps:$4 sm:$0xff]   ;;  %v8259_v34 = vld [vmem:[%s8842_s10 + $0x1180] ss:$8 sps:$4 sm:$0xff]  }
 0x256   : > { %5917 = vmatmul.mubr.bf16.vlgmr.msra.gmra.mxu1 %v8166_v35  ;;  %5929 = vmatprep.subr.bf16.mxu0 %v8174_v36  ;;  %v8262_v35 = vld [vmem:[%s10000_s0 + $0x80] ss:$196 sps:$4 sm:$0xff]   ;;  %v8273_v36 = vld [vmem:[%s8842_s10 + $0x1374] ss:$8 sps:$4 sm:$0xff]  }
 0x257   : > { %5971 = vmatpush1.bf16.msra.mxu1 %v8169_v37  ;;  %6002 = vmatprep.mubr.bf16.mxu1 %v8270_v38  ;;  %v8265_v37 = vld [vmem:[%s8842_s10 + $0x1270] ss:$8 sps:$4 sm:$0xff]  }
 0x258   : > { %5972 = vmatprep.subr.bf16.mxu1 %v8177_v39  ;;  %v8366_v38 = vld [vmem:[%s10000_s0 + $0x94] ss:$196 sps:$4 sm:$0xff]   ;;  %v8268_v39 = vld [vmem:[%s10000_s0 + $0x88] ss:$196 sps:$4 sm:$0xff]  }
 0x259   : > { %5930 = vmatpush1.bf16.msra.mxu0 %v8172_v40  ;;  %v8276_v40 = vld [vmem:[%s8842_s10 + $0x1264] ss:$8 sps:$4 sm:$0xff]  }
 0x25a   : > { %5931 = vmatprep.subr.bf16.mxu0 %v8180_v41  ;;  %v8271_v41 = vld [vmem:[%s8842_s10 + $0x1370] ss:$8 sps:$4 sm:$0xff]  }
 0x25b   : > { %5973 = vmatpush1.bf16.msra.mxu1 %v8175_v42  ;;  %v8372_v42 = vld [vmem:[%s10000_s0 + $0x9c] ss:$196 sps:$4 sm:$0xff]  }
 0x25c   : > { %5974 = vmatprep.subr.bf16.mxu1 %v8183_v43  ;;  %v8279_v43 = vld [vmem:[%s8842_s10 + $0x1364] ss:$8 sps:$4 sm:$0xff]  }
 0x25d   : > { %5932 = vmatpush1.bf16.msra.mxu0 %v8178_v44  ;;  %v8274_v44 = vld [vmem:[%s8842_s10 + $0x1260] ss:$8 sps:$4 sm:$0xff]  }
 0x25e   : > { %5933 = vmatprep.subr.bf16.mxu0 %v8186_v45  ;;  %v8282_v45 = vld [vmem:[%s8842_s10 + $0x1254] ss:$8 sps:$4 sm:$0xff]  }
 0x25f   : > { %5975 = vmatpush1.bf16.msra.mxu1 %v8181_v46  ;;  %v8277_v46 = vld [vmem:[%s8842_s10 + $0x1360] ss:$8 sps:$4 sm:$0xff]  }
 0x260   : > { %5976 = vmatprep.subr.bf16.mxu1 %v8189_v47  ;;  %v8285_v47 = vld [vmem:[%s8842_s10 + $0x1354] ss:$8 sps:$4 sm:$0xff]  }
 0x261   : > { %5934 = vmatpush1.bf16.msra.mxu0 %v8184_v48  ;;  %v8280_v48 = vld [vmem:[%s8842_s10 + $0x1250] ss:$8 sps:$4 sm:$0xff]  }
 0x262   : > { %5935 = vmatprep.subr.bf16.mxu0 %v8192_v49  ;;  %v8288_v49 = vld [vmem:[%s8842_s10 + $0x1244] ss:$8 sps:$4 sm:$0xff]  }
 0x263   : > { %5977 = vmatpush1.bf16.msra.mxu1 %v8187_v50  ;;  %v8283_v50 = vld [vmem:[%s8842_s10 + $0x1350] ss:$8 sps:$4 sm:$0xff]  }
 0x264   : > { %5978 = vmatprep.subr.bf16.mxu1 %v8195_v51  ;;  %v8291_v51 = vld [vmem:[%s8842_s10 + $0x1344] ss:$8 sps:$4 sm:$0xff]  }
 0x265   : > { %5936 = vmatpush1.bf16.msra.mxu0 %v8190_v52  ;;  %v8286_v52 = vld [vmem:[%s8842_s10 + $0x1240] ss:$8 sps:$4 sm:$0xff]  }
 0x266   : > { %5937 = vmatprep.subr.bf16.mxu0 %v8198_v53  ;;  %v8294_v53 = vld [vmem:[%s8842_s10 + $0x1234] ss:$8 sps:$4 sm:$0xff]  }
 0x267   : > { %5979 = vmatpush1.bf16.msra.mxu1 %v8193_v54  ;;  %v8289_v54 = vld [vmem:[%s8842_s10 + $0x1340] ss:$8 sps:$4 sm:$0xff]  }
 0x268   : > { %5980 = vmatprep.subr.bf16.mxu1 %v8201_v55  ;;  %v8297_v55 = vld [vmem:[%s8842_s10 + $0x1334] ss:$8 sps:$4 sm:$0xff]  }
 0x269   : > { %5938 = vmatpush1.bf16.msra.mxu0 %v8196_v56  ;;  %v8292_v56 = vld [vmem:[%s8842_s10 + $0x1230] ss:$8 sps:$4 sm:$0xff]  }
 0x26a   : > { %5939 = vmatprep.subr.bf16.mxu0 %v8204_v57  ;;  %v8300_v57 = vld [vmem:[%s8842_s10 + $0x1224] ss:$8 sps:$4 sm:$0xff]  }
 0x26b   : > { %5981 = vmatpush1.bf16.msra.mxu1 %v8199_v58  ;;  %v8295_v58 = vld [vmem:[%s8842_s10 + $0x1330] ss:$8 sps:$4 sm:$0xff]  }
 0x26c   : > { %5982 = vmatprep.subr.bf16.mxu1 %v8207_v59  ;;  %v8303_v59 = vld [vmem:[%s8842_s10 + $0x1324] ss:$8 sps:$4 sm:$0xff]  }
 0x26d   : > { %5940 = vmatpush1.bf16.msra.mxu0 %v8202_v60  ;;  %v8298_v60 = vld [vmem:[%s8842_s10 + $0x1220] ss:$8 sps:$4 sm:$0xff]  }
 0x26e   : > { %5941 = vmatprep.subr.bf16.mxu0 %v8210_v61  ;;  %v8306_v61 = vld [vmem:[%s8842_s10 + $0x1214] ss:$8 sps:$4 sm:$0xff]  }
 0x26f   : > { %5983 = vmatpush1.bf16.msra.mxu1 %v8205_v62  ;;  %v8301_v62 = vld [vmem:[%s8842_s10 + $0x1320] ss:$8 sps:$4 sm:$0xff]  }
 0x270   : > { %5984 = vmatprep.subr.bf16.mxu1 %v8213_v63  ;;  %v8309_v63 = vld [vmem:[%s8842_s10 + $0x1314] ss:$8 sps:$4 sm:$0xff]  }
 0x271   : > { %5942 = vmatpush1.bf16.msra.mxu0 %v8208_v0  ;;  %v8304_v0 = vld [vmem:[%s8842_s10 + $0x1210] ss:$8 sps:$4 sm:$0xff]  }
 0x272   : > { %5943 = vmatprep.subr.bf16.mxu0 %v8216_v1  ;;  %v8312_v1 = vld [vmem:[%s8842_s10 + $0x1204] ss:$8 sps:$4 sm:$0xff]  }
 0x273   : > { %5985 = vmatpush1.bf16.msra.mxu1 %v8211_v2  ;;  %v8307_v2 = vld [vmem:[%s8842_s10 + $0x1310] ss:$8 sps:$4 sm:$0xff]  }
 0x274   : > { %5986 = vmatprep.subr.bf16.mxu1 %v8219_v3  ;;  %v8315_v3 = vld [vmem:[%s8842_s10 + $0x1304] ss:$8 sps:$4 sm:$0xff]  }
 0x275   : > { %5944 = vmatpush2.bf16.msra.mxu0 %v8214_v4  ;;  %v8310_v4 = vld [vmem:[%s8842_s10 + $0x1200] ss:$8 sps:$4 sm:$0xff]  }
 0x276   : > { %5945 = vmatprep.subr.bf16.mxu0 %v8222_v5  ;;  %v8318_v5 = vld [vmem:[%s8842_s10 + $0x12f4] ss:$8 sps:$4 sm:$0xff]  }
 0x277   : > { %5987 = vmatpush2.bf16.msra.mxu1 %v8217_v6  ;;  %v8313_v6 = vld [vmem:[%s8842_s10 + $0x1300] ss:$8 sps:$4 sm:$0xff]  }
 0x278   : > { %5988 = vmatprep.subr.bf16.mxu1 %v8225_v7  ;;  %v8321_v7 = vld [vmem:[%s8842_s10 + $0x13f4] ss:$8 sps:$4 sm:$0xff]  }
 0x279   : > { %5946 = vmatpush2.bf16.msra.mxu0 %v8220_v8  ;;  %v8316_v8 = vld [vmem:[%s8842_s10 + $0x12f0] ss:$8 sps:$4 sm:$0xff]  }
 0x27a   : > { %5947 = vmatprep.subr.bf16.mxu0 %v8228_v9  ;;  %v8324_v9 = vld [vmem:[%s8842_s10 + $0x12e4] ss:$8 sps:$4 sm:$0xff]  }
 0x27b   : > { %5989 = vmatpush2.bf16.msra.mxu1 %v8223_v10  ;;  %v8319_v10 = vld [vmem:[%s8842_s10 + $0x13f0] ss:$8 sps:$4 sm:$0xff]  }
 0x27c   : > { %5990 = vmatprep.subr.bf16.mxu1 %v8231_v11  ;;  %v8327_v11 = vld [vmem:[%s8842_s10 + $0x13e4] ss:$8 sps:$4 sm:$0xff]  }
 0x27d   : > { %5948 = vmatpush2.bf16.msra.mxu0 %v8226_v12  ;;  %v8322_v12 = vld [vmem:[%s8842_s10 + $0x12e0] ss:$8 sps:$4 sm:$0xff]  }
 0x27e   : > { %5949 = vmatprep.subr.bf16.mxu0 %v8234_v13  ;;  %v8330_v13 = vld [vmem:[%s8842_s10 + $0x12d4] ss:$8 sps:$4 sm:$0xff]  }
 0x27f   : > { %5991 = vmatpush2.bf16.msra.mxu1 %v8229_v14  ;;  %v8325_v14 = vld [vmem:[%s8842_s10 + $0x13e0] ss:$8 sps:$4 sm:$0xff]  }
 0x280   : > { %5992 = vmatprep.subr.bf16.mxu1 %v8237_v15  ;;  %v8333_v15 = vld [vmem:[%s8842_s10 + $0x13d4] ss:$8 sps:$4 sm:$0xff]  }
 0x281   : > { %5950 = vmatpush2.bf16.msra.mxu0 %v8232_v16  ;;  %v8328_v16 = vld [vmem:[%s8842_s10 + $0x12d0] ss:$8 sps:$4 sm:$0xff]  }
 0x282   : > { %5951 = vmatprep.subr.bf16.mxu0 %v8240_v17  ;;  %v8336_v17 = vld [vmem:[%s8842_s10 + $0x12c4] ss:$8 sps:$4 sm:$0xff]  }
 0x283   : > { %5993 = vmatpush2.bf16.msra.mxu1 %v8235_v18  ;;  %v8331_v18 = vld [vmem:[%s8842_s10 + $0x13d0] ss:$8 sps:$4 sm:$0xff]  }
 0x284   : > { %5994 = vmatprep.subr.bf16.mxu1 %v8243_v19  ;;  %v8339_v19 = vld [vmem:[%s8842_s10 + $0x13c4] ss:$8 sps:$4 sm:$0xff]  }
 0x285   : > { %5952 = vmatpush2.bf16.msra.mxu0 %v8238_v20  ;;  %v8334_v20 = vld [vmem:[%s8842_s10 + $0x12c0] ss:$8 sps:$4 sm:$0xff]  }
 0x286   : > { %5953 = vmatprep.subr.bf16.mxu0 %v8246_v21  ;;  %v8342_v21 = vld [vmem:[%s8842_s10 + $0x12b4] ss:$8 sps:$4 sm:$0xff]  }
 0x287   : > { %5995 = vmatpush2.bf16.msra.mxu1 %v8241_v22  ;;  %v8337_v22 = vld [vmem:[%s8842_s10 + $0x13c0] ss:$8 sps:$4 sm:$0xff]  }
 0x288   : > { %5996 = vmatprep.subr.bf16.mxu1 %v8249_v23  ;;  %v8345_v23 = vld [vmem:[%s8842_s10 + $0x13b4] ss:$8 sps:$4 sm:$0xff]  }
 0x289   : > { %5954 = vmatpush2.bf16.msra.mxu0 %v8244_v24  ;;  %v8340_v24 = vld [vmem:[%s8842_s10 + $0x12b0] ss:$8 sps:$4 sm:$0xff]  }
 0x28a   : > { %5955 = vmatprep.subr.bf16.mxu0 %v8252_v25  ;;  %v8348_v25 = vld [vmem:[%s8842_s10 + $0x12a4] ss:$8 sps:$4 sm:$0xff]  }
 0x28b   : > { %5997 = vmatpush2.bf16.msra.mxu1 %v8247_v26  ;;  %v8343_v26 = vld [vmem:[%s8842_s10 + $0x13b0] ss:$8 sps:$4 sm:$0xff]  }
 0x28c   : > { %5998 = vmatprep.subr.bf16.mxu1 %v8255_v27  ;;  %v8351_v27 = vld [vmem:[%s8842_s10 + $0x13a4] ss:$8 sps:$4 sm:$0xff]  }
 0x28d   : > { %5956 = vmatpush2.bf16.msra.mxu0 %v8250_v28  ;;  %v8346_v28 = vld [vmem:[%s8842_s10 + $0x12a0] ss:$8 sps:$4 sm:$0xff]  }
 0x28e   : > { %5957 = vmatprep.subr.bf16.mxu0 %v8258_v29  ;;  %v8354_v29 = vld [vmem:[%s8842_s10 + $0x1294] ss:$8 sps:$4 sm:$0xff]  }
 0x28f   : > { %5999 = vmatpush2.bf16.msra.mxu1 %v8253_v30  ;;  %v8349_v30 = vld [vmem:[%s8842_s10 + $0x13a0] ss:$8 sps:$4 sm:$0xff]  }
 0x290   : > { %6000 = vmatprep.subr.bf16.mxu1 %v8261_v31  ;;  %v8357_v31 = vld [vmem:[%s8842_s10 + $0x1394] ss:$8 sps:$4 sm:$0xff]  }
 0x291   : > { %5958 = vmatpush2.bf16.msra.mxu0 %v8256_v32  ;;  %v8352_v32 = vld [vmem:[%s8842_s10 + $0x1290] ss:$8 sps:$4 sm:$0xff]  }
 0x292   : > { %6013 = vmatprep.subr.bf16.mxu0 %v8267_v33  ;;  %v8360_v33 = vld [vmem:[%s8842_s10 + $0x1284] ss:$8 sps:$4 sm:$0xff]  }
 0x293   : > { %6001 = vmatpush2.bf16.msra.mxu1 %v8259_v34  ;;  %v8355_v34 = vld [vmem:[%s8842_s10 + $0x1390] ss:$8 sps:$4 sm:$0xff]  }
 0x294   : > { %5960 = vmatmul.mubr.bf16.vlgmr.msra.gmra.mxu0 %v8262_v35  ;;  %6056 = vmatprep.subr.bf16.mxu1 %v8273_v36  ;;  %v8363_v35 = vld [vmem:[%s8842_s10 + $0x1384] ss:$8 sps:$4 sm:$0xff]   ;;  %v8358_v36 = vld [vmem:[%s8842_s10 + $0x1280] ss:$8 sps:$4 sm:$0xff]  }
 0x295   : > { %6014 = vmatpush1.bf16.msra.mxu0 %v8265_v37  ;;  %6045 = vmatprep.mubr.bf16.mxu0 %v8366_v38  ;;  %v8369_v37 = vld [vmem:[%s8842_s10 + $0x1474] ss:$8 sps:$4 sm:$0xff]   ;;  %v8361_v38 = vld [vmem:[%s8842_s10 + $0x1380] ss:$8 sps:$4 sm:$0xff]  }
 0x296   : > { %6003 = vmatmul.mubr.bf16.vlgmr.msra.gmra.mxu1 %v8268_v39  ;;  %6015 = vmatprep.subr.bf16.mxu0 %v8276_v40  ;;  %v8364_v39 = vld [vmem:[%s10000_s0 + $0x90] ss:$196 sps:$4 sm:$0xff]  }
 0x297   : > { %6057 = vmatpush1.bf16.msra.mxu1 %v8271_v41  ;;  %6088 = vmatprep.mubr.bf16.mxu1 %v8372_v42  ;;  %v8375_v40 = vld [vmem:[%s8842_s10 + $0x1574] ss:$8 sps:$4 sm:$0xff]   ;;  %v8367_v41 = vld [vmem:[%s8842_s10 + $0x1470] ss:$8 sps:$4 sm:$0xff]   ;;  %v8468_v42 = vld [vmem:[%s10000_s0 + $0xa4] ss:$196 sps:$4 sm:$0xff]  }
 0x298   : > { %6058 = vmatprep.subr.bf16.mxu1 %v8279_v43  ;;  %v8370_v43 = vld [vmem:[%s10000_s0 + $0x98] ss:$196 sps:$4 sm:$0xff]  }
 0x299   : > { %6016 = vmatpush1.bf16.msra.mxu0 %v8274_v44  ;;  %v8378_v44 = vld [vmem:[%s8842_s10 + $0x1464] ss:$8 sps:$4 sm:$0xff]  }
 0x29a   : > { %6017 = vmatprep.subr.bf16.mxu0 %v8282_v45  ;;  %v8373_v45 = vld [vmem:[%s8842_s10 + $0x1570] ss:$8 sps:$4 sm:$0xff]  }
 0x29b   : > { %6059 = vmatpush1.bf16.msra.mxu1 %v8277_v46  ;;  %v8474_v46 = vld [vmem:[%s10000_s0 + $0xac] ss:$196 sps:$4 sm:$0xff]  }
 0x29c   : > { %6060 = vmatprep.subr.bf16.mxu1 %v8285_v47  ;;  %v8381_v47 = vld [vmem:[%s8842_s10 + $0x1564] ss:$8 sps:$4 sm:$0xff]  }
 0x29d   : > { %6018 = vmatpush1.bf16.msra.mxu0 %v8280_v48  ;;  %v8376_v48 = vld [vmem:[%s8842_s10 + $0x1460] ss:$8 sps:$4 sm:$0xff]  }
 0x29e   : > { %6019 = vmatprep.subr.bf16.mxu0 %v8288_v49  ;;  %v8384_v49 = vld [vmem:[%s8842_s10 + $0x1454] ss:$8 sps:$4 sm:$0xff]  }
 0x29f   : > { %6061 = vmatpush1.bf16.msra.mxu1 %v8283_v50  ;;  %v8379_v50 = vld [vmem:[%s8842_s10 + $0x1560] ss:$8 sps:$4 sm:$0xff]  }
 0x2a0   : > { %6062 = vmatprep.subr.bf16.mxu1 %v8291_v51  ;;  %v8387_v51 = vld [vmem:[%s8842_s10 + $0x1554] ss:$8 sps:$4 sm:$0xff]  }
 0x2a1   : > { %6020 = vmatpush1.bf16.msra.mxu0 %v8286_v52  ;;  %v8382_v52 = vld [vmem:[%s8842_s10 + $0x1450] ss:$8 sps:$4 sm:$0xff]  }
 0x2a2   : > { %6021 = vmatprep.subr.bf16.mxu0 %v8294_v53  ;;  %v8390_v53 = vld [vmem:[%s8842_s10 + $0x1444] ss:$8 sps:$4 sm:$0xff]  }
 0x2a3   : > { %6063 = vmatpush1.bf16.msra.mxu1 %v8289_v54  ;;  %v8385_v54 = vld [vmem:[%s8842_s10 + $0x1550] ss:$8 sps:$4 sm:$0xff]  }
 0x2a4   : > { %6064 = vmatprep.subr.bf16.mxu1 %v8297_v55  ;;  %v8393_v55 = vld [vmem:[%s8842_s10 + $0x1544] ss:$8 sps:$4 sm:$0xff]  }
 0x2a5   : > { %6022 = vmatpush1.bf16.msra.mxu0 %v8292_v56  ;;  %v8388_v56 = vld [vmem:[%s8842_s10 + $0x1440] ss:$8 sps:$4 sm:$0xff]  }
 0x2a6   : > { %6023 = vmatprep.subr.bf16.mxu0 %v8300_v57  ;;  %v8396_v57 = vld [vmem:[%s8842_s10 + $0x1434] ss:$8 sps:$4 sm:$0xff]  }
 0x2a7   : > { %6065 = vmatpush1.bf16.msra.mxu1 %v8295_v58  ;;  %v8391_v58 = vld [vmem:[%s8842_s10 + $0x1540] ss:$8 sps:$4 sm:$0xff]  }
 0x2a8   : > { %6066 = vmatprep.subr.bf16.mxu1 %v8303_v59  ;;  %v8399_v59 = vld [vmem:[%s8842_s10 + $0x1534] ss:$8 sps:$4 sm:$0xff]  }
 0x2a9   : > { %6024 = vmatpush1.bf16.msra.mxu0 %v8298_v60  ;;  %v8394_v60 = vld [vmem:[%s8842_s10 + $0x1430] ss:$8 sps:$4 sm:$0xff]  }
 0x2aa   : > { %6025 = vmatprep.subr.bf16.mxu0 %v8306_v61  ;;  %v8402_v61 = vld [vmem:[%s8842_s10 + $0x1424] ss:$8 sps:$4 sm:$0xff]  }
 0x2ab   : > { %6067 = vmatpush1.bf16.msra.mxu1 %v8301_v62  ;;  %v8397_v62 = vld [vmem:[%s8842_s10 + $0x1530] ss:$8 sps:$4 sm:$0xff]  }
 0x2ac   : > { %6068 = vmatprep.subr.bf16.mxu1 %v8309_v63  ;;  %v8405_v63 = vld [vmem:[%s8842_s10 + $0x1524] ss:$8 sps:$4 sm:$0xff]  }
 0x2ad   : > { %6026 = vmatpush1.bf16.msra.mxu0 %v8304_v0  ;;  %v8400_v0 = vld [vmem:[%s8842_s10 + $0x1420] ss:$8 sps:$4 sm:$0xff]  }
 0x2ae   : > { %6027 = vmatprep.subr.bf16.mxu0 %v8312_v1  ;;  %v8408_v1 = vld [vmem:[%s8842_s10 + $0x1414] ss:$8 sps:$4 sm:$0xff]  }
 0x2af   : > { %6069 = vmatpush1.bf16.msra.mxu1 %v8307_v2  ;;  %v8403_v2 = vld [vmem:[%s8842_s10 + $0x1520] ss:$8 sps:$4 sm:$0xff]  }
 0x2b0   : > { %6070 = vmatprep.subr.bf16.mxu1 %v8315_v3  ;;  %v8411_v3 = vld [vmem:[%s8842_s10 + $0x1514] ss:$8 sps:$4 sm:$0xff]  }
 0x2b1   : > { %6028 = vmatpush1.bf16.msra.mxu0 %v8310_v4  ;;  %v8406_v4 = vld [vmem:[%s8842_s10 + $0x1410] ss:$8 sps:$4 sm:$0xff]  }
 0x2b2   : > { %6029 = vmatprep.subr.bf16.mxu0 %v8318_v5  ;;  %v8414_v5 = vld [vmem:[%s8842_s10 + $0x1404] ss:$8 sps:$4 sm:$0xff]  }
 0x2b3   : > { %6071 = vmatpush1.bf16.msra.mxu1 %v8313_v6  ;;  %v8409_v6 = vld [vmem:[%s8842_s10 + $0x1510] ss:$8 sps:$4 sm:$0xff]  }
 0x2b4   : > { %6072 = vmatprep.subr.bf16.mxu1 %v8321_v7  ;;  %v8417_v7 = vld [vmem:[%s8842_s10 + $0x1504] ss:$8 sps:$4 sm:$0xff]  }
 0x2b5   : > { %6030 = vmatpush2.bf16.msra.mxu0 %v8316_v8  ;;  %v8412_v8 = vld [vmem:[%s8842_s10 + $0x1400] ss:$8 sps:$4 sm:$0xff]  }
 0x2b6   : > { %6031 = vmatprep.subr.bf16.mxu0 %v8324_v9  ;;  %v8420_v9 = vld [vmem:[%s8842_s10 + $0x14f4] ss:$8 sps:$4 sm:$0xff]  }
 0x2b7   : > { %6073 = vmatpush2.bf16.msra.mxu1 %v8319_v10  ;;  %v8415_v10 = vld [vmem:[%s8842_s10 + $0x1500] ss:$8 sps:$4 sm:$0xff]  }
 0x2b8   : > { %6074 = vmatprep.subr.bf16.mxu1 %v8327_v11  ;;  %v8423_v11 = vld [vmem:[%s8842_s10 + $0x15f4] ss:$8 sps:$4 sm:$0xff]  }
 0x2b9   : > { %6032 = vmatpush2.bf16.msra.mxu0 %v8322_v12  ;;  %v8418_v12 = vld [vmem:[%s8842_s10 + $0x14f0] ss:$8 sps:$4 sm:$0xff]  }
 0x2ba   : > { %6033 = vmatprep.subr.bf16.mxu0 %v8330_v13  ;;  %v8426_v13 = vld [vmem:[%s8842_s10 + $0x14e4] ss:$8 sps:$4 sm:$0xff]  }
 0x2bb   : > { %6075 = vmatpush2.bf16.msra.mxu1 %v8325_v14  ;;  %v8421_v14 = vld [vmem:[%s8842_s10 + $0x15f0] ss:$8 sps:$4 sm:$0xff]  }
 0x2bc   : > { %6076 = vmatprep.subr.bf16.mxu1 %v8333_v15  ;;  %v8429_v15 = vld [vmem:[%s8842_s10 + $0x15e4] ss:$8 sps:$4 sm:$0xff]  }
 0x2bd   : > { %6034 = vmatpush2.bf16.msra.mxu0 %v8328_v16  ;;  %v8424_v16 = vld [vmem:[%s8842_s10 + $0x14e0] ss:$8 sps:$4 sm:$0xff]  }
 0x2be   : > { %6035 = vmatprep.subr.bf16.mxu0 %v8336_v17  ;;  %v8432_v17 = vld [vmem:[%s8842_s10 + $0x14d4] ss:$8 sps:$4 sm:$0xff]  }
 0x2bf   : > { %6077 = vmatpush2.bf16.msra.mxu1 %v8331_v18  ;;  %v8427_v18 = vld [vmem:[%s8842_s10 + $0x15e0] ss:$8 sps:$4 sm:$0xff]  }
 0x2c0   : > { %6078 = vmatprep.subr.bf16.mxu1 %v8339_v19  ;;  %v8435_v19 = vld [vmem:[%s8842_s10 + $0x15d4] ss:$8 sps:$4 sm:$0xff]  }
 0x2c1   : > { %6036 = vmatpush2.bf16.msra.mxu0 %v8334_v20  ;;  %v8430_v20 = vld [vmem:[%s8842_s10 + $0x14d0] ss:$8 sps:$4 sm:$0xff]  }
 0x2c2   : > { %6037 = vmatprep.subr.bf16.mxu0 %v8342_v21  ;;  %v8438_v21 = vld [vmem:[%s8842_s10 + $0x14c4] ss:$8 sps:$4 sm:$0xff]  }
 0x2c3   : > { %6079 = vmatpush2.bf16.msra.mxu1 %v8337_v22  ;;  %v8433_v22 = vld [vmem:[%s8842_s10 + $0x15d0] ss:$8 sps:$4 sm:$0xff]  }
 0x2c4   : > { %6080 = vmatprep.subr.bf16.mxu1 %v8345_v23  ;;  %v8441_v23 = vld [vmem:[%s8842_s10 + $0x15c4] ss:$8 sps:$4 sm:$0xff]  }
 0x2c5   : > { %6038 = vmatpush2.bf16.msra.mxu0 %v8340_v24  ;;  %v8436_v24 = vld [vmem:[%s8842_s10 + $0x14c0] ss:$8 sps:$4 sm:$0xff]  }
 0x2c6   : > { %6039 = vmatprep.subr.bf16.mxu0 %v8348_v25  ;;  %v8444_v25 = vld [vmem:[%s8842_s10 + $0x14b4] ss:$8 sps:$4 sm:$0xff]  }
 0x2c7   : > { %6081 = vmatpush2.bf16.msra.mxu1 %v8343_v26  ;;  %v8439_v26 = vld [vmem:[%s8842_s10 + $0x15c0] ss:$8 sps:$4 sm:$0xff]  }
 0x2c8   : > { %6082 = vmatprep.subr.bf16.mxu1 %v8351_v27  ;;  %v8447_v27 = vld [vmem:[%s8842_s10 + $0x15b4] ss:$8 sps:$4 sm:$0xff]  }
 0x2c9   : > { %6040 = vmatpush2.bf16.msra.mxu0 %v8346_v28  ;;  %v8442_v28 = vld [vmem:[%s8842_s10 + $0x14b0] ss:$8 sps:$4 sm:$0xff]  }
 0x2ca   : > { %6041 = vmatprep.subr.bf16.mxu0 %v8354_v29  ;;  %v8450_v29 = vld [vmem:[%s8842_s10 + $0x14a4] ss:$8 sps:$4 sm:$0xff]  }
 0x2cb   : > { %6083 = vmatpush2.bf16.msra.mxu1 %v8349_v30  ;;  %v8445_v30 = vld [vmem:[%s8842_s10 + $0x15b0] ss:$8 sps:$4 sm:$0xff]  }
 0x2cc   : > { %6084 = vmatprep.subr.bf16.mxu1 %v8357_v31  ;;  %v8453_v31 = vld [vmem:[%s8842_s10 + $0x15a4] ss:$8 sps:$4 sm:$0xff]  }
 0x2cd   : > { %6042 = vmatpush2.bf16.msra.mxu0 %v8352_v32  ;;  %v8448_v32 = vld [vmem:[%s8842_s10 + $0x14a0] ss:$8 sps:$4 sm:$0xff]  }
 0x2ce   : > { %6043 = vmatprep.subr.bf16.mxu0 %v8360_v33  ;;  %v8456_v33 = vld [vmem:[%s8842_s10 + $0x1494] ss:$8 sps:$4 sm:$0xff]  }
 0x2cf   : > { %6085 = vmatpush2.bf16.msra.mxu1 %v8355_v34  ;;  %v8451_v34 = vld [vmem:[%s8842_s10 + $0x15a0] ss:$8 sps:$4 sm:$0xff]  }
 0x2d0   : > { %6086 = vmatprep.subr.bf16.mxu1 %v8363_v35  ;;  %v8459_v35 = vld [vmem:[%s8842_s10 + $0x1594] ss:$8 sps:$4 sm:$0xff]  }
 0x2d1   : > { %6044 = vmatpush2.bf16.msra.mxu0 %v8358_v36  ;;  %v8454_v36 = vld [vmem:[%s8842_s10 + $0x1490] ss:$8 sps:$4 sm:$0xff]  }
 0x2d2   : > { %6099 = vmatprep.subr.bf16.mxu0 %v8369_v37  ;;  %v8462_v37 = vld [vmem:[%s8842_s10 + $0x1484] ss:$8 sps:$4 sm:$0xff]  }
 0x2d3   : > { %6087 = vmatpush2.bf16.msra.mxu1 %v8361_v38  ;;  %v8457_v38 = vld [vmem:[%s8842_s10 + $0x1590] ss:$8 sps:$4 sm:$0xff]  }
 0x2d4   : > { %6046 = vmatmul.mubr.bf16.vlgmr.msra.gmra.mxu0 %v8364_v39  ;;  %6142 = vmatprep.subr.bf16.mxu1 %v8375_v40  ;;  %v8465_v39 = vld [vmem:[%s8842_s10 + $0x1584] ss:$8 sps:$4 sm:$0xff]   ;;  %v8460_v40 = vld [vmem:[%s8842_s10 + $0x1480] ss:$8 sps:$4 sm:$0xff]  }
 0x2d5   : > { %6100 = vmatpush1.bf16.msra.mxu0 %v8367_v41  ;;  %6131 = vmatprep.mubr.bf16.mxu0 %v8468_v42  ;;  %v8471_v41 = vld [vmem:[%s8842_s10 + $0x1674] ss:$8 sps:$4 sm:$0xff]   ;;  %v8463_v42 = vld [vmem:[%s8842_s10 + $0x1580] ss:$8 sps:$4 sm:$0xff]  }
 0x2d6   : > { %6089 = vmatmul.mubr.bf16.vlgmr.msra.gmra.mxu1 %v8370_v43  ;;  %6101 = vmatprep.subr.bf16.mxu0 %v8378_v44  ;;  %v8466_v43 = vld [vmem:[%s10000_s0 + $0xa0] ss:$196 sps:$4 sm:$0xff]   ;;  %v8477_v44 = vld [vmem:[%s8842_s10 + $0x1774] ss:$8 sps:$4 sm:$0xff]  }
 0x2d7   : > { %6143 = vmatpush1.bf16.msra.mxu1 %v8373_v45  ;;  %6174 = vmatprep.mubr.bf16.mxu1 %v8474_v46  ;;  %v8469_v45 = vld [vmem:[%s8842_s10 + $0x1670] ss:$8 sps:$4 sm:$0xff]  }
 0x2d8   : > { %6144 = vmatprep.subr.bf16.mxu1 %v8381_v47  ;;  %v8570_v46 = vld [vmem:[%s10000_s0 + $0xb4] ss:$196 sps:$4 sm:$0xff]   ;;  %v8472_v47 = vld [vmem:[%s10000_s0 + $0xa8] ss:$196 sps:$4 sm:$0xff]  }
 0x2d9   : > { %6102 = vmatpush1.bf16.msra.mxu0 %v8376_v48  ;;  %v8480_v48 = vld [vmem:[%s8842_s10 + $0x1664] ss:$8 sps:$4 sm:$0xff]  }
 0x2da   : > { %6103 = vmatprep.subr.bf16.mxu0 %v8384_v49  ;;  %v8475_v49 = vld [vmem:[%s8842_s10 + $0x1770] ss:$8 sps:$4 sm:$0xff]  }
 0x2db   : > { %6145 = vmatpush1.bf16.msra.mxu1 %v8379_v50  ;;  %v8576_v50 = vld [vmem:[%s10000_s0 + $0xbc] ss:$196 sps:$4 sm:$0xff]  }
 0x2dc   : > { %6146 = vmatprep.subr.bf16.mxu1 %v8387_v51  ;;  %v8483_v51 = vld [vmem:[%s8842_s10 + $0x1764] ss:$8 sps:$4 sm:$0xff]  }
 0x2dd   : > { %6104 = vmatpush1.bf16.msra.mxu0 %v8382_v52  ;;  %v8478_v52 = vld [vmem:[%s8842_s10 + $0x1660] ss:$8 sps:$4 sm:$0xff]  }
 0x2de   : > { %6105 = vmatprep.subr.bf16.mxu0 %v8390_v53  ;;  %v8486_v53 = vld [vmem:[%s8842_s10 + $0x1654] ss:$8 sps:$4 sm:$0xff]  }
 0x2df   : > { %6147 = vmatpush1.bf16.msra.mxu1 %v8385_v54  ;;  %v8481_v54 = vld [vmem:[%s8842_s10 + $0x1760] ss:$8 sps:$4 sm:$0xff]  }
 0x2e0   : > { %6148 = vmatprep.subr.bf16.mxu1 %v8393_v55  ;;  %v8489_v55 = vld [vmem:[%s8842_s10 + $0x1754] ss:$8 sps:$4 sm:$0xff]  }
 0x2e1   : > { %6106 = vmatpush1.bf16.msra.mxu0 %v8388_v56  ;;  %v8484_v56 = vld [vmem:[%s8842_s10 + $0x1650] ss:$8 sps:$4 sm:$0xff]  }
 0x2e2   : > { %6107 = vmatprep.subr.bf16.mxu0 %v8396_v57  ;;  %v8492_v57 = vld [vmem:[%s8842_s10 + $0x1644] ss:$8 sps:$4 sm:$0xff]  }
 0x2e3   : > { %6149 = vmatpush1.bf16.msra.mxu1 %v8391_v58  ;;  %v8487_v58 = vld [vmem:[%s8842_s10 + $0x1750] ss:$8 sps:$4 sm:$0xff]  }
 0x2e4   : > { %6150 = vmatprep.subr.bf16.mxu1 %v8399_v59  ;;  %v8495_v59 = vld [vmem:[%s8842_s10 + $0x1744] ss:$8 sps:$4 sm:$0xff]  }
 0x2e5   : > { %6108 = vmatpush1.bf16.msra.mxu0 %v8394_v60  ;;  %v8490_v60 = vld [vmem:[%s8842_s10 + $0x1640] ss:$8 sps:$4 sm:$0xff]  }
 0x2e6   : > { %6109 = vmatprep.subr.bf16.mxu0 %v8402_v61  ;;  %v8498_v61 = vld [vmem:[%s8842_s10 + $0x1634] ss:$8 sps:$4 sm:$0xff]  }
 0x2e7   : > { %6151 = vmatpush1.bf16.msra.mxu1 %v8397_v62  ;;  %v8493_v62 = vld [vmem:[%s8842_s10 + $0x1740] ss:$8 sps:$4 sm:$0xff]  }
 0x2e8   : > { %6152 = vmatprep.subr.bf16.mxu1 %v8405_v63  ;;  %v8501_v63 = vld [vmem:[%s8842_s10 + $0x1734] ss:$8 sps:$4 sm:$0xff]  }
 0x2e9   : > { %6110 = vmatpush1.bf16.msra.mxu0 %v8400_v0  ;;  %v8496_v0 = vld [vmem:[%s8842_s10 + $0x1630] ss:$8 sps:$4 sm:$0xff]  }
 0x2ea   : > { %6111 = vmatprep.subr.bf16.mxu0 %v8408_v1  ;;  %v8504_v1 = vld [vmem:[%s8842_s10 + $0x1624] ss:$8 sps:$4 sm:$0xff]  }
 0x2eb   : > { %6153 = vmatpush1.bf16.msra.mxu1 %v8403_v2  ;;  %v8499_v2 = vld [vmem:[%s8842_s10 + $0x1730] ss:$8 sps:$4 sm:$0xff]  }
 0x2ec   : > { %6154 = vmatprep.subr.bf16.mxu1 %v8411_v3  ;;  %v8507_v3 = vld [vmem:[%s8842_s10 + $0x1724] ss:$8 sps:$4 sm:$0xff]  }
 0x2ed   : > { %6112 = vmatpush1.bf16.msra.mxu0 %v8406_v4  ;;  %v8502_v4 = vld [vmem:[%s8842_s10 + $0x1620] ss:$8 sps:$4 sm:$0xff]  }
 0x2ee   : > { %6113 = vmatprep.subr.bf16.mxu0 %v8414_v5  ;;  %v8510_v5 = vld [vmem:[%s8842_s10 + $0x1614] ss:$8 sps:$4 sm:$0xff]  }
 0x2ef   : > { %6155 = vmatpush1.bf16.msra.mxu1 %v8409_v6  ;;  %v8505_v6 = vld [vmem:[%s8842_s10 + $0x1720] ss:$8 sps:$4 sm:$0xff]  }
 0x2f0   : > { %6156 = vmatprep.subr.bf16.mxu1 %v8417_v7  ;;  %v8513_v7 = vld [vmem:[%s8842_s10 + $0x1714] ss:$8 sps:$4 sm:$0xff]  }
 0x2f1   : > { %6114 = vmatpush1.bf16.msra.mxu0 %v8412_v8  ;;  %v8508_v8 = vld [vmem:[%s8842_s10 + $0x1610] ss:$8 sps:$4 sm:$0xff]  }
 0x2f2   : > { %6115 = vmatprep.subr.bf16.mxu0 %v8420_v9  ;;  %v8516_v9 = vld [vmem:[%s8842_s10 + $0x1604] ss:$8 sps:$4 sm:$0xff]  }
 0x2f3   : > { %6157 = vmatpush1.bf16.msra.mxu1 %v8415_v10  ;;  %v8511_v10 = vld [vmem:[%s8842_s10 + $0x1710] ss:$8 sps:$4 sm:$0xff]  }
 0x2f4   : > { %6158 = vmatprep.subr.bf16.mxu1 %v8423_v11  ;;  %v8519_v11 = vld [vmem:[%s8842_s10 + $0x1704] ss:$8 sps:$4 sm:$0xff]  }
 0x2f5   : > { %6116 = vmatpush2.bf16.msra.mxu0 %v8418_v12  ;;  %v8514_v12 = vld [vmem:[%s8842_s10 + $0x1600] ss:$8 sps:$4 sm:$0xff]  }
 0x2f6   : > { %6117 = vmatprep.subr.bf16.mxu0 %v8426_v13  ;;  %v8522_v13 = vld [vmem:[%s8842_s10 + $0x16f4] ss:$8 sps:$4 sm:$0xff]  }
 0x2f7   : > { %6159 = vmatpush2.bf16.msra.mxu1 %v8421_v14  ;;  %v8517_v14 = vld [vmem:[%s8842_s10 + $0x1700] ss:$8 sps:$4 sm:$0xff]  }
 0x2f8   : > { %6160 = vmatprep.subr.bf16.mxu1 %v8429_v15  ;;  %v8525_v15 = vld [vmem:[%s8842_s10 + $0x17f4] ss:$8 sps:$4 sm:$0xff]  }
 0x2f9   : > { %6118 = vmatpush2.bf16.msra.mxu0 %v8424_v16  ;;  %v8520_v16 = vld [vmem:[%s8842_s10 + $0x16f0] ss:$8 sps:$4 sm:$0xff]  }
 0x2fa   : > { %6119 = vmatprep.subr.bf16.mxu0 %v8432_v17  ;;  %v8528_v17 = vld [vmem:[%s8842_s10 + $0x16e4] ss:$8 sps:$4 sm:$0xff]  }
 0x2fb   : > { %6161 = vmatpush2.bf16.msra.mxu1 %v8427_v18  ;;  %v8523_v18 = vld [vmem:[%s8842_s10 + $0x17f0] ss:$8 sps:$4 sm:$0xff]  }
 0x2fc   : > { %6162 = vmatprep.subr.bf16.mxu1 %v8435_v19  ;;  %v8531_v19 = vld [vmem:[%s8842_s10 + $0x17e4] ss:$8 sps:$4 sm:$0xff]  }
 0x2fd   : > { %6120 = vmatpush2.bf16.msra.mxu0 %v8430_v20  ;;  %v8526_v20 = vld [vmem:[%s8842_s10 + $0x16e0] ss:$8 sps:$4 sm:$0xff]  }
 0x2fe   : > { %6121 = vmatprep.subr.bf16.mxu0 %v8438_v21  ;;  %v8534_v21 = vld [vmem:[%s8842_s10 + $0x16d4] ss:$8 sps:$4 sm:$0xff]  }
 0x2ff   : > { %6163 = vmatpush2.bf16.msra.mxu1 %v8433_v22  ;;  %v8529_v22 = vld [vmem:[%s8842_s10 + $0x17e0] ss:$8 sps:$4 sm:$0xff]  }
 0x300   : > { %6164 = vmatprep.subr.bf16.mxu1 %v8441_v23  ;;  %v8537_v23 = vld [vmem:[%s8842_s10 + $0x17d4] ss:$8 sps:$4 sm:$0xff]  }
 0x301   : > { %6122 = vmatpush2.bf16.msra.mxu0 %v8436_v24  ;;  %v8532_v24 = vld [vmem:[%s8842_s10 + $0x16d0] ss:$8 sps:$4 sm:$0xff]  }
 0x302   : > { %6123 = vmatprep.subr.bf16.mxu0 %v8444_v25  ;;  %v8540_v25 = vld [vmem:[%s8842_s10 + $0x16c4] ss:$8 sps:$4 sm:$0xff]  }
 0x303   : > { %6165 = vmatpush2.bf16.msra.mxu1 %v8439_v26  ;;  %v8535_v26 = vld [vmem:[%s8842_s10 + $0x17d0] ss:$8 sps:$4 sm:$0xff]  }
 0x304   : > { %6166 = vmatprep.subr.bf16.mxu1 %v8447_v27  ;;  %v8543_v27 = vld [vmem:[%s8842_s10 + $0x17c4] ss:$8 sps:$4 sm:$0xff]  }
 0x305   : > { %6124 = vmatpush2.bf16.msra.mxu0 %v8442_v28  ;;  %v8538_v28 = vld [vmem:[%s8842_s10 + $0x16c0] ss:$8 sps:$4 sm:$0xff]  }
 0x306   : > { %6125 = vmatprep.subr.bf16.mxu0 %v8450_v29  ;;  %v8546_v29 = vld [vmem:[%s8842_s10 + $0x16b4] ss:$8 sps:$4 sm:$0xff]  }
 0x307   : > { %6167 = vmatpush2.bf16.msra.mxu1 %v8445_v30  ;;  %v8541_v30 = vld [vmem:[%s8842_s10 + $0x17c0] ss:$8 sps:$4 sm:$0xff]  }
 0x308   : > { %6168 = vmatprep.subr.bf16.mxu1 %v8453_v31  ;;  %v8549_v31 = vld [vmem:[%s8842_s10 + $0x17b4] ss:$8 sps:$4 sm:$0xff]  }
 0x309   : > { %6126 = vmatpush2.bf16.msra.mxu0 %v8448_v32  ;;  %v8544_v32 = vld [vmem:[%s8842_s10 + $0x16b0] ss:$8 sps:$4 sm:$0xff]  }
 0x30a   : > { %6127 = vmatprep.subr.bf16.mxu0 %v8456_v33  ;;  %v8552_v33 = vld [vmem:[%s8842_s10 + $0x16a4] ss:$8 sps:$4 sm:$0xff]  }
 0x30b   : > { %6169 = vmatpush2.bf16.msra.mxu1 %v8451_v34  ;;  %v8547_v34 = vld [vmem:[%s8842_s10 + $0x17b0] ss:$8 sps:$4 sm:$0xff]  }
 0x30c   : > { %6170 = vmatprep.subr.bf16.mxu1 %v8459_v35  ;;  %v8555_v35 = vld [vmem:[%s8842_s10 + $0x17a4] ss:$8 sps:$4 sm:$0xff]  }
 0x30d   : > { %6128 = vmatpush2.bf16.msra.mxu0 %v8454_v36  ;;  %v8550_v36 = vld [vmem:[%s8842_s10 + $0x16a0] ss:$8 sps:$4 sm:$0xff]  }
 0x30e   : > { %6129 = vmatprep.subr.bf16.mxu0 %v8462_v37  ;;  %v8558_v37 = vld [vmem:[%s8842_s10 + $0x1694] ss:$8 sps:$4 sm:$0xff]  }
 0x30f   : > { %6171 = vmatpush2.bf16.msra.mxu1 %v8457_v38  ;;  %v8553_v38 = vld [vmem:[%s8842_s10 + $0x17a0] ss:$8 sps:$4 sm:$0xff]  }
 0x310   : > { %6172 = vmatprep.subr.bf16.mxu1 %v8465_v39  ;;  %v8561_v39 = vld [vmem:[%s8842_s10 + $0x1794] ss:$8 sps:$4 sm:$0xff]  }
 0x311   : > { %6130 = vmatpush2.bf16.msra.mxu0 %v8460_v40  ;;  %v8556_v40 = vld [vmem:[%s8842_s10 + $0x1690] ss:$8 sps:$4 sm:$0xff]  }
 0x312   : > { %6185 = vmatprep.subr.bf16.mxu0 %v8471_v41  ;;  %v8564_v41 = vld [vmem:[%s8842_s10 + $0x1684] ss:$8 sps:$4 sm:$0xff]  }
 0x313   : > { %6173 = vmatpush2.bf16.msra.mxu1 %v8463_v42  ;;  %v8559_v42 = vld [vmem:[%s8842_s10 + $0x1790] ss:$8 sps:$4 sm:$0xff]  }
 0x314   : > { %6132 = vmatmul.mubr.bf16.vlgmr.msra.gmra.mxu0 %v8466_v43  ;;  %6228 = vmatprep.subr.bf16.mxu1 %v8477_v44  ;;  %v8567_v43 = vld [vmem:[%s8842_s10 + $0x1784] ss:$8 sps:$4 sm:$0xff]   ;;  %v8562_v44 = vld [vmem:[%s8842_s10 + $0x1680] ss:$8 sps:$4 sm:$0xff]  }
 0x315   : > { %6186 = vmatpush1.bf16.msra.mxu0 %v8469_v45  ;;  %6217 = vmatprep.mubr.bf16.mxu0 %v8570_v46  ;;  %v8573_v45 = vld [vmem:[%s8842_s10 + $0x1874] ss:$8 sps:$4 sm:$0xff]   ;;  %v8565_v46 = vld [vmem:[%s8842_s10 + $0x1780] ss:$8 sps:$4 sm:$0xff]  }
 0x316   : > { %6175 = vmatmul.mubr.bf16.vlgmr.msra.gmra.mxu1 %v8472_v47  ;;  %6187 = vmatprep.subr.bf16.mxu0 %v8480_v48  ;;  %v8568_v47 = vld [vmem:[%s10000_s0 + $0xb0] ss:$196 sps:$4 sm:$0xff]  }
 0x317   : > { %6229 = vmatpush1.bf16.msra.mxu1 %v8475_v49  ;;  %6260 = vmatprep.mubr.bf16.mxu1 %v8576_v50  ;;  %v8571_v48 = vld [vmem:[%s8842_s10 + $0x1870] ss:$8 sps:$4 sm:$0xff]   ;;  %v8579_v50 = vld [vmem:[%s8842_s10 + $0x1864] ss:$8 sps:$4 sm:$0xff]  }
 0x318   : > { %6230 = vmatprep.subr.bf16.mxu1 %v8483_v51  ;;  %v8574_v49 = vld [vmem:[%s10000_s0 + $0xb8] ss:$196 sps:$4 sm:$0xff]   ;;  %v8577_v51 = vld [vmem:[%s8842_s10 + $0x1860] ss:$8 sps:$4 sm:$0xff]  }
 0x319   : > { %6188 = vmatpush1.bf16.msra.mxu0 %v8478_v52  ;;  %v8700_v52 = vmov 0  }
 0x31a   : > { %6189 = vmatprep.subr.bf16.mxu0 %v8486_v53  ;;  %v8582_v53 = vld [vmem:[%s8842_s10 + $0x1854] ss:$8 sps:$4 sm:$0xff]  }
 0x31b   : > { %6231 = vmatpush1.bf16.msra.mxu1 %v8481_v54  ;;  %v8580_v54 = vld [vmem:[%s8842_s10 + $0x1850] ss:$8 sps:$4 sm:$0xff]  }
 0x31c   : > { %6232 = vmatprep.subr.bf16.mxu1 %v8489_v55  ;;  %v8585_v55 = vld [vmem:[%s8842_s10 + $0x1844] ss:$8 sps:$4 sm:$0xff]  }
 0x31d   : > { %6190 = vmatpush1.bf16.msra.mxu0 %v8484_v56  ;;  %v8583_v56 = vld [vmem:[%s8842_s10 + $0x1840] ss:$8 sps:$4 sm:$0xff]  }
 0x31e   : > { %6191 = vmatprep.subr.bf16.mxu0 %v8492_v57  ;;  %v8588_v57 = vld [vmem:[%s8842_s10 + $0x1834] ss:$8 sps:$4 sm:$0xff]  }
 0x31f   : > { %6233 = vmatpush1.bf16.msra.mxu1 %v8487_v58  ;;  %v8586_v58 = vld [vmem:[%s8842_s10 + $0x1830] ss:$8 sps:$4 sm:$0xff]  }
 0x320   : > { %6234 = vmatprep.subr.bf16.mxu1 %v8495_v59  ;;  %v8591_v59 = vld [vmem:[%s8842_s10 + $0x1824] ss:$8 sps:$4 sm:$0xff]  }
 0x321   : > { %6192 = vmatpush1.bf16.msra.mxu0 %v8490_v60  ;;  %v8589_v60 = vld [vmem:[%s8842_s10 + $0x1820] ss:$8 sps:$4 sm:$0xff]  }
 0x322   : > { %6193 = vmatprep.subr.bf16.mxu0 %v8498_v61  ;;  %v8594_v61 = vld [vmem:[%s8842_s10 + $0x1814] ss:$8 sps:$4 sm:$0xff]  }
 0x323   : > { %6235 = vmatpush1.bf16.msra.mxu1 %v8493_v62  ;;  %v8592_v62 = vld [vmem:[%s8842_s10 + $0x1810] ss:$8 sps:$4 sm:$0xff]  }
 0x324   : > { %6236 = vmatprep.subr.bf16.mxu1 %v8501_v63  ;;  %v8597_v63 = vld [vmem:[%s8842_s10 + $0x1804] ss:$8 sps:$4 sm:$0xff]  }
 0x325   : > { %6194 = vmatpush1.bf16.msra.mxu0 %v8496_v0  ;;  %v8595_v0 = vld [vmem:[%s8842_s10 + $0x1800] ss:$8 sps:$4 sm:$0xff]   ;;  %s6458_s10 = sshll.u32 %s8838_s30, 5  ;;  %s7299_s30 = sshll.u32 (%p10023_p7), %s8740_s16, 4 }
 0x326   : > { %6195 = vmatprep.subr.bf16.mxu0 %v8504_v1  ;;  %v8598_v1 = vld [vmem:[%s10000_s0 + $0xc0] ss:$196 sps:$4 sm:$0xff]   ;;  %s6339_s25 = scalar_lea.vmem (%p10023_p7), %s10003_s3, %s7299_s30 }
 0x327   : > { %6237 = vmatpush1.bf16.msra.mxu1 %v8499_v2  ;;  %v5273_v2 = vpop.f32.mrf.mxu0 }
 0x328   : > { %6238 = vmatprep.subr.bf16.mxu1 %v8507_v3 }
 0x329   : > { %6196 = vmatpush1.bf16.msra.mxu0 %v8502_v4  ;;  %v9787_v3 = vpop.f32.mrf.mxu0  ;;  %v9789_v4 = vpop.f32.mrf.mxu1 }
 0x32a   : > { %6197 = vmatprep.subr.bf16.mxu0 %v8510_v5 }
 0x32b   : > { %6239 = vmatpush1.bf16.msra.mxu1 %v8505_v6  ;;  %v9791_v5 = vpop.f32.mrf.mxu0  ;;  %v9793_v6 = vpop.f32.mrf.mxu1 }
 0x32c   : > { %6240 = vmatprep.subr.bf16.mxu1 %v8513_v7 }
 0x32d   : > { %6198 = vmatpush1.bf16.msra.mxu0 %v8508_v8  ;;  %v9795_v7 = vpop.f32.mrf.mxu0  ;;  %v9797_v8 = vpop.f32.mrf.mxu1 }
 0x32e   : > { %6199 = vmatprep.subr.bf16.mxu0 %v8516_v9 }
 0x32f   : > { %6241 = vmatpush1.bf16.msra.mxu1 %v8511_v10  ;;  %v9799_v9 = vpop.f32.mrf.mxu0  ;;  %v9801_v10 = vpop.f32.mrf.mxu1 }
 0x330   : > { %6242 = vmatprep.subr.bf16.mxu1 %v8519_v11 }
 0x331   : > { %6200 = vmatpush1.bf16.msra.mxu0 %v8514_v12  ;;  %v9803_v11 = vpop.f32.mrf.mxu0  ;;  %v9805_v12 = vpop.f32.mrf.mxu1 }
 0x332   : > { %6201 = vmatprep.subr.bf16.mxu0 %v8522_v13 }
 0x333   : > { %6243 = vmatpush1.bf16.msra.mxu1 %v8517_v14  ;;  %v9807_v13 = vpop.f32.mrf.mxu0  ;;  %v9809_v14 = vpop.f32.mrf.mxu1 }
 0x334   : > { %6244 = vmatprep.subr.bf16.mxu1 %v8525_v15 }
 0x335   : > { %6202 = vmatpush2.bf16.msra.mxu0 %v8520_v16  ;;  %v9811_v15 = vpop.f32.mrf.mxu0  ;;  %v9813_v16 = vpop.f32.mrf.mxu1 }
 0x336   : > { %6203 = vmatprep.subr.bf16.mxu0 %v8528_v17 }
 0x337   : > { %6245 = vmatpush2.bf16.msra.mxu1 %v8523_v18  ;;  %v9815_v17 = vpop.f32.mrf.mxu0  ;;  %v9817_v18 = vpop.f32.mrf.mxu1 }
 0x338   : > { %6246 = vmatprep.subr.bf16.mxu1 %v8531_v19 }
 0x339   : > { %6204 = vmatpush2.bf16.msra.mxu0 %v8526_v20  ;;  %v9819_v19 = vpop.f32.mrf.mxu0  ;;  %v9821_v20 = vpop.f32.mrf.mxu1 }
 0x33a   : > { %6205 = vmatprep.subr.bf16.mxu0 %v8534_v21 }
 0x33b   : > { %6247 = vmatpush2.bf16.msra.mxu1 %v8529_v22  ;;  %v9823_v21 = vpop.f32.mrf.mxu0  ;;  %v9825_v22 = vpop.f32.mrf.mxu1 }
 0x33c   : > { %6248 = vmatprep.subr.bf16.mxu1 %v8537_v23 }
 0x33d   : > { %6206 = vmatpush2.bf16.msra.mxu0 %v8532_v24  ;;  %v9827_v23 = vpop.f32.mrf.mxu0  ;;  %v9829_v24 = vpop.f32.mrf.mxu1 }
 0x33e   : > { %6207 = vmatprep.subr.bf16.mxu0 %v8540_v25 }
 0x33f   : > { %6249 = vmatpush2.bf16.msra.mxu1 %v8535_v26  ;;  %v9831_v25 = vpop.f32.mrf.mxu0  ;;  %v9833_v26 = vpop.f32.mrf.mxu1 }
 0x340   : > { %6250 = vmatprep.subr.bf16.mxu1 %v8543_v27 }
 0x341   : > { %6208 = vmatpush2.bf16.msra.mxu0 %v8538_v28  ;;  %v9835_v27 = vpop.f32.mrf.mxu0  ;;  %v9837_v28 = vpop.f32.mrf.mxu1 }
 0x342   : > { %6209 = vmatprep.subr.bf16.mxu0 %v8546_v29 }
 0x343   : > { %6251 = vmatpush2.bf16.msra.mxu1 %v8541_v30  ;;  %v9839_v29 = vpop.f32.mrf.mxu0  ;;  %v9841_v30 = vpop.f32.mrf.mxu1 }
 0x344   : > { %6252 = vmatprep.subr.bf16.mxu1 %v8549_v31 }
 0x345   : > { %6210 = vmatpush2.bf16.msra.mxu0 %v8544_v32  ;;  %v9843_v31 = vpop.f32.mrf.mxu0  ;;  %v9845_v32 = vpop.f32.mrf.mxu1 }
 0x346   : > { %6211 = vmatprep.subr.bf16.mxu0 %v8552_v33 }
 0x347   : > { %6253 = vmatpush2.bf16.msra.mxu1 %v8547_v34  ;;  %v9847_v33 = vpop.f32.mrf.mxu0  ;;  %v9849_v34 = vpop.f32.mrf.mxu1 }
 0x348   : > { %6254 = vmatprep.subr.bf16.mxu1 %v8555_v35 }
 0x349   : > { %6212 = vmatpush2.bf16.msra.mxu0 %v8550_v36  ;;  %v9851_v35 = vpop.f32.mrf.mxu0  ;;  %v9853_v36 = vpop.f32.mrf.mxu1 }
 0x34a   : > { %6213 = vmatprep.subr.bf16.mxu0 %v8558_v37 }
 0x34b   : > { %6255 = vmatpush2.bf16.msra.mxu1 %v8553_v38  ;;  %v9855_v37 = vpop.f32.mrf.mxu0  ;;  %v9857_v38 = vpop.f32.mrf.mxu1 }
 0x34c   : > { %6256 = vmatprep.subr.bf16.mxu1 %v8561_v39 }
 0x34d   : > { %6214 = vmatpush2.bf16.msra.mxu0 %v8556_v40  ;;  %v9859_v39 = vpop.f32.mrf.mxu0  ;;  %v9861_v40 = vpop.f32.mrf.mxu1 }
 0x34e   : > { %6215 = vmatprep.subr.bf16.mxu0 %v8564_v41 }
 0x34f   : > { %6257 = vmatpush2.bf16.msra.mxu1 %v8559_v42  ;;  %v9863_v41 = vpop.f32.mrf.mxu0  ;;  %v9865_v42 = vpop.f32.mrf.mxu1 }
 0x350   : > { %6258 = vmatprep.subr.bf16.mxu1 %v8567_v43 }
 0x351   : > { %6216 = vmatpush2.bf16.msra.mxu0 %v8562_v44  ;;  %v9867_v43 = vpop.f32.mrf.mxu0  ;;  %v9869_v44 = vpop.f32.mrf.mxu1 }
 0x352   : > { %6271 = vmatprep.subr.bf16.mxu0 %v8573_v45 }
 0x353   : > { %6259 = vmatpush2.bf16.msra.mxu1 %v8565_v46  ;;  %v9871_v45 = vpop.f32.mrf.mxu0  ;;  %v9873_v46 = vpop.f32.mrf.mxu1 }
 0x354   : > { %6218 = vmatmul.mubr.bf16.vlgmr.msra.gmra.mxu0 %v8568_v47  ;;  %v1063_v47 = vlaneseq }
 0x355   : > { %6272 = vmatpush1.bf16.msra.mxu0 %v8571_v48  ;;  %6303 = vmatprep.mubr.bf16.mxu0 %v8700_v52  ;;  %v9875_v48 = vpop.f32.mrf.mxu0 }
 0x356   : > { %6261 = vmatmul.mubr.bf16.vlgmr.msra.gmra.mxu1 %v8574_v49  ;;  %6273 = vmatprep.subr.bf16.mxu0 %v8579_v50  ;;  %v9877_v49 = vpop.f32.mrf.mxu1 }
 0x357   : > { %v9879_v50 = vpop.f32.mrf.mxu0 }
 0x358   : > { %v9881_v52 = vpop.f32.mrf.mxu1 }
 0x359   : > { %6274 = vmatpush1.bf16.msra.mxu0 %v8577_v51  ;;  %v1064_v51 = vshrl.u32 %v1063_v47, 7  ;;  %10011 = vst [vmem:[#allocation9_spill] sm:$0xff] %v9881_v52 }
 0x35a   : > { %6275 = vmatprep.subr.bf16.mxu0 %v8582_v53  ;;  %v9883_v53 = vpop.f32.mrf.mxu0 }
 0x35d   : > { %6276 = vmatpush1.bf16.msra.mxu0 %v8580_v54  ;;  %v9885_v54 = vpop.f32.mrf.mxu1 }
 0x35e   : > { %6277 = vmatprep.subr.bf16.mxu0 %v8585_v55  ;;  %10012 = vst [vmem:[#allocation10_spill] sm:$0xff] %v9885_v54  ;;  %v1065_v55 = vsub.s32 0, %v1064_v51 }
 0x361   : > { %6278 = vmatpush1.bf16.msra.mxu0 %v8583_v56  ;;  %v1061_v56 = vld [vmem:[%s8850_s9] sm:$0x3]  ;;  %s222_s9 = scalar_lea.vmem [#allocation6], %s6458_s10 }
 0x362   : > { %6279 = vmatprep.subr.bf16.mxu0 %v8588_v57  ;;  %v1069_v57 = vsub.s32 1, %v1064_v51 }
 0x365   : > { %6280 = vmatpush1.bf16.msra.mxu0 %v8586_v58  ;;  %v9888_v58 = vpop.f32.mrf.mxu0 }
 0x366   : > { %6281 = vmatprep.subr.bf16.mxu0 %v8591_v59  ;;  %10013 = vst [vmem:[#allocation11_spill] sm:$0xff] %v9888_v58  ;;  %v9890_v59 = vpop.f32.mrf.mxu1 }
 0x367   : > { %10014 = vst [vmem:[#allocation12_spill] sm:$0xff] %v9890_v59 }
 0x369   : > { %6282 = vmatpush1.bf16.msra.mxu0 %v8589_v60  ;;  %v1066_v60 = vrot.slane %v1061_v56, %v1065_v55 }
 0x36a   : > { %6283 = vmatprep.subr.bf16.mxu0 %v8594_v61  ;;  %v1070_v61 = vrot.slane %v1061_v56, %v1069_v57 }
 0x36b   : > { %v5278_v51 = vadd.f32 %v9791_v5, %v1066_v60 }
 0x36c   : > { %v5276_v47 = vadd.f32 %v9787_v3, %v1070_v61  ;;  %v5280_v55 = vadd.f32 %v9795_v7, %v1070_v61 }
 0x36d   : > { %6284 = vmatpush1.bf16.msra.mxu0 %v8592_v62  ;;  %v9892_v62 = vpop.f32.mrf.mxu0  ;;  %v5321_v57 = vadd.f32 %v9797_v8, %v5278_v51 }
 0x36e   : > { %6285 = vmatprep.subr.bf16.mxu0 %v8597_v63  ;;  %v9894_v63 = vpop.f32.mrf.mxu1  ;;  %v5319_v56 = vadd.f32 %v9793_v6, %v5276_v47 }
 0x36f   : > { %10015 = vst [vmem:[#allocation13_spill] sm:$0xff] %v9894_v63 }
 0x370   : > { %v9899_v52 = vpop.f32.mrf.mxu1  ;;  %v5362_v3 = vadd.f32 %v9803_v11, %v5319_v56 }
 0x371   : > { %6286 = vmatpush1.bf16.msra.mxu0 %v8595_v0  ;;  %v5274_v0 = vadd.f32 %v5273_v2, %v1066_v60  ;;  %10016 = vst [vmem:[#allocation14_spill] sm:$0xff] %v9899_v52  ;;  %v5364_v60 = vadd.f32 %v9807_v13, %v5321_v57 }
 0x372   : > { %v9905_v59 = vpop.f32.mrf.mxu1  ;;  %v5405_v6 = vadd.f32 %v9809_v14, %v5362_v3 }
 0x373   : > { %v5317_v54 = vadd.f32 %v9789_v4, %v5274_v0  ;;  %v5323_v4 = vadd.f32 %v9801_v10, %v5280_v55  ;;  %v5407_v11 = vadd.f32 %v9813_v16, %v5364_v60 }
 0x374   : > { %6304 = vmatmul.mubr.bf16.vlgmr.msra.gmra.mxu0 %v8598_v1  ;;  %v9896_v1 = vpop.f32.mrf.mxu0  ;;  %v9914_v52 = vpop.f32.mrf.mxu1  ;;  %v5448_v61 = vadd.f32 %v9819_v19, %v5405_v6 }
 0x375   : > { %v5360_v2 = vadd.f32 %v9799_v9, %v5317_v54  ;;  %v5366_v7 = vadd.f32 %v9811_v15, %v5323_v4  ;;  %v5450_v13 = vadd.f32 %v9823_v21, %v5407_v11  ;;  %v10017_v11 = vld [vmem:[#allocation9_spill] sm:$0xff] }
 0x376   : > { %v9903_v58 = vpop.f32.mrf.mxu0  ;;  %v9924_v8 = vpop.f32.mrf.mxu1 }
 0x377   : > { %v5403_v5 = vadd.f32 %v9805_v12, %v5360_v2  ;;  %v5409_v10 = vadd.f32 %v9817_v18, %v5366_v7  ;;  %v5493_v19 = vadd.f32 %v9829_v24, %v5450_v13 }
 0x378   : > { %v9912_v63 = vpop.f32.mrf.mxu0  ;;  %v9933_v15 = vpop.f32.mrf.mxu1 }
 0x379   : > { %v5446_v9 = vadd.f32 %v9815_v17, %v5403_v5  ;;  %v5452_v14 = vadd.f32 %v9827_v23, %v5409_v10  ;;  %v5491_v17 = vadd.f32 %v9825_v22, %v5448_v61  ;;  %v5536_v21 = vadd.f32 %v9839_v29, %v5493_v19  ;;  %v10018_v10 = vld [vmem:[#allocation10_spill] sm:$0xff] }
 0x37a   : > { %v9922_v54 = vpop.f32.mrf.mxu0  ;;  %v6004_v16 = vpop.f32.mrf.mxu1 }
 0x37b   : > { %v5489_v12 = vadd.f32 %v9821_v20, %v5446_v9  ;;  %v5534_v55 = vadd.f32 %v9835_v27, %v5491_v17  ;;  %v5495_v18 = vadd.f32 %v9833_v26, %v5452_v14  ;;  %v5579_v57 = vadd.f32 %v9845_v32, %v5536_v21  ;;  %v10020_v14 = vld [vmem:[#allocation12_spill] sm:$0xff] }
 0x37c   : > { %v9928_v0 = vpop.f32.mrf.mxu0  ;;  %v6006_v2 = vpop.f32.mrf.mxu1 }
 0x37d   : > { %v5532_v47 = vadd.f32 %v9831_v25, %v5489_v12  ;;  %v5538_v23 = vadd.f32 %v9843_v31, %v5495_v18  ;;  %v5577_v22 = vadd.f32 %v9841_v30, %v5534_v55  ;;  %v5622_v29 = vadd.f32 %v9855_v37, %v5579_v57  ;;  %v10019_v12 = vld [vmem:[#allocation11_spill] sm:$0xff]  ;;  %v10022_v55 = vld [vmem:[#allocation14_spill] sm:$0xff] }
 0x37e   : > { %v5963_v51 = vpop.f32.mrf.mxu0  ;;  %v6008_v27 = vpop.f32.mrf.mxu1 }
 0x37f   : > { %v5575_v20 = vadd.f32 %v9837_v28, %v5532_v47  ;;  %v5620_v24 = vadd.f32 %v9851_v35, %v5577_v22  ;;  %v5581_v26 = vadd.f32 %v9849_v34, %v5538_v23  ;;  %v5665_v32 = vadd.f32 %v9861_v40, %v5622_v29  ;;  %v10021_v47 = vld [vmem:[#allocation13_spill] sm:$0xff] }
 0x380   : > { %v5965_v56 = vpop.f32.mrf.mxu0 }
 0x381   : > { %v5618_v25 = vadd.f32 %v9847_v33, %v5575_v20  ;;  %v5624_v5 = vadd.f32 %v9859_v39, %v5581_v26  ;;  %v5663_v31 = vadd.f32 %v9857_v38, %v5620_v24  ;;  %v6010_v33 = vpop.f32.mrf.mxu1  ;;  %v5708_v37 = vadd.f32 %v9871_v45, %v5665_v32 }
 0x382   : > { %v5967_v3 = vpop.f32.mrf.mxu0 }
 0x383   : > { %v5661_v28 = vadd.f32 %v9853_v36, %v5618_v25  ;;  %v5706_v35 = vadd.f32 %v9867_v43, %v5663_v31  ;;  %v5667_v34 = vadd.f32 %v9865_v42, %v5624_v5  ;;  %v5751_v40 = vadd.f32 %v9877_v49, %v5708_v37 }
 0x385   : > { %v5704_v30 = vadd.f32 %v9863_v41, %v5661_v28  ;;  %v5710_v6 = vadd.f32 %v9875_v48, %v5667_v34  ;;  %v5749_v39 = vadd.f32 %v9873_v46, %v5706_v35 }
 0x387   : > { %v5747_v36 = vadd.f32 %v9869_v44, %v5704_v30  ;;  %v5792_v43 = vadd.f32 %v9883_v53, %v5749_v39  ;;  %v5753_v61 = vadd.f32 %v10017_v11, %v5710_v6  ;;  %v5794_v44 = vadd.f32 %v10019_v12, %v5751_v40 }
 0x389   : > { %v5790_v38 = vadd.f32 %v9879_v50, %v5747_v36  ;;  %v5796_v48 = vadd.f32 %v9892_v62, %v5753_v61  ;;  %v5835_v46 = vadd.f32 %v10020_v14, %v5792_v43  ;;  %v5837_v19 = vadd.f32 %v10021_v47, %v5794_v44 }
 0x38b   : > { %v5833_v42 = vadd.f32 %v10018_v10, %v5790_v38  ;;  %v5878_v49 = vadd.f32 %v9903_v58, %v5835_v46  ;;  %v5839_v18 = vadd.f32 %v10022_v55, %v5796_v48  ;;  %v5880_v21 = vadd.f32 %v9912_v63, %v5837_v19 }
 0x38d   : > { %v5876_v50 = vadd.f32 %v9896_v1, %v5833_v42  ;;  %v5882_v62 = vadd.f32 %v9922_v54, %v5839_v18  ;;  %v5921_v25 = vadd.f32 %v9914_v52, %v5878_v49  ;;  %v5923_v57 = vadd.f32 %v9924_v8, %v5880_v21 }
 0x38f   : > { %v5919_v20 = vadd.f32 %v9905_v59, %v5876_v50  ;;  %v5964_v24 = vadd.f32 %v5963_v51, %v5921_v25  ;;  %v5925_v28 = vadd.f32 %v9933_v15, %v5882_v62  ;;  %v5966_v5 = vadd.f32 %v5965_v56, %v5923_v57 }
 0x391   : > { %v5962_v1 = vadd.f32 %v9928_v0, %v5919_v20  ;;  %v5968_v59 = vadd.f32 %v5967_v3, %v5925_v28  ;;  %v6007_v31 = vadd.f32 %v6006_v2, %v5964_v24  ;;  %v6009_v35 = vadd.f32 %v6008_v27, %v5966_v5 }
 0x393   : > { %v6005_v29 = vadd.f32 %v6004_v16, %v5962_v1  ;;  %v6011_v52 = vadd.f32 %v6010_v33, %v5968_v59 }
 0x394   : > { %v6047_v4 = vpop.f32.mrf.mxu0 }
 0x395   : > { %v6048_v63 = vadd.f32 %v6047_v4, %v6005_v29 }
 0x396   : > { %v6049_v60 = vpop.f32.mrf.mxu0  ;;  %v6090_v7 = vpop.f32.mrf.mxu1 }
 0x397   : > { %v6050_v54 = vadd.f32 %v6049_v60, %v6007_v31  ;;  %v6091_v36 = vadd.f32 %v6090_v7, %v6048_v63 }
 0x398   : > { %v6051_v41 = vpop.f32.mrf.mxu0  ;;  %v6092_v9 = vpop.f32.mrf.mxu1 }
 0x399   : > { %v6052_v0 = vadd.f32 %v6051_v41, %v6009_v35  ;;  %v6093_v51 = vadd.f32 %v6092_v9, %v6050_v54 }
 0x39a   : > { %v6053_v13 = vpop.f32.mrf.mxu0  ;;  %v6094_v45 = vpop.f32.mrf.mxu1 }
 0x39b   : > { %v6054_v8 = vadd.f32 %v6053_v13, %v6011_v52  ;;  %v6095_v15 = vadd.f32 %v6094_v45, %v6052_v0 }
 0x39c   : > { %v6096_v53 = vpop.f32.mrf.mxu1 }
 0x39d   : > { %v6097_v56 = vadd.f32 %v6096_v53, %v6054_v8 }
 0x3d4   : > { %v6133_v17 = vpop.f32.mrf.mxu0 }
 0x3d5   : > { %v6134_v6 = vadd.f32 %v6133_v17, %v6091_v36 }
 0x3d6   : > { %v6135_v23 = vpop.f32.mrf.mxu0  ;;  %v6176_v22 = vpop.f32.mrf.mxu1 }
 0x3d7   : > { %v6136_v16 = vadd.f32 %v6135_v23, %v6093_v51  ;;  %v6177_v2 = vadd.f32 %v6176_v22, %v6134_v6 }
 0x3d8   : > { %v6137_v26 = vpop.f32.mrf.mxu0  ;;  %v6178_v58 = vpop.f32.mrf.mxu1 }
 0x3d9   : > { %v6138_v3 = vadd.f32 %v6137_v26, %v6095_v15  ;;  %v6179_v60 = vadd.f32 %v6178_v58, %v6136_v16 }
 0x3da   : > { %v6139_v30 = vpop.f32.mrf.mxu0  ;;  %v6180_v32 = vpop.f32.mrf.mxu1 }
 0x3db   : > { %v6140_v27 = vadd.f32 %v6139_v30, %v6097_v56  ;;  %v6181_v33 = vadd.f32 %v6180_v32, %v6138_v3 }
 0x3dc   : > { %v6182_v37 = vpop.f32.mrf.mxu1 }
 0x3dd   : > { %v6183_v61 = vadd.f32 %v6182_v37, %v6140_v27 }
 0x414   : > { %v6219_v34 = vpop.f32.mrf.mxu0 }
 0x415   : > { %v6220_v43 = vadd.f32 %v6219_v34, %v6177_v2 }
 0x416   : > { %v6221_v39 = vpop.f32.mrf.mxu0  ;;  %v6262_v38 = vpop.f32.mrf.mxu1 }
 0x417   : > { %v6222_v7 = vadd.f32 %v6221_v39, %v6179_v60  ;;  %v6263_v9 = vadd.f32 %v6262_v38, %v6220_v43 }
 0x418   : > { %v6223_v4 = vpop.f32.mrf.mxu0  ;;  %v6264_v40 = vpop.f32.mrf.mxu1 }
 0x419   : > { %v6224_v10 = vadd.f32 %v6223_v4, %v6181_v33  ;;  %v6265_v44 = vadd.f32 %v6264_v40, %v6222_v7 }
 0x41a   : > { %v6225_v41 = vpop.f32.mrf.mxu0  ;;  %v6266_v11 = vpop.f32.mrf.mxu1 }
 0x41b   : > { %v6226_v42 = vadd.f32 %v6225_v41, %v6183_v61  ;;  %v6267_v14 = vadd.f32 %v6266_v11, %v6224_v10 }
 0x41c   : > { %v6268_v13 = vpop.f32.mrf.mxu1 }
 0x41d   : > { %v6269_v17 = vadd.f32 %v6268_v13, %v6226_v42 }
 0x434   : > { %v6305_v12 = vpop.f32.mrf.mxu0 }
 0x435   : > { %v6306_v45 = vadd.f32 %v6305_v12, %v6263_v9 }
 0x436   : > { %v6307_v48 = vpop.f32.mrf.mxu0 }
 0x437   : > { %vm6314_vm0 = vcmp.ge.f32.partialorder %v6306_v45, 0.0  ;;  %v6318_v46 = vmul.f32 0.1, %v6306_v45  ;;  %v6308_v50 = vadd.f32 %v6307_v48, %v6265_v44 }
 0x438   : > { %v6309_v47 = vpop.f32.mrf.mxu0 }
 0x439   : > { %v6322_v19 = vsel %vm6314_vm0, %v6306_v45, %v6318_v46  ;;  %vm6315_vm1 = vcmp.ge.f32.partialorder %v6308_v50, 0.0  ;;  %v6319_v49 = vmul.f32 0.1, %v6308_v50  ;;  %v6310_v53 = vadd.f32 %v6309_v47, %v6267_v14 }
 0x43a   : > { %6326 = vst [vmem:[%s222_s9] sm:$0xff] %v6322_v19  ;;  %v6311_v55 = vpop.f32.mrf.mxu0 }
 0x43b   : > { %v6323_v18 = vsel %vm6315_vm1, %v6308_v50, %v6319_v49  ;;  %vm6316_vm2 = vcmp.ge.f32.partialorder %v6310_v53, 0.0  ;;  %v6320_v20 = vmul.f32 0.1, %v6310_v53  ;;  %v6312_v21 = vadd.f32 %v6311_v55, %v6269_v17 }
 0x43c   : > { %6327 = vst [vmem:[%s222_s9 + $0x8] sm:$0xff] %v6323_v18  ;;  %6336 = sbr.rel (!%p10023_p7) target bundleno = 1097 (0x449), region = 44 }
 0x43d   : > { %v6324_v23 = vsel %vm6316_vm2, %v6310_v53, %v6320_v20  ;;  %vm6317_vm3 = vcmp.ge.f32.partialorder %v6312_v21, 0.0  ;;  %v6321_v22 = vmul.f32 0.1, %v6312_v21 }
 0x43e   : > { %6328 = vst [vmem:[%s222_s9 + $0x10] sm:$0xff] %v6324_v23 }
 0x43f   : > { %v6325_v62 = vsel %vm6317_vm3, %v6312_v21, %v6321_v22 }
 0x440   : > { %6329 = vst [vmem:[%s222_s9 + $0x18] sm:$0xff] %v6325_v62 }
 0x441   : > { %v6352_v25 = vld [vmem:[%s222_s9] sm:$0xff] }
 0x442   : > { %6353 = vst [vmem:[%s6339_s25] sm:$0xff] %v6352_v25 }
 0x443   : > { %v6354_v1 = vld [vmem:[%s222_s9 + $0x8] sm:$0xff] }
 0x444   : > { %6355 = vst [vmem:[%s6339_s25 + $0x8] sm:$0xff] %v6354_v1 }
 0x445   : > { %v6356_v57 = vld [vmem:[%s222_s9 + $0x10] sm:$0xff] }
 0x446   : > { %6357 = vst [vmem:[%s6339_s25 + $0x20] sm:$0xff] %v6356_v57 }
 0x447   : > { %v6358_v24 = vld [vmem:[%s222_s9 + $0x18] sm:$0xff] }
 0x448   : > { %6359 = vst [vmem:[%s6339_s25 + $0x28] sm:$0xff] %v6358_v24 }
 0x449 PF: > { %p16_p10 = scmp.ge.s32.totalorder %s8743_s17, 4   ;;  %s10024_s12 = smov %s8685_s13 }
 0x44a   : > { %s10025_s13 = smov %s8689_s14  ;;  %s10026_s14 = smov %s8753_s20 }
 0x44b   : > { %s10027_s15 = smov %s8743_s17  ;;  %18 = sbr.rel (!%p16_p10) target bundleno = 5 (0x5), region = 108 }
 0x450   :  { %6375 = vsyncpa [#allocation3], 1 }
 0x451   :  { %6377 = vsyncpa [#allocation3 + $0x1], 1 }
 0x452   :  { %6378 = vsyncpa [#allocation5], 1 }
 0x453   :  { %6380 = vsyncpa [#allocation5 + $0x1], 1 }

</bundles_post_ra>
